<compile_context>
chip_gen: v5e
topology: v5e:2x2
jax: 0.10.0
libtpu: 0.0.40
codegen_flags: <defaults>
</compile_context>

<pallas_src>
import jax
import jax.numpy as jnp
from jax.experimental import pallas as pl
from jax.experimental.pallas import tpu as pltpu

N_EMBD = 384
N_HEAD = 6
HEAD_SIZE = N_EMBD // N_HEAD   # 64
HIDDEN = 4 * N_EMBD            # 1536
EPS = 1e-5                     # nn.LayerNorm default


def _layer_norm(x, w, b):
    # f32 element-wise math (keep off bf16 on the VPU/EUP path).
    mean = jnp.mean(x, axis=-1, keepdims=True)
    var = jnp.mean((x - mean) ** 2, axis=-1, keepdims=True)  # biased, like PyTorch
    return (x - mean) * jax.lax.rsqrt(var + EPS) * w + b


def block_kernel(x_ref, ln1w_ref, ln1b_ref, wqkv_ref, wp_ref, bp_ref,
                 ln2w_ref, ln2b_ref, w1_ref, b1_ref, w2_ref, b2_ref, o_ref):
    Bt, T, C = x_ref.shape
    R = Bt * T
    bf16 = jnp.bfloat16

    x = x_ref[...].reshape(R, C)                       # (R, C) f32, rows aggregated

    # ---- x + sa(ln1(x)) -------------------------------------------------
    h = _layer_norm(x, ln1w_ref[...], ln1b_ref[...])   # f32

    # Fused QKV: one (R, C) @ (C, 3C) MXU matmul, bf16 inputs, f32 accumulation.
    qkv = jnp.dot(h.astype(bf16), wqkv_ref[...],
                  preferred_element_type=jnp.float32)  # (R, 3C) f32

    scale = float(N_EMBD) ** -0.5                      # C**-0.5, as in the reference
    q = (qkv[:, :C] * scale).reshape(Bt, T, C)         # fold scale into q once
    k = qkv[:, C:2 * C].reshape(Bt, T, C)
    v = qkv[:, 2 * C:].reshape(Bt, T, C)

    row = jax.lax.broadcasted_iota(jnp.int32, (1, T, T), 1)
    col = jax.lax.broadcasted_iota(jnp.int32, (1, T, T), 2)
    causal = row >= col                                # (1, T, T) tril mask

    head_outs = []
    for hd in range(N_HEAD):
        s = hd * HEAD_SIZE
        qh = q[:, :, s:s + HEAD_SIZE].astype(bf16)     # (Bt, T, D)
        kh = k[:, :, s:s + HEAD_SIZE].astype(bf16)
        vh = v[:, :, s:s + HEAD_SIZE].astype(bf16)
        wei = jnp.einsum('btd,bsd->bts', qh, kh,
                         preferred_element_type=jnp.float32)   # (Bt, T, T)
        wei = jnp.where(causal, wei, -jnp.inf)
        wei = wei - jnp.max(wei, axis=-1, keepdims=True)
        e = jnp.exp(wei)
        p = e * pl.reciprocal(jnp.sum(e, axis=-1, keepdims=True), approx=True)
        # attention dropout: identity (eval mode)
        head_outs.append(jnp.einsum('bts,bsd->btd', p.astype(bf16), vh,
                                    preferred_element_type=jnp.float32))
    attn = jnp.concatenate(head_outs, axis=-1).reshape(R, C)   # (R, C) f32

    sa = jnp.dot(attn.astype(bf16), wp_ref[...],
                 preferred_element_type=jnp.float32) + bp_ref[...]
    x1 = x + sa

    # ---- x + ffwd(ln2(x)) -----------------------------------------------
    h2 = _layer_norm(x1, ln2w_ref[...], ln2b_ref[...])
    ff = jnp.dot(h2.astype(bf16), w1_ref[...],
                 preferred_element_type=jnp.float32) + b1_ref[...]
    ff = jnp.maximum(ff, 0.0)                           # ReLU (f32)
    ff = jnp.dot(ff.astype(bf16), w2_ref[...],
                 preferred_element_type=jnp.float32) + b2_ref[...]
    # ffwd dropout: identity (eval mode)
    o_ref[...] = (x1 + ff).reshape(Bt, T, C)


def transformer_block(x, p, block_b=None):
    B, T, C = x.shape
    assert C == N_EMBD

    if block_b is None:
        # Aggregate batch items per grid step so the matmul M dim is >= ~256 rows
        # when possible, while keeping block_b a divisor of B.
        target = max(1, 256 // T)
        block_b = 1
        for d in range(min(B, target), 0, -1):
            if B % d == 0:
                block_b = d
                break
    assert B % block_b == 0
    grid = (B // block_b,)

    bf16 = jnp.bfloat16
    # Fuse QKV on the host; ship matmul weights as bf16 (halves weight VMEM).
    wqkv = jnp.concatenate([p["wq"], p["wk"], p["wv"]], axis=1).astype(bf16)
    wp = p["wp"].astype(bf16)
    w1 = p["w1"].astype(bf16)
    w2 = p["w2"].astype(bf16)

    def w_spec(shape):
        return pl.BlockSpec(shape, lambda b: (0,) * len(shape))

    in_specs = [
        pl.BlockSpec((block_b, T, C), lambda b: (b, 0, 0)),   # x
        w_spec((1, C)), w_spec((1, C)),                       # ln1 w, b (f32)
        w_spec((C, 3 * C)),                                   # fused Wqkv (bf16)
        w_spec((C, C)), w_spec((1, C)),                       # proj W (bf16), b (f32)
        w_spec((1, C)), w_spec((1, C)),                       # ln2 w, b (f32)
        w_spec((C, HIDDEN)), w_spec((1, HIDDEN)),             # ffwd W1 (bf16), b1
        w_spec((HIDDEN, C)), w_spec((1, C)),                  # ffwd W2 (bf16), b2
    ]

    # Advisory cost estimate so XLA schedules neighbours sensibly.
    matmul_flops = 24 * B * T * C * C + 4 * B * N_HEAD * T * T * HEAD_SIZE
    bytes_accessed = (2 * B * T * C * 4                       # x in + out (f32)
                      + 2 * (wqkv.size + wp.size + w1.size + w2.size)   # bf16 weights
                      + 4 * (p["bp"].size + p["b1"].size + p["b2"].size + 4 * C))
    cost = pl.CostEstimate(flops=int(matmul_flops),
                           transcendentals=int(B * N_HEAD * T * T + 2 * B * T),
                           bytes_accessed=int(bytes_accessed))

    return pl.pallas_call(
        block_kernel,
        out_shape=jax.ShapeDtypeStruct((B, T, C), jnp.float32),
        grid=grid,
        in_specs=in_specs,
        out_specs=pl.BlockSpec((block_b, T, C), lambda b: (b, 0, 0)),
        compiler_params=pltpu.CompilerParams(
            dimension_semantics=("parallel",)),
        cost_estimate=cost,
    )(x, p["ln1w"], p["ln1b"], wqkv, wp, p["bp"],
      p["ln2w"], p["ln2b"], w1, p["b1"], w2, p["b2"])


def ref_block(x, p):
    """Pure-JAX f32 reference matching the PyTorch forward (eval mode)."""
    def ln(z, w, b):
        m = z.mean(-1, keepdims=True)
        v = ((z - m) ** 2).mean(-1, keepdims=True)
        return (z - m) / jnp.sqrt(v + EPS) * w[0] + b[0]

    B, T, C = x.shape
    h = ln(x, p["ln1w"], p["ln1b"])
    q = h @ p["wq"]
    k = h @ p["wk"]
    v = h @ p["wv"]
    qh = q.reshape(B, T, N_HEAD, HEAD_SIZE).transpose(0, 2, 1, 3)
    kh = k.reshape(B, T, N_HEAD, HEAD_SIZE).transpose(0, 2, 1, 3)
    vh = v.reshape(B, T, N_HEAD, HEAD_SIZE).transpose(0, 2, 1, 3)
    wei = jnp.einsum("bhtd,bhsd->bhts", qh, kh) * (float(N_EMBD) ** -0.5)
    mask = jnp.tril(jnp.ones((T, T), dtype=bool))
    wei = jnp.where(mask, wei, -jnp.inf)
    wei = jax.nn.softmax(wei, axis=-1)
    out = jnp.einsum("bhts,bhsd->bhtd", wei, vh)
    out = out.transpose(0, 2, 1, 3).reshape(B, T, C)
    x1 = x + (out @ p["wp"] + p["bp"][0])
    h2 = ln(x1, p["ln2w"], p["ln2b"])
    ff = jnp.maximum(h2 @ p["w1"] + p["b1"][0], 0.0) @ p["w2"] + p["b2"][0]
    return x1 + ff


def init_params(key):
    ks = jax.random.split(key, 12)
    s = 0.02
    return {
        "ln1w": 1.0 + s * jax.random.normal(ks[0], (1, N_EMBD), jnp.float32),
        "ln1b": s * jax.random.normal(ks[1], (1, N_EMBD), jnp.float32),
        "wq": s * jax.random.normal(ks[2], (N_EMBD, N_EMBD), jnp.float32),
        "wk": s * jax.random.normal(ks[3], (N_EMBD, N_EMBD), jnp.float32),
        "wv": s * jax.random.normal(ks[4], (N_EMBD, N_EMBD), jnp.float32),
        "wp": s * jax.random.normal(ks[5], (N_EMBD, N_EMBD), jnp.float32),
        "bp": s * jax.random.normal(ks[6], (1, N_EMBD), jnp.float32),
        "ln2w": 1.0 + s * jax.random.normal(ks[7], (1, N_EMBD), jnp.float32),
        "ln2b": s * jax.random.normal(ks[8], (1, N_EMBD), jnp.float32),
        "w1": s * jax.random.normal(ks[9], (N_EMBD, HIDDEN), jnp.float32),
        "b1": s * jax.random.normal(ks[10], (1, HIDDEN), jnp.float32),
        "w2": s * jax.random.normal(ks[11], (HIDDEN, N_EMBD), jnp.float32),
        "b2": jnp.zeros((1, N_EMBD), jnp.float32),
    }


if __name__ == "__main__":
    key = jax.random.PRNGKey(0)
    k_x, k_p = jax.random.split(key)
    B, T = 2, 8                      # T <= block_size (256)
    x = jax.random.normal(k_x, (B, T, N_EMBD), jnp.float32)
    params = init_params(k_p)

    out = transformer_block(x, params)
    out = jax.block_until_ready(out)

    ref = ref_block(x, params)       # pure f32 reference
    assert out.shape == (B, T, N_EMBD)
    max_diff = float(jnp.max(jnp.abs(out - ref)))
    # kernel runs matmuls with bf16 inputs (f32 accumulation) -> loose-ish tolerance
    assert jnp.allclose(out, ref, atol=3e-2, rtol=3e-2), max_diff
    print("KERNEL_OK")
</pallas_src>

<mosaic_0001>
module attributes {stable_mosaic.version = 11 : i64} {
  func.func @block_kernel(%arg0: i32, %arg1: memref<2x8x384xf32, #tpu.memory_space<vmem>>, %arg2: memref<1x384xf32, #tpu.memory_space<vmem>>, %arg3: memref<1x384xf32, #tpu.memory_space<vmem>>, %arg4: memref<384x1152xbf16, #tpu.memory_space<vmem>>, %arg5: memref<384x384xbf16, #tpu.memory_space<vmem>>, %arg6: memref<1x384xf32, #tpu.memory_space<vmem>>, %arg7: memref<1x384xf32, #tpu.memory_space<vmem>>, %arg8: memref<1x384xf32, #tpu.memory_space<vmem>>, %arg9: memref<384x1536xbf16, #tpu.memory_space<vmem>>, %arg10: memref<1x1536xf32, #tpu.memory_space<vmem>>, %arg11: memref<1536x384xbf16, #tpu.memory_space<vmem>>, %arg12: memref<1x384xf32, #tpu.memory_space<vmem>>, %arg13: memref<2x8x384xf32, #tpu.memory_space<vmem>>) attributes {dimension_semantics = [#tpu.dimension_semantics<parallel>], iteration_bounds = array<i64: 1>, scalar_prefetch = 0 : i64, scratch_operands = 0 : i64, tpu.core_type = #tpu.core_type<tc>, window_params = [{transform_indices = @transform_0, window_bounds = array<i64: 2, 8, 384>}, {pipeline_mode = #tpu.pipeline_mode<synchronous>, transform_indices = @transform_1, window_bounds = array<i64: 1, 384>}, {pipeline_mode = #tpu.pipeline_mode<synchronous>, transform_indices = @transform_2, window_bounds = array<i64: 1, 384>}, {pipeline_mode = #tpu.pipeline_mode<synchronous>, transform_indices = @transform_3, window_bounds = array<i64: 384, 1152>}, {pipeline_mode = #tpu.pipeline_mode<synchronous>, transform_indices = @transform_4, window_bounds = array<i64: 384, 384>}, {pipeline_mode = #tpu.pipeline_mode<synchronous>, transform_indices = @transform_5, window_bounds = array<i64: 1, 384>}, {pipeline_mode = #tpu.pipeline_mode<synchronous>, transform_indices = @transform_6, window_bounds = array<i64: 1, 384>}, {pipeline_mode = #tpu.pipeline_mode<synchronous>, transform_indices = @transform_7, window_bounds = array<i64: 1, 384>}, {pipeline_mode = #tpu.pipeline_mode<synchronous>, transform_indices = @transform_8, window_bounds = array<i64: 384, 1536>}, {pipeline_mode = #tpu.pipeline_mode<synchronous>, transform_indices = @transform_9, window_bounds = array<i64: 1, 1536>}, {pipeline_mode = #tpu.pipeline_mode<synchronous>, transform_indices = @transform_10, window_bounds = array<i64: 1536, 384>}, {pipeline_mode = #tpu.pipeline_mode<synchronous>, transform_indices = @transform_11, window_bounds = array<i64: 1, 384>}, {transform_indices = @transform_12, window_bounds = array<i64: 2, 8, 384>}]} {
    %c0 = arith.constant 0 : index
    %c0_0 = arith.constant 0 : index
    %c0_1 = arith.constant 0 : index
    %0 = vector.load %arg1[%c0, %c0_0, %c0_1] : memref<2x8x384xf32, #tpu.memory_space<vmem>>, vector<2x8x384xf32>
    %1 = vector.shape_cast %0 : vector<2x8x384xf32> to vector<16x384xf32>
    %c0_2 = arith.constant 0 : index
    %c0_3 = arith.constant 0 : index
    %2 = vector.load %arg2[%c0_2, %c0_3] : memref<1x384xf32, #tpu.memory_space<vmem>>, vector<1x384xf32>
    %c0_4 = arith.constant 0 : index
    %c0_5 = arith.constant 0 : index
    %3 = vector.load %arg3[%c0_4, %c0_5] : memref<1x384xf32, #tpu.memory_space<vmem>>, vector<1x384xf32>
    %cst = arith.constant dense<0.000000e+00> : vector<16xf32>
    %4 = vector.multi_reduction <add>, %1, %cst [1] : vector<16x384xf32> to vector<16xf32>
    %5 = vector.shape_cast %4 : vector<16xf32> to vector<16x1xf32>
    %cst_6 = arith.constant 3.840000e+02 : f32
    %6 = vector.broadcast %cst_6 : f32 to vector<16x1xf32>
    %7 = arith.divf %5, %6 : vector<16x1xf32>
    %8 = vector.broadcast %7 : vector<16x1xf32> to vector<16x384xf32>
    %9 = arith.subf %1, %8 : vector<16x384xf32>
    %10 = arith.mulf %9, %9 : vector<16x384xf32>
    %cst_7 = arith.constant dense<0.000000e+00> : vector<16xf32>
    %11 = vector.multi_reduction <add>, %10, %cst_7 [1] : vector<16x384xf32> to vector<16xf32>
    %12 = vector.shape_cast %11 : vector<16xf32> to vector<16x1xf32>
    %cst_8 = arith.constant 3.840000e+02 : f32
    %13 = vector.broadcast %cst_8 : f32 to vector<16x1xf32>
    %14 = arith.divf %12, %13 : vector<16x1xf32>
    %15 = vector.broadcast %7 : vector<16x1xf32> to vector<16x384xf32>
    %16 = arith.subf %1, %15 : vector<16x384xf32>
    %cst_9 = arith.constant 9.99999974E-6 : f32
    %17 = vector.broadcast %cst_9 : f32 to vector<16x1xf32>
    %18 = arith.addf %14, %17 : vector<16x1xf32>
    %19 = math.rsqrt %18 : vector<16x1xf32>
    %20 = vector.broadcast %19 : vector<16x1xf32> to vector<16x384xf32>
    %21 = arith.mulf %16, %20 : vector<16x384xf32>
    %22 = vector.broadcast %2 : vector<1x384xf32> to vector<16x384xf32>
    %23 = arith.mulf %21, %22 : vector<16x384xf32>
    %24 = vector.broadcast %3 : vector<1x384xf32> to vector<16x384xf32>
    %25 = arith.addf %23, %24 : vector<16x384xf32>
    %26 = arith.truncf %25 : vector<16x384xf32> to vector<16x384xbf16>
    %c0_10 = arith.constant 0 : index
    %c0_11 = arith.constant 0 : index
    %27 = vector.load %arg4[%c0_10, %c0_11] : memref<384x1152xbf16, #tpu.memory_space<vmem>>, vector<384x1152xbf16>
    %cst_12 = arith.constant dense<0.000000e+00> : vector<16x1152xf32>
    %28 = tpu.matmul %26, %27, %cst_12 {dimension_numbers = #tpu.dot_dimension_numbers<[1], [0], [0], [1], [0, 0, 1, 1], [], []>} : vector<16x384xbf16>, vector<384x1152xbf16>, vector<16x1152xf32> -> vector<16x1152xf32>
    %29 = vector.extract_strided_slice %28 {offsets = [0, 0], sizes = [16, 384], strides = [1, 1]} : vector<16x1152xf32> to vector<16x384xf32>
    %cst_13 = arith.constant 0.0510310382 : f32
    %30 = vector.broadcast %cst_13 : f32 to vector<16x384xf32>
    %31 = arith.mulf %29, %30 : vector<16x384xf32>
    %32 = vector.shape_cast %31 : vector<16x384xf32> to vector<2x8x384xf32>
    %33 = vector.extract_strided_slice %28 {offsets = [0, 384], sizes = [16, 384], strides = [1, 1]} : vector<16x1152xf32> to vector<16x384xf32>
    %34 = vector.shape_cast %33 : vector<16x384xf32> to vector<2x8x384xf32>
    %35 = vector.extract_strided_slice %28 {offsets = [0, 768], sizes = [16, 384], strides = [1, 1]} : vector<16x1152xf32> to vector<16x384xf32>
    %36 = vector.shape_cast %35 : vector<16x384xf32> to vector<2x8x384xf32>
    %37 = tpu.iota {dimensions = array<i32: 1>} : vector<1x8x8xi32>
    %38 = tpu.iota {dimensions = array<i32: 2>} : vector<1x8x8xi32>
    %39 = arith.cmpi sge, %37, %38 : vector<1x8x8xi32>
    %40 = vector.extract_strided_slice %32 {offsets = [0, 0, 0], sizes = [2, 8, 64], strides = [1, 1, 1]} : vector<2x8x384xf32> to vector<2x8x64xf32>
    %41 = arith.truncf %40 : vector<2x8x64xf32> to vector<2x8x64xbf16>
    %42 = vector.extract_strided_slice %34 {offsets = [0, 0, 0], sizes = [2, 8, 64], strides = [1, 1, 1]} : vector<2x8x384xf32> to vector<2x8x64xf32>
    %43 = arith.truncf %42 : vector<2x8x64xf32> to vector<2x8x64xbf16>
    %44 = vector.extract_strided_slice %36 {offsets = [0, 0, 0], sizes = [2, 8, 64], strides = [1, 1, 1]} : vector<2x8x384xf32> to vector<2x8x64xf32>
    %45 = arith.truncf %44 : vector<2x8x64xf32> to vector<2x8x64xbf16>
    "tpu.trace_start"() <{level = 10 : i32, message = "btd,bsd->bts"}> : () -> ()
    %cst_14 = arith.constant dense<0.000000e+00> : vector<2x8x8xf32>
    %46 = tpu.matmul %41, %43, %cst_14 {dimension_numbers = #tpu.dot_dimension_numbers<[2], [2], [1], [1], [0, 0, 0, 1, 1, 1], [0], [0]>} : vector<2x8x64xbf16>, vector<2x8x64xbf16>, vector<2x8x8xf32> -> vector<2x8x8xf32>
    %cst_15 = arith.constant 0xFF800000 : f32
    "tpu.trace_stop"() : () -> ()
    %47 = vector.shape_cast %39 : vector<1x8x8xi1> to vector<1x8x8xi1>
    %48 = vector.broadcast %47 : vector<1x8x8xi1> to vector<2x8x8xi1>
    %49 = vector.broadcast %cst_15 : f32 to vector<2x8x8xf32>
    %50 = arith.select %48, %46, %49 : vector<2x8x8xi1>, vector<2x8x8xf32>
    %cst_16 = arith.constant dense<0xFF800000> : vector<2x8xf32>
    %51 = vector.multi_reduction <maximumf>, %50, %cst_16 [2] : vector<2x8x8xf32> to vector<2x8xf32>
    %52 = vector.shape_cast %51 : vector<2x8xf32> to vector<2x8x1xf32>
    %53 = vector.broadcast %52 : vector<2x8x1xf32> to vector<2x8x8xf32>
    %54 = arith.subf %50, %53 : vector<2x8x8xf32>
    %55 = math.exp %54 : vector<2x8x8xf32>
    %cst_17 = arith.constant dense<0.000000e+00> : vector<2x8xf32>
    %56 = vector.multi_reduction <add>, %55, %cst_17 [2] : vector<2x8x8xf32> to vector<2x8xf32>
    %57 = vector.shape_cast %56 : vector<2x8xf32> to vector<2x8x1xf32>
    %58 = tpu.reciprocal %57 {approx = true} : vector<2x8x1xf32> -> vector<2x8x1xf32>
    %59 = vector.broadcast %58 : vector<2x8x1xf32> to vector<2x8x8xf32>
    %60 = arith.mulf %55, %59 : vector<2x8x8xf32>
    %61 = arith.truncf %60 : vector<2x8x8xf32> to vector<2x8x8xbf16>
    "tpu.trace_start"() <{level = 10 : i32, message = "bts,bsd->btd"}> : () -> ()
    %cst_18 = arith.constant dense<0.000000e+00> : vector<2x8x64xf32>
    %62 = tpu.matmul %61, %45, %cst_18 {dimension_numbers = #tpu.dot_dimension_numbers<[2], [1], [1], [2], [0, 0, 0, 1, 1, 2], [0], [0]>} : vector<2x8x8xbf16>, vector<2x8x64xbf16>, vector<2x8x64xf32> -> vector<2x8x64xf32>
    "tpu.trace_stop"() : () -> ()
    %63 = vector.extract_strided_slice %32 {offsets = [0, 0, 64], sizes = [2, 8, 64], strides = [1, 1, 1]} : vector<2x8x384xf32> to vector<2x8x64xf32>
    %64 = arith.truncf %63 : vector<2x8x64xf32> to vector<2x8x64xbf16>
    %65 = vector.extract_strided_slice %34 {offsets = [0, 0, 64], sizes = [2, 8, 64], strides = [1, 1, 1]} : vector<2x8x384xf32> to vector<2x8x64xf32>
    %66 = arith.truncf %65 : vector<2x8x64xf32> to vector<2x8x64xbf16>
    %67 = vector.extract_strided_slice %36 {offsets = [0, 0, 64], sizes = [2, 8, 64], strides = [1, 1, 1]} : vector<2x8x384xf32> to vector<2x8x64xf32>
    %68 = arith.truncf %67 : vector<2x8x64xf32> to vector<2x8x64xbf16>
    "tpu.trace_start"() <{level = 10 : i32, message = "btd,bsd->bts"}> : () -> ()
    %cst_19 = arith.constant dense<0.000000e+00> : vector<2x8x8xf32>
    %69 = tpu.matmul %64, %66, %cst_19 {dimension_numbers = #tpu.dot_dimension_numbers<[2], [2], [1], [1], [0, 0, 0, 1, 1, 1], [0], [0]>} : vector<2x8x64xbf16>, vector<2x8x64xbf16>, vector<2x8x8xf32> -> vector<2x8x8xf32>
    %cst_20 = arith.constant 0xFF800000 : f32
    "tpu.trace_stop"() : () -> ()
    %70 = vector.shape_cast %39 : vector<1x8x8xi1> to vector<1x8x8xi1>
    %71 = vector.broadcast %70 : vector<1x8x8xi1> to vector<2x8x8xi1>
    %72 = vector.broadcast %cst_20 : f32 to vector<2x8x8xf32>
    %73 = arith.select %71, %69, %72 : vector<2x8x8xi1>, vector<2x8x8xf32>
    %cst_21 = arith.constant dense<0xFF800000> : vector<2x8xf32>
    %74 = vector.multi_reduction <maximumf>, %73, %cst_21 [2] : vector<2x8x8xf32> to vector<2x8xf32>
    %75 = vector.shape_cast %74 : vector<2x8xf32> to vector<2x8x1xf32>
    %76 = vector.broadcast %75 : vector<2x8x1xf32> to vector<2x8x8xf32>
    %77 = arith.subf %73, %76 : vector<2x8x8xf32>
    %78 = math.exp %77 : vector<2x8x8xf32>
    %cst_22 = arith.constant dense<0.000000e+00> : vector<2x8xf32>
    %79 = vector.multi_reduction <add>, %78, %cst_22 [2] : vector<2x8x8xf32> to vector<2x8xf32>
    %80 = vector.shape_cast %79 : vector<2x8xf32> to vector<2x8x1xf32>
    %81 = tpu.reciprocal %80 {approx = true} : vector<2x8x1xf32> -> vector<2x8x1xf32>
    %82 = vector.broadcast %81 : vector<2x8x1xf32> to vector<2x8x8xf32>
    %83 = arith.mulf %78, %82 : vector<2x8x8xf32>
    %84 = arith.truncf %83 : vector<2x8x8xf32> to vector<2x8x8xbf16>
    "tpu.trace_start"() <{level = 10 : i32, message = "bts,bsd->btd"}> : () -> ()
    %cst_23 = arith.constant dense<0.000000e+00> : vector<2x8x64xf32>
    %85 = tpu.matmul %84, %68, %cst_23 {dimension_numbers = #tpu.dot_dimension_numbers<[2], [1], [1], [2], [0, 0, 0, 1, 1, 2], [0], [0]>} : vector<2x8x8xbf16>, vector<2x8x64xbf16>, vector<2x8x64xf32> -> vector<2x8x64xf32>
    "tpu.trace_stop"() : () -> ()
    %86 = vector.extract_strided_slice %32 {offsets = [0, 0, 128], sizes = [2, 8, 64], strides = [1, 1, 1]} : vector<2x8x384xf32> to vector<2x8x64xf32>
    %87 = arith.truncf %86 : vector<2x8x64xf32> to vector<2x8x64xbf16>
    %88 = vector.extract_strided_slice %34 {offsets = [0, 0, 128], sizes = [2, 8, 64], strides = [1, 1, 1]} : vector<2x8x384xf32> to vector<2x8x64xf32>
    %89 = arith.truncf %88 : vector<2x8x64xf32> to vector<2x8x64xbf16>
    %90 = vector.extract_strided_slice %36 {offsets = [0, 0, 128], sizes = [2, 8, 64], strides = [1, 1, 1]} : vector<2x8x384xf32> to vector<2x8x64xf32>
    %91 = arith.truncf %90 : vector<2x8x64xf32> to vector<2x8x64xbf16>
    "tpu.trace_start"() <{level = 10 : i32, message = "btd,bsd->bts"}> : () -> ()
    %cst_24 = arith.constant dense<0.000000e+00> : vector<2x8x8xf32>
    %92 = tpu.matmul %87, %89, %cst_24 {dimension_numbers = #tpu.dot_dimension_numbers<[2], [2], [1], [1], [0, 0, 0, 1, 1, 1], [0], [0]>} : vector<2x8x64xbf16>, vector<2x8x64xbf16>, vector<2x8x8xf32> -> vector<2x8x8xf32>
    %cst_25 = arith.constant 0xFF800000 : f32
    "tpu.trace_stop"() : () -> ()
    %93 = vector.shape_cast %39 : vector<1x8x8xi1> to vector<1x8x8xi1>
    %94 = vector.broadcast %93 : vector<1x8x8xi1> to vector<2x8x8xi1>
    %95 = vector.broadcast %cst_25 : f32 to vector<2x8x8xf32>
    %96 = arith.select %94, %92, %95 : vector<2x8x8xi1>, vector<2x8x8xf32>
    %cst_26 = arith.constant dense<0xFF800000> : vector<2x8xf32>
    %97 = vector.multi_reduction <maximumf>, %96, %cst_26 [2] : vector<2x8x8xf32> to vector<2x8xf32>
    %98 = vector.shape_cast %97 : vector<2x8xf32> to vector<2x8x1xf32>
    %99 = vector.broadcast %98 : vector<2x8x1xf32> to vector<2x8x8xf32>
    %100 = arith.subf %96, %99 : vector<2x8x8xf32>
    %101 = math.exp %100 : vector<2x8x8xf32>
    %cst_27 = arith.constant dense<0.000000e+00> : vector<2x8xf32>
    %102 = vector.multi_reduction <add>, %101, %cst_27 [2] : vector<2x8x8xf32> to vector<2x8xf32>
    %103 = vector.shape_cast %102 : vector<2x8xf32> to vector<2x8x1xf32>
    %104 = tpu.reciprocal %103 {approx = true} : vector<2x8x1xf32> -> vector<2x8x1xf32>
    %105 = vector.broadcast %104 : vector<2x8x1xf32> to vector<2x8x8xf32>
    %106 = arith.mulf %101, %105 : vector<2x8x8xf32>
    %107 = arith.truncf %106 : vector<2x8x8xf32> to vector<2x8x8xbf16>
    "tpu.trace_start"() <{level = 10 : i32, message = "bts,bsd->btd"}> : () -> ()
    %cst_28 = arith.constant dense<0.000000e+00> : vector<2x8x64xf32>
    %108 = tpu.matmul %107, %91, %cst_28 {dimension_numbers = #tpu.dot_dimension_numbers<[2], [1], [1], [2], [0, 0, 0, 1, 1, 2], [0], [0]>} : vector<2x8x8xbf16>, vector<2x8x64xbf16>, vector<2x8x64xf32> -> vector<2x8x64xf32>
    "tpu.trace_stop"() : () -> ()
    %109 = vector.extract_strided_slice %32 {offsets = [0, 0, 192], sizes = [2, 8, 64], strides = [1, 1, 1]} : vector<2x8x384xf32> to vector<2x8x64xf32>
    %110 = arith.truncf %109 : vector<2x8x64xf32> to vector<2x8x64xbf16>
    %111 = vector.extract_strided_slice %34 {offsets = [0, 0, 192], sizes = [2, 8, 64], strides = [1, 1, 1]} : vector<2x8x384xf32> to vector<2x8x64xf32>
    %112 = arith.truncf %111 : vector<2x8x64xf32> to vector<2x8x64xbf16>
    %113 = vector.extract_strided_slice %36 {offsets = [0, 0, 192], sizes = [2, 8, 64], strides = [1, 1, 1]} : vector<2x8x384xf32> to vector<2x8x64xf32>
    %114 = arith.truncf %113 : vector<2x8x64xf32> to vector<2x8x64xbf16>
    "tpu.trace_start"() <{level = 10 : i32, message = "btd,bsd->bts"}> : () -> ()
    %cst_29 = arith.constant dense<0.000000e+00> : vector<2x8x8xf32>
    %115 = tpu.matmul %110, %112, %cst_29 {dimension_numbers = #tpu.dot_dimension_numbers<[2], [2], [1], [1], [0, 0, 0, 1, 1, 1], [0], [0]>} : vector<2x8x64xbf16>, vector<2x8x64xbf16>, vector<2x8x8xf32> -> vector<2x8x8xf32>
    %cst_30 = arith.constant 0xFF800000 : f32
    "tpu.trace_stop"() : () -> ()
    %116 = vector.shape_cast %39 : vector<1x8x8xi1> to vector<1x8x8xi1>
    %117 = vector.broadcast %116 : vector<1x8x8xi1> to vector<2x8x8xi1>
    %118 = vector.broadcast %cst_30 : f32 to vector<2x8x8xf32>
    %119 = arith.select %117, %115, %118 : vector<2x8x8xi1>, vector<2x8x8xf32>
    %cst_31 = arith.constant dense<0xFF800000> : vector<2x8xf32>
    %120 = vector.multi_reduction <maximumf>, %119, %cst_31 [2] : vector<2x8x8xf32> to vector<2x8xf32>
    %121 = vector.shape_cast %120 : vector<2x8xf32> to vector<2x8x1xf32>
    %122 = vector.broadcast %121 : vector<2x8x1xf32> to vector<2x8x8xf32>
    %123 = arith.subf %119, %122 : vector<2x8x8xf32>
    %124 = math.exp %123 : vector<2x8x8xf32>
    %cst_32 = arith.constant dense<0.000000e+00> : vector<2x8xf32>
    %125 = vector.multi_reduction <add>, %124, %cst_32 [2] : vector<2x8x8xf32> to vector<2x8xf32>
    %126 = vector.shape_cast %125 : vector<2x8xf32> to vector<2x8x1xf32>
    %127 = tpu.reciprocal %126 {approx = true} : vector<2x8x1xf32> -> vector<2x8x1xf32>
    %128 = vector.broadcast %127 : vector<2x8x1xf32> to vector<2x8x8xf32>
    %129 = arith.mulf %124, %128 : vector<2x8x8xf32>
    %130 = arith.truncf %129 : vector<2x8x8xf32> to vector<2x8x8xbf16>
    "tpu.trace_start"() <{level = 10 : i32, message = "bts,bsd->btd"}> : () -> ()
    %cst_33 = arith.constant dense<0.000000e+00> : vector<2x8x64xf32>
    %131 = tpu.matmul %130, %114, %cst_33 {dimension_numbers = #tpu.dot_dimension_numbers<[2], [1], [1], [2], [0, 0, 0, 1, 1, 2], [0], [0]>} : vector<2x8x8xbf16>, vector<2x8x64xbf16>, vector<2x8x64xf32> -> vector<2x8x64xf32>
    "tpu.trace_stop"() : () -> ()
    %132 = vector.extract_strided_slice %32 {offsets = [0, 0, 256], sizes = [2, 8, 64], strides = [1, 1, 1]} : vector<2x8x384xf32> to vector<2x8x64xf32>
    %133 = arith.truncf %132 : vector<2x8x64xf32> to vector<2x8x64xbf16>
    %134 = vector.extract_strided_slice %34 {offsets = [0, 0, 256], sizes = [2, 8, 64], strides = [1, 1, 1]} : vector<2x8x384xf32> to vector<2x8x64xf32>
    %135 = arith.truncf %134 : vector<2x8x64xf32> to vector<2x8x64xbf16>
    %136 = vector.extract_strided_slice %36 {offsets = [0, 0, 256], sizes = [2, 8, 64], strides = [1, 1, 1]} : vector<2x8x384xf32> to vector<2x8x64xf32>
    %137 = arith.truncf %136 : vector<2x8x64xf32> to vector<2x8x64xbf16>
    "tpu.trace_start"() <{level = 10 : i32, message = "btd,bsd->bts"}> : () -> ()
    %cst_34 = arith.constant dense<0.000000e+00> : vector<2x8x8xf32>
    %138 = tpu.matmul %133, %135, %cst_34 {dimension_numbers = #tpu.dot_dimension_numbers<[2], [2], [1], [1], [0, 0, 0, 1, 1, 1], [0], [0]>} : vector<2x8x64xbf16>, vector<2x8x64xbf16>, vector<2x8x8xf32> -> vector<2x8x8xf32>
    %cst_35 = arith.constant 0xFF800000 : f32
    "tpu.trace_stop"() : () -> ()
    %139 = vector.shape_cast %39 : vector<1x8x8xi1> to vector<1x8x8xi1>
    %140 = vector.broadcast %139 : vector<1x8x8xi1> to vector<2x8x8xi1>
    %141 = vector.broadcast %cst_35 : f32 to vector<2x8x8xf32>
    %142 = arith.select %140, %138, %141 : vector<2x8x8xi1>, vector<2x8x8xf32>
    %cst_36 = arith.constant dense<0xFF800000> : vector<2x8xf32>
    %143 = vector.multi_reduction <maximumf>, %142, %cst_36 [2] : vector<2x8x8xf32> to vector<2x8xf32>
    %144 = vector.shape_cast %143 : vector<2x8xf32> to vector<2x8x1xf32>
    %145 = vector.broadcast %144 : vector<2x8x1xf32> to vector<2x8x8xf32>
    %146 = arith.subf %142, %145 : vector<2x8x8xf32>
    %147 = math.exp %146 : vector<2x8x8xf32>
    %cst_37 = arith.constant dense<0.000000e+00> : vector<2x8xf32>
    %148 = vector.multi_reduction <add>, %147, %cst_37 [2] : vector<2x8x8xf32> to vector<2x8xf32>
    %149 = vector.shape_cast %148 : vector<2x8xf32> to vector<2x8x1xf32>
    %150 = tpu.reciprocal %149 {approx = true} : vector<2x8x1xf32> -> vector<2x8x1xf32>
    %151 = vector.broadcast %150 : vector<2x8x1xf32> to vector<2x8x8xf32>
    %152 = arith.mulf %147, %151 : vector<2x8x8xf32>
    %153 = arith.truncf %152 : vector<2x8x8xf32> to vector<2x8x8xbf16>
    "tpu.trace_start"() <{level = 10 : i32, message = "bts,bsd->btd"}> : () -> ()
    %cst_38 = arith.constant dense<0.000000e+00> : vector<2x8x64xf32>
    %154 = tpu.matmul %153, %137, %cst_38 {dimension_numbers = #tpu.dot_dimension_numbers<[2], [1], [1], [2], [0, 0, 0, 1, 1, 2], [0], [0]>} : vector<2x8x8xbf16>, vector<2x8x64xbf16>, vector<2x8x64xf32> -> vector<2x8x64xf32>
    "tpu.trace_stop"() : () -> ()
    %155 = vector.extract_strided_slice %32 {offsets = [0, 0, 320], sizes = [2, 8, 64], strides = [1, 1, 1]} : vector<2x8x384xf32> to vector<2x8x64xf32>
    %156 = arith.truncf %155 : vector<2x8x64xf32> to vector<2x8x64xbf16>
    %157 = vector.extract_strided_slice %34 {offsets = [0, 0, 320], sizes = [2, 8, 64], strides = [1, 1, 1]} : vector<2x8x384xf32> to vector<2x8x64xf32>
    %158 = arith.truncf %157 : vector<2x8x64xf32> to vector<2x8x64xbf16>
    %159 = vector.extract_strided_slice %36 {offsets = [0, 0, 320], sizes = [2, 8, 64], strides = [1, 1, 1]} : vector<2x8x384xf32> to vector<2x8x64xf32>
    %160 = arith.truncf %159 : vector<2x8x64xf32> to vector<2x8x64xbf16>
    "tpu.trace_start"() <{level = 10 : i32, message = "btd,bsd->bts"}> : () -> ()
    %cst_39 = arith.constant dense<0.000000e+00> : vector<2x8x8xf32>
    %161 = tpu.matmul %156, %158, %cst_39 {dimension_numbers = #tpu.dot_dimension_numbers<[2], [2], [1], [1], [0, 0, 0, 1, 1, 1], [0], [0]>} : vector<2x8x64xbf16>, vector<2x8x64xbf16>, vector<2x8x8xf32> -> vector<2x8x8xf32>
    %cst_40 = arith.constant 0xFF800000 : f32
    "tpu.trace_stop"() : () -> ()
    %162 = vector.shape_cast %39 : vector<1x8x8xi1> to vector<1x8x8xi1>
    %163 = vector.broadcast %162 : vector<1x8x8xi1> to vector<2x8x8xi1>
    %164 = vector.broadcast %cst_40 : f32 to vector<2x8x8xf32>
    %165 = arith.select %163, %161, %164 : vector<2x8x8xi1>, vector<2x8x8xf32>
    %cst_41 = arith.constant dense<0xFF800000> : vector<2x8xf32>
    %166 = vector.multi_reduction <maximumf>, %165, %cst_41 [2] : vector<2x8x8xf32> to vector<2x8xf32>
    %167 = vector.shape_cast %166 : vector<2x8xf32> to vector<2x8x1xf32>
    %168 = vector.broadcast %167 : vector<2x8x1xf32> to vector<2x8x8xf32>
    %169 = arith.subf %165, %168 : vector<2x8x8xf32>
    %170 = math.exp %169 : vector<2x8x8xf32>
    %cst_42 = arith.constant dense<0.000000e+00> : vector<2x8xf32>
    %171 = vector.multi_reduction <add>, %170, %cst_42 [2] : vector<2x8x8xf32> to vector<2x8xf32>
    %172 = vector.shape_cast %171 : vector<2x8xf32> to vector<2x8x1xf32>
    %173 = tpu.reciprocal %172 {approx = true} : vector<2x8x1xf32> -> vector<2x8x1xf32>
    %174 = vector.broadcast %173 : vector<2x8x1xf32> to vector<2x8x8xf32>
    %175 = arith.mulf %170, %174 : vector<2x8x8xf32>
    %176 = arith.truncf %175 : vector<2x8x8xf32> to vector<2x8x8xbf16>
    "tpu.trace_start"() <{level = 10 : i32, message = "bts,bsd->btd"}> : () -> ()
    %cst_43 = arith.constant dense<0.000000e+00> : vector<2x8x64xf32>
    %177 = tpu.matmul %176, %160, %cst_43 {dimension_numbers = #tpu.dot_dimension_numbers<[2], [1], [1], [2], [0, 0, 0, 1, 1, 2], [0], [0]>} : vector<2x8x8xbf16>, vector<2x8x64xbf16>, vector<2x8x64xf32> -> vector<2x8x64xf32>
    "tpu.trace_stop"() : () -> ()
    %178 = tpu.concatenate %62, %85, %108, %131, %154, %177 in 2 : vector<2x8x64xf32>, vector<2x8x64xf32>, vector<2x8x64xf32>, vector<2x8x64xf32>, vector<2x8x64xf32>, vector<2x8x64xf32> -> vector<2x8x384xf32>
    %179 = vector.shape_cast %178 : vector<2x8x384xf32> to vector<16x384xf32>
    %180 = arith.truncf %179 : vector<16x384xf32> to vector<16x384xbf16>
    %c0_44 = arith.constant 0 : index
    %c0_45 = arith.constant 0 : index
    %181 = vector.load %arg5[%c0_44, %c0_45] : memref<384x384xbf16, #tpu.memory_space<vmem>>, vector<384x384xbf16>
    %cst_46 = arith.constant dense<0.000000e+00> : vector<16x384xf32>
    %182 = tpu.matmul %180, %181, %cst_46 {dimension_numbers = #tpu.dot_dimension_numbers<[1], [0], [0], [1], [0, 0, 1, 1], [], []>} : vector<16x384xbf16>, vector<384x384xbf16>, vector<16x384xf32> -> vector<16x384xf32>
    %c0_47 = arith.constant 0 : index
    %c0_48 = arith.constant 0 : index
    %183 = vector.load %arg6[%c0_47, %c0_48] : memref<1x384xf32, #tpu.memory_space<vmem>>, vector<1x384xf32>
    %184 = vector.broadcast %183 : vector<1x384xf32> to vector<16x384xf32>
    %185 = arith.addf %182, %184 : vector<16x384xf32>
    %186 = arith.addf %1, %185 : vector<16x384xf32>
    %c0_49 = arith.constant 0 : index
    %c0_50 = arith.constant 0 : index
    %187 = vector.load %arg7[%c0_49, %c0_50] : memref<1x384xf32, #tpu.memory_space<vmem>>, vector<1x384xf32>
    %c0_51 = arith.constant 0 : index
    %c0_52 = arith.constant 0 : index
    %188 = vector.load %arg8[%c0_51, %c0_52] : memref<1x384xf32, #tpu.memory_space<vmem>>, vector<1x384xf32>
    %cst_53 = arith.constant dense<0.000000e+00> : vector<16xf32>
    %189 = vector.multi_reduction <add>, %186, %cst_53 [1] : vector<16x384xf32> to vector<16xf32>
    %190 = vector.shape_cast %189 : vector<16xf32> to vector<16x1xf32>
    %cst_54 = arith.constant 3.840000e+02 : f32
    %191 = vector.broadcast %cst_54 : f32 to vector<16x1xf32>
    %192 = arith.divf %190, %191 : vector<16x1xf32>
    %193 = vector.broadcast %192 : vector<16x1xf32> to vector<16x384xf32>
    %194 = arith.subf %186, %193 : vector<16x384xf32>
    %195 = arith.mulf %194, %194 : vector<16x384xf32>
    %cst_55 = arith.constant dense<0.000000e+00> : vector<16xf32>
    %196 = vector.multi_reduction <add>, %195, %cst_55 [1] : vector<16x384xf32> to vector<16xf32>
    %197 = vector.shape_cast %196 : vector<16xf32> to vector<16x1xf32>
    %cst_56 = arith.constant 3.840000e+02 : f32
    %198 = vector.broadcast %cst_56 : f32 to vector<16x1xf32>
    %199 = arith.divf %197, %198 : vector<16x1xf32>
    %200 = vector.broadcast %192 : vector<16x1xf32> to vector<16x384xf32>
    %201 = arith.subf %186, %200 : vector<16x384xf32>
    %cst_57 = arith.constant 9.99999974E-6 : f32
    %202 = vector.broadcast %cst_57 : f32 to vector<16x1xf32>
    %203 = arith.addf %199, %202 : vector<16x1xf32>
    %204 = math.rsqrt %203 : vector<16x1xf32>
    %205 = vector.broadcast %204 : vector<16x1xf32> to vector<16x384xf32>
    %206 = arith.mulf %201, %205 : vector<16x384xf32>
    %207 = vector.broadcast %187 : vector<1x384xf32> to vector<16x384xf32>
    %208 = arith.mulf %206, %207 : vector<16x384xf32>
    %209 = vector.broadcast %188 : vector<1x384xf32> to vector<16x384xf32>
    %210 = arith.addf %208, %209 : vector<16x384xf32>
    %211 = arith.truncf %210 : vector<16x384xf32> to vector<16x384xbf16>
    %c0_58 = arith.constant 0 : index
    %c0_59 = arith.constant 0 : index
    %212 = vector.load %arg9[%c0_58, %c0_59] : memref<384x1536xbf16, #tpu.memory_space<vmem>>, vector<384x1536xbf16>
    %cst_60 = arith.constant dense<0.000000e+00> : vector<16x1536xf32>
    %213 = tpu.matmul %211, %212, %cst_60 {dimension_numbers = #tpu.dot_dimension_numbers<[1], [0], [0], [1], [0, 0, 1, 1], [], []>} : vector<16x384xbf16>, vector<384x1536xbf16>, vector<16x1536xf32> -> vector<16x1536xf32>
    %c0_61 = arith.constant 0 : index
    %c0_62 = arith.constant 0 : index
    %214 = vector.load %arg10[%c0_61, %c0_62] : memref<1x1536xf32, #tpu.memory_space<vmem>>, vector<1x1536xf32>
    %215 = vector.broadcast %214 : vector<1x1536xf32> to vector<16x1536xf32>
    %216 = arith.addf %213, %215 : vector<16x1536xf32>
    %cst_63 = arith.constant 0.000000e+00 : f32
    %217 = vector.broadcast %cst_63 : f32 to vector<16x1536xf32>
    %218 = arith.maximumf %216, %217 : vector<16x1536xf32>
    %219 = arith.truncf %218 : vector<16x1536xf32> to vector<16x1536xbf16>
    %c0_64 = arith.constant 0 : index
    %c0_65 = arith.constant 0 : index
    %220 = vector.load %arg11[%c0_64, %c0_65] : memref<1536x384xbf16, #tpu.memory_space<vmem>>, vector<1536x384xbf16>
    %cst_66 = arith.constant dense<0.000000e+00> : vector<16x384xf32>
    %221 = tpu.matmul %219, %220, %cst_66 {dimension_numbers = #tpu.dot_dimension_numbers<[1], [0], [0], [1], [0, 0, 1, 1], [], []>} : vector<16x1536xbf16>, vector<1536x384xbf16>, vector<16x384xf32> -> vector<16x384xf32>
    %c0_67 = arith.constant 0 : index
    %c0_68 = arith.constant 0 : index
    %222 = vector.load %arg12[%c0_67, %c0_68] : memref<1x384xf32, #tpu.memory_space<vmem>>, vector<1x384xf32>
    %223 = vector.broadcast %222 : vector<1x384xf32> to vector<16x384xf32>
    %224 = arith.addf %221, %223 : vector<16x384xf32>
    %225 = arith.addf %186, %224 : vector<16x384xf32>
    %226 = vector.shape_cast %225 : vector<16x384xf32> to vector<2x8x384xf32>
    %c0_69 = arith.constant 0 : index
    %c0_70 = arith.constant 0 : index
    %c0_71 = arith.constant 0 : index
    %227 = vector.load %arg13[%c0_69, %c0_70, %c0_71] : memref<2x8x384xf32, #tpu.memory_space<vmem>>, vector<2x8x384xf32>
    tpu.vector_store %arg13[%c0_69, %c0_70, %c0_71], %226 {strides = array<i32>} : memref<2x8x384xf32, #tpu.memory_space<vmem>>, vector<2x8x384xf32>,
    return
  }
  func.func @transform_0(%arg0: i32) -> (i32, i32, i32) {
    %c0_i32 = arith.constant 0 : i32
    %c0_i32_0 = arith.constant 0 : i32
    %c0_i32_1 = arith.constant 0 : i32
    return %arg0, %c0_i32, %c0_i32_0 : i32, i32, i32
  }
  func.func @transform_1(%arg0: i32) -> (i32, i32) {
    %c0_i32 = arith.constant 0 : i32
    %c0_i32_0 = arith.constant 0 : i32
    %c0_i32_1 = arith.constant 0 : i32
    return %c0_i32, %c0_i32_0 : i32, i32
  }
  func.func @transform_2(%arg0: i32) -> (i32, i32) {
    %c0_i32 = arith.constant 0 : i32
    %c0_i32_0 = arith.constant 0 : i32
    %c0_i32_1 = arith.constant 0 : i32
    return %c0_i32, %c0_i32_0 : i32, i32
  }
  func.func @transform_3(%arg0: i32) -> (i32, i32) {
    %c0_i32 = arith.constant 0 : i32
    %c0_i32_0 = arith.constant 0 : i32
    %c0_i32_1 = arith.constant 0 : i32
    return %c0_i32, %c0_i32_0 : i32, i32
  }
  func.func @transform_4(%arg0: i32) -> (i32, i32) {
    %c0_i32 = arith.constant 0 : i32
    %c0_i32_0 = arith.constant 0 : i32
    %c0_i32_1 = arith.constant 0 : i32
    return %c0_i32, %c0_i32_0 : i32, i32
  }
  func.func @transform_5(%arg0: i32) -> (i32, i32) {
    %c0_i32 = arith.constant 0 : i32
    %c0_i32_0 = arith.constant 0 : i32
    %c0_i32_1 = arith.constant 0 : i32
    return %c0_i32, %c0_i32_0 : i32, i32
  }
  func.func @transform_6(%arg0: i32) -> (i32, i32) {
    %c0_i32 = arith.constant 0 : i32
    %c0_i32_0 = arith.constant 0 : i32
    %c0_i32_1 = arith.constant 0 : i32
    return %c0_i32, %c0_i32_0 : i32, i32
  }
  func.func @transform_7(%arg0: i32) -> (i32, i32) {
    %c0_i32 = arith.constant 0 : i32
    %c0_i32_0 = arith.constant 0 : i32
    %c0_i32_1 = arith.constant 0 : i32
    return %c0_i32, %c0_i32_0 : i32, i32
  }
  func.func @transform_8(%arg0: i32) -> (i32, i32) {
    %c0_i32 = arith.constant 0 : i32
    %c0_i32_0 = arith.constant 0 : i32
    %c0_i32_1 = arith.constant 0 : i32
    return %c0_i32, %c0_i32_0 : i32, i32
  }
  func.func @transform_9(%arg0: i32) -> (i32, i32) {
    %c0_i32 = arith.constant 0 : i32
    %c0_i32_0 = arith.constant 0 : i32
    %c0_i32_1 = arith.constant 0 : i32
    return %c0_i32, %c0_i32_0 : i32, i32
  }
  func.func @transform_10(%arg0: i32) -> (i32, i32) {
    %c0_i32 = arith.constant 0 : i32
    %c0_i32_0 = arith.constant 0 : i32
    %c0_i32_1 = arith.constant 0 : i32
    return %c0_i32, %c0_i32_0 : i32, i32
  }
  func.func @transform_11(%arg0: i32) -> (i32, i32) {
    %c0_i32 = arith.constant 0 : i32
    %c0_i32_0 = arith.constant 0 : i32
    %c0_i32_1 = arith.constant 0 : i32
    return %c0_i32, %c0_i32_0 : i32, i32
  }
  func.func @transform_12(%arg0: i32) -> (i32, i32, i32) {
    %c0_i32 = arith.constant 0 : i32
    %c0_i32_0 = arith.constant 0 : i32
    %c0_i32_1 = arith.constant 0 : i32
    return %arg0, %c0_i32, %c0_i32_0 : i32, i32, i32
  }
}

</mosaic_0001>

<bundles_post_ra>
// kernel: tpu_custom_call.1
= control target key start
LH: loop header
LB: loop body
LE: loop exit
PB: predicated region body
PF: predicated region fallthrough
CT: control target
= control target key end

     0   :  { %17 = vsyncpa [#allocation3], 0  ;;  %s13964_s0 = inlined_call_operand.hbm [shape: f32[2,8,384], index: 0, kind: input, shape index: {}]   ;;  %s13965_s1 = inlined_call_operand.hbm [shape: f32[1,384], index: 1, kind: input, shape index: {}]   ;;  %s13966_s2 = inlined_call_operand.hbm [shape: f32[1,384], index: 2, kind: input, shape index: {}]   ;;  %s13967_s3 = inlined_call_operand.hbm [shape: bf16[384,1152], index: 3, kind: input, shape index: {}]   ;;  %s13968_s4 = inlined_call_operand.hbm [shape: bf16[384,384], index: 4, kind: input, shape index: {}]   ;;  %s13969_s5 = inlined_call_operand.hbm [shape: f32[1,384], index: 5, kind: input, shape index: {}]   ;;  %s13970_s6 = inlined_call_operand.hbm [shape: f32[1,384], index: 6, kind: input, shape index: {}]   ;;  %s13971_s7 = inlined_call_operand.hbm [shape: f32[1,384], index: 7, kind: input, shape index: {}]   ;;  %s13972_s8 = inlined_call_operand.hbm [shape: bf16[384,1536], index: 8, kind: input, shape index: {}]   ;;  %s13973_s9 = inlined_call_operand.hbm [shape: f32[1,1536], index: 9, kind: input, shape index: {}]   ;;  %s13974_s10 = inlined_call_operand.hbm [shape: bf16[1536,384], index: 10, kind: input, shape index: {}]   ;;  %s13975_s11 = inlined_call_operand.hbm [shape: f32[1,384], index: 11, kind: input, shape index: {}]   ;;  %s13976_s12 = inlined_call_operand.hbm [shape: f32[2,8,384], index: 12, kind: output, shape index: {}]  }
   0x1   :  { %18 = vsyncpa [#allocation6], 0 }
   0x2   :  { %19 = vsyncpa [#allocation9], 0 }
   0x3   :  { %20 = vsyncpa [#allocation12], 0 }
   0x4   :  { %21 = vsyncpa [#allocation15], 0 }
   0x5   :  { %22 = vsyncpa [#allocation18], 0 }
   0x6   :  { %23 = vsyncpa [#allocation21], 0  ;;  %s43_s23 = sshll.u32 %s13965_s1, 4  ;;  %s44_s23 = int_to_ptr.hbm [resolvable:$true] %s43_s23 }
   0x7   :  { %24 = vsyncpa [#allocation4], 0  ;;  %s13061_s24 = smov [#allocation5]   ;;  %s64_s28 = sshll.u32 %s13967_s3, 4  ;;  %s65_s28 = int_to_ptr.hbm [resolvable:$true] %s64_s28 }
   0x8   :  { %s45_s25 = sshll.u32 %s13061_s24, 4  ;;  %s13062_s29 = smov [#allocation8]   ;;  %s46_s25 = int_to_ptr.vmem [resolvable:$true] %s45_s25 }
   0x9   :  { %48 = dma.hbm_to_vmem [thread:$0]  %s44_s23, 48, %s46_s25, [#allocation6]  }
   0xa   :  { %s66_s30 = sshll.u32 %s13062_s29, 4  ;;  %s13063_s13 = smov 576   ;;  %s67_s30 = int_to_ptr.vmem [resolvable:$true] %s66_s30 }
   0xb   :  { %s13064_s14 = smov 36   ;;  %s91_s1 = sshll.u32 %s13969_s5, 4  ;;  %s92_s1 = int_to_ptr.hbm [resolvable:$true] %s91_s1 }
   0xc   :  { %72 = dma.hbm_to_vmem [thread:$0]  %s65_s28, 27648, %s67_s30, [#allocation9], %s13063_s13, %s13063_s13, %s13064_s14  }
   0xd   :  { %s13065_s17 = smov [#allocation11]   ;;  %s113_s3 = sshll.u32 %s13971_s7, 4  ;;  %s114_s3 = int_to_ptr.hbm [resolvable:$true] %s113_s3 }
   0xe   :  { %s93_s18 = sshll.u32 %s13065_s17, 4  ;;  %s13066_s21 = smov [#allocation14]   ;;  %s94_s18 = int_to_ptr.vmem [resolvable:$true] %s93_s18 }
   0xf   :  { %96 = dma.hbm_to_vmem [thread:$0]  %s92_s1, 48, %s94_s18, [#allocation12]  }
  0x10   :  { %s115_s22 = sshll.u32 %s13066_s21, 4  ;;  %s137_s25 = sshll.u32 %s13973_s9, 4  ;;  %s116_s22 = int_to_ptr.vmem [resolvable:$true] %s115_s22  ;;  %s138_s25 = int_to_ptr.hbm [resolvable:$true] %s137_s25 }
  0x11   :  { %118 = dma.hbm_to_vmem [thread:$0]  %s114_s3, 48, %s116_s22, [#allocation15]  }
  0x12   :  { %s29_s27 = sshll.u32 %s13964_s0, 4  ;;  %s13067_s28 = smov [#allocation17]   ;;  %s30_s27 = int_to_ptr.hbm [resolvable:$true] %s29_s27 }
  0x13   :  { %s139_s29 = sshll.u32 %s13067_s28, 4  ;;  %s13068_s7 = smov [#allocation2]   ;;  %s140_s29 = int_to_ptr.vmem [resolvable:$true] %s139_s29 }
  0x14   :  { %142 = dma.hbm_to_vmem [thread:$0]  %s138_s25, 192, %s140_s29, [#allocation18]  }
  0x15   :  { %s31_s30 = sshll.u32 %s13068_s7, 4  ;;  %s13069_s13 = smov 384   ;;  %s32_s30 = int_to_ptr.vmem [resolvable:$true] %s31_s30 }
  0x16   :  { %s13070_s14 = smov 24   ;;  %s54_s16 = sshll.u32 %s13966_s2, 4  ;;  %s55_s16 = int_to_ptr.hbm [resolvable:$true] %s54_s16 }
  0x17   :  { %37 = dma.hbm_to_vmem [thread:$0]  %s30_s27, 768, %s32_s30, [#allocation3], %s13069_s13, %s13069_s13, %s13070_s14  }
  0x18   :  { %s13071_s0 = smov [#allocation7]   ;;  %s77_s19 = sshll.u32 %s13968_s4, 4  ;;  %s78_s19 = int_to_ptr.hbm [resolvable:$true] %s77_s19 }
  0x19   :  { %s56_s1 = sshll.u32 %s13071_s0, 4  ;;  %s13072_s20 = smov [#allocation10]   ;;  %s57_s1 = int_to_ptr.vmem [resolvable:$true] %s56_s1 }
  0x1a   :  { %59 = dma.hbm_to_vmem [thread:$0]  %s55_s16, 48, %s57_s1, [#allocation6]  }
  0x1b   :  { %s79_s3 = sshll.u32 %s13072_s20, 4  ;;  %s13073_s21 = smov 192   ;;  %s80_s3 = int_to_ptr.vmem [resolvable:$true] %s79_s3 }
  0x1c   :  { %s13074_s22 = smov 12   ;;  %s102_s2 = sshll.u32 %s13970_s6, 4  ;;  %s103_s2 = int_to_ptr.hbm [resolvable:$true] %s102_s2 }
  0x1d   :  { %85 = dma.hbm_to_vmem [thread:$0]  %s78_s19, 9216, %s80_s3, [#allocation9], %s13073_s21, %s13073_s21, %s13074_s22  }
  0x1e   :  { %s13075_s25 = smov [#allocation13]   ;;  %s123_s4 = sshll.u32 %s13972_s8, 4  ;;  %s124_s4 = int_to_ptr.hbm [resolvable:$true] %s123_s4 }
  0x1f   :  { %s104_s5 = sshll.u32 %s13075_s25, 4  ;;  %s13076_s28 = smov [#allocation16]   ;;  %s105_s5 = int_to_ptr.vmem [resolvable:$true] %s104_s5 }
  0x20   :  { %107 = dma.hbm_to_vmem [thread:$0]  %s103_s2, 48, %s105_s5, [#allocation12]  }
  0x21   :  { %s125_s29 = sshll.u32 %s13076_s28, 4  ;;  %s13077_s7 = smov 768   ;;  %s126_s29 = int_to_ptr.vmem [resolvable:$true] %s125_s29 }
  0x22   :  { %s13078_s30 = smov 48   ;;  %s147_s6 = sshll.u32 %s13974_s10, 4  ;;  %s148_s6 = int_to_ptr.hbm [resolvable:$true] %s147_s6 }
  0x23   :  { %131 = dma.hbm_to_vmem [thread:$0]  %s124_s4, 36864, %s126_s29, [#allocation15], %s13077_s7, %s13077_s7, %s13078_s30  }
  0x24   :  { %s13079_s16 = smov [#allocation19]   ;;  %s161_s8 = sshll.u32 %s13975_s11, 4  ;;  %s162_s8 = int_to_ptr.hbm [resolvable:$true] %s161_s8 }
  0x25   :  { %s149_s0 = sshll.u32 %s13079_s16, 4  ;;  %s13080_s18 = smov [#allocation20]   ;;  %s150_s0 = int_to_ptr.vmem [resolvable:$true] %s149_s0 }
  0x26   :  { %155 = dma.hbm_to_vmem [thread:$0]  %s148_s6, 36864, %s150_s0, [#allocation18], %s13073_s21, %s13073_s21, %s13074_s22  }
  0x27   :  { %s163_s19 = sshll.u32 %s13080_s18, 4  ;;  %s164_s19 = int_to_ptr.vmem [resolvable:$true] %s163_s19 }
  0x28   :  { %166 = dma.hbm_to_vmem [thread:$0]  %s162_s8, 48, %s164_s19, [#allocation21]  }
  0x29   :  { %13045 = dma.done.wait [#allocation3], 768  }
  0x2a   :  { %13046 = vsyncadd [#allocation3], 4294966528 }
  0x2b   :  { %13047 = dma.done.wait [#allocation6], 96  }
  0x2c   :  { %13048 = vsyncadd [#allocation6], 4294967200 }
  0x2d   :  { %13049 = dma.done.wait [#allocation9], 36864  }
  0x2e   :  { %13050 = vsyncadd [#allocation9], 4294930432 }
  0x2f   :  { %13051 = dma.done.wait [#allocation12], 96  }
  0x30   :  { %13052 = vsyncadd [#allocation12], 4294967200 }
  0x31   :  { %13053 = dma.done.wait [#allocation15], 36912  }
  0x32   :  { %13054 = vsyncadd [#allocation15], 4294930384 }
  0x33   :  { %13055 = dma.done.wait [#allocation18], 37056  }
  0x34   :  { %13056 = vsyncadd [#allocation18], 4294930240 }
  0x35   :  { %13057 = dma.done.wait [#allocation21], 48  }
  0x36   :  { %13058 = vsyncadd [#allocation21], 4294967248  ;;  %v13188_v0 = vld [vmem:[#allocation2] sm:$0xff]  ;;  %v13190_v1 = vld [vmem:[#allocation2 + $0x8] sm:$0xff]  ;;  %v13081_v10 = vmov 384.0   ;;  %s13082_s10 = smov 64  }
  0x37   :  { %v13192_v2 = vld [vmem:[#allocation2 + $0x10] sm:$0xff]  ;;  %v224_v3 = vadd.f32 %v13190_v1, %v13188_v0  ;;  %v13196_v4 = vld [vmem:[#allocation2 + $0x18] sm:$0xff]  ;;  %v13198_v5 = vld [vmem:[#allocation2 + $0x20] sm:$0xff]  ;;  %12669 = vrcp.f32 %v13081_v10  ;;  %vm2059_vm7 = vcmask 523264   ;;  %vm2130_vm8 = vcmask 1043456   ;;  %s13083_s11 = smov [#allocation22]  }
  0x38   :  { %v228_v7 = vadd.f32 %v13198_v5, %v13196_v4  ;;  %v13203_v8 = vld [vmem:[#allocation2 + $0x28] sm:$0xff]  ;;  %v8541_v14 = vld [vmem:[#allocation8 + $0x1f8] sm:$0xf]  ;;  %v11834_v15 = vld [vmem:[#allocation8 + $0x218] sm:$0xf0]  ;;  %vm2102_vm10 = vcmask 64512  }
  0x39   :  { %v225_v6 = vadd.f32 %v224_v3, %v13192_v2  ;;  %v8829_v16 = vld [vmem:[#allocation8 + $0x438] sm:$0xf]  ;;  %v8542_v17 = vor.u32 %v11834_v15, %v8541_v14  ;;  %v11906_v18 = vld [vmem:[#allocation8 + $0x458] sm:$0xf0]  ;;  %v8543_v24 = vld [vmem:[#allocation8 + $0x21c] sm:$0xf0] }
  0x3a   :  { %v229_v9 = vadd.f32 %v228_v7, %v13203_v8  ;;  %v9117_v19 = vld [vmem:[#allocation8 + $0x678] sm:$0xf]  ;;  %v11978_v20 = vld [vmem:[#allocation8 + $0x698] sm:$0xf0]  ;;  %v8830_v21 = vor.u32 %v11906_v18, %v8829_v16  ;;  %v8505_v25 = vld [vmem:[#allocation8 + $0x1b0] sm:$0xf] }
  0x3b   :  { %226 = vadd.xlane.f32.xlu0 %v225_v6  ;;  %v9118_v22 = vor.u32 %v11978_v20, %v9117_v19  ;;  %v11830_v23 = vld [vmem:[#allocation8 + $0x1fc] sm:$0xf]  ;;  %1664 = vmatpush.bf16.msra.mxu0 %v8542_v17  ;;  %v11825_v28 = vld [vmem:[#allocation8 + $0x1d0] sm:$0xf0]  ;;  %v8793_v29 = vld [vmem:[#allocation8 + $0x3f0] sm:$0xf] }
  0x3c   :  { %v8546_v27 = vor.u32 %v11830_v23, %v8543_v24  ;;  %v11897_v30 = vld [vmem:[#allocation8 + $0x410] sm:$0xf0]  ;;  %1678 = vmatpush.bf16.msra.mxu1 %v8830_v21  ;;  %v8506_v31 = vor.u32 %v11825_v28, %v8505_v25  ;;  %v9081_v33 = vld [vmem:[#allocation8 + $0x630] sm:$0xf]  ;;  %v8507_v37 = vld [vmem:[#allocation8 + $0x1d4] sm:$0xf0] }
  0x3d   :  { %v12670_v11 = vpop.eup %12669  ;;  %1692 = vmatpush.bf16.msra.mxu2 %v9118_v22  ;;  %v8794_v32 = vor.u32 %v11897_v30, %v8793_v29  ;;  %v11969_v34 = vld [vmem:[#allocation8 + $0x650] sm:$0xf0]  ;;  %v8469_v38 = vld [vmem:[#allocation8 + $0x168] sm:$0xf]  ;;  %v11816_v39 = vld [vmem:[#allocation8 + $0x188] sm:$0xf0] }
  0x3e   :  { %v233_v12 = vmul.f32 384.0, %v12670_v11  ;;  %v11821_v35 = vld [vmem:[#allocation8 + $0x1b4] sm:$0xf]  ;;  %1706 = vmatpush.bf16.msra.mxu3 %v8546_v27  ;;  %v9082_v36 = vor.u32 %v11969_v34, %v9081_v33  ;;  %v8757_v41 = vld [vmem:[#allocation8 + $0x3a8] sm:$0xf]  ;;  %v8470_v45 = vor.u32 %v11816_v39, %v8469_v38  ;;  %vm237_vm0 = vweird.f32 %v12670_v11  ;;  %s8266_s20 = sshll.u32 %s13083_s11, 4  ;;  %s8267_s20 = int_to_ptr.vmem [resolvable:$true] %s8266_s20 }
  0x3f   :  { %v8510_v40 = vor.u32 %v11821_v35, %v8507_v37  ;;  %v11888_v42 = vld [vmem:[#allocation8 + $0x3c8] sm:$0xf0]  ;;  %v9045_v43 = vld [vmem:[#allocation8 + $0x5e8] sm:$0xf]  ;;  %1665 = vmatpush.bf16.msra.mxu0 %v8506_v31  ;;  %v8471_v48 = vld [vmem:[#allocation8 + $0x18c] sm:$0xf0] }
  0x40   :  { %v234_v13 = vsub.f32 1.0, %v233_v12  ;;  %v11960_v46 = vld [vmem:[#allocation8 + $0x608] sm:$0xf0]  ;;  %1679 = vmatpush.bf16.msra.mxu1 %v8794_v32  ;;  %v8758_v49 = vor.u32 %v11888_v42, %v8757_v41  ;;  %v8433_v51 = vld [vmem:[#allocation8 + $0x120] sm:$0xf]  ;;  %s8268_s22 = sshll.u32 %s13976_s12, 4  ;;  %s8269_s22 = int_to_ptr.hbm [resolvable:$true] %s8268_s22 }
  0x41   :  { %v11812_v47 = vld [vmem:[#allocation8 + $0x16c] sm:$0xf]  ;;  %1693 = vmatpush.bf16.msra.mxu2 %v9082_v36  ;;  %v9046_v50 = vor.u32 %v11960_v46, %v9045_v43  ;;  %v11807_v52 = vld [vmem:[#allocation8 + $0x140] sm:$0xf0]  ;;  %v8721_v53 = vld [vmem:[#allocation8 + $0x360] sm:$0xf] }
  0x42   :  { %v235_v26 = vmul.f32 %v12670_v11, %v234_v13  ;;  %1707 = vmatpush.bf16.msra.mxu3 %v8510_v40  ;;  %v8474_v54 = vor.u32 %v11812_v47, %v8471_v48  ;;  %v11879_v55 = vld [vmem:[#allocation8 + $0x380] sm:$0xf0]  ;;  %v9009_v56 = vld [vmem:[#allocation8 + $0x5a0] sm:$0xf]  ;;  %v8435_v59 = vld [vmem:[#allocation8 + $0x144] sm:$0xf0]  ;;  %v8434_v61 = vor.u32 %v11807_v52, %v8433_v51 }
  0x43   :  { %230 = vadd.xlane.f32.xlu0 %v229_v9  ;;  %v11951_v57 = vld [vmem:[#allocation8 + $0x5c0] sm:$0xf0]  ;;  %1666 = vmatpush.bf16.msra.mxu0 %v8470_v45  ;;  %v8397_v62 = vld [vmem:[#allocation8 + $0xd8] sm:$0xf]  ;;  %v11798_v63 = vld [vmem:[#allocation8 + $0xf8] sm:$0xf0]  ;;  %v8722_v6 = vor.u32 %v11879_v55, %v8721_v53 }
  0x44   :  { %v236_v44 = vadd.f32 %v12670_v11, %v235_v26  ;;  %v11803_v58 = vld [vmem:[#allocation8 + $0x124] sm:$0xf]  ;;  %v8685_v3 = vld [vmem:[#allocation8 + $0x318] sm:$0xf]  ;;  %1680 = vmatpush.bf16.msra.mxu1 %v8758_v49  ;;  %v9010_v7 = vor.u32 %v11951_v57, %v9009_v56  ;;  %v11870_v9 = vld [vmem:[#allocation8 + $0x338] sm:$0xf0]  ;;  %v8398_v17 = vor.u32 %v11798_v63, %v8397_v62 }
  0x45   :  { %1694 = vmatpush.bf16.msra.mxu2 %v9046_v50  ;;  %v8973_v10 = vld [vmem:[#allocation8 + $0x558] sm:$0xf]  ;;  %v11942_v12 = vld [vmem:[#allocation8 + $0x578] sm:$0xf0]  ;;  %v8438_v14 = vor.u32 %v11803_v58, %v8435_v59  ;;  %v8686_v18 = vor.u32 %v11870_v9, %v8685_v3  ;;  %v11789_v36 = vld [vmem:[#allocation8 + $0xb0] sm:$0xf0] }
  0x46   :  { %v13206_v60 = vsel %vm237_vm0, %v12670_v11, %v236_v44  ;;  %1708 = vmatpush.bf16.msra.mxu3 %v8474_v54  ;;  %v11794_v16 = vld [vmem:[#allocation8 + $0xdc] sm:$0xf]  ;;  %v8399_v11 = vld [vmem:[#allocation8 + $0xfc] sm:$0xf0]  ;;  %v8974_v19 = vor.u32 %v11942_v12, %v8973_v10  ;;  %v11861_v38 = vld [vmem:[#allocation8 + $0x2f0] sm:$0xf0] }
  0x47   :  { %1667 = vmatpush.bf16.msra.mxu0 %v8434_v61  ;;  %v8402_v23 = vor.u32 %v11794_v16, %v8399_v11  ;;  %v11933_v39 = vld [vmem:[#allocation8 + $0x530] sm:$0xf0]  ;;  %v8363_v43 = vld [vmem:[#allocation8 + $0xb4] sm:$0xf0]  ;;  %v8325_v45 = vld [vmem:[#allocation8 + $0x48] sm:$0xf] }
  0x48   :  { %1681 = vmatpush.bf16.msra.mxu1 %v8722_v6  ;;  %v11785_v42 = vld [vmem:[#allocation8 + $0x94] sm:$0xf]  ;;  %v11780_v46 = vld [vmem:[#allocation8 + $0x68] sm:$0xf0]  ;;  %v8613_v47 = vld [vmem:[#allocation8 + $0x288] sm:$0xf] }
  0x49   :  { %1695 = vmatpush.bf16.msra.mxu2 %v9010_v7  ;;  %v8366_v44 = vor.u32 %v11785_v42, %v8363_v43  ;;  %v8326_v48 = vor.u32 %v11780_v46, %v8325_v45  ;;  %v11852_v49 = vld [vmem:[#allocation8 + $0x2a8] sm:$0xf0]  ;;  %v8901_v50 = vld [vmem:[#allocation8 + $0x4c8] sm:$0xf]  ;;  %v8327_v55 = vld [vmem:[#allocation8 + $0x6c] sm:$0xf0] }
  0x4a   :  { %1709 = vmatpush.bf16.msra.mxu3 %v8438_v14  ;;  %v11924_v51 = vld [vmem:[#allocation8 + $0x4e8] sm:$0xf0]  ;;  %v8614_v52 = vor.u32 %v11852_v49, %v8613_v47  ;;  %v8289_v57 = vld [vmem:[#allocation8] sm:$0xf]  ;;  %v11771_v58 = vld [vmem:[#allocation8 + $0x20] sm:$0xf0] }
  0x4b   :  { %1668 = vmatpush.bf16.msra.mxu0 %v8398_v17  ;;  %v8902_v53 = vor.u32 %v11924_v51, %v8901_v50  ;;  %v11776_v54 = vld [vmem:[#allocation8 + $0x4c] sm:$0xf]  ;;  %v8577_v59 = vld [vmem:[#allocation8 + $0x240] sm:$0xf]  ;;  %v8290_v61 = vor.u32 %v11771_v58, %v8289_v57  ;;  %v11843_v62 = vld [vmem:[#allocation8 + $0x260] sm:$0xf0] }
  0x4c   :  { %1682 = vmatpush.bf16.msra.mxu1 %v8686_v18  ;;  %v8330_v56 = vor.u32 %v11776_v54, %v8327_v55  ;;  %v8865_v63 = vld [vmem:[#allocation8 + $0x480] sm:$0xf]  ;;  %v11915_v3 = vld [vmem:[#allocation8 + $0x4a0] sm:$0xf0]  ;;  %v8578_v6 = vor.u32 %v11843_v62, %v8577_v59  ;;  %v8291_v10 = vld [vmem:[#allocation8 + $0x24] sm:$0xf0] }
  0x4d   :  { %1696 = vmatpush.bf16.msra.mxu2 %v8974_v19  ;;  %v8866_v7 = vor.u32 %v11915_v3, %v8865_v63  ;;  %v11767_v9 = vld [vmem:[#allocation8 + $0x4] sm:$0xf]  ;;  %v11902_v12 = vld [vmem:[#allocation8 + $0x43c] sm:$0xf]  ;;  %v8831_v14 = vld [vmem:[#allocation8 + $0x45c] sm:$0xf0] }
  0x4e   :  { %1710 = vmatpush.bf16.msra.mxu3 %v8402_v23  ;;  %v9119_v16 = vld [vmem:[#allocation8 + $0x69c] sm:$0xf0]  ;;  %v8834_v11 = vor.u32 %v11902_v12, %v8831_v14  ;;  %v11835_v19 = vld [vmem:[#allocation8 + $0x220] sm:$0xf0]  ;;  %v11817_v42 = vld [vmem:[#allocation8 + $0x190] sm:$0xf0] }
  0x4f   :  { %v8549_v18 = vld [vmem:[#allocation8 + $0x200] sm:$0xf]  ;;  %v8765_v45 = vld [vmem:[#allocation8 + $0x3b0] sm:$0xf]  ;;  %v11889_v46 = vld [vmem:[#allocation8 + $0x3d0] sm:$0xf0] }
  0x50   :  { %v8837_v23 = vld [vmem:[#allocation8 + $0x440] sm:$0xf]  ;;  %v8766_v47 = vor.u32 %v11889_v46, %v8765_v45  ;;  %v8723_v49 = vld [vmem:[#allocation8 + $0x384] sm:$0xf0]  ;;  %v11947_v50 = vld [vmem:[#allocation8 + $0x5a4] sm:$0xf] }
  0x51   :  { %v11808_v54 = vld [vmem:[#allocation8 + $0x148] sm:$0xf0]  ;;  %v8729_v57 = vld [vmem:[#allocation8 + $0x368] sm:$0xf]  ;;  %v8687_v62 = vld [vmem:[#allocation8 + $0x33c] sm:$0xf0] }
  0x52   :  { %1711 = vmatpush.bf16.msra.mxu3 %v8366_v44  ;;  %v11880_v58 = vld [vmem:[#allocation8 + $0x388] sm:$0xf0]  ;;  %v11938_v63 = vld [vmem:[#allocation8 + $0x55c] sm:$0xf]  ;;  %v11871_v14 = vld [vmem:[#allocation8 + $0x340] sm:$0xf0] }
  0x53   :  { %v8730_v59 = vor.u32 %v11880_v58, %v8729_v57  ;;  %v11911_v45 = vld [vmem:[#allocation8 + $0x484] sm:$0xf]  ;;  %v8867_v46 = vld [vmem:[#allocation8 + $0x4a4] sm:$0xf0] }
  0x56   :  { %1712 = vmatpush.bf16.msra.mxu3 %v8330_v56 }
  0xae   :  { %v227_v13 = vpop.xlane.xlu0 %226 }
  0xaf   :  { %v239_v15 = vmul.f32 %v13206_v60, %v227_v13  ;;  %v8294_v13 = vor.u32 %v11767_v9, %v8291_v10  ;;  %v11799_v9 = vld [vmem:[#allocation8 + $0x100] sm:$0xf0] }
  0xb1   :  { %v13210_v20 = vsub.f32 %v13188_v0, %v239_v15  ;;  %v13213_v21 = vsub.f32 %v13190_v1, %v239_v15  ;;  %v13216_v22 = vsub.f32 %v13192_v2, %v239_v15  ;;  %v11974_v15 = vld [vmem:[#allocation8 + $0x67c] sm:$0xf]  ;;  %1713 = vmatpush.bf16.msra.mxu3 %v8294_v13  ;;  %v8693_v13 = vld [vmem:[#allocation8 + $0x320] sm:$0xf] }
  0xb2   :  { %v9122_v17 = vor.u32 %v11974_v15, %v9119_v16  ;;  %v8694_v15 = vor.u32 %v11871_v14, %v8693_v13  ;;  %v11857_v16 = vld [vmem:[#allocation8 + $0x2d4] sm:$0xf] }
  0xb3   :  { %v247_v24 = vmul.f32 %v13210_v20, %v13210_v20  ;;  %v248_v25 = vmul.f32 %v13213_v21, %v13213_v21  ;;  %v249_v0 = vmul.f32 %v13216_v22, %v13216_v22 }
  0xb5   :  { %v253_v26 = vadd.f32 %v248_v25, %v247_v24  ;;  %v8550_v24 = vor.u32 %v11835_v19, %v8549_v18  ;;  %v11907_v25 = vld [vmem:[#allocation8 + $0x460] sm:$0xf0]  ;;  %v8939_v19 = vld [vmem:[#allocation8 + $0x534] sm:$0xf0] }
  0xb6   :  { %v231_v1 = vpop.xlane.xlu0 %230 }
  0xb7   :  { %v240_v2 = vmul.f32 %v13206_v60, %v231_v1  ;;  %v254_v27 = vadd.f32 %v253_v26, %v249_v0  ;;  %v11893_v0 = vld [vmem:[#allocation8 + $0x3f4] sm:$0xf]  ;;  %v8795_v26 = vld [vmem:[#allocation8 + $0x414] sm:$0xf0]  ;;  %v8838_v1 = vor.u32 %v11907_v25, %v8837_v23 }
  0xb8   :  { %v8369_v23 = vld [vmem:[#allocation8 + $0x98] sm:$0xf] }
  0xb9   :  { %v13226_v28 = vsub.f32 %v13196_v4, %v240_v2  ;;  %v13229_v29 = vsub.f32 %v13198_v5, %v240_v2  ;;  %v13232_v30 = vsub.f32 %v13203_v8, %v240_v2  ;;  %255 = vadd.xlane.f32.xlu1 %v254_v27  ;;  %v8361_v4 = vld [vmem:[#allocation8 + $0x90] sm:$0xf]  ;;  %v8798_v2 = vor.u32 %v11893_v0, %v8795_v26  ;;  %v11965_v27 = vld [vmem:[#allocation8 + $0x634] sm:$0xf]  ;;  %v8657_v26 = vld [vmem:[#allocation8 + $0x2d8] sm:$0xf] }
  0xba   :  { %v8649_v5 = vld [vmem:[#allocation8 + $0x2d0] sm:$0xf]  ;;  %v8362_v37 = vor.u32 %v11789_v36, %v8361_v4  ;;  %v11898_v4 = vld [vmem:[#allocation8 + $0x418] sm:$0xf0]  ;;  %1762 = vmatpush.bf16.msrb.mxu3 %v8838_v1 }
  0xbb   :  { %v250_v31 = vmul.f32 %v13226_v28, %v13226_v28  ;;  %v251_v32 = vmul.f32 %v13229_v29, %v13229_v29  ;;  %v252_v33 = vmul.f32 %v13232_v30, %v13232_v30  ;;  %v8937_v8 = vld [vmem:[#allocation8 + $0x510] sm:$0xf]  ;;  %v8650_v40 = vor.u32 %v11861_v38, %v8649_v5  ;;  %v11862_v1 = vld [vmem:[#allocation8 + $0x2f8] sm:$0xf0] }
  0xbc   :  { %v8938_v41 = vor.u32 %v11933_v39, %v8937_v8  ;;  %1669 = vmatpush.bf16.msra.mxu0 %v8362_v37  ;;  %v11884_v37 = vld [vmem:[#allocation8 + $0x3ac] sm:$0xf]  ;;  %v8759_v38 = vld [vmem:[#allocation8 + $0x3cc] sm:$0xf0] }
  0xbd   :  { %v257_v34 = vadd.f32 %v251_v32, %v250_v31  ;;  %1683 = vmatpush.bf16.msra.mxu1 %v8650_v40  ;;  %v9083_v31 = vld [vmem:[#allocation8 + $0x654] sm:$0xf0]  ;;  %v11956_v8 = vld [vmem:[#allocation8 + $0x5ec] sm:$0xf]  ;;  %v8762_v39 = vor.u32 %v11884_v37, %v8759_v38  ;;  %v9047_v40 = vld [vmem:[#allocation8 + $0x60c] sm:$0xf0] }
  0xbe   :  { %1697 = vmatpush.bf16.msra.mxu2 %v8938_v41  ;;  %v8513_v32 = vld [vmem:[#allocation8 + $0x1b8] sm:$0xf]  ;;  %v8477_v41 = vld [vmem:[#allocation8 + $0x170] sm:$0xf]  ;;  %v9050_v43 = vor.u32 %v11956_v8, %v9047_v40 }
  0xbf   :  { %v258_v35 = vadd.f32 %v257_v34, %v252_v33  ;;  %v9086_v33 = vor.u32 %v11965_v27, %v9083_v31  ;;  %v11826_v34 = vld [vmem:[#allocation8 + $0x1d8] sm:$0xf0]  ;;  %v8478_v44 = vor.u32 %v11817_v42, %v8477_v41  ;;  %v11848_v27 = vld [vmem:[#allocation8 + $0x28c] sm:$0xf]  ;;  %v8615_v31 = vld [vmem:[#allocation8 + $0x2ac] sm:$0xf0] }
  0xc0   :  { %1670 = vmatpush.bf16.msra.mxu0 %v8326_v48  ;;  %v8514_v36 = vor.u32 %v11826_v34, %v8513_v32  ;;  %v11875_v48 = vld [vmem:[#allocation8 + $0x364] sm:$0xf]  ;;  %v11920_v32 = vld [vmem:[#allocation8 + $0x4cc] sm:$0xf]  ;;  %v8618_v34 = vor.u32 %v11848_v27, %v8615_v31  ;;  %v8621_v8 = vld [vmem:[#allocation8 + $0x290] sm:$0xf] }
  0xc1   :  { %259 = vadd.xlane.f32.xlu1 %v258_v35  ;;  %1684 = vmatpush.bf16.msra.mxu1 %v8614_v52  ;;  %v8801_v35 = vld [vmem:[#allocation8 + $0x3f8] sm:$0xf]  ;;  %v8726_v51 = vor.u32 %v11875_v48, %v8723_v49  ;;  %v9011_v52 = vld [vmem:[#allocation8 + $0x5c4] sm:$0xf0]  ;;  %v11839_v42 = vld [vmem:[#allocation8 + $0x244] sm:$0xf]  ;;  %v8870_v48 = vor.u32 %v11911_v45, %v8867_v46 }
  0xc2   :  { %1698 = vmatpush.bf16.msra.mxu2 %v8902_v53  ;;  %v8802_v5 = vor.u32 %v11898_v4, %v8801_v35  ;;  %v8441_v53 = vld [vmem:[#allocation8 + $0x128] sm:$0xf]  ;;  %v9014_v55 = vor.u32 %v11947_v50, %v9011_v52  ;;  %v8903_v35 = vld [vmem:[#allocation8 + $0x4ec] sm:$0xf0]  ;;  %v11772_v49 = vld [vmem:[#allocation8 + $0x28] sm:$0xf0] }
  0xc3   :  { %v8442_v56 = vor.u32 %v11808_v54, %v8441_v53  ;;  %v8333_v4 = vld [vmem:[#allocation8 + $0x50] sm:$0xf]  ;;  %v8906_v37 = vor.u32 %v11920_v32, %v8903_v35  ;;  %v8585_v50 = vld [vmem:[#allocation8 + $0x248] sm:$0xf]  ;;  %v11979_v35 = vld [vmem:[#allocation8 + $0x6a0] sm:$0xf0] }
  0xc4   :  { %1671 = vmatpush.bf16.msra.mxu0 %v8290_v61  ;;  %1763 = vmatpush.bf16.msrb.mxu3 %v8802_v5  ;;  %v11866_v61 = vld [vmem:[#allocation8 + $0x31c] sm:$0xf] }
  0xc5   :  { %1685 = vmatpush.bf16.msra.mxu1 %v8578_v6  ;;  %v8690_v3 = vor.u32 %v11866_v61, %v8687_v62  ;;  %v8975_v6 = vld [vmem:[#allocation8 + $0x57c] sm:$0xf0] }
  0xc6   :  { %1699 = vmatpush.bf16.msra.mxu2 %v8866_v7  ;;  %v8405_v7 = vld [vmem:[#allocation8 + $0xe0] sm:$0xf]  ;;  %v8978_v10 = vor.u32 %v11938_v63, %v8975_v6 }
  0xc7   :  { %v8406_v12 = vor.u32 %v11799_v9, %v8405_v7  ;;  %v222_v7 = vld [vmem:[#allocation5] sm:$0x7] }
  0xc8   :  { %1720 = vmatpush.bf16.msrb.mxu0 %v8834_v11  ;;  %1764 = vmatpush.bf16.msrb.mxu3 %v8766_v47  ;;  %v8651_v11 = vld [vmem:[#allocation8 + $0x2f4] sm:$0xf0]  ;;  %v8297_v47 = vld [vmem:[#allocation8 + $0x8] sm:$0xf]  ;;  %v292_v13 = vperm.slane %v222_v7, 0  ;;  %v293_v14 = vperm.slane %v222_v7, 1 }
  0xc9   :  { %1734 = vmatpush.bf16.msrb.mxu1 %v9122_v17  ;;  %v11929_v17 = vld [vmem:[#allocation8 + $0x514] sm:$0xf]  ;;  %v8654_v18 = vor.u32 %v11857_v16, %v8651_v11  ;;  %v8298_v52 = vor.u32 %v11772_v49, %v8297_v47  ;;  %v9089_v47 = vld [vmem:[#allocation8 + $0x638] sm:$0xf] }
  0xca   :  { %1748 = vmatpush.bf16.msrb.mxu2 %v8550_v24  ;;  %v11790_v24 = vld [vmem:[#allocation8 + $0xb8] sm:$0xf0]  ;;  %v8942_v25 = vor.u32 %v11929_v17, %v8939_v19 }
  0xcb   :  { %v8370_v0 = vor.u32 %v11790_v24, %v8369_v23 }
  0xcc   :  { %1721 = vmatpush.bf16.msrb.mxu0 %v8798_v2  ;;  %1765 = vmatpush.bf16.msrb.mxu3 %v8730_v59  ;;  %v8658_v2 = vor.u32 %v11862_v1, %v8657_v26 }
  0xcd   :  { %1735 = vmatpush.bf16.msrb.mxu1 %v9086_v33 }
  0xce   :  { %1749 = vmatpush.bf16.msrb.mxu2 %v8514_v36  ;;  %v11781_v36 = vld [vmem:[#allocation8 + $0x70] sm:$0xf0] }
  0xcf   :  { %v8334_v38 = vor.u32 %v11781_v36, %v8333_v4 }
  0xd0   :  { %1722 = vmatpush.bf16.msrb.mxu0 %v8762_v39  ;;  %1766 = vmatpush.bf16.msrb.mxu3 %v8694_v15  ;;  %v11853_v39 = vld [vmem:[#allocation8 + $0x2b0] sm:$0xf0]  ;;  %v223_v15 = vld [vmem:[#allocation7] sm:$0x7] }
  0xd1   :  { %1736 = vmatpush.bf16.msrb.mxu1 %v9050_v43  ;;  %v8622_v40 = vor.u32 %v11853_v39, %v8621_v8  ;;  %v8579_v43 = vld [vmem:[#allocation8 + $0x264] sm:$0xf0]  ;;  %v305_v24 = vperm.slane %v223_v15, 0 }
  0xd2   :  { %1750 = vmatpush.bf16.msrb.mxu2 %v8478_v44  ;;  %v8582_v44 = vor.u32 %v11839_v42, %v8579_v43  ;;  %v8839_v42 = vld [vmem:[#allocation8 + $0x464] sm:$0xf0] }
  0xd3   :  { %v9127_v43 = vld [vmem:[#allocation8 + $0x6a4] sm:$0xf0] }
  0xd4   :  { %1723 = vmatpush.bf16.msrb.mxu0 %v8726_v51  ;;  %1767 = vmatpush.bf16.msrb.mxu3 %v8658_v2  ;;  %v11844_v51 = vld [vmem:[#allocation8 + $0x268] sm:$0xf0] }
  0xd5   :  { %1737 = vmatpush.bf16.msrb.mxu1 %v9014_v55  ;;  %v8586_v53 = vor.u32 %v11844_v51, %v8585_v50  ;;  %v11822_v51 = vld [vmem:[#allocation8 + $0x1bc] sm:$0xf] }
  0xd6   :  { %1751 = vmatpush.bf16.msrb.mxu2 %v8442_v56 }
  0xd8   :  { %1724 = vmatpush.bf16.msrb.mxu0 %v8690_v3  ;;  %1768 = vmatpush.bf16.msrb.mxu3 %v8622_v40 }
  0xd9   :  { %1738 = vmatpush.bf16.msrb.mxu1 %v8978_v10 }
  0xda   :  { %1752 = vmatpush.bf16.msrb.mxu2 %v8406_v12 }
  0xdc   :  { %1725 = vmatpush.bf16.msrb.mxu0 %v8654_v18  ;;  %1769 = vmatpush.bf16.msrb.mxu3 %v8586_v53  ;;  %v294_v18 = vperm.slane %v222_v7, 2  ;;  %v11894_v53 = vld [vmem:[#allocation8 + $0x3fc] sm:$0xf]  ;;  %v11885_v7 = vld [vmem:[#allocation8 + $0x3b4] sm:$0xf] }
  0xdd   :  { %1739 = vmatpush.bf16.msrb.mxu1 %v8942_v25  ;;  %v306_v25 = vperm.slane %v223_v15, 1 }
  0xde   :  { %1753 = vmatpush.bf16.msrb.mxu2 %v8370_v0  ;;  %v307_v0 = vperm.slane %v223_v15, 2  ;;  %v9017_v15 = vld [vmem:[#allocation8 + $0x5a8] sm:$0xf] }
  0xe0   :  { %1726 = vmatpush.bf16.msrb.mxu0 %v8618_v34 }
  0xe1   :  { %1740 = vmatpush.bf16.msrb.mxu1 %v8906_v37  ;;  %v8551_v37 = vld [vmem:[#allocation8 + $0x224] sm:$0xf0] }
  0xe2   :  { %1754 = vmatpush.bf16.msrb.mxu2 %v8334_v38  ;;  %v11903_v38 = vld [vmem:[#allocation8 + $0x444] sm:$0xf] }
  0xe3   :  { %v8842_v49 = vor.u32 %v11903_v38, %v8839_v42  ;;  %v8659_v42 = vld [vmem:[#allocation8 + $0x2fc] sm:$0xf0] }
  0xe4   :  { %1727 = vmatpush.bf16.msrb.mxu0 %v8582_v44 }
  0xe5   :  { %1741 = vmatpush.bf16.msrb.mxu1 %v8870_v48  ;;  %v11970_v48 = vld [vmem:[#allocation8 + $0x658] sm:$0xf0] }
  0xe6   :  { %1755 = vmatpush.bf16.msrb.mxu2 %v8298_v52  ;;  %v8515_v52 = vld [vmem:[#allocation8 + $0x1dc] sm:$0xf0] }
 0x12c   :  { %v256_v33 = vpop.xlane.xlu1 %255 }
 0x12d   :  { %v261_v5 = vmul.f32 %v256_v33, %v13206_v60 }
 0x12f   :  { %v263_v41 = vadd.f32 1e-05, %v261_v5  ;;  %v11831_v5 = vld [vmem:[#allocation8 + $0x204] sm:$0xf] }
 0x130   :  { %v8554_v46 = vor.u32 %v11831_v5, %v8551_v37  ;;  %v8945_v5 = vld [vmem:[#allocation8 + $0x518] sm:$0xf]  ;;  %v11934_v37 = vld [vmem:[#allocation8 + $0x538] sm:$0xf0] }
 0x131   :  { %12671 = vrsqrt.f32 %v263_v41  ;;  %vm271_vm2 = vweird.f32 %v263_v41 }
 0x134   :  { %v260_v54 = vpop.xlane.xlu1 %259 }
 0x135   :  { %v262_v55 = vmul.f32 %v260_v54, %v13206_v60  ;;  %v8803_v54 = vld [vmem:[#allocation8 + $0x41c] sm:$0xf0] }
 0x137   :  { %v12672_v56 = vpop.eup %12671  ;;  %v264_v57 = vadd.f32 1e-05, %v262_v55  ;;  %v11966_v55 = vld [vmem:[#allocation8 + $0x63c] sm:$0xf] }
 0x138   :  { %v266_v58 = vmul.f32 %v12672_v56, %v263_v41  ;;  %vm272_vm1 = vweird.f32 %v12672_v56 }
 0x139   :  { %12673 = vrsqrt.f32 %v264_v57  ;;  %vm273_vm3 = vmor %vm271_vm2, %vm272_vm1  ;;  %vm281_vm5 = vweird.f32 %v264_v57 }
 0x13a   :  { %v267_v59 = vmul.f32 %v12672_v56, %v266_v58  ;;  %v8518_v58 = vor.u32 %v11822_v51, %v8515_v52  ;;  %v11777_v51 = vld [vmem:[#allocation8 + $0x54] sm:$0xf]  ;;  %v8335_v52 = vld [vmem:[#allocation8 + $0x74] sm:$0xf0] }
 0x13c   :  { %v268_v61 = vmul.f32 0.5, %v267_v59  ;;  %v9053_v59 = vld [vmem:[#allocation8 + $0x5f0] sm:$0xf] }
 0x13e   :  { %v269_v62 = vsub.f32 1.5, %v268_v61  ;;  %v11961_v61 = vld [vmem:[#allocation8 + $0x610] sm:$0xf0] }
 0x13f   :  { %v12674_v63 = vpop.eup %12673 }
 0x140   :  { %v270_v3 = vmul.f32 %v12672_v56, %v269_v62  ;;  %v276_v6 = vmul.f32 %v12674_v63, %v264_v57  ;;  %vm282_vm4 = vweird.f32 %v12674_v63  ;;  %v9090_v57 = vor.u32 %v11970_v48, %v9089_v47  ;;  %v8909_v47 = vld [vmem:[#allocation8 + $0x4d0] sm:$0xf]  ;;  %v11925_v48 = vld [vmem:[#allocation8 + $0x4f0] sm:$0xf0] }
 0x141   :  { %vm283_vm6 = vmor %vm281_vm5, %vm282_vm4  ;;  %v8806_v62 = vor.u32 %v11894_v53, %v8803_v54  ;;  %v11849_v53 = vld [vmem:[#allocation8 + $0x294] sm:$0xf]  ;;  %v8623_v54 = vld [vmem:[#allocation8 + $0x2b4] sm:$0xf0] }
 0x142   :  { %v277_v9 = vmul.f32 %v12674_v63, %v276_v6  ;;  %v274_v10 = vsel %vm273_vm3, %v12672_v56, %v270_v3  ;;  %v9091_v56 = vld [vmem:[#allocation8 + $0x65c] sm:$0xf0]  ;;  %v11813_v3 = vld [vmem:[#allocation8 + $0x174] sm:$0xf]  ;;  %v8479_v6 = vld [vmem:[#allocation8 + $0x194] sm:$0xf0] }
 0x143   :  { %v285_v16 = vmul.f32 %v274_v10, %v13210_v20  ;;  %v286_v11 = vmul.f32 %v274_v10, %v13213_v21  ;;  %v287_v19 = vmul.f32 %v274_v10, %v13216_v22  ;;  %v9125_v22 = vld [vmem:[#allocation8 + $0x680] sm:$0xf]  ;;  %v11957_v10 = vld [vmem:[#allocation8 + $0x5f4] sm:$0xf] }
 0x144   :  { %v278_v12 = vmul.f32 0.5, %v277_v9  ;;  %v8767_v9 = vld [vmem:[#allocation8 + $0x3d4] sm:$0xf0] }
 0x145   :  { %v298_v26 = vmul.f32 %v292_v13, %v285_v16  ;;  %v299_v1 = vmul.f32 %v293_v14, %v286_v11  ;;  %v300_v27 = vmul.f32 %v294_v18, %v287_v19  ;;  %v11952_v16 = vld [vmem:[#allocation8 + $0x5c8] sm:$0xf0]  ;;  %v8770_v11 = vor.u32 %v11885_v7, %v8767_v9  ;;  %v8443_v19 = vld [vmem:[#allocation8 + $0x14c] sm:$0xf0] }
 0x146   :  { %v279_v17 = vsub.f32 1.5, %v278_v12  ;;  %v9055_v12 = vld [vmem:[#allocation8 + $0x614] sm:$0xf0]  ;;  %v11840_v7 = vld [vmem:[#allocation8 + $0x24c] sm:$0xf] }
 0x147   :  { %v311_v4 = vadd.f32 %v305_v24, %v298_v26  ;;  %v312_v36 = vadd.f32 %v306_v25, %v299_v1  ;;  %v313_v8 = vadd.f32 %v307_v0, %v300_v27  ;;  %v9018_v26 = vor.u32 %v11952_v16, %v9017_v15  ;;  %v11943_v27 = vld [vmem:[#allocation8 + $0x580] sm:$0xf0]  ;;  %v8587_v9 = vld [vmem:[#allocation8 + $0x26c] sm:$0xf0]  ;;  %v8845_v15 = vld [vmem:[#allocation8 + $0x448] sm:$0xf] }
 0x148   :  { %v280_v23 = vmul.f32 %v12674_v63, %v279_v17  ;;  %v9058_v17 = vor.u32 %v11957_v10, %v9055_v12  ;;  %v11912_v10 = vld [vmem:[#allocation8 + $0x48c] sm:$0xf]  ;;  %v8875_v12 = vld [vmem:[#allocation8 + $0x4ac] sm:$0xf0] }
 0x149   :  { %v11908_v16 = vld [vmem:[#allocation8 + $0x468] sm:$0xf0] }
 0x14a   :  { %v284_v2 = vsel %vm283_vm6, %v12674_v63, %v280_v23  ;;  %v9094_v63 = vor.u32 %v11966_v55, %v9091_v56  ;;  %v11876_v23 = vld [vmem:[#allocation8 + $0x36c] sm:$0xf]  ;;  %v11921_v55 = vld [vmem:[#allocation8 + $0x4d4] sm:$0xf]  ;;  %v8911_v56 = vld [vmem:[#allocation8 + $0x4f4] sm:$0xf0] }
 0x14b   :  { %v288_v31 = vmul.f32 %v284_v2, %v13226_v28  ;;  %v289_v20 = vmul.f32 %v284_v2, %v13229_v29  ;;  %v290_v21 = vmul.f32 %v284_v2, %v13232_v30  ;;  %v11975_v28 = vld [vmem:[#allocation8 + $0x684] sm:$0xf]  ;;  %v9126_v29 = vor.u32 %v11979_v35, %v9125_v22  ;;  %v8981_v2 = vld [vmem:[#allocation8 + $0x560] sm:$0xf]  ;;  %v8983_v35 = vld [vmem:[#allocation8 + $0x584] sm:$0xf0] }
 0x14c   :  { %v9130_v50 = vor.u32 %v11975_v28, %v9127_v43  ;;  %v11939_v22 = vld [vmem:[#allocation8 + $0x564] sm:$0xf]  ;;  %v11930_v28 = vld [vmem:[#allocation8 + $0x51c] sm:$0xf]  ;;  %v8947_v43 = vld [vmem:[#allocation8 + $0x53c] sm:$0xf0] }
 0x14d   :  { %v301_v32 = vmul.f32 %v292_v13, %v288_v31  ;;  %v302_v33 = vmul.f32 %v293_v14, %v289_v20  ;;  %v303_v34 = vmul.f32 %v294_v18, %v290_v21  ;;  %v9054_v13 = vor.u32 %v11961_v61, %v9053_v59  ;;  %v11804_v18 = vld [vmem:[#allocation8 + $0x12c] sm:$0xf]  ;;  %v11795_v21 = vld [vmem:[#allocation8 + $0xe4] sm:$0xf] }
 0x14e   :  { %v8482_v14 = vor.u32 %v11813_v3, %v8479_v6  ;;  %v8446_v1 = vor.u32 %v11804_v18, %v8443_v19  ;;  %v8338_v59 = vor.u32 %v11777_v51, %v8335_v52  ;;  %v11916_v61 = vld [vmem:[#allocation8 + $0x4a8] sm:$0xf0]  ;;  %v8626_v3 = vor.u32 %v11849_v53, %v8623_v54  ;;  %v8737_v51 = vld [vmem:[#allocation8 + $0x370] sm:$0xf]  ;;  %v11881_v52 = vld [vmem:[#allocation8 + $0x390] sm:$0xf0] }
 0x14f   :  { %v314_v39 = vadd.f32 %v305_v24, %v301_v32  ;;  %v315_v40 = vadd.f32 %v306_v25, %v302_v33  ;;  %v316_v41 = vadd.f32 %v307_v0, %v303_v34  ;;  %v8731_v24 = vld [vmem:[#allocation8 + $0x38c] sm:$0xf0]  ;;  %v11948_v25 = vld [vmem:[#allocation8 + $0x5ac] sm:$0xf]  ;;  %v8407_v32 = vld [vmem:[#allocation8 + $0x104] sm:$0xf0]  ;;  %v8914_v6 = vor.u32 %v11921_v55, %v8911_v56 }
 0x150   :  { %v9019_v0 = vld [vmem:[#allocation8 + $0x5cc] sm:$0xf0]  ;;  %v8734_v31 = vor.u32 %v11876_v23, %v8731_v24  ;;  %v11867_v33 = vld [vmem:[#allocation8 + $0x324] sm:$0xf]  ;;  %v8695_v34 = vld [vmem:[#allocation8 + $0x344] sm:$0xf0] }
 0x151   :  { %v13248_v44 = vpack.c.bf16 %v314_v39, %v311_v4  ;;  %v13250_v30 = vpack.c.bf16 %v315_v40, %v312_v36  ;;  %v13252_v45 = vpack.c.bf16 %v316_v41, %v313_v8  ;;  %v9022_v20 = vor.u32 %v11948_v25, %v9019_v0  ;;  %v11786_v39 = vld [vmem:[#allocation8 + $0x9c] sm:$0xf]  ;;  %v8371_v40 = vld [vmem:[#allocation8 + $0xbc] sm:$0xf0]  ;;  %v11980_v19 = vld [vmem:[#allocation8 + $0x6a8] sm:$0xf0] }
 0x152   :  { %v8982_v4 = vor.u32 %v11943_v27, %v8981_v2  ;;  %v8410_v36 = vor.u32 %v11795_v21, %v8407_v32  ;;  %v8698_v38 = vor.u32 %v11867_v33, %v8695_v34  ;;  %v8986_v8 = vor.u32 %v11939_v22, %v8983_v35  ;;  %v11858_v41 = vld [vmem:[#allocation8 + $0x2dc] sm:$0xf]  ;;  %v11832_v23 = vld [vmem:[#allocation8 + $0x20c] sm:$0xf]  ;;  %v8559_v24 = vld [vmem:[#allocation8 + $0x22c] sm:$0xf0] }
 0x153   :  { %1672 = vmatmul.bf16.vlgmr.msra.gmra.mxu0 %v13248_v44  ;;  %1686 = vmatmul.bf16.vlgmr.msra.gmra.mxu1 %v13250_v30  ;;  %v8590_v25 = vor.u32 %v11840_v7, %v8587_v9  ;;  %v8878_v0 = vor.u32 %v11912_v10, %v8875_v12  ;;  %v8521_v2 = vld [vmem:[#allocation8 + $0x1c0] sm:$0xf]  ;;  %v11827_v27 = vld [vmem:[#allocation8 + $0x1e0] sm:$0xf0]  ;;  %v8523_v35 = vld [vmem:[#allocation8 + $0x1e4] sm:$0xf0] }
 0x154   :  { %1700 = vmatmul.bf16.vlgmr.msra.gmra.mxu2 %v13252_v45  ;;  %1714 = vmatmul.bf16.vlgmr.msra.gmra.mxu3 %v13248_v44  ;;  %v8809_v21 = vld [vmem:[#allocation8 + $0x400] sm:$0xf]  ;;  %v11899_v32 = vld [vmem:[#allocation8 + $0x420] sm:$0xf0]  ;;  %v9025_v53 = vld [vmem:[#allocation8 + $0x5b0] sm:$0xf] }
 0x155   :  { %1776 = vmatpush.bf16.msra.mxu0 %v9126_v29  ;;  %1790 = vmatpush.bf16.msra.mxu1 %v8554_v46  ;;  %v8946_v29 = vor.u32 %v11934_v37, %v8945_v5  ;;  %v8374_v46 = vor.u32 %v11786_v39, %v8371_v40  ;;  %v9097_v33 = vld [vmem:[#allocation8 + $0x640] sm:$0xf]  ;;  %v11971_v34 = vld [vmem:[#allocation8 + $0x660] sm:$0xf0]  ;;  %v8485_v5 = vld [vmem:[#allocation8 + $0x178] sm:$0xf] }
 0x156   :  { %1804 = vmatpush.bf16.msra.mxu2 %v8842_v49  ;;  %1818 = vmatpush.bf16.msra.mxu3 %v9130_v50  ;;  %v8662_v49 = vor.u32 %v11858_v41, %v8659_v42  ;;  %v8950_v50 = vor.u32 %v11930_v28, %v8947_v43  ;;  %v11823_v22 = vld [vmem:[#allocation8 + $0x1c4] sm:$0xf]  ;;  %v11818_v37 = vld [vmem:[#allocation8 + $0x198] sm:$0xf0]  ;;  %v8773_v39 = vld [vmem:[#allocation8 + $0x3b8] sm:$0xf] }
 0x157   :  { %v11890_v40 = vld [vmem:[#allocation8 + $0x3d8] sm:$0xf0]  ;;  %v9061_v41 = vld [vmem:[#allocation8 + $0x5f8] sm:$0xf]  ;;  %v8487_v43 = vld [vmem:[#allocation8 + $0x19c] sm:$0xf0] }
 0x158   :  { %v11962_v42 = vld [vmem:[#allocation8 + $0x618] sm:$0xf0]  ;;  %v11953_v54 = vld [vmem:[#allocation8 + $0x5d0] sm:$0xf0]  ;;  %v8451_v56 = vld [vmem:[#allocation8 + $0x154] sm:$0xf0] }
 0x159   :  { %1777 = vmatpush.bf16.msra.mxu0 %v9090_v57  ;;  %1791 = vmatpush.bf16.msra.mxu1 %v8518_v58  ;;  %v8873_v57 = vld [vmem:[#allocation8 + $0x488] sm:$0xf]  ;;  %v8910_v58 = vor.u32 %v11925_v48, %v8909_v47  ;;  %v11814_v28 = vld [vmem:[#allocation8 + $0x17c] sm:$0xf]  ;;  %v8449_v47 = vld [vmem:[#allocation8 + $0x130] sm:$0xf] }
 0x15a   :  { %1805 = vmatpush.bf16.msra.mxu2 %v8806_v62  ;;  %1819 = vmatpush.bf16.msra.mxu3 %v9094_v63  ;;  %v11768_v62 = vld [vmem:[#allocation8 + $0xc] sm:$0xf]  ;;  %v8299_v63 = vld [vmem:[#allocation8 + $0x2c] sm:$0xf0]  ;;  %v11809_v48 = vld [vmem:[#allocation8 + $0x150] sm:$0xf0] }
 0x15b   :  { %v8302_v18 = vor.u32 %v11768_v62, %v8299_v63  ;;  %v11805_v55 = vld [vmem:[#allocation8 + $0x134] sm:$0xf]  ;;  %v9026_v62 = vor.u32 %v11953_v54, %v9025_v53  ;;  %v8989_v7 = vld [vmem:[#allocation8 + $0x568] sm:$0xf]  ;;  %v11944_v9 = vld [vmem:[#allocation8 + $0x588] sm:$0xf0] }
 0x15c   :  { %v8454_v63 = vor.u32 %v11805_v55, %v8451_v56  ;;  %v11796_v10 = vld [vmem:[#allocation8 + $0xec] sm:$0xf]  ;;  %v8415_v12 = vld [vmem:[#allocation8 + $0x10c] sm:$0xf0]  ;;  %v11909_v54 = vld [vmem:[#allocation8 + $0x470] sm:$0xf0] }
 0x15d   :  { %1778 = vmatpush.bf16.msra.mxu0 %v9054_v13  ;;  %1792 = vmatpush.bf16.msra.mxu1 %v8482_v14  ;;  %v8557_v13 = vld [vmem:[#allocation8 + $0x208] sm:$0xf]  ;;  %v11836_v14 = vld [vmem:[#allocation8 + $0x228] sm:$0xf0]  ;;  %v8853_v53 = vld [vmem:[#allocation8 + $0x450] sm:$0xf] }
 0x15e   :  { %1806 = vmatpush.bf16.msra.mxu2 %v8770_v11  ;;  %1820 = vmatpush.bf16.msra.mxu3 %v9058_v17  ;;  %v9133_v11 = vld [vmem:[#allocation8 + $0x688] sm:$0xf]  ;;  %v8874_v17 = vor.u32 %v11916_v61, %v8873_v57  ;;  %v8450_v57 = vor.u32 %v11809_v48, %v8449_v47  ;;  %v11800_v61 = vld [vmem:[#allocation8 + $0x108] sm:$0xf0]  ;;  %v9135_v48 = vld [vmem:[#allocation8 + $0x6ac] sm:$0xf0] }
 0x15f   :  { %v11976_v47 = vld [vmem:[#allocation8 + $0x68c] sm:$0xf] }
 0x161   :  { %1779 = vmatpush.bf16.msra.mxu0 %v9018_v26  ;;  %1793 = vmatpush.bf16.msra.mxu1 %v8446_v1  ;;  %v8558_v26 = vor.u32 %v11836_v14, %v8557_v13  ;;  %v8846_v1 = vor.u32 %v11908_v16, %v8845_v15  ;;  %v8377_v15 = vld [vmem:[#allocation8 + $0xa0] sm:$0xf]  ;;  %v11791_v16 = vld [vmem:[#allocation8 + $0xc0] sm:$0xf0] }
 0x162   :  { %1807 = vmatpush.bf16.msra.mxu2 %v8734_v31  ;;  %1821 = vmatpush.bf16.msra.mxu3 %v9022_v20  ;;  %v9134_v31 = vor.u32 %v11980_v19, %v9133_v11  ;;  %v8562_v20 = vor.u32 %v11832_v23, %v8559_v24  ;;  %v8990_v11 = vor.u32 %v11944_v9, %v8989_v7  ;;  %v11863_v19 = vld [vmem:[#allocation8 + $0x300] sm:$0xf0]  ;;  %v8953_v23 = vld [vmem:[#allocation8 + $0x520] sm:$0xf]  ;;  %v8529_v7 = vld [vmem:[#allocation8 + $0x1c8] sm:$0xf] }
 0x163   :  { %1728 = vmatmul.bf16.vlgmr.msrb.gmra.mxu0 %v13250_v30  ;;  %1742 = vmatmul.bf16.vlgmr.msrb.gmra.mxu1 %v13252_v45  ;;  %v11935_v24 = vld [vmem:[#allocation8 + $0x540] sm:$0xf0]  ;;  %v11828_v9 = vld [vmem:[#allocation8 + $0x1e8] sm:$0xf0] }
 0x164   :  { %1756 = vmatmul.bf16.vlgmr.msrb.gmra.mxu2 %v13248_v44  ;;  %1770 = vmatmul.bf16.vlgmr.msrb.gmra.mxu3 %v13250_v30 }
 0x165   :  { %1780 = vmatpush.bf16.msra.mxu0 %v8982_v4  ;;  %1794 = vmatpush.bf16.msra.mxu1 %v8410_v36  ;;  %v8522_v4 = vor.u32 %v11827_v27, %v8521_v2  ;;  %v8810_v36 = vor.u32 %v11899_v32, %v8809_v21  ;;  %v8341_v2 = vld [vmem:[#allocation8 + $0x58] sm:$0xf]  ;;  %v11782_v27 = vld [vmem:[#allocation8 + $0x78] sm:$0xf0] }
 0x166   :  { %1808 = vmatpush.bf16.msra.mxu2 %v8698_v38  ;;  %1822 = vmatpush.bf16.msra.mxu3 %v8986_v8  ;;  %v9098_v38 = vor.u32 %v11971_v34, %v9097_v33  ;;  %v8526_v8 = vor.u32 %v11823_v22, %v8523_v35  ;;  %v8629_v21 = vld [vmem:[#allocation8 + $0x298] sm:$0xf]  ;;  %v11854_v32 = vld [vmem:[#allocation8 + $0x2b8] sm:$0xf0]  ;;  %v8343_v35 = vld [vmem:[#allocation8 + $0x7c] sm:$0xf0] }
 0x167   :  { %v8917_v33 = vld [vmem:[#allocation8 + $0x4d8] sm:$0xf]  ;;  %v11926_v34 = vld [vmem:[#allocation8 + $0x4f8] sm:$0xf0] }
 0x168   :  { %v11778_v22 = vld [vmem:[#allocation8 + $0x5c] sm:$0xf] }
 0x169   :  { %1781 = vmatpush.bf16.msra.mxu0 %v8946_v29  ;;  %1795 = vmatpush.bf16.msra.mxu1 %v8374_v46  ;;  %v8486_v29 = vor.u32 %v11818_v37, %v8485_v5  ;;  %v8774_v46 = vor.u32 %v11890_v40, %v8773_v39  ;;  %v8630_v5 = vor.u32 %v11854_v32, %v8629_v21  ;;  %v11773_v37 = vld [vmem:[#allocation8 + $0x30] sm:$0xf0]  ;;  %v9027_v32 = vld [vmem:[#allocation8 + $0x5d4] sm:$0xf0] }
 0x16a   :  { %1809 = vmatpush.bf16.msra.mxu2 %v8662_v49  ;;  %1823 = vmatpush.bf16.msra.mxu3 %v8950_v50  ;;  %v9062_v49 = vor.u32 %v11962_v42, %v9061_v41  ;;  %v8490_v50 = vor.u32 %v11814_v28, %v8487_v43  ;;  %v8918_v39 = vor.u32 %v11926_v34, %v8917_v33  ;;  %v8881_v41 = vld [vmem:[#allocation8 + $0x490] sm:$0xf]  ;;  %v11917_v42 = vld [vmem:[#allocation8 + $0x4b0] sm:$0xf0]  ;;  %v8307_v43 = vld [vmem:[#allocation8 + $0x34] sm:$0xf0] }
 0x16b   :  { %v8346_v40 = vor.u32 %v11778_v22, %v8343_v35  ;;  %v11769_v28 = vld [vmem:[#allocation8 + $0x14] sm:$0xf]  ;;  %v8882_v55 = vor.u32 %v11917_v42, %v8881_v41  ;;  %v8457_v33 = vld [vmem:[#allocation8 + $0x138] sm:$0xf]  ;;  %v11810_v34 = vld [vmem:[#allocation8 + $0x158] sm:$0xf0] }
 0x16c   :  { %v8310_v56 = vor.u32 %v11769_v28, %v8307_v43  ;;  %v11949_v21 = vld [vmem:[#allocation8 + $0x5b4] sm:$0xf]  ;;  %v8745_v22 = vld [vmem:[#allocation8 + $0x378] sm:$0xf]  ;;  %v11882_v35 = vld [vmem:[#allocation8 + $0x398] sm:$0xf0] }
 0x16d   :  { %1782 = vmatpush.bf16.msra.mxu0 %v8910_v58  ;;  %1796 = vmatpush.bf16.msra.mxu1 %v8338_v59  ;;  %v8738_v58 = vor.u32 %v11881_v52, %v8737_v51  ;;  %v8413_v59 = vld [vmem:[#allocation8 + $0xe8] sm:$0xf]  ;;  %v11837_v52 = vld [vmem:[#allocation8 + $0x230] sm:$0xf0]  ;;  %v8421_v41 = vld [vmem:[#allocation8 + $0xf0] sm:$0xf] }
 0x16e   :  { %1810 = vmatpush.bf16.msra.mxu2 %v8626_v3  ;;  %1824 = vmatpush.bf16.msra.mxu3 %v8914_v6  ;;  %v8701_v3 = vld [vmem:[#allocation8 + $0x328] sm:$0xf]  ;;  %v11872_v6 = vld [vmem:[#allocation8 + $0x348] sm:$0xf0]  ;;  %v8414_v13 = vor.u32 %v11800_v61, %v8413_v59  ;;  %v11895_v59 = vld [vmem:[#allocation8 + $0x404] sm:$0xf] }
 0x16f   :  { %v8702_v14 = vor.u32 %v11872_v6, %v8701_v3  ;;  %v8811_v61 = vld [vmem:[#allocation8 + $0x424] sm:$0xf0]  ;;  %v11967_v3 = vld [vmem:[#allocation8 + $0x644] sm:$0xf]  ;;  %v11801_v42 = vld [vmem:[#allocation8 + $0x110] sm:$0xf0] }
 0x170   :  { %v9099_v6 = vld [vmem:[#allocation8 + $0x664] sm:$0xf0]  ;;  %v8709_v28 = vld [vmem:[#allocation8 + $0x330] sm:$0xf]  ;;  %v11873_v43 = vld [vmem:[#allocation8 + $0x350] sm:$0xf0] }
 0x171   :  { %1783 = vmatpush.bf16.msra.mxu0 %v8874_v17  ;;  %1797 = vmatpush.bf16.msra.mxu1 %v8302_v18  ;;  %v8418_v17 = vor.u32 %v11796_v10, %v8415_v12  ;;  %v8665_v18 = vld [vmem:[#allocation8 + $0x2e0] sm:$0xf]  ;;  %v8817_v10 = vld [vmem:[#allocation8 + $0x408] sm:$0xf]  ;;  %v11900_v12 = vld [vmem:[#allocation8 + $0x428] sm:$0xf0] }
 0x172   :  { %1811 = vmatpush.bf16.msra.mxu2 %v8590_v25  ;;  %1825 = vmatpush.bf16.msra.mxu3 %v8878_v0  ;;  %v11787_v25 = vld [vmem:[#allocation8 + $0xa4] sm:$0xf]  ;;  %v8379_v0 = vld [vmem:[#allocation8 + $0xc4] sm:$0xf0] }
 0x174   :  { %1784 = vmatmul.bf16.vlgmr.msra.gmra.mxu0 %v13252_v45  ;;  %1798 = vmatmul.bf16.vlgmr.msra.gmra.mxu1 %v13248_v44 }
 0x175   :  { %1832 = vmatpush.bf16.msrb.mxu0 %v8558_v26  ;;  %1846 = vmatpush.bf16.msrb.mxu1 %v8846_v1  ;;  %v8378_v26 = vor.u32 %v11791_v16, %v8377_v15  ;;  %v8666_v1 = vor.u32 %v11863_v19, %v8665_v18  ;;  %v11886_v15 = vld [vmem:[#allocation8 + $0x3bc] sm:$0xf]  ;;  %v8775_v16 = vld [vmem:[#allocation8 + $0x3dc] sm:$0xf0] }
 0x176   :  { %1860 = vmatpush.bf16.msrb.mxu2 %v9134_v31  ;;  %1874 = vmatpush.bf16.msrb.mxu3 %v8562_v20  ;;  %v8954_v31 = vor.u32 %v11935_v24, %v8953_v23  ;;  %v8382_v20 = vor.u32 %v11787_v25, %v8379_v0  ;;  %v11958_v18 = vld [vmem:[#allocation8 + $0x5fc] sm:$0xf]  ;;  %v9063_v19 = vld [vmem:[#allocation8 + $0x61c] sm:$0xf0]  ;;  %v11819_v24 = vld [vmem:[#allocation8 + $0x1a0] sm:$0xf0] }
 0x177   :  { %1812 = vmatmul.bf16.vlgmr.msra.gmra.mxu2 %v13250_v30  ;;  %1826 = vmatmul.bf16.vlgmr.msra.gmra.mxu3 %v13252_v45  ;;  %v8493_v23 = vld [vmem:[#allocation8 + $0x180] sm:$0xf]  ;;  %v11891_v0 = vld [vmem:[#allocation8 + $0x3e0] sm:$0xf0] }
 0x178   :  { %v8781_v25 = vld [vmem:[#allocation8 + $0x3c0] sm:$0xf] }
 0x179   :  { %1833 = vmatpush.bf16.msrb.mxu0 %v8522_v4  ;;  %1847 = vmatpush.bf16.msrb.mxu1 %v8810_v36  ;;  %v8305_v4 = vld [vmem:[#allocation8 + $0x10] sm:$0xf]  ;;  %v8342_v36 = vor.u32 %v11782_v27, %v8341_v2  ;;  %v11877_v2 = vld [vmem:[#allocation8 + $0x374] sm:$0xf]  ;;  %v8739_v27 = vld [vmem:[#allocation8 + $0x394] sm:$0xf0] }
 0x17a   :  { %1861 = vmatpush.bf16.msrb.mxu2 %v9098_v38  ;;  %1875 = vmatpush.bf16.msrb.mxu3 %v8526_v8  ;;  %v8593_v38 = vld [vmem:[#allocation8 + $0x250] sm:$0xf]  ;;  %v11845_v8 = vld [vmem:[#allocation8 + $0x270] sm:$0xf0] }
 0x17b   :  { %v8594_v51 = vor.u32 %v11845_v8, %v8593_v38  ;;  %v8458_v38 = vor.u32 %v11810_v34, %v8457_v33  ;;  %v8746_v8 = vor.u32 %v11882_v35, %v8745_v22  ;;  %v11977_v33 = vld [vmem:[#allocation8 + $0x694] sm:$0xf]  ;;  %v9143_v34 = vld [vmem:[#allocation8 + $0x6b4] sm:$0xf0] }
 0x17d   :  { %1834 = vmatpush.bf16.msrb.mxu0 %v8486_v29  ;;  %1848 = vmatpush.bf16.msrb.mxu1 %v8774_v46  ;;  %v11904_v29 = vld [vmem:[#allocation8 + $0x44c] sm:$0xf]  ;;  %v8847_v46 = vld [vmem:[#allocation8 + $0x46c] sm:$0xf0] }
 0x17e   :  { %1862 = vmatpush.bf16.msrb.mxu2 %v9062_v49  ;;  %1876 = vmatpush.bf16.msrb.mxu3 %v8490_v50  ;;  %v8565_v49 = vld [vmem:[#allocation8 + $0x210] sm:$0xf]  ;;  %v8306_v50 = vor.u32 %v11773_v37, %v8305_v4  ;;  %v8742_v4 = vor.u32 %v11877_v2, %v8739_v27  ;;  %v11833_v2 = vld [vmem:[#allocation8 + $0x214] sm:$0xf]  ;;  %v8567_v27 = vld [vmem:[#allocation8 + $0x234] sm:$0xf0] }
 0x17f   :  { %v8703_v37 = vld [vmem:[#allocation8 + $0x34c] sm:$0xf0] }
 0x181   :  { %1835 = vmatpush.bf16.msrb.mxu0 %v8450_v57  ;;  %1849 = vmatpush.bf16.msrb.mxu1 %v8738_v58  ;;  %v8850_v57 = vor.u32 %v11904_v29, %v8847_v46  ;;  %v9138_v58 = vor.u32 %v11976_v47, %v9135_v48  ;;  %v11859_v47 = vld [vmem:[#allocation8 + $0x2e4] sm:$0xf]  ;;  %v8667_v48 = vld [vmem:[#allocation8 + $0x304] sm:$0xf0] }
 0x182   :  { %1863 = vmatpush.bf16.msrb.mxu2 %v9026_v62  ;;  %1877 = vmatpush.bf16.msrb.mxu3 %v8454_v63  ;;  %v8566_v62 = vor.u32 %v11837_v52, %v8565_v49  ;;  %v8854_v63 = vor.u32 %v11909_v54, %v8853_v53  ;;  %v8422_v49 = vor.u32 %v11801_v42, %v8421_v41  ;;  %v8955_v52 = vld [vmem:[#allocation8 + $0x544] sm:$0xf0]  ;;  %v11792_v54 = vld [vmem:[#allocation8 + $0xc8] sm:$0xf0]  ;;  %v8819_v42 = vld [vmem:[#allocation8 + $0x42c] sm:$0xf0] }
 0x183   :  { %v8385_v53 = vld [vmem:[#allocation8 + $0xa8] sm:$0xf]  ;;  %v11896_v41 = vld [vmem:[#allocation8 + $0x40c] sm:$0xf] }
 0x185   :  { %1836 = vmatpush.bf16.msrb.mxu0 %v8414_v13  ;;  %1850 = vmatpush.bf16.msrb.mxu1 %v8702_v14  ;;  %v8814_v13 = vor.u32 %v11895_v59, %v8811_v61  ;;  %v9102_v14 = vor.u32 %v11967_v3, %v9099_v6  ;;  %v11850_v59 = vld [vmem:[#allocation8 + $0x29c] sm:$0xf]  ;;  %v8631_v61 = vld [vmem:[#allocation8 + $0x2bc] sm:$0xf0] }
 0x186   :  { %1864 = vmatpush.bf16.msrb.mxu2 %v8990_v11  ;;  %1878 = vmatpush.bf16.msrb.mxu3 %v8418_v17  ;;  %v8530_v11 = vor.u32 %v11828_v9, %v8529_v7  ;;  %v8818_v17 = vor.u32 %v11900_v12, %v8817_v10  ;;  %v11922_v3 = vld [vmem:[#allocation8 + $0x4dc] sm:$0xf]  ;;  %v8919_v6 = vld [vmem:[#allocation8 + $0x4fc] sm:$0xf0]  ;;  %v11783_v9 = vld [vmem:[#allocation8 + $0x80] sm:$0xf0] }
 0x187   :  { %v8349_v7 = vld [vmem:[#allocation8 + $0x60] sm:$0xf]  ;;  %v11855_v12 = vld [vmem:[#allocation8 + $0x2c0] sm:$0xf0] }
 0x188   :  { %v8637_v10 = vld [vmem:[#allocation8 + $0x2a0] sm:$0xf] }
 0x189   :  { %1837 = vmatpush.bf16.msrb.mxu0 %v8378_v26  ;;  %1851 = vmatpush.bf16.msrb.mxu1 %v8666_v1  ;;  %v8778_v26 = vor.u32 %v11886_v15, %v8775_v16  ;;  %v9066_v1 = vor.u32 %v11958_v18, %v9063_v19  ;;  %v8922_v15 = vor.u32 %v11922_v3, %v8919_v6  ;;  %v8595_v16 = vld [vmem:[#allocation8 + $0x274] sm:$0xf0]  ;;  %v11806_v3 = vld [vmem:[#allocation8 + $0x13c] sm:$0xf]  ;;  %v8459_v6 = vld [vmem:[#allocation8 + $0x15c] sm:$0xf0] }
 0x18a   :  { %1865 = vmatpush.bf16.msrb.mxu2 %v8954_v31  ;;  %1879 = vmatpush.bf16.msrb.mxu3 %v8382_v20  ;;  %v8494_v31 = vor.u32 %v11819_v24, %v8493_v23  ;;  %v8782_v20 = vor.u32 %v11891_v0, %v8781_v25  ;;  %v8350_v18 = vor.u32 %v11783_v9, %v8349_v7  ;;  %v8313_v23 = vld [vmem:[#allocation8 + $0x18] sm:$0xf]  ;;  %v11774_v24 = vld [vmem:[#allocation8 + $0x38] sm:$0xf0]  ;;  %v8747_v9 = vld [vmem:[#allocation8 + $0x39c] sm:$0xf0] }
 0x18b   :  { %v8638_v19 = vor.u32 %v11855_v12, %v8637_v10  ;;  %v8601_v25 = vld [vmem:[#allocation8 + $0x258] sm:$0xf]  ;;  %v11846_v0 = vld [vmem:[#allocation8 + $0x278] sm:$0xf0]  ;;  %v8314_v22 = vor.u32 %v11774_v24, %v8313_v23  ;;  %v9035_v12 = vld [vmem:[#allocation8 + $0x5dc] sm:$0xf0] }
 0x18c   :  { %v8602_v35 = vor.u32 %v11846_v0, %v8601_v25  ;;  %v11878_v7 = vld [vmem:[#allocation8 + $0x37c] sm:$0xf]  ;;  %v11869_v23 = vld [vmem:[#allocation8 + $0x334] sm:$0xf]  ;;  %v8711_v24 = vld [vmem:[#allocation8 + $0x354] sm:$0xf0] }
 0x18d   :  { %1838 = vmatpush.bf16.msrb.mxu0 %v8342_v36  ;;  %1852 = vmatpush.bf16.msrb.mxu1 %v8630_v5  ;;  %v9030_v36 = vor.u32 %v11949_v21, %v9027_v32  ;;  %v11868_v5 = vld [vmem:[#allocation8 + $0x32c] sm:$0xf]  ;;  %v8855_v32 = vld [vmem:[#allocation8 + $0x474] sm:$0xf0]  ;;  %v11950_v10 = vld [vmem:[#allocation8 + $0x5bc] sm:$0xf] }
 0x18e   :  { %1866 = vmatpush.bf16.msrb.mxu2 %v8918_v39  ;;  %1880 = vmatpush.bf16.msrb.mxu3 %v8346_v40  ;;  %v11940_v39 = vld [vmem:[#allocation8 + $0x56c] sm:$0xf]  ;;  %v8991_v40 = vld [vmem:[#allocation8 + $0x58c] sm:$0xf0]  ;;  %v8706_v29 = vor.u32 %v11868_v5, %v8703_v37  ;;  %v9105_v5 = vld [vmem:[#allocation8 + $0x648] sm:$0xf] }
 0x18f   :  { %v8994_v46 = vor.u32 %v11940_v39, %v8991_v40  ;;  %v11972_v37 = vld [vmem:[#allocation8 + $0x668] sm:$0xf0]  ;;  %v8531_v40 = vld [vmem:[#allocation8 + $0x1ec] sm:$0xf0]  ;;  %v11941_v25 = vld [vmem:[#allocation8 + $0x574] sm:$0xf] }
 0x190   :  { %v11824_v39 = vld [vmem:[#allocation8 + $0x1cc] sm:$0xf]  ;;  %v8999_v0 = vld [vmem:[#allocation8 + $0x594] sm:$0xf0] }
 0x191   :  { %1839 = vmatpush.bf16.msrb.mxu0 %v8306_v50  ;;  %1853 = vmatpush.bf16.msrb.mxu1 %v8594_v51  ;;  %v8710_v50 = vor.u32 %v11873_v43, %v8709_v28  ;;  %v11931_v51 = vld [vmem:[#allocation8 + $0x524] sm:$0xf]  ;;  %v11968_v28 = vld [vmem:[#allocation8 + $0x64c] sm:$0xf]  ;;  %v9107_v43 = vld [vmem:[#allocation8 + $0x66c] sm:$0xf0] }
 0x192   :  { %1867 = vmatpush.bf16.msrb.mxu2 %v8882_v55  ;;  %1881 = vmatpush.bf16.msrb.mxu3 %v8310_v56  ;;  %v8673_v55 = vld [vmem:[#allocation8 + $0x2e8] sm:$0xf]  ;;  %v11864_v56 = vld [vmem:[#allocation8 + $0x308] sm:$0xf0] }
 0x194   :  { %1840 = vmatmul.bf16.vlgmr.msrb.gmra.mxu0 %v13248_v44  ;;  %1854 = vmatmul.bf16.vlgmr.msrb.gmra.mxu1 %v13250_v30 }
 0x195   :  { %1888 = vmatpush.bf16.msra.mxu0 %v8850_v57  ;;  %1902 = vmatpush.bf16.msra.mxu1 %v9138_v58  ;;  %v8670_v57 = vor.u32 %v11859_v47, %v8667_v48  ;;  %v8958_v58 = vor.u32 %v11931_v51, %v8955_v52  ;;  %v9069_v47 = vld [vmem:[#allocation8 + $0x600] sm:$0xf]  ;;  %v11963_v48 = vld [vmem:[#allocation8 + $0x620] sm:$0xf0]  ;;  %v8495_v52 = vld [vmem:[#allocation8 + $0x1a4] sm:$0xf0] }
 0x196   :  { %1916 = vmatpush.bf16.msra.mxu2 %v8566_v62  ;;  %1930 = vmatpush.bf16.msra.mxu3 %v8854_v63  ;;  %v8386_v62 = vor.u32 %v11792_v54, %v8385_v53  ;;  %v8674_v63 = vor.u32 %v11864_v56, %v8673_v55  ;;  %v11815_v51 = vld [vmem:[#allocation8 + $0x184] sm:$0xf]  ;;  %v8783_v54 = vld [vmem:[#allocation8 + $0x3e4] sm:$0xf0] }
 0x197   :  { %1868 = vmatmul.bf16.vlgmr.msrb.gmra.mxu2 %v13252_v45  ;;  %1882 = vmatmul.bf16.vlgmr.msrb.gmra.mxu3 %v13248_v44  ;;  %v11887_v53 = vld [vmem:[#allocation8 + $0x3c4] sm:$0xf]  ;;  %v9071_v56 = vld [vmem:[#allocation8 + $0x624] sm:$0xf0] }
 0x198   :  { %v11959_v55 = vld [vmem:[#allocation8 + $0x604] sm:$0xf] }
 0x199   :  { %1889 = vmatpush.bf16.msra.mxu0 %v8814_v13  ;;  %1903 = vmatpush.bf16.msra.mxu1 %v9102_v14  ;;  %v11841_v13 = vld [vmem:[#allocation8 + $0x254] sm:$0xf]  ;;  %v8634_v14 = vor.u32 %v11850_v59, %v8631_v61  ;;  %v9033_v59 = vld [vmem:[#allocation8 + $0x5b8] sm:$0xf]  ;;  %v11954_v61 = vld [vmem:[#allocation8 + $0x5d8] sm:$0xf0] }
 0x19a   :  { %1917 = vmatpush.bf16.msra.mxu2 %v8530_v11  ;;  %1931 = vmatpush.bf16.msra.mxu3 %v8818_v17  ;;  %v11913_v11 = vld [vmem:[#allocation8 + $0x494] sm:$0xf]  ;;  %v8883_v17 = vld [vmem:[#allocation8 + $0x4b4] sm:$0xf0] }
 0x19b   :  { %v8886_v21 = vor.u32 %v11913_v11, %v8883_v17  ;;  %v8750_v11 = vor.u32 %v11878_v7, %v8747_v9  ;;  %v9038_v17 = vor.u32 %v11950_v10, %v9035_v12 }
 0x19d   :  { %1890 = vmatpush.bf16.msra.mxu0 %v8778_v26  ;;  %1904 = vmatpush.bf16.msra.mxu1 %v9066_v1  ;;  %v9141_v26 = vld [vmem:[#allocation8 + $0x690] sm:$0xf]  ;;  %v11981_v1 = vld [vmem:[#allocation8 + $0x6b0] sm:$0xf0] }
 0x19e   :  { %1918 = vmatpush.bf16.msra.mxu2 %v8494_v31  ;;  %1932 = vmatpush.bf16.msra.mxu3 %v8782_v20  ;;  %v11905_v31 = vld [vmem:[#allocation8 + $0x454] sm:$0xf]  ;;  %v8598_v20 = vor.u32 %v11841_v13, %v8595_v16  ;;  %v9034_v13 = vor.u32 %v11954_v61, %v9033_v59  ;;  %v8861_v59 = vld [vmem:[#allocation8 + $0x458] sm:$0xf]  ;;  %v11910_v61 = vld [vmem:[#allocation8 + $0x478] sm:$0xf0] }
 0x19f   :  { %v11945_v16 = vld [vmem:[#allocation8 + $0x590] sm:$0xf0]  ;;  %v8862_v12 = vor.u32 %v11910_v61, %v8861_v59  ;;  %v8357_v61 = vld [vmem:[#allocation8 + $0x68] sm:$0xf] }
 0x1a1   :  { %1891 = vmatpush.bf16.msra.mxu0 %v8742_v4  ;;  %1905 = vmatpush.bf16.msra.mxu1 %v9030_v36  ;;  %v9142_v4 = vor.u32 %v11981_v1, %v9141_v26  ;;  %v8570_v36 = vor.u32 %v11833_v2, %v8567_v27  ;;  %v8961_v2 = vld [vmem:[#allocation8 + $0x528] sm:$0xf]  ;;  %v11936_v27 = vld [vmem:[#allocation8 + $0x548] sm:$0xf0] }
 0x1a2   :  { %1919 = vmatpush.bf16.msra.mxu2 %v8458_v38  ;;  %1933 = vmatpush.bf16.msra.mxu3 %v8746_v8  ;;  %v8858_v38 = vor.u32 %v11905_v31, %v8855_v32  ;;  %v9146_v8 = vor.u32 %v11977_v33, %v9143_v34  ;;  %v8714_v31 = vor.u32 %v11869_v23, %v8711_v24  ;;  %v8387_v32 = vld [vmem:[#allocation8 + $0xcc] sm:$0xf0]  ;;  %v11860_v33 = vld [vmem:[#allocation8 + $0x2ec] sm:$0xf]  ;;  %v8501_v24 = vld [vmem:[#allocation8 + $0x188] sm:$0xf] }
 0x1a3   :  { %v8675_v34 = vld [vmem:[#allocation8 + $0x30c] sm:$0xf0] }
 0x1a5   :  { %1892 = vmatpush.bf16.msra.mxu0 %v8706_v29  ;;  %1906 = vmatpush.bf16.msra.mxu1 %v8994_v46  ;;  %v9106_v29 = vor.u32 %v11972_v37, %v9105_v5  ;;  %v8534_v46 = vor.u32 %v11824_v39, %v8531_v40  ;;  %v8925_v5 = vld [vmem:[#allocation8 + $0x4e0] sm:$0xf]  ;;  %v11927_v37 = vld [vmem:[#allocation8 + $0x500] sm:$0xf0]  ;;  %v8351_v40 = vld [vmem:[#allocation8 + $0x84] sm:$0xf0] }
 0x1a6   :  { %1920 = vmatpush.bf16.msra.mxu2 %v8422_v49  ;;  %1934 = vmatpush.bf16.msra.mxu3 %v8710_v50  ;;  %v8822_v49 = vor.u32 %v11896_v41, %v8819_v42  ;;  %v9110_v50 = vor.u32 %v11968_v28, %v9107_v43  ;;  %v11779_v39 = vld [vmem:[#allocation8 + $0x64] sm:$0xf]  ;;  %v8639_v42 = vld [vmem:[#allocation8 + $0x2c4] sm:$0xf0] }
 0x1a7   :  { %v11851_v41 = vld [vmem:[#allocation8 + $0x2a4] sm:$0xf]  ;;  %v8927_v43 = vld [vmem:[#allocation8 + $0x504] sm:$0xf0] }
 0x1a8   :  { %v11923_v28 = vld [vmem:[#allocation8 + $0x4e4] sm:$0xf] }
 0x1a9   :  { %1893 = vmatpush.bf16.msra.mxu0 %v8670_v57  ;;  %1907 = vmatpush.bf16.msra.mxu1 %v8958_v58  ;;  %v9070_v57 = vor.u32 %v11963_v48, %v9069_v47  ;;  %v8498_v58 = vor.u32 %v11815_v51, %v8495_v52  ;;  %v8889_v47 = vld [vmem:[#allocation8 + $0x498] sm:$0xf]  ;;  %v11918_v48 = vld [vmem:[#allocation8 + $0x4b8] sm:$0xf0]  ;;  %v8930_v51 = vor.u32 %v11923_v28, %v8927_v43  ;;  %v8315_v52 = vld [vmem:[#allocation8 + $0x3c] sm:$0xf0] }
 0x1aa   :  { %1921 = vmatpush.bf16.msra.mxu2 %v8386_v62  ;;  %1935 = vmatpush.bf16.msra.mxu3 %v8674_v63  ;;  %v8786_v62 = vor.u32 %v11887_v53, %v8783_v54  ;;  %v9074_v63 = vor.u32 %v11959_v55, %v9071_v56  ;;  %v11842_v53 = vld [vmem:[#allocation8 + $0x25c] sm:$0xf]  ;;  %v8603_v54 = vld [vmem:[#allocation8 + $0x27c] sm:$0xf0] }
 0x1ab   :  { %v11914_v55 = vld [vmem:[#allocation8 + $0x49c] sm:$0xf]  ;;  %v8891_v56 = vld [vmem:[#allocation8 + $0x4bc] sm:$0xf0]  ;;  %v8606_v7 = vor.u32 %v11842_v53, %v8603_v54  ;;  %v8681_v53 = vld [vmem:[#allocation8 + $0x2f0] sm:$0xf] }
 0x1ac   :  { %v8894_v9 = vor.u32 %v11914_v55, %v8891_v56  ;;  %v11865_v54 = vld [vmem:[#allocation8 + $0x310] sm:$0xf0]  ;;  %v8969_v56 = vld [vmem:[#allocation8 + $0x530] sm:$0xf] }
 0x1ad   :  { %1894 = vmatpush.bf16.msra.mxu0 %v8634_v14  ;;  %1908 = vmatpush.bf16.msra.mxu1 %v8922_v15  ;;  %v8462_v14 = vor.u32 %v11806_v3, %v8459_v6  ;;  %v8997_v15 = vld [vmem:[#allocation8 + $0x570] sm:$0xf]  ;;  %v9149_v3 = vld [vmem:[#allocation8 + $0x698] sm:$0xf]  ;;  %v11982_v6 = vld [vmem:[#allocation8 + $0x6b8] sm:$0xf0]  ;;  %v8682_v59 = vor.u32 %v11865_v54, %v8681_v53 }
 0x1ae   :  { %1922 = vmatpush.bf16.msra.mxu2 %v8350_v18  ;;  %1936 = vmatpush.bf16.msra.mxu3 %v8638_v19  ;;  %v11797_v18 = vld [vmem:[#allocation8 + $0xf4] sm:$0xf]  ;;  %v8423_v19 = vld [vmem:[#allocation8 + $0x114] sm:$0xf0]  ;;  %v8998_v26 = vor.u32 %v11945_v16, %v8997_v15  ;;  %v8825_v16 = vld [vmem:[#allocation8 + $0x410] sm:$0xf] }
 0x1af   :  { %v8426_v1 = vor.u32 %v11797_v18, %v8423_v19  ;;  %v11829_v15 = vld [vmem:[#allocation8 + $0x1f0] sm:$0xf0] }
 0x1b0   :  { %v11973_v18 = vld [vmem:[#allocation8 + $0x670] sm:$0xf0] }
 0x1b1   :  { %1895 = vmatpush.bf16.msra.mxu0 %v8598_v20  ;;  %1909 = vmatpush.bf16.msra.mxu1 %v8886_v21  ;;  %v9002_v20 = vor.u32 %v11941_v25, %v8999_v0  ;;  %v11788_v21 = vld [vmem:[#allocation8 + $0xac] sm:$0xf] }
 0x1b2   :  { %1923 = vmatpush.bf16.msra.mxu2 %v8314_v22  ;;  %1937 = vmatpush.bf16.msra.mxu3 %v8602_v35  ;;  %v11932_v22 = vld [vmem:[#allocation8 + $0x52c] sm:$0xf]  ;;  %v8963_v35 = vld [vmem:[#allocation8 + $0x54c] sm:$0xf0] }
 0x1b3   :  { %v11820_v0 = vld [vmem:[#allocation8 + $0x1a8] sm:$0xf0] }
 0x1b4   :  { %1896 = vmatmul.bf16.vlgmr.msra.gmra.mxu0 %v13250_v30  ;;  %1910 = vmatmul.bf16.vlgmr.msra.gmra.mxu1 %v13252_v45 }
 0x1b5   :  { %1944 = vmatpush.bf16.msrb.mxu0 %v9142_v4  ;;  %1958 = vmatpush.bf16.msrb.mxu1 %v8570_v36  ;;  %v8962_v4 = vor.u32 %v11936_v27, %v8961_v2  ;;  %v8390_v36 = vor.u32 %v11788_v21, %v8387_v32  ;;  %v9077_v2 = vld [vmem:[#allocation8 + $0x608] sm:$0xf]  ;;  %v11964_v27 = vld [vmem:[#allocation8 + $0x628] sm:$0xf0] }
 0x1b6   :  { %1972 = vmatpush.bf16.msrb.mxu2 %v8858_v38  ;;  %1986 = vmatpush.bf16.msrb.mxu3 %v9146_v8  ;;  %v8678_v38 = vor.u32 %v11860_v33, %v8675_v34  ;;  %v8966_v8 = vor.u32 %v11932_v22, %v8963_v35  ;;  %v8465_v33 = vld [vmem:[#allocation8 + $0x140] sm:$0xf]  ;;  %v9078_v34 = vor.u32 %v11964_v27, %v9077_v2  ;;  %v11811_v22 = vld [vmem:[#allocation8 + $0x160] sm:$0xf0] }
 0x1b7   :  { %1924 = vmatmul.bf16.vlgmr.msra.gmra.mxu2 %v13248_v44  ;;  %1938 = vmatmul.bf16.vlgmr.msra.gmra.mxu3 %v13250_v30  ;;  %v8753_v35 = vld [vmem:[#allocation8 + $0x380] sm:$0xf] }
 0x1b9   :  { %1945 = vmatpush.bf16.msrb.mxu0 %v9106_v29  ;;  %1959 = vmatpush.bf16.msrb.mxu1 %v8534_v46  ;;  %v8926_v29 = vor.u32 %v11927_v37, %v8925_v5  ;;  %v8354_v46 = vor.u32 %v11779_v39, %v8351_v40  ;;  %v11955_v5 = vld [vmem:[#allocation8 + $0x5e0] sm:$0xf0]  ;;  %v8466_v37 = vor.u32 %v11811_v22, %v8465_v33  ;;  %v11802_v40 = vld [vmem:[#allocation8 + $0x118] sm:$0xf0] }
 0x1ba   :  { %1973 = vmatpush.bf16.msrb.mxu2 %v8822_v49  ;;  %1987 = vmatpush.bf16.msrb.mxu3 %v9110_v50  ;;  %v11770_v49 = vld [vmem:[#allocation8 + $0x1c] sm:$0xf]  ;;  %v8642_v50 = vor.u32 %v11851_v41, %v8639_v42  ;;  %v8717_v41 = vld [vmem:[#allocation8 + $0x338] sm:$0xf] }
 0x1bb   :  { %v11874_v42 = vld [vmem:[#allocation8 + $0x358] sm:$0xf0] }
 0x1bd   :  { %1946 = vmatpush.bf16.msrb.mxu0 %v9070_v57  ;;  %1960 = vmatpush.bf16.msrb.mxu1 %v8498_v58  ;;  %v8573_v57 = vld [vmem:[#allocation8 + $0x218] sm:$0xf]  ;;  %v11838_v58 = vld [vmem:[#allocation8 + $0x238] sm:$0xf0] }
 0x1be   :  { %1974 = vmatpush.bf16.msrb.mxu2 %v8786_v62  ;;  %1988 = vmatpush.bf16.msrb.mxu3 %v9074_v63  ;;  %v8890_v62 = vor.u32 %v11918_v48, %v8889_v47  ;;  %v8318_v63 = vor.u32 %v11770_v49, %v8315_v52  ;;  %v8574_v10 = vor.u32 %v11838_v58, %v8573_v57  ;;  %v11793_v52 = vld [vmem:[#allocation8 + $0xd0] sm:$0xf0] }
 0x1bf   :  { %v8718_v48 = vor.u32 %v11874_v42, %v8717_v41  ;;  %v11937_v57 = vld [vmem:[#allocation8 + $0x550] sm:$0xf0] }
 0x1c1   :  { %1947 = vmatpush.bf16.msrb.mxu0 %v9034_v13  ;;  %1961 = vmatpush.bf16.msrb.mxu1 %v8462_v14  ;;  %v8537_v13 = vld [vmem:[#allocation8 + $0x1d0] sm:$0xf]  ;;  %v9150_v14 = vor.u32 %v11982_v6, %v9149_v3  ;;  %v11784_v3 = vld [vmem:[#allocation8 + $0x88] sm:$0xf0]  ;;  %v8645_v6 = vld [vmem:[#allocation8 + $0x2a8] sm:$0xf] }
 0x1c2   :  { %1975 = vmatpush.bf16.msrb.mxu2 %v8750_v11  ;;  %1989 = vmatpush.bf16.msrb.mxu3 %v9038_v17  ;;  %v11901_v11 = vld [vmem:[#allocation8 + $0x430] sm:$0xf0]  ;;  %v9113_v17 = vld [vmem:[#allocation8 + $0x650] sm:$0xf]  ;;  %v8538_v19 = vor.u32 %v11829_v15, %v8537_v13  ;;  %v11928_v13 = vld [vmem:[#allocation8 + $0x508] sm:$0xf0]  ;;  %v8358_v15 = vor.u32 %v11784_v3, %v8357_v61 }
 0x1c3   :  { %v8826_v23 = vor.u32 %v11901_v11, %v8825_v16  ;;  %v9114_v25 = vor.u32 %v11973_v18, %v9113_v17  ;;  %v8321_v11 = vld [vmem:[#allocation8 + $0x20] sm:$0xf]  ;;  %v11775_v17 = vld [vmem:[#allocation8 + $0x40] sm:$0xf0] }
 0x1c4   :  { %v8322_v2 = vor.u32 %v11775_v17, %v8321_v11 }
 0x1c5   :  { %1948 = vmatpush.bf16.msrb.mxu0 %v8998_v26  ;;  %1962 = vmatpush.bf16.msrb.mxu1 %v8426_v1  ;;  %v8789_v26 = vld [vmem:[#allocation8 + $0x3c8] sm:$0xf]  ;;  %v11892_v1 = vld [vmem:[#allocation8 + $0x3e8] sm:$0xf0] }
 0x1c6   :  { %1976 = vmatpush.bf16.msrb.mxu2 %v8714_v31  ;;  %1990 = vmatpush.bf16.msrb.mxu3 %v9002_v20  ;;  %v8502_v20 = vor.u32 %v11820_v0, %v8501_v24  ;;  %v8790_v21 = vor.u32 %v11892_v1, %v8789_v26  ;;  %v11847_v24 = vld [vmem:[#allocation8 + $0x280] sm:$0xf0]  ;;  %v8897_v0 = vld [vmem:[#allocation8 + $0x4a0] sm:$0xf] }
 0x1c7   :  { %v11919_v26 = vld [vmem:[#allocation8 + $0x4c0] sm:$0xf0] }
 0x1c9   :  { %1949 = vmatpush.bf16.msrb.mxu0 %v8962_v4  ;;  %1963 = vmatpush.bf16.msrb.mxu1 %v8390_v36  ;;  %v11883_v4 = vld [vmem:[#allocation8 + $0x3a0] sm:$0xf0]  ;;  %v9041_v36 = vld [vmem:[#allocation8 + $0x5c0] sm:$0xf] }
 0x1ca   :  { %1977 = vmatpush.bf16.msrb.mxu2 %v8678_v38  ;;  %1991 = vmatpush.bf16.msrb.mxu3 %v8966_v8  ;;  %v8754_v38 = vor.u32 %v11883_v4, %v8753_v35  ;;  %v8429_v8 = vld [vmem:[#allocation8 + $0xf8] sm:$0xf]  ;;  %v9042_v39 = vor.u32 %v11955_v5, %v9041_v36 }
 0x1cb   :  { %v8430_v47 = vor.u32 %v11802_v40, %v8429_v8 }
 0x1cd   :  { %1950 = vmatpush.bf16.msrb.mxu0 %v8926_v29  ;;  %1964 = vmatpush.bf16.msrb.mxu1 %v8354_v46  ;;  %v9005_v29 = vld [vmem:[#allocation8 + $0x578] sm:$0xf]  ;;  %v11946_v46 = vld [vmem:[#allocation8 + $0x598] sm:$0xf0] }
 0x1ce   :  { %1978 = vmatpush.bf16.msrb.mxu2 %v8642_v50  ;;  %1992 = vmatpush.bf16.msrb.mxu3 %v8930_v51  ;;  %v8393_v50 = vld [vmem:[#allocation8 + $0xb0] sm:$0xf]  ;;  %v9006_v51 = vor.u32 %v11946_v46, %v9005_v29 }
 0x1cf   :  { %v8394_v58 = vor.u32 %v11793_v52, %v8393_v50 }
 0x1d0   :  { %v13278_v31 = vpop.f32.mrf.mxu1  ;;  %v13280_v32 = vpop.f32.mrf.mxu0 }
 0x1d1   :  { %1951 = vmatpush.bf16.msrb.mxu0 %v8890_v62  ;;  %1965 = vmatpush.bf16.msrb.mxu1 %v8318_v63  ;;  %v8970_v63 = vor.u32 %v11937_v57, %v8969_v56  ;;  %v1688_v8 = vadd.f32 %v13278_v31, %v13280_v32 }
 0x1d2   :  { %1979 = vmatpush.bf16.msrb.mxu2 %v8606_v7  ;;  %1993 = vmatpush.bf16.msrb.mxu3 %v8894_v9  ;;  %v11856_v7 = vld [vmem:[#allocation8 + $0x2c8] sm:$0xf0] }
 0x1d3   :  { %v8646_v16 = vor.u32 %v11856_v7, %v8645_v6 }
 0x1d4   :  { %1952 = vmatmul.bf16.vlgmr.msrb.gmra.mxu0 %v13252_v45  ;;  %1966 = vmatmul.bf16.vlgmr.msrb.gmra.mxu1 %v13248_v44 }
 0x1d5   :  { %2000 = vmatpush.bf16.msra.mxu0 %v8574_v10  ;;  %2014 = vmatpush.bf16.msra.mxu1 %v8862_v12  ;;  %v8933_v12 = vld [vmem:[#allocation8 + $0x4e8] sm:$0xf] }
 0x1d6   :  { %2028 = vmatpush.bf16.msra.mxu2 %v9150_v14  ;;  %1994 = vmatmul.bf16.vlgmr.msrb.gmra.mxu3 %v13252_v45 }
 0x1d7   :  { %1980 = vmatmul.bf16.vlgmr.msrb.gmra.mxu2 %v13250_v30  ;;  %v13282_v28 = vpop.f32.mrf.mxu2  ;;  %v13284_v43 = vpop.f32.mrf.mxu3 }
 0x1d8   :  { %v1689_v49 = vpop.f32.mrf.mxu1  ;;  %v1675_v55 = vpop.f32.mrf.mxu0  ;;  %v1702_v41 = vadd.f32 %v13282_v28, %v1688_v8 }
 0x1d9   :  { %2001 = vmatpush.bf16.msra.mxu0 %v8538_v19  ;;  %2015 = vmatpush.bf16.msra.mxu1 %v8826_v23  ;;  %v1690_v62 = vadd.f32 %v1689_v49, %v1675_v55  ;;  %v8934_v19 = vor.u32 %v11928_v13, %v8933_v12  ;;  %v8609_v23 = vld [vmem:[#allocation8 + $0x260] sm:$0xf] }
 0x1da   :  { %2029 = vmatpush.bf16.msra.mxu2 %v9114_v25  ;;  %v8610_v27 = vor.u32 %v11847_v24, %v8609_v23 }
 0x1dd   :  { %2002 = vmatpush.bf16.msra.mxu0 %v8502_v20  ;;  %2016 = vmatpush.bf16.msra.mxu1 %v8790_v21  ;;  %v8898_v20 = vor.u32 %v11919_v26, %v8897_v0 }
 0x1de   :  { %2030 = vmatpush.bf16.msra.mxu2 %v9078_v34 }
 0x1df   :  { %v1703_v9 = vpop.f32.mrf.mxu2  ;;  %v1717_v10 = vpop.f32.mrf.mxu3 }
 0x1e0   :  { %v1704_v14 = vadd.f32 %v1703_v9, %v1690_v62  ;;  %v13286_v25 = vpop.f32.mrf.mxu1  ;;  %v1729_v35 = vpop.f32.mrf.mxu0 }
 0x1e1   :  { %2003 = vmatpush.bf16.msra.mxu0 %v8466_v37  ;;  %2017 = vmatpush.bf16.msra.mxu1 %v8754_v38 }
 0x1e2   :  { %2031 = vmatpush.bf16.msra.mxu2 %v9042_v39  ;;  %v2045_v18 = vmul.f32 0.05103104, %v1704_v14 }
 0x1e4   :  { %v13288_v1 = vpack.c.bf16 %v2045_v18, %v2045_v18 }
 0x1e5   :  { %2004 = vmatpush.bf16.msra.mxu0 %v8430_v47  ;;  %2018 = vmatpush.bf16.msra.mxu1 %v8718_v48 }
 0x1e6   :  { %2032 = vmatpush.bf16.msra.mxu2 %v9006_v51  ;;  %v2196_v21 = vunpack.c.l.b16 %v13288_v1 }
 0x1e7   :  { %v1757_v33 = vpop.f32.mrf.mxu2  ;;  %v1771_v34 = vpop.f32.mrf.mxu3 }
 0x1e8   :  { %v2197_v22 = vpack.c.b16 %v2196_v21, %v2196_v21  ;;  %v1745_v4 = vpop.f32.mrf.mxu1  ;;  %v1731_v37 = vpop.f32.mrf.mxu0  ;;  %v1772_v57 = vadd.f32 %v1771_v34, %v1757_v33 }
 0x1e9   :  { %2005 = vmatpush.bf16.msra.mxu0 %v8394_v58  ;;  %2019 = vmatpush.bf16.msra.mxu1 %v8682_v59  ;;  %v1732_v29 = vadd.f32 %v1731_v37, %v1717_v10 }
 0x1ea   :  { %2033 = vmatpush.bf16.msra.mxu2 %v8970_v63  ;;  %2198 = vrot.lane.b32.xlu1 %v2197_v22, %s13082_s10 }
 0x1eb   :  { %v1746_v52 = vadd.f32 %v1745_v4, %v1732_v29 }
 0x1ed   :  { %2006 = vmatpush.bf16.msra.mxu0 %v8358_v15  ;;  %2020 = vmatpush.bf16.msra.mxu1 %v8646_v16  ;;  %v2046_v55 = vmul.f32 0.05103104, %v1746_v52  ;;  %v1730_v15 = vadd.f32 %v1729_v35, %v13284_v43 }
 0x1ee   :  { %2034 = vmatpush.bf16.msra.mxu2 %v8934_v19 }
 0x1ef   :  { %v13295_v36 = vpop.f32.mrf.mxu2  ;;  %v13297_v5 = vpop.f32.mrf.mxu3  ;;  %v13306_v62 = vpack.c.bf16 %v2046_v55, %v2046_v55  ;;  %v1744_v19 = vadd.f32 %v13286_v25, %v1730_v15 }
 0x1f1   :  { %2007 = vmatpush.bf16.msra.mxu0 %v8322_v2  ;;  %2021 = vmatpush.bf16.msra.mxu1 %v8610_v27  ;;  %v1799_v38 = vpop.f32.mrf.mxu1  ;;  %v1785_v46 = vpop.f32.mrf.mxu0  ;;  %v2436_v9 = vunpack.c.l.b16 %v13306_v62  ;;  %v2043_v43 = vmul.f32 0.05103104, %v1744_v19 }
 0x1f2   :  { %2035 = vmatpush.bf16.msra.mxu2 %v8898_v20  ;;  %v1786_v63 = vadd.f32 %v1785_v46, %v1772_v57 }
 0x1f3   :  { %v2437_v14 = vpack.c.b16 %v2436_v9, %v2436_v9 }
 0x1f4   :  { %2008 = vmatmul.bf16.vlgmr.msra.gmra.mxu0 %v13248_v44  ;;  %2022 = vmatmul.bf16.vlgmr.msra.gmra.mxu1 %v13250_v30  ;;  %v2042_v30 = vmul.f32 0.05103104, %v1702_v41  ;;  %v2044_v7 = vmul.f32 0.05103104, %v1786_v63 }
 0x1f5   :  { %2036 = vmatmul.bf16.vlgmr.msra.gmra.mxu2 %v13252_v45 }
 0x1f6   :  { %v2053_v51 = vpack.c.bf16 %v2042_v30, %v2042_v30  ;;  %v13311_v13 = vpack.c.bf16 %v2044_v7, %v2044_v7 }
 0x1f8   :  { %v2167_v28 = vunpack.c.l.b16 %v2053_v51  ;;  %v2647_v16 = vunpack.c.l.b16 %v13311_v13 }
 0x1f9   :  { %v1801_v49 = vpop.f32.mrf.mxu1  ;;  %v1787_v61 = vpop.f32.mrf.mxu0 }
 0x1fa   :  { %v1813_v39 = vpop.f32.mrf.mxu2  ;;  %v1827_v40 = vpop.f32.mrf.mxu3  ;;  %v2168_v6 = vpack.c.b16 %v2167_v28, %v2167_v28  ;;  %v2648_v24 = vpack.c.b16 %v2647_v16, %v2647_v16 }
 0x1fb   :  { %v1814_v42 = vadd.f32 %v1813_v39, %v1799_v38  ;;  %v1774_v38 = vadd.f32 %v13297_v5, %v13295_v36 }
 0x1fd   :  { %v1828_v44 = vadd.f32 %v1827_v40, %v1814_v42  ;;  %v1788_v41 = vadd.f32 %v1787_v61, %v1774_v38 }
 0x1ff   :  { %v2055_v45 = vpack.c.bf16 %v1828_v44, %v1828_v44  ;;  %v2047_v30 = vmul.f32 0.05103104, %v1788_v41 }
 0x201   :  { %v2064_v47 = vsel %vm2059_vm7, %v2055_v45, 0  ;;  %v2172_v48 = vunpack.c.l.b16 %v2055_v45 }
 0x202   :  { %v1815_v50 = vpop.f32.mrf.mxu2  ;;  %2073 = vmatpush.bf16.xpose.msra.mxu3 %v2064_v47  ;;  %v1829_v53 = vpop.f32.mrf.mxu3 }
 0x203   :  { %v1816_v31 = vadd.f32 %v1815_v50, %v1801_v49  ;;  %v2173_v32 = vpack.c.b16 %v2172_v48, %v2172_v48  ;;  %v13330_v48 = vpack.c.bf16 %v2047_v30, %v2047_v30 }
 0x205   :  { %v1830_v54 = vadd.f32 %v1829_v53, %v1816_v31  ;;  %2174 = vrot.lane.b32.xlu2 %v2173_v32, %s13082_s10  ;;  %v2676_v5 = vunpack.c.l.b16 %v13330_v48 }
 0x207   :  { %v2056_v56 = vpack.c.bf16 %v1830_v54, %v1830_v54  ;;  %v2677_v32 = vpack.c.b16 %v2676_v5, %v2676_v5 }
 0x209   :  { %v2201_v58 = vunpack.c.l.b16 %v2056_v56  ;;  %9151 = vmatmul.msk.bf16.vlgmr.msra.gmra.mxu3 %vm2059_vm7, %v2053_v51  ;;  %v2083_v59 = vsel %vm2059_vm7, %v2056_v56, 0 }
 0x20a   :  { %2092 = vmatpush.bf16.xpose.msrb.mxu3 %v2083_v59 }
 0x20b   :  { %v2202_v3 = vpack.c.b16 %v2201_v58, %v2201_v58 }
 0x20d   :  { %2203 = vrot.lane.b32.xlu0 %v2202_v3, %s13082_s10  ;;  %2169 = vrot.lane.b32.xlu2 %v2168_v6, %s13082_s10 }
 0x211   :  { %v1841_v10 = vpop.f32.mrf.mxu0  ;;  %v1855_v12 = vpop.f32.mrf.mxu1 }
 0x212   :  { %v1856_v11 = vadd.f32 %v1855_v12, %v1841_v10 }
 0x215   :  { %2438 = vrot.lane.b32.xlu0 %v2437_v14, %s13082_s10 }
 0x219   :  { %9152 = vmatmul.msk.bf16.vlgmr.msrb.gmra.mxu3 %vm2059_vm7, %v13288_v1  ;;  %v1843_v0 = vpop.f32.mrf.mxu0  ;;  %v1857_v26 = vpop.f32.mrf.mxu1  ;;  %v2298_v1 = vpack.c.bf16 %v2043_v43, %v2043_v43  ;;  %v2048_v43 = vlaneseq }
 0x21a   :  { %v1869_v17 = vpop.f32.mrf.mxu2  ;;  %v1858_v21 = vadd.f32 %v1857_v26, %v1843_v0  ;;  %v1883_v37 = vpop.f32.mrf.mxu3 }
 0x21b   :  { %v1870_v18 = vadd.f32 %v1869_v17, %v1856_v11  ;;  %v2407_v4 = vunpack.c.l.b16 %v2298_v1 }
 0x21d   :  { %v2300_v23 = vpack.c.bf16 %v1870_v18, %v1870_v18  ;;  %2649 = vrot.lane.b32.xlu0 %v2648_v24, %s13082_s10  ;;  %v2408_v40 = vpack.c.b16 %v2407_v4, %v2407_v4 }
 0x21f   :  { %v2308_v2 = vsel %vm2059_vm7, %v2300_v23, 0  ;;  %v2412_v27 = vunpack.c.l.b16 %v2300_v23 }
 0x220   :  { %2317 = vmatpush.bf16.xpose.msrb.mxu2 %v2308_v2 }
 0x221   :  { %v2413_v20 = vpack.c.b16 %v2412_v27, %v2412_v27 }
 0x222   :  { %v1871_v33 = vpop.f32.mrf.mxu2  ;;  %v1885_v46 = vpop.f32.mrf.mxu3 }
 0x223   :  { %v1872_v34 = vadd.f32 %v1871_v33, %v1858_v21  ;;  %2414 = vrot.lane.b32.xlu2 %v2413_v20, %s13082_s10  ;;  %v2049_v33 = vshrl.u32 %v2048_v43, 7 }
 0x225   :  { %v13322_v22 = vpack.c.bf16 %v1872_v34, %v1872_v34  ;;  %v2051_v34 = vand.u32 127, %v2048_v43 }
 0x227   :  { %v2441_v25 = vunpack.c.l.b16 %v13322_v22  ;;  %9159 = vmatmul.msk.bf16.vlgmr.msrb.gmra.mxu2 %vm2059_vm7, %v2298_v1  ;;  %v2327_v27 = vsel %vm2059_vm7, %v13322_v22, 0  ;;  %vm13360_vm9 = vcmp.ge.s32.totalorder %v2049_v33, %v2051_v34 }
 0x229   :  { %v2442_v35 = vpack.c.b16 %v2441_v25, %v2441_v25 }
 0x22b   :  { %2443 = vrot.lane.b32.xlu2 %v2442_v35, %s13082_s10 }
 0x231   :  { %v1897_v8 = vpop.f32.mrf.mxu0  ;;  %v1911_v39 = vpop.f32.mrf.mxu1 }
 0x232   :  { %v1898_v42 = vadd.f32 %v1897_v8, %v1883_v37 }
 0x233   :  { %2409 = vrot.lane.b32.xlu2 %v2408_v40, %s13082_s10 }
 0x234   :  { %v1912_v44 = vadd.f32 %v1911_v39, %v1898_v42 }
 0x236   :  { %v2540_v29 = vpack.c.bf16 %v1912_v44, %v1912_v44 }
 0x238   :  { %v2652_v45 = vunpack.c.l.b16 %v2540_v29  ;;  %v2548_v0 = vsel %vm2059_vm7, %v2540_v29, 0 }
 0x239   :  { %v1899_v47 = vpop.f32.mrf.mxu0  ;;  %v1913_v51 = vpop.f32.mrf.mxu1 }
 0x23a   :  { %v2653_v49 = vpack.c.b16 %v2652_v45, %v2652_v45  ;;  %v1900_v50 = vadd.f32 %v1899_v47, %v1885_v46  ;;  %v1925_v54 = vpop.f32.mrf.mxu2  ;;  %v1939_v28 = vpop.f32.mrf.mxu3 }
 0x23b   :  { %v1940_v55 = vadd.f32 %v1939_v28, %v1925_v54 }
 0x23c   :  { %v1914_v52 = vadd.f32 %v1913_v51, %v1900_v50  ;;  %2654 = vrot.lane.b32.xlu2 %v2653_v49, %s13082_s10 }
 0x23e   :  { %v13333_v36 = vpack.c.bf16 %v1914_v52, %v1914_v52 }
 0x240   :  { %v2681_v31 = vunpack.c.l.b16 %v13333_v36  ;;  %v2567_v44 = vsel %vm2059_vm7, %v13333_v36, 0 }
 0x242   :  { %v2682_v53 = vpack.c.b16 %v2681_v31, %v2681_v31  ;;  %v1927_v56 = vpop.f32.mrf.mxu2  ;;  %v1941_v58 = vpop.f32.mrf.mxu3 }
 0x243   :  { %v1942_v3 = vadd.f32 %v1941_v58, %v1927_v56 }
 0x244   :  { %2678 = vrot.lane.b32.xlu2 %v2677_v32, %s13082_s10  ;;  %2683 = vrot.lane.b32.xlu1 %v2682_v53, %s13082_s10 }
 0x251   :  { %v1953_v57 = vpop.f32.mrf.mxu0  ;;  %v1967_v6 = vpop.f32.mrf.mxu1 }
 0x252   :  { %v1954_v59 = vadd.f32 %v1953_v57, %v1940_v55 }
 0x254   :  { %v13339_v61 = vpack.c.bf16 %v1954_v59, %v1954_v59 }
 0x256   :  { %v2132_v63 = vsel %vm2130_vm8, %v13339_v61, 0 }
 0x257   :  { %2141 = vmatpush.bf16.msrb.mxu0 %v2132_v63 }
 0x259   :  { %v1955_v10 = vpop.f32.mrf.mxu0  ;;  %v1995_v12 = vpop.f32.mrf.mxu3 }
 0x25a   :  { %v1981_v7 = vpop.f32.mrf.mxu2  ;;  %v1956_v14 = vadd.f32 %v1955_v10, %v1942_v3 }
 0x25b   :  { %v1982_v9 = vadd.f32 %v1981_v7, %v1967_v6 }
 0x25c   :  { %v13345_v16 = vpack.c.bf16 %v1956_v14, %v1956_v14  ;;  %v2199_v1 = vpop.permute.xlu1 %2198 }
 0x25d   :  { %v13343_v15 = vadd.f32 %v1995_v12, %v1982_v9 }
 0x25e   :  { %v2151_v11 = vsel %vm2130_vm8, %v13345_v16, 0 }
 0x25f   :  { %2160 = vmatpush.bf16.msrb.mxu1 %v2151_v11  ;;  %v2175_v17 = vpop.permute.xlu2 %2174  ;;  %v13467_v35 = vpack.c.bf16 %v13343_v15, %v13343_v15 }
 0x260   :  { %v2180_v18 = vsel %vm2059_vm7, %v2175_v17, 0 }
 0x261   :  { %2189 = vmatpush.bf16.xpose.msra.mxu3 %v2180_v18  ;;  %v13356_v21 = vpop.f32.mrf.mxu3 }
 0x262   :  { %v13367_v38 = vpop.f32.mrf.mxu2 }
 0x267   :  { %v2170_v19 = vpop.permute.xlu2 %2169 }
 0x268   :  { %9155 = vmatmul.msk.bf16.vlgmr.msra.gmra.mxu3 %vm2059_vm7, %v2170_v19 }
 0x278   :  { %v13371_v42 = vpop.f32.mrf.mxu2 }
 0x27d   :  { %v2415_v23 = vpop.permute.xlu2 %2414 }
 0x27e   :  { %v2420_v24 = vsel %vm2059_vm7, %v2415_v23, 0 }
 0x27f   :  { %2429 = vmatpush.bf16.xpose.msra.mxu2 %v2420_v24  ;;  %v2204_v26 = vpop.permute.xlu0 %2203 }
 0x280   :  { %v2209_v2 = vsel %vm2059_vm7, %v2204_v26, 0  ;;  %v13379_v29 = vpop.f32.mrf.mxu2 }
 0x281   :  { %2218 = vmatpush.bf16.xpose.msrb.mxu3 %v2209_v2 }
 0x285   :  { %v2444_v20 = vpop.permute.xlu2 %2443 }
 0x286   :  { %v2449_v25 = vsel %vm2059_vm7, %v2444_v20, 0 }
 0x287   :  { %2557 = vmatpush.bf16.xpose.msrb.mxu2 %v2548_v0  ;;  %v2439_v45 = vpop.permute.xlu0 %2438 }
 0x288   :  { %9156 = vmatmul.msk.bf16.vlgmr.msrb.gmra.mxu3 %vm2059_vm7, %v2199_v1 }
 0x289   :  { %2336 = vmatpush.bf16.xpose.msra.mxu3 %v2327_v27 }
 0x28c   :  { %v2075_v22 = vpop.f32.mrf.mxu3 }
 0x28d   :  { %v2410_v4 = vpop.permute.xlu2 %2409  ;;  %v2100_v37 = vsel %vm13360_vm9, %v2075_v22, -inf }
 0x28e   :  { %9163 = vmatmul.msk.bf16.vlgmr.msra.gmra.mxu2 %vm2059_vm7, %v2410_v4  ;;  %v2103_v8 = vsel %vm2102_vm10, %v2100_v37, -inf }
 0x28f   :  { %2104 = vmax.xlane.f32.xlu1 %v2103_v8  ;;  %v2650_v50 = vpop.permute.xlu0 %2649 }
 0x291   :  { %2458 = vmatpush.bf16.xpose.msrb.mxu3 %v2449_v25 }
 0x294   :  { %v2077_v40 = vpop.f32.mrf.mxu3 }
 0x296   :  { %v2655_v39 = vpop.permute.xlu2 %2654 }
 0x297   :  { %v2660_v41 = vsel %vm2059_vm7, %v2655_v39, 0 }
 0x298   :  { %2669 = vmatpush.bf16.xpose.msra.mxu2 %v2660_v41  ;;  %9160 = vmatmul.msk.bf16.vlgmr.msra.gmra.mxu3 %vm2059_vm7, %v13306_v62 }
 0x299   :  { %2576 = vmatpush.bf16.xpose.msra.mxu3 %v2567_v44 }
 0x29c   :  { %v2094_v30 = vpop.f32.mrf.mxu3 }
 0x29e   :  { %9167 = vmatmul.msk.bf16.vlgmr.msrb.gmra.mxu2 %vm2059_vm7, %v13311_v13  ;;  %v2101_v13 = vsel %vm13360_vm9, %v2094_v30, -inf  ;;  %v2679_v31 = vpop.permute.xlu2 %2678 }
 0x29f   :  { %v2106_v52 = vsel %vm2102_vm10, %v2101_v13, -inf }
 0x2a4   :  { %v2096_v46 = vpop.f32.mrf.mxu3 }
 0x2a8   :  { %9164 = vmatmul.msk.bf16.vlgmr.msrb.gmra.mxu3 %vm2059_vm7, %v2439_v45 }
 0x2aa   :  { %v2319_v47 = vpop.f32.mrf.mxu2 }
 0x2ab   :  { %v13384_v49 = vsel %vm13360_vm9, %v2319_v47, -inf }
 0x2ac   :  { %v2344_v62 = vsel %vm2102_vm10, %v13384_v49, -inf }
 0x2ad   :  { %2345 = vmax.xlane.f32.xlu0 %v2344_v62 }
 0x2ae   :  { %9171 = vmatmul.msk.bf16.vlgmr.msra.gmra.mxu2 %vm2059_vm7, %v2650_v50 }
 0x2b2   :  { %v2321_v51 = vpop.f32.mrf.mxu2 }
 0x2b5   :  { %2107 = vmax.xlane.f32.xlu0 %v2106_v52 }
 0x2b6   :  { %v2684_v36 = vpop.permute.xlu1 %2683 }
 0x2b7   :  { %v2689_v5 = vsel %vm2059_vm7, %v2684_v36, 0 }
 0x2b8   :  { %2698 = vmatpush.bf16.xpose.msrb.mxu3 %v2689_v5 }
 0x2b9   :  { %9168 = vmatmul.msk.bf16.vlgmr.msra.gmra.mxu3 %vm2059_vm7, %v13330_v48 }
 0x2c9   :  { %9172 = vmatmul.msk.bf16.vlgmr.msrb.gmra.mxu3 %vm2059_vm7, %v2679_v31 }
 0x2eb   :  { %v2191_v32 = vpop.f32.mrf.mxu3 }
 0x2ec   :  { %v13398_v53 = vsel %vm13360_vm9, %v2191_v32, -inf  ;;  %v2491_v32 = vunpack.c.l.b16 %v13467_v35 }
 0x2ed   :  { %v2226_v54 = vsel %vm2102_vm10, %v13398_v53, -inf }
 0x2ee   :  { %2227 = vmax.xlane.f32.xlu2 %v2226_v54  ;;  %v2492_v54 = vpack.c.b16 %v2491_v32, %v2491_v32 }
 0x2f3   :  { %v2193_v28 = vpop.f32.mrf.mxu3 }
 0x302   :  { %v2105_v55 = vpop.xlane.xlu1 %2104 }
 0x303   :  { %v2109_v56 = vsub.f32 %v2100_v37, %v2105_v55 }
 0x305   :  { %v2111_v57 = vmul.f32 1.442695, %v2109_v56  ;;  %v2275_v56 = vunpack.c.l.b16 %v13345_v16 }
 0x307   :  { %12675 = vpow2.f32 %v2111_v57 }
 0x30b   :  { %v2220_v58 = vpop.f32.mrf.mxu3 }
 0x30c   :  { %v13414_v9 = vsel %vm13360_vm9, %v2220_v58, -inf  ;;  %v2276_v58 = vpack.c.b16 %v2275_v56, %v2275_v56 }
 0x30d   :  { %v13402_v59 = vpop.eup %12675  ;;  %v2229_v12 = vsel %vm2102_vm10, %v13414_v9, -inf }
 0x30e   :  { %v2115_v48 = vsel %vm2102_vm10, %v13402_v59, 0.0 }
 0x30f   :  { %2116 = vadd.xlane.f32.xlu2 %v2115_v48 }
 0x311   :  { %v2431_v63 = vpop.f32.mrf.mxu2 }
 0x312   :  { %v13408_v3 = vsel %vm13360_vm9, %v2431_v63, -inf }
 0x313   :  { %v2466_v6 = vsel %vm2102_vm10, %v13408_v3, -inf  ;;  %v2222_v7 = vpop.f32.mrf.mxu3 }
 0x314   :  { %2467 = vmax.xlane.f32.xlu1 %v2466_v6 }
 0x319   :  { %v2433_v10 = vpop.f32.mrf.mxu2 }
 0x31b   :  { %v2338_v14 = vpop.f32.mrf.mxu3 }
 0x31c   :  { %2230 = vmax.xlane.f32.xlu1 %v2229_v12  ;;  %v13420_v11 = vsel %vm13360_vm9, %v2338_v14, -inf }
 0x31d   :  { %v2347_v17 = vsel %vm2102_vm10, %v13420_v11, -inf }
 0x31e   :  { %2348 = vmax.xlane.f32.xlu2 %v2347_v17 }
 0x320   :  { %v2346_v18 = vpop.xlane.xlu0 %2345 }
 0x321   :  { %v2559_v19 = vpop.f32.mrf.mxu2  ;;  %v2350_v45 = vsub.f32 %v13384_v49, %v2346_v18 }
 0x322   :  { %v13426_v23 = vsel %vm13360_vm9, %v2559_v19, -inf }
 0x323   :  { %v2584_v24 = vsel %vm2102_vm10, %v13426_v23, -inf  ;;  %v2340_v0 = vpop.f32.mrf.mxu3  ;;  %v2352_v46 = vmul.f32 1.442695, %v2350_v45 }
 0x324   :  { %2585 = vmax.xlane.f32.xlu0 %v2584_v24 }
 0x328   :  { %v2108_v26 = vpop.xlane.xlu0 %2107 }
 0x329   :  { %v2110_v2 = vsub.f32 %v2101_v13, %v2108_v26  ;;  %v2561_v27 = vpop.f32.mrf.mxu2  ;;  %v2251_v13 = vunpack.c.l.b16 %v13339_v61 }
 0x32b   :  { %v2113_v43 = vmul.f32 1.442695, %v2110_v2  ;;  %v2460_v20 = vpop.f32.mrf.mxu3  ;;  %v2252_v36 = vpack.c.b16 %v2251_v13, %v2251_v13 }
 0x32c   :  { %v13432_v33 = vsel %vm13360_vm9, %v2460_v20, -inf }
 0x32d   :  { %12677 = vpow2.f32 %v2113_v43  ;;  %v2469_v34 = vsel %vm2102_vm10, %v13432_v33, -inf }
 0x32e   :  { %2470 = vmax.xlane.f32.xlu0 %v2469_v34  ;;  %12679 = vpow2.f32 %v2352_v46 }
 0x331   :  { %v2671_v1 = vpop.f32.mrf.mxu2 }
 0x332   :  { %v13440_v4 = vsel %vm13360_vm9, %v2671_v1, -inf }
 0x333   :  { %v13436_v25 = vpop.eup %12677  ;;  %v2462_v37 = vpop.f32.mrf.mxu3  ;;  %v2706_v8 = vsel %vm2102_vm10, %v13440_v4, -inf }
 0x334   :  { %v2118_v22 = vsel %vm2102_vm10, %v13436_v25, 0.0  ;;  %v13460_v51 = vpop.eup %12679 }
 0x335   :  { %2119 = vadd.xlane.f32.xlu1 %v2118_v22  ;;  %v2356_v49 = vsel %vm2102_vm10, %v13460_v51, 0.0 }
 0x336   :  { %2707 = vmax.xlane.f32.xlu0 %v2706_v8 }
 0x339   :  { %v2673_v39 = vpop.f32.mrf.mxu2 }
 0x33c   :  { %v2578_v40 = vpop.f32.mrf.mxu3 }
 0x33d   :  { %v13448_v41 = vsel %vm13360_vm9, %v2578_v40, -inf }
 0x33e   :  { %v2587_v44 = vsel %vm2102_vm10, %v13448_v41, -inf }
 0x33f   :  { %2588 = vmax.xlane.f32.xlu2 %v2587_v44 }
 0x344   :  { %v2580_v30 = vpop.f32.mrf.mxu3 }
 0x34c   :  { %v2700_v47 = vpop.f32.mrf.mxu3 }
 0x34d   :  { %v13455_v62 = vsel %vm13360_vm9, %v2700_v47, -inf }
 0x34e   :  { %v2709_v50 = vsel %vm2102_vm10, %v13455_v62, -inf }
 0x34f   :  { %2710 = vmax.xlane.f32.xlu0 %v2709_v50 }
 0x354   :  { %v2702_v52 = vpop.f32.mrf.mxu3 }
 0x355   :  { %v2372_v52 = vsel %vm2130_vm8, %v13467_v35, 0 }
 0x357   :  { %2253 = vrot.lane.b32.xlu2 %v2252_v36, %s13082_s10  ;;  %2357 = vadd.xlane.f32.xlu0 %v2356_v49 }
 0x361   :  { %v2228_v5 = vpop.xlane.xlu2 %2227 }
 0x362   :  { %v2232_v31 = vsub.f32 %v13398_v53, %v2228_v5  ;;  %v2009_v5 = vpop.f32.mrf.mxu0 }
 0x364   :  { %v2234_v61 = vmul.f32 1.442695, %v2232_v31 }
 0x366   :  { %12681 = vpow2.f32 %v2234_v61 }
 0x36b   :  { %2493 = vrot.lane.b32.xlu0 %v2492_v54, %s13082_s10 }
 0x36c   :  { %v13472_v28 = vpop.eup %12681 }
 0x36d   :  { %v2238_v55 = vsel %vm2102_vm10, %v13472_v28, 0.0 }
 0x36e   :  { %2239 = vadd.xlane.f32.xlu1 %v2238_v55 }
 0x382   :  { %v2117_v15 = vpop.xlane.xlu2 %2116 }
 0x383   :  { %12683 = vrcp.f32 %v2117_v15 }
 0x387   :  { %v2468_v57 = vpop.xlane.xlu1 %2467  ;;  %2277 = vrot.lane.b32.xlu1 %v2276_v58, %s13082_s10 }
 0x389   :  { %v12684_v53 = vpop.eup %12683 }
 0x38a   :  { %v2123_v48 = vmul.f32 %v12684_v53, %v13402_v59 }
 0x38c   :  { %v2125_v63 = vpack.c.bf16 %v2123_v48, %v2123_v48  ;;  %v2011_v48 = vpop.f32.mrf.mxu0 }
 0x38e   :  { %9153 = vmatmul.msk.bf16.vlgmr.msrb.gmra.mxu0 %vm2102_vm10, %v2125_v63 }
 0x38f   :  { %v2231_v6 = vpop.xlane.xlu1 %2230 }
 0x390   :  { %v2233_v7 = vsub.f32 %v13414_v9, %v2231_v6  ;;  %v2472_v9 = vsub.f32 %v13408_v3, %v2468_v57 }
 0x391   :  { %v2349_v12 = vpop.xlane.xlu2 %2348 }
 0x392   :  { %v2236_v10 = vmul.f32 1.442695, %v2233_v7  ;;  %v2351_v16 = vsub.f32 %v13420_v11, %v2349_v12  ;;  %v2474_v0 = vmul.f32 1.442695, %v2472_v9 }
 0x394   :  { %12685 = vpow2.f32 %v2236_v10  ;;  %v2354_v14 = vmul.f32 1.442695, %v2351_v16 }
 0x396   :  { %12687 = vpow2.f32 %v2354_v14 }
 0x397   :  { %v13484_v18 = vpop.xlane.xlu0 %2585  ;;  %12689 = vpow2.f32 %v2474_v0 }
 0x39a   :  { %v13482_v17 = vpop.eup %12685 }
 0x39b   :  { %v2241_v59 = vsel %vm2102_vm10, %v13482_v17, 0.0 }
 0x39c   :  { %2242 = vadd.xlane.f32.xlu0 %v2241_v59  ;;  %v13488_v19 = vpop.eup %12687 }
 0x39d   :  { %v2359_v24 = vsel %vm2102_vm10, %v13488_v19, 0.0  ;;  %v13495_v34 = vpop.eup %12689 }
 0x39e   :  { %2360 = vadd.xlane.f32.xlu2 %v2359_v24 }
 0x3a1   :  { %v2471_v11 = vpop.xlane.xlu0 %2470 }
 0x3a2   :  { %v2473_v26 = vsub.f32 %v13432_v33, %v2471_v11  ;;  %v1969_v33 = vpop.f32.mrf.mxu1 }
 0x3a3   :  { %v1984_v39 = vadd.f32 %v13367_v38, %v1969_v33 }
 0x3a4   :  { %v2476_v2 = vmul.f32 1.442695, %v2473_v26 }
 0x3a5   :  { %v1998_v45 = vadd.f32 %v13356_v21, %v1984_v39 }
 0x3a6   :  { %12691 = vpow2.f32 %v2476_v2 }
 0x3a8   :  { %v2120_v27 = vpop.xlane.xlu1 %2119 }
 0x3a9   :  { %12693 = vrcp.f32 %v2120_v27  ;;  %v2708_v43 = vpop.xlane.xlu0 %2707 }
 0x3aa   :  { %v2712_v20 = vsub.f32 %v13440_v4, %v2708_v43  ;;  %v2478_v4 = vsel %vm2102_vm10, %v13495_v34, 0.0  ;;  %v2023_v49 = vpop.f32.mrf.mxu1 }
 0x3ab   :  { %v2024_v61 = vadd.f32 %v2023_v49, %v2009_v5 }
 0x3ac   :  { %v13497_v1 = vpop.eup %12691  ;;  %v2714_v3 = vmul.f32 1.442695, %v2712_v20 }
 0x3ad   :  { %v2481_v37 = vsel %vm2102_vm10, %v13497_v1, 0.0  ;;  %v2038_v35 = vadd.f32 %v13371_v42, %v2024_v61  ;;  %v2590_v42 = vsub.f32 %v13426_v23, %v13484_v18 }
 0x3ae   :  { %2482 = vadd.xlane.f32.xlu0 %v2481_v37  ;;  %12695 = vpow2.f32 %v2714_v3 }
 0x3af   :  { %v12694_v22 = vpop.eup %12693  ;;  %v2542_v56 = vpack.c.bf16 %v2038_v35, %v2038_v35  ;;  %v2592_v10 = vmul.f32 1.442695, %v2590_v42 }
 0x3b0   :  { %v2124_v8 = vmul.f32 %v12694_v22, %v13436_v25  ;;  %v2303_v25 = vpack.c.bf16 %v1998_v45, %v1998_v45 }
 0x3b1   :  { %2479 = vadd.xlane.f32.xlu1 %v2478_v4  ;;  %v2731_v57 = vunpack.c.l.b16 %v2542_v56  ;;  %v2612_v3 = vsel %vm2130_vm8, %v2542_v56, 0 }
 0x3b2   :  { %v2126_v40 = vpack.c.bf16 %v2124_v8, %v2124_v8  ;;  %v2589_v44 = vpop.xlane.xlu2 %2588  ;;  %v2025_v63 = vpop.f32.mrf.mxu1 }
 0x3b3   :  { %v2591_v30 = vsub.f32 %v13448_v41, %v2589_v44  ;;  %v2515_v41 = vunpack.c.l.b16 %v2303_v25  ;;  %v2732_v53 = vpack.c.b16 %v2731_v57, %v2731_v57 }
 0x3b4   :  { %9154 = vmatmul.msk.bf16.vlgmr.msrb.gmra.mxu1 %vm2102_vm10, %v2126_v40  ;;  %v13508_v47 = vpop.eup %12695 }
 0x3b5   :  { %v2594_v46 = vmul.f32 1.442695, %v2591_v30  ;;  %v2718_v38 = vsel %vm2102_vm10, %v13508_v47, 0.0  ;;  %v2516_v31 = vpack.c.b16 %v2515_v41, %v2515_v41 }
 0x3b7   :  { %12697 = vpow2.f32 %v2594_v46 }
 0x3b9   :  { %2719 = vadd.xlane.f32.xlu1 %v2718_v38 }
 0x3ba   :  { %v2254_v50 = vpop.permute.xlu2 %2253 }
 0x3bb   :  { %v2259_v13 = vsel %vm2130_vm8, %v2254_v50, 0 }
 0x3bc   :  { %2268 = vmatpush.bf16.msra.mxu0 %v2259_v13 }
 0x3bd   :  { %v13515_v36 = vpop.eup %12697 }
 0x3be   :  { %v2599_v21 = vsel %vm2102_vm10, %v13515_v36, 0.0 }
 0x3bf   :  { %2600 = vadd.xlane.f32.xlu2 %v2599_v21 }
 0x3c0   :  { %2381 = vmatpush.bf16.msrb.mxu0 %v2372_v52 }
 0x3c2   :  { %v2711_v32 = vpop.xlane.xlu0 %2710  ;;  %2517 = vrot.lane.b32.xlu0 %v2516_v31, %s13082_s10 }
 0x3c3   :  { %v2713_v54 = vsub.f32 %v13455_v62, %v2711_v32  ;;  %v2026_v62 = vadd.f32 %v2025_v63, %v2011_v48 }
 0x3c5   :  { %v2716_v55 = vmul.f32 1.442695, %v2713_v54  ;;  %v2040_v6 = vadd.f32 %v13379_v29, %v2026_v62 }
 0x3c7   :  { %12699 = vpow2.f32 %v2716_v55  ;;  %v2543_v7 = vpack.c.bf16 %v2040_v6, %v2040_v6 }
 0x3c8   :  { %12701 = vpow2.f32 %v2592_v10 }
 0x3c9   :  { %v2755_v12 = vunpack.c.l.b16 %v2543_v7  ;;  %v2631_v21 = vsel %vm2130_vm8, %v2543_v7, 0 }
 0x3ca   :  { %v2358_v14 = vpop.xlane.xlu0 %2357 }
 0x3cb   :  { %v2756_v59 = vpack.c.b16 %v2755_v12, %v2755_v12 }
 0x3cd   :  { %v13522_v15 = vpop.eup %12699 }
 0x3ce   :  { %v2721_v58 = vsel %vm2102_vm10, %v13522_v15, 0.0  ;;  %v13531_v9 = vpop.eup %12701 }
 0x3cf   :  { %2722 = vadd.xlane.f32.xlu2 %v2721_v58  ;;  %v2596_v23 = vsel %vm2102_vm10, %v13531_v9, 0.0 }
 0x3d2   :  { %2733 = vrot.lane.b32.xlu1 %v2732_v53, %s13082_s10 }
 0x3dd   :  { %v2494_v11 = vpop.permute.xlu0 %2493 }
 0x3de   :  { %v2499_v18 = vsel %vm2130_vm8, %v2494_v11, 0 }
 0x3e1   :  { %v2240_v16 = vpop.xlane.xlu1 %2239 }
 0x3e2   :  { %12703 = vrcp.f32 %v2240_v16 }
 0x3e3   :  { %12705 = vrcp.f32 %v2358_v14 }
 0x3e7   :  { %2757 = vrot.lane.b32.xlu2 %v2756_v59, %s13082_s10 }
 0x3e8   :  { %v12704_v24 = vpop.eup %12703 }
 0x3e9   :  { %v2246_v0 = vmul.f32 %v12704_v24, %v13472_v28  ;;  %v12706_v26 = vpop.eup %12705  ;;  %v2391_v28 = vsel %vm2130_vm8, %v2303_v25, 0 }
 0x3ea   :  { %v2364_v2 = vmul.f32 %v12706_v26, %v13460_v51 }
 0x3eb   :  { %v2248_v29 = vpack.c.bf16 %v2246_v0, %v2246_v0 }
 0x3ec   :  { %2597 = vadd.xlane.f32.xlu0 %v2596_v23  ;;  %v2366_v20 = vpack.c.bf16 %v2364_v2, %v2364_v2  ;;  %v9261_v2 = vld [vmem:[#allocation10 + $0xa8] sm:$0xf] }
 0x3ed   :  { %9157 = vmatmul.msk.bf16.vlgmr.msra.gmra.mxu0 %vm2102_vm10, %v2248_v29 }
 0x3ee   :  { %2508 = vmatpush.bf16.msra.mxu0 %v2499_v18 }
 0x3f9   :  { %v2278_v27 = vpop.permute.xlu1 %2277 }
 0x3fa   :  { %v2283_v43 = vsel %vm2130_vm8, %v2278_v27, 0  ;;  %v12005_v27 = vld [vmem:[#allocation10 + $0xb0] sm:$0xf0] }
 0x3fb   :  { %2292 = vmatpush.bf16.msra.mxu1 %v2283_v43  ;;  %v12004_v43 = vld [vmem:[#allocation10 + $0xac] sm:$0xf] }
 0x3fd   :  { %9161 = vmatmul.msk.bf16.vlgmr.msrb.gmra.mxu0 %vm2102_vm10, %v2366_v20  ;;  %v9262_v20 = vor.u32 %v12005_v27, %v9261_v2  ;;  %v9359_v2 = vld [vmem:[#allocation10 + $0x174] sm:$0xf0]  ;;  %v9365_v27 = vld [vmem:[#allocation10 + $0x170] sm:$0xf] }
 0x3fe   :  { %2621 = vmatpush.bf16.msrb.mxu0 %v2612_v3  ;;  %v9249_v3 = vld [vmem:[#allocation10 + $0x90] sm:$0xf] }
 0x3ff   :  { %2400 = vmatpush.bf16.msrb.mxu1 %v2391_v28  ;;  %v9263_v28 = vld [vmem:[#allocation10 + $0xb4] sm:$0xf0]  ;;  %3299 = vmatpush.bf16.msrb.mxu2 %v9262_v20  ;;  %v12030_v20 = vld [vmem:[#allocation10 + $0x178] sm:$0xf0] }
 0x40b   :  { %v13543_v22 = vpop.f32.mrf.mxu0 }
 0x40f   :  { %v2243_v37 = vpop.xlane.xlu0 %2242 }
 0x410   :  { %12707 = vrcp.f32 %v2243_v37  ;;  %v12002_v37 = vld [vmem:[#allocation10 + $0x98] sm:$0xf0] }
 0x411   :  { %v2361_v40 = vpop.xlane.xlu2 %2360 }
 0x412   :  { %12709 = vrcp.f32 %v2361_v40 }
 0x413   :  { %v2145_v8 = vpop.f32.mrf.mxu0 }
 0x414   :  { %v9266_v8 = vor.u32 %v12004_v43, %v9263_v28  ;;  %v9333_v28 = vld [vmem:[#allocation10 + $0x138] sm:$0xf] }
 0x416   :  { %v12708_v33 = vpop.eup %12707 }
 0x417   :  { %v2247_v51 = vmul.f32 %v12708_v33, %v13482_v17  ;;  %v12001_v33 = vld [vmem:[#allocation10 + $0x94] sm:$0xf] }
 0x418   :  { %v12710_v4 = vpop.eup %12709 }
 0x419   :  { %v2249_v39 = vpack.c.bf16 %v2247_v51, %v2247_v51  ;;  %v2365_v44 = vmul.f32 %v12710_v4, %v13488_v19  ;;  %v9251_v51 = vld [vmem:[#allocation10 + $0x9c] sm:$0xf0] }
 0x41a   :  { %v9254_v40 = vor.u32 %v12001_v33, %v9251_v51  ;;  %v12025_v33 = vld [vmem:[#allocation10 + $0x154] sm:$0xf]  ;;  %v9347_v51 = vld [vmem:[#allocation10 + $0x15c] sm:$0xf0] }
 0x41b   :  { %9158 = vmatmul.msk.bf16.vlgmr.msra.gmra.mxu1 %vm2102_vm10, %v2249_v39  ;;  %v2367_v45 = vpack.c.bf16 %v2365_v44, %v2365_v44  ;;  %v9250_v39 = vor.u32 %v12002_v37, %v9249_v3  ;;  %v9237_v44 = vld [vmem:[#allocation10 + $0x78] sm:$0xf]  ;;  %v12023_v3 = vld [vmem:[#allocation10 + $0x140] sm:$0xf0]  ;;  %v9366_v37 = vor.u32 %v12030_v20, %v9365_v27  ;;  %v9293_v27 = vld [vmem:[#allocation10 + $0xe0] sm:$0xf] }
 0x41d   :  { %3300 = vmatpush.bf16.msrb.mxu2 %v9250_v39  ;;  %v9353_v39 = vld [vmem:[#allocation10 + $0x158] sm:$0xf] }
 0x421   :  { %v2483_v46 = vpop.xlane.xlu0 %2482 }
 0x424   :  { %v2480_v30 = vpop.xlane.xlu1 %2479 }
 0x425   :  { %12711 = vrcp.f32 %v2480_v30  ;;  %v11999_v30 = vld [vmem:[#allocation10 + $0x80] sm:$0xf0] }
 0x426   :  { %12713 = vrcp.f32 %v2483_v46  ;;  %v9238_v46 = vor.u32 %v11999_v30, %v9237_v44  ;;  %v12027_v44 = vld [vmem:[#allocation10 + $0x160] sm:$0xf0]  ;;  %v9321_v30 = vld [vmem:[#allocation10 + $0x120] sm:$0xf] }
 0x428   :  { %3301 = vmatpush.bf16.msrb.mxu2 %v9238_v46  ;;  %v9354_v46 = vor.u32 %v12027_v44, %v9353_v39 }
 0x42b   :  { %9162 = vmatmul.msk.bf16.vlgmr.msrb.gmra.mxu1 %vm2102_vm10, %v2367_v45  ;;  %v12712_v25 = vpop.eup %12711  ;;  %v11998_v45 = vld [vmem:[#allocation10 + $0x7c] sm:$0xf] }
 0x42c   :  { %v2486_v38 = vmul.f32 %v12712_v25, %v13495_v34  ;;  %v12714_v13 = vpop.eup %12713  ;;  %v2720_v34 = vpop.xlane.xlu1 %2719  ;;  %v9239_v25 = vld [vmem:[#allocation10 + $0x84] sm:$0xf0] }
 0x42d   :  { %v2487_v52 = vmul.f32 %v12714_v13, %v13497_v1  ;;  %v9242_v13 = vor.u32 %v11998_v45, %v9239_v25  ;;  %v12020_v45 = vld [vmem:[#allocation10 + $0x128] sm:$0xf0] }
 0x42e   :  { %v2488_v50 = vpack.c.bf16 %v2486_v38, %v2486_v38  ;;  %v9225_v38 = vld [vmem:[#allocation10 + $0x60] sm:$0xf]  ;;  %v9322_v25 = vor.u32 %v12020_v45, %v9321_v30  ;;  %v9453_v30 = vld [vmem:[#allocation10 + $0x228] sm:$0xf]  ;;  %v12053_v45 = vld [vmem:[#allocation10 + $0x230] sm:$0xf0] }
 0x42f   :  { %v2489_v49 = vpack.c.bf16 %v2487_v52, %v2487_v52  ;;  %v11995_v52 = vld [vmem:[#allocation10 + $0x64] sm:$0xf] }
 0x430   :  { %9165 = vmatmul.msk.bf16.vlgmr.msra.gmra.mxu0 %vm2102_vm10, %v2488_v50  ;;  %v11996_v50 = vld [vmem:[#allocation10 + $0x68] sm:$0xf0] }
 0x431   :  { %v13550_v17 = vpop.f32.mrf.mxu1 }
 0x432   :  { %v2601_v5 = vpop.xlane.xlu2 %2600 }
 0x433   :  { %12715 = vrcp.f32 %v2601_v5  ;;  %v9213_v5 = vld [vmem:[#allocation10 + $0x48] sm:$0xf] }
 0x434   :  { %v2518_v41 = vpop.permute.xlu0 %2517 }
 0x435   :  { %v2523_v19 = vsel %vm2130_vm8, %v2518_v41, 0  ;;  %v9227_v41 = vld [vmem:[#allocation10 + $0x6c] sm:$0xf0] }
 0x436   :  { %2532 = vmatpush.bf16.msra.mxu1 %v2523_v19  ;;  %v9226_v19 = vor.u32 %v11996_v50, %v9225_v38  ;;  %v12022_v38 = vld [vmem:[#allocation10 + $0x13c] sm:$0xf]  ;;  %v9335_v50 = vld [vmem:[#allocation10 + $0x144] sm:$0xf0] }
 0x438   :  { %3302 = vmatpush.bf16.msrb.mxu2 %v9226_v19 }
 0x439   :  { %v2164_v31 = vpop.f32.mrf.mxu1  ;;  %v12716_v32 = vpop.eup %12715 }
 0x43a   :  { %2640 = vmatpush.bf16.msrb.mxu1 %v2631_v21  ;;  %v2605_v54 = vmul.f32 %v12716_v32, %v13515_v36  ;;  %v9230_v21 = vor.u32 %v11995_v52, %v9227_v41  ;;  %v11993_v31 = vld [vmem:[#allocation10 + $0x50] sm:$0xf0]  ;;  %v12024_v52 = vld [vmem:[#allocation10 + $0x148] sm:$0xf0]  ;;  %v9338_v41 = vor.u32 %v12022_v38, %v9335_v50 }
 0x43b   :  { %9166 = vmatmul.msk.bf16.vlgmr.msra.gmra.mxu1 %vm2102_vm10, %v2489_v49  ;;  %v9214_v32 = vor.u32 %v11993_v31, %v9213_v5  ;;  %v12017_v5 = vld [vmem:[#allocation10 + $0x110] sm:$0xf0]  ;;  %v12052_v38 = vld [vmem:[#allocation10 + $0x22c] sm:$0xf] }
 0x43c   :  { %v2607_v55 = vpack.c.bf16 %v2605_v54, %v2605_v54  ;;  %v9201_v54 = vld [vmem:[#allocation10 + $0x30] sm:$0xf] }
 0x43d   :  { %3303 = vmatpush.bf16.msrb.mxu2 %v9214_v32  ;;  %v9323_v32 = vld [vmem:[#allocation10 + $0x12c] sm:$0xf0] }
 0x442   :  { %v2723_v61 = vpop.xlane.xlu2 %2722 }
 0x443   :  { %12717 = vrcp.f32 %v2723_v61  ;;  %v9215_v61 = vld [vmem:[#allocation10 + $0x54] sm:$0xf0] }
 0x444   :  { %v2734_v35 = vpop.permute.xlu1 %2733 }
 0x445   :  { %v2739_v1 = vsel %vm2130_vm8, %v2734_v35, 0  ;;  %v11990_v35 = vld [vmem:[#allocation10 + $0x38] sm:$0xf0] }
 0x446   :  { %2748 = vmatpush.bf16.msra.mxu0 %v2739_v1 }
 0x449   :  { %v12718_v58 = vpop.eup %12717 }
 0x44a   :  { %v2758_v56 = vpop.permute.xlu2 %2757  ;;  %v2727_v53 = vmul.f32 %v12718_v58, %v13522_v15 }
 0x44b   :  { %9170 = vmatmul.msk.bf16.vlgmr.msrb.gmra.mxu1 %vm2102_vm10, %v2607_v55  ;;  %v2763_v57 = vsel %vm2130_vm8, %v2758_v56, 0  ;;  %v11989_v55 = vld [vmem:[#allocation10 + $0x34] sm:$0xf]  ;;  %v9203_v56 = vld [vmem:[#allocation10 + $0x3c] sm:$0xf0] }
 0x44c   :  { %2772 = vmatpush.bf16.msra.mxu1 %v2763_v57  ;;  %v2729_v48 = vpack.c.bf16 %v2727_v53, %v2727_v53  ;;  %v9202_v57 = vor.u32 %v11990_v35, %v9201_v54  ;;  %v9206_v58 = vor.u32 %v11989_v55, %v9203_v56  ;;  %v12021_v35 = vld [vmem:[#allocation10 + $0x130] sm:$0xf0]  ;;  %v9297_v55 = vld [vmem:[#allocation10 + $0xf0] sm:$0xf]  ;;  %v12014_v56 = vld [vmem:[#allocation10 + $0xf8] sm:$0xf0] }
 0x44e   :  { %3304 = vmatpush.bf16.msrb.mxu2 %v9202_v57 }
 0x450   :  { %3341 = vmatpush.bf16.msrb.mxu1 %v9266_v8  ;;  %v9334_v8 = vor.u32 %v12023_v3, %v9333_v28 }
 0x454   :  { %3342 = vmatpush.bf16.msrb.mxu1 %v9254_v40  ;;  %v9350_v40 = vor.u32 %v12025_v33, %v9347_v51  ;;  %v9281_v33 = vld [vmem:[#allocation10 + $0xc8] sm:$0xf]  ;;  %v12009_v51 = vld [vmem:[#allocation10 + $0xd0] sm:$0xf0] }
 0x458   :  { %3343 = vmatpush.bf16.msrb.mxu1 %v9242_v13  ;;  %v9341_v13 = vld [vmem:[#allocation10 + $0x140] sm:$0xf] }
 0x45b   :  { %9174 = vmatmul.msk.bf16.vlgmr.msra.gmra.mxu1 %vm2102_vm10, %v2729_v48  ;;  %v9357_v48 = vld [vmem:[#allocation10 + $0x168] sm:$0xf] }
 0x45c   :  { %3344 = vmatpush.bf16.msrb.mxu1 %v9230_v21  ;;  %v9342_v21 = vor.u32 %v12024_v52, %v9341_v13  ;;  %v9455_v13 = vld [vmem:[#allocation10 + $0x234] sm:$0xf0] }
 0x45d   :  { %v9429_v52 = vld [vmem:[#allocation10 + $0x1f8] sm:$0xf] }
 0x45f   :  { %v2598_v63 = vpop.xlane.xlu0 %2597 }
 0x460   :  { %12719 = vrcp.f32 %v2598_v63  ;;  %v12029_v63 = vld [vmem:[#allocation10 + $0x170] sm:$0xf0] }
 0x461   :  { %12721 = vrcp.f32 %v2720_v34  ;;  %v11992_v34 = vld [vmem:[#allocation10 + $0x4c] sm:$0xf] }
 0x462   :  { %v9218_v1 = vor.u32 %v11992_v34, %v9215_v61  ;;  %v12019_v34 = vld [vmem:[#allocation10 + $0x124] sm:$0xf]  ;;  %v9329_v61 = vld [vmem:[#allocation10 + $0x128] sm:$0xf] }
 0x463   :  { %v9326_v54 = vor.u32 %v12019_v34, %v9323_v32  ;;  %v12046_v32 = vld [vmem:[#allocation10 + $0x1fc] sm:$0xf] }
 0x464   :  { %3345 = vmatpush.bf16.msrb.mxu1 %v9218_v1  ;;  %v9330_v1 = vor.u32 %v12021_v35, %v9329_v61  ;;  %v9431_v61 = vld [vmem:[#allocation10 + $0x204] sm:$0xf0]  ;;  %v12044_v35 = vld [vmem:[#allocation10 + $0x1e8] sm:$0xf0] }
 0x466   :  { %v12720_v36 = vpop.eup %12719 }
 0x467   :  { %v2604_v62 = vmul.f32 %v12720_v36, %v13531_v9  ;;  %v12722_v7 = vpop.eup %12721  ;;  %v9189_v36 = vld [vmem:[#allocation10 + $0x18] sm:$0xf] }
 0x468   :  { %v2726_v12 = vmul.f32 %v12722_v7, %v13508_v47  ;;  %3346 = vmatpush.bf16.msrb.mxu1 %v9206_v58  ;;  %v9191_v7 = vld [vmem:[#allocation10 + $0x24] sm:$0xf0]  ;;  %v9298_v58 = vor.u32 %v12014_v56, %v9297_v55  ;;  %v9461_v55 = vld [vmem:[#allocation10 + $0x230] sm:$0xf]  ;;  %v12054_v56 = vld [vmem:[#allocation10 + $0x238] sm:$0xf0] }
 0x469   :  { %v2606_v6 = vpack.c.bf16 %v2604_v62, %v2604_v62  ;;  %v9358_v62 = vor.u32 %v12029_v63, %v9357_v48  ;;  %v12016_v48 = vld [vmem:[#allocation10 + $0x10c] sm:$0xf]  ;;  %v9311_v63 = vld [vmem:[#allocation10 + $0x114] sm:$0xf0] }
 0x46a   :  { %v2270_v42 = vpop.f32.mrf.mxu0  ;;  %v2728_v16 = vpack.c.bf16 %v2726_v12, %v2726_v12 }
 0x46b   :  { %9169 = vmatmul.msk.bf16.vlgmr.msrb.gmra.mxu0 %vm2102_vm10, %v2606_v6  ;;  %v11987_v6 = vld [vmem:[#allocation10 + $0x20] sm:$0xf0]  ;;  %3313 = vmatpush.bf16.msra.mxu3 %v9358_v62  ;;  %v9314_v62 = vor.u32 %v12016_v48, %v9311_v63 }
 0x472   :  { %v2272_v10 = vpop.f32.mrf.mxu0 }
 0x473   :  { %v9190_v10 = vor.u32 %v11987_v6, %v9189_v36  ;;  %v9317_v36 = vld [vmem:[#allocation10 + $0x110] sm:$0xf]  ;;  %v12018_v6 = vld [vmem:[#allocation10 + $0x118] sm:$0xf0] }
 0x475   :  { %3305 = vmatpush.bf16.msrb.mxu2 %v9190_v10  ;;  %v9318_v10 = vor.u32 %v12018_v6, %v9317_v36  ;;  %v12043_v36 = vld [vmem:[#allocation10 + $0x1e4] sm:$0xf]  ;;  %v9405_v6 = vld [vmem:[#allocation10 + $0x1c8] sm:$0xf] }
 0x47a   :  { %v13566_v14 = vpop.f32.mrf.mxu0 }
 0x47b   :  { %9173 = vmatmul.msk.bf16.vlgmr.msra.gmra.mxu0 %vm2102_vm10, %v2728_v16  ;;  %v9345_v16 = vld [vmem:[#allocation10 + $0x150] sm:$0xf] }
 0x482   :  { %v2385_v15 = vpop.f32.mrf.mxu0 }
 0x483   :  { %v12026_v15 = vld [vmem:[#allocation10 + $0x158] sm:$0xf0] }
 0x498   :  { %v2294_v59 = vpop.f32.mrf.mxu1 }
 0x499   :  { %v12654_v24 = vpack.i.bf16 %v2294_v59, %v2270_v42  ;;  %v11986_v42 = vld [vmem:[#allocation10 + $0x1c] sm:$0xf]  ;;  %v9177_v59 = vld [vmem:[#allocation10] sm:$0xf] }
 0x49a   :  { %v9194_v12 = vor.u32 %v11986_v42, %v9191_v7  ;;  %v9285_v42 = vld [vmem:[#allocation10 + $0xd8] sm:$0xf]  ;;  %v12011_v7 = vld [vmem:[#allocation10 + $0xe0] sm:$0xf0] }
 0x49b   :  { %12655 = vrot.lane.b32.xlu1 %v12654_v24, %s13082_s10  ;;  %v9346_v24 = vor.u32 %v12026_v15, %v9345_v16  ;;  %v12013_v16 = vld [vmem:[#allocation10 + $0xf4] sm:$0xf]  ;;  %v9299_v15 = vld [vmem:[#allocation10 + $0xfc] sm:$0xf0] }
 0x49c   :  { %3347 = vmatpush.bf16.msrb.mxu1 %v9194_v12  ;;  %v9286_v12 = vor.u32 %v12011_v7, %v9285_v42  ;;  %v12041_v42 = vld [vmem:[#allocation10 + $0x1d0] sm:$0xf0] }
 0x49d   :  { %3314 = vmatpush.bf16.msra.mxu3 %v9346_v24  ;;  %v9302_v24 = vor.u32 %v12013_v16, %v9299_v15  ;;  %v9449_v15 = vld [vmem:[#allocation10 + $0x218] sm:$0xf] }
 0x4a0   :  { %v2296_v9 = vpop.f32.mrf.mxu1 }
 0x4a1   :  { %v11984_v9 = vld [vmem:[#allocation10 + $0x8] sm:$0xf0]  ;;  %3315 = vmatpush.bf16.msra.mxu3 %v9334_v8  ;;  %v9275_v8 = vld [vmem:[#allocation10 + $0xcc] sm:$0xf0] }
 0x4a5   :  { %3316 = vmatpush.bf16.msra.mxu3 %v9322_v25  ;;  %v12050_v25 = vld [vmem:[#allocation10 + $0x218] sm:$0xf0] }
 0x4a8   :  { %v13570_v0 = vpop.f32.mrf.mxu1 }
 0x4ad   :  { %v2510_v11 = vpop.f32.mrf.mxu0 }
 0x4b0   :  { %v2404_v29 = vpop.f32.mrf.mxu1 }
 0x4b1   :  { %v9179_v29 = vld [vmem:[#allocation10 + $0xc] sm:$0xf0] }
 0x4b5   :  { %v2512_v23 = vpop.f32.mrf.mxu0 }
 0x4b6   :  { %v9178_v23 = vor.u32 %v11984_v9, %v9177_v59  ;;  %v9305_v59 = vld [vmem:[#allocation10 + $0xf8] sm:$0xf]  ;;  %v12015_v9 = vld [vmem:[#allocation10 + $0x100] sm:$0xf0] }
 0x4b8   :  { %v2534_v18 = vpop.f32.mrf.mxu1  ;;  %3306 = vmatpush.bf16.msrb.mxu2 %v9178_v23  ;;  %v12008_v23 = vld [vmem:[#allocation10 + $0xc8] sm:$0xf0] }
 0x4b9   :  { %v12659_v26 = vpack.i.bf16 %v2534_v18, %v2510_v11  ;;  %v11983_v11 = vld [vmem:[#allocation10 + $0x4] sm:$0xf] }
 0x4ba   :  { %v9182_v18 = vor.u32 %v11983_v11, %v9179_v29  ;;  %v9306_v11 = vor.u32 %v12015_v9, %v9305_v59  ;;  %v9273_v29 = vld [vmem:[#allocation10 + $0xc0] sm:$0xf]  ;;  %v12051_v59 = vld [vmem:[#allocation10 + $0x220] sm:$0xf0]  ;;  %v9406_v9 = vor.u32 %v12041_v42, %v9405_v6  ;;  %v9233_v6 = vld [vmem:[#allocation10 + $0x68] sm:$0xf] }
 0x4bb   :  { %12660 = vrot.lane.b32.xlu2 %v12659_v26, %s13082_s10 }
 0x4bc   :  { %3348 = vmatpush.bf16.msrb.mxu1 %v9182_v18  ;;  %v12010_v18 = vld [vmem:[#allocation10 + $0xdc] sm:$0xf] }
 0x4c0   :  { %v2536_v47 = vpop.f32.mrf.mxu1  ;;  %3397 = vmatpush.bf16.msra.mxu1 %v9366_v37  ;;  %v12007_v37 = vld [vmem:[#allocation10 + $0xc4] sm:$0xf] }
 0x4c1   :  { %v12028_v47 = vld [vmem:[#allocation10 + $0x16c] sm:$0xf]  ;;  %v9278_v39 = vor.u32 %v12007_v37, %v9275_v8  ;;  %v9381_v37 = vld [vmem:[#allocation10 + $0x198] sm:$0xf]  ;;  %v12035_v8 = vld [vmem:[#allocation10 + $0x1a0] sm:$0xf0] }
 0x4c2   :  { %v9362_v43 = vor.u32 %v12028_v47, %v9359_v2  ;;  %v9274_v47 = vor.u32 %v12008_v23, %v9273_v29  ;;  %v9287_v2 = vld [vmem:[#allocation10 + $0xe4] sm:$0xf0]  ;;  %v9407_v29 = vld [vmem:[#allocation10 + $0x1d4] sm:$0xf0]  ;;  %v9393_v23 = vld [vmem:[#allocation10 + $0x1b0] sm:$0xf] }
 0x4c3   :  { %v9290_v28 = vor.u32 %v12010_v18, %v9287_v2  ;;  %v9450_v18 = vor.u32 %v12051_v59, %v9449_v15 }
 0x4c4   :  { %3355 = vmatpush.bf16.msra.mxu2 %v9362_v43  ;;  %3398 = vmatpush.bf16.msra.mxu1 %v9354_v46  ;;  %v12012_v43 = vld [vmem:[#allocation10 + $0xe8] sm:$0xf0]  ;;  %v9454_v46 = vor.u32 %v12053_v45, %v9453_v30  ;;  %v12045_v30 = vld [vmem:[#allocation10 + $0x1f0] sm:$0xf0] }
 0x4c5   :  { %v9294_v3 = vor.u32 %v12012_v43, %v9293_v27 }
 0x4c6   :  { %3327 = vmatpush.bf16.msrb.mxu0 %v9454_v46  ;;  %v12034_v46 = vld [vmem:[#allocation10 + $0x19c] sm:$0xf] }
 0x4c8   :  { %v13573_v4 = vpop.f32.mrf.mxu1  ;;  %3356 = vmatpush.bf16.msra.mxu2 %v9350_v40  ;;  %3399 = vmatpush.bf16.msra.mxu1 %v9342_v21  ;;  %v9282_v40 = vor.u32 %v12009_v51, %v9281_v33  ;;  %v9458_v21 = vor.u32 %v12052_v38, %v9455_v13  ;;  %v9369_v38 = vld [vmem:[#allocation10 + $0x180] sm:$0xf] }
 0x4cc   :  { %3357 = vmatpush.bf16.msra.mxu2 %v9338_v41  ;;  %3400 = vmatpush.bf16.msra.mxu1 %v9330_v1  ;;  %v12047_v41 = vld [vmem:[#allocation10 + $0x200] sm:$0xf0] }
 0x4cd   :  { %v9430_v34 = vor.u32 %v12047_v41, %v9429_v52  ;;  %v12006_v52 = vld [vmem:[#allocation10 + $0xb8] sm:$0xf0]  ;;  %v9413_v41 = vld [vmem:[#allocation10 + $0x1d0] sm:$0xf] }
 0x4d0   :  { %v2644_v49 = vpop.f32.mrf.mxu1  ;;  %3358 = vmatpush.bf16.msra.mxu2 %v9326_v54  ;;  %3401 = vmatpush.bf16.msra.mxu1 %v9318_v10  ;;  %v9417_v54 = vld [vmem:[#allocation10 + $0x1e0] sm:$0xf] }
 0x4d1   :  { %v9309_v49 = vld [vmem:[#allocation10 + $0x108] sm:$0xf]  ;;  %v9418_v63 = vor.u32 %v12044_v35, %v9417_v54  ;;  %v12039_v54 = vld [vmem:[#allocation10 + $0x1c0] sm:$0xf0] }
 0x4d2   :  { %v9310_v31 = vor.u32 %v12017_v5, %v9309_v49  ;;  %v12049_v49 = vld [vmem:[#allocation10 + $0x214] sm:$0xf]  ;;  %v9443_v5 = vld [vmem:[#allocation10 + $0x21c] sm:$0xf0] }
 0x4d4   :  { %3317 = vmatpush.bf16.msra.mxu3 %v9310_v31  ;;  %3359 = vmatpush.bf16.msra.mxu2 %v9314_v62  ;;  %v9446_v31 = vor.u32 %v12049_v49, %v9443_v5  ;;  %v9419_v62 = vld [vmem:[#allocation10 + $0x1ec] sm:$0xf0] }
 0x4d5   :  { %3402 = vmatpush.bf16.msra.mxu1 %v9306_v11  ;;  %v12040_v11 = vld [vmem:[#allocation10 + $0x1cc] sm:$0xf] }
 0x4d6   :  { %v9410_v2 = vor.u32 %v12040_v11, %v9407_v29  ;;  %v9209_v29 = vld [vmem:[#allocation10 + $0x38] sm:$0xf] }
 0x4d8   :  { %v13575_v53 = vpop.f32.mrf.mxu1  ;;  %3318 = vmatpush.bf16.msra.mxu3 %v9298_v58  ;;  %3360 = vmatpush.bf16.msra.mxu2 %v9302_v24  ;;  %v9422_v24 = vor.u32 %v12043_v36, %v9419_v62  ;;  %v12031_v36 = vld [vmem:[#allocation10 + $0x184] sm:$0xf]  ;;  %v9371_v62 = vld [vmem:[#allocation10 + $0x18c] sm:$0xf0] }
 0x4d9   :  { %3403 = vmatpush.bf16.msra.mxu1 %v9294_v3  ;;  %v9395_v3 = vld [vmem:[#allocation10 + $0x1bc] sm:$0xf0]  ;;  %v9374_v42 = vor.u32 %v12031_v36, %v9371_v62  ;;  %v12729_v62 = vld [vmem:[#allocation2 + $0x10] sm:$0xff] }
 0x4dc   :  { %3319 = vmatpush.bf16.msra.mxu3 %v9286_v12  ;;  %3361 = vmatpush.bf16.msra.mxu2 %v9290_v28  ;;  %v9462_v12 = vor.u32 %v12054_v56, %v9461_v55  ;;  %v12037_v28 = vld [vmem:[#allocation10 + $0x1b4] sm:$0xf]  ;;  %v9245_v55 = vld [vmem:[#allocation10 + $0x80] sm:$0xf]  ;;  %v12000_v56 = vld [vmem:[#allocation10 + $0x88] sm:$0xf0] }
 0x4dd   :  { %3404 = vmatpush.bf16.msra.mxu1 %v9282_v40  ;;  %v9398_v45 = vor.u32 %v12037_v28, %v9395_v3 }
 0x4e0   :  { %v2776_v26 = vpop.f32.mrf.mxu1  ;;  %3320 = vmatpush.bf16.msra.mxu3 %v9274_v47  ;;  %3362 = vmatpush.bf16.msra.mxu2 %v9278_v39  ;;  %v12048_v47 = vld [vmem:[#allocation10 + $0x208] sm:$0xf0] }
 0x4e4   :  { %3369 = vmatpush.bf16.msrb.mxu3 %v9458_v21 }
 0x4e8   :  { %v13577_v19 = vpop.f32.mrf.mxu0  ;;  %3370 = vmatpush.bf16.msrb.mxu3 %v9446_v31 }
 0x4f0   :  { %v2625_v57 = vpop.f32.mrf.mxu0 }
 0x4f1   :  { %v9434_v57 = vor.u32 %v12046_v32, %v9431_v61  ;;  %v12003_v32 = vld [vmem:[#allocation10 + $0xa0] sm:$0xf0]  ;;  %v9401_v61 = vld [vmem:[#allocation10 + $0x1b8] sm:$0xf] }
 0x4f3   :  { %3371 = vmatpush.bf16.msrb.mxu3 %v9434_v57  ;;  %v9389_v57 = vld [vmem:[#allocation10 + $0x1a0] sm:$0xf] }
 0x4f7   :  { %3372 = vmatpush.bf16.msrb.mxu3 %v9422_v24  ;;  %v9221_v24 = vld [vmem:[#allocation10 + $0x50] sm:$0xf] }
 0x4f8   :  { %v2750_v26 = vpop.f32.mrf.mxu0 }
 0x4f9   :  { %v12664_v20 = vpack.i.bf16 %v13575_v53, %v2750_v26  ;;  %v9441_v53 = vld [vmem:[#allocation10 + $0x210] sm:$0xf]  ;;  %v9437_v26 = vld [vmem:[#allocation10 + $0x200] sm:$0xf] }
 0x4fa   :  { %v9442_v50 = vor.u32 %v12050_v25, %v9441_v53  ;;  %v9438_v39 = vor.u32 %v12048_v47, %v9437_v26  ;;  %v9382_v53 = vor.u32 %v12035_v8, %v9381_v37  ;;  %v9383_v25 = vld [vmem:[#allocation10 + $0x1a4] sm:$0xf0] }
 0x4fb   :  { %12665 = vrot.lane.b32.xlu0 %v12664_v20, %s13082_s10  ;;  %3373 = vmatpush.bf16.msrb.mxu3 %v9410_v2  ;;  %v9386_v21 = vor.u32 %v12034_v46, %v9383_v25  ;;  %v9185_v47 = vld [vmem:[#allocation10 + $0x8] sm:$0xf]  ;;  %v11985_v2 = vld [vmem:[#allocation10 + $0x10] sm:$0xf0] }
 0x4fc   :  { %3328 = vmatpush.bf16.msrb.mxu0 %v9442_v50  ;;  %v12032_v50 = vld [vmem:[#allocation10 + $0x188] sm:$0xf0] }
 0x4fd   :  { %v9370_v49 = vor.u32 %v12032_v50, %v9369_v38 }
 0x4ff   :  { %3374 = vmatpush.bf16.msrb.mxu3 %v9398_v45 }
 0x500   :  { %v2752_v44 = vpop.f32.mrf.mxu0  ;;  %3329 = vmatpush.bf16.msrb.mxu0 %v9430_v34  ;;  %v9257_v34 = vld [vmem:[#allocation10 + $0x98] sm:$0xf] }
 0x501   :  { %v9425_v44 = vld [vmem:[#allocation10 + $0x1e8] sm:$0xf]  ;;  %v9258_v35 = vor.u32 %v12003_v32, %v9257_v34 }
 0x502   :  { %v9426_v13 = vor.u32 %v12045_v30, %v9425_v44 }
 0x503   :  { %3375 = vmatpush.bf16.msrb.mxu3 %v9386_v21 }
 0x504   :  { %3330 = vmatpush.bf16.msrb.mxu0 %v9418_v63 }
 0x507   :  { %3376 = vmatpush.bf16.msrb.mxu3 %v9374_v42 }
 0x508   :  { %3331 = vmatpush.bf16.msrb.mxu0 %v9406_v9  ;;  %v11994_v9 = vld [vmem:[#allocation10 + $0x58] sm:$0xf0] }
 0x509   :  { %v9222_v11 = vor.u32 %v11994_v9, %v9221_v24  ;;  %v12730_v24 = vld [vmem:[#allocation2 + $0x20] sm:$0xff] }
 0x50d   :  { %v12656_v1 = vpop.permute.xlu1 %12655 }
 0x50e   :  { %v12658_v58 = vunpack.i.h.bf16 %v12656_v1  ;;  %v12657_v48 = vunpack.i.l.bf16 %v12656_v1  ;;  %v9402_v1 = vor.u32 %v12039_v54, %v9401_v61  ;;  %v12727_v61 = vld [vmem:[#allocation2 + $0x8] sm:$0xff] }
 0x510   :  { %v2803_v7 = vsel %vm2059_vm7, %v13550_v17, %v12658_v58  ;;  %v2802_v10 = vsel %vm2059_vm7, %v13543_v22, %v12657_v48  ;;  %v12038_v17 = vld [vmem:[#allocation10 + $0x1b8] sm:$0xf0]  ;;  %v12036_v58 = vld [vmem:[#allocation10 + $0x1a8] sm:$0xf0]  ;;  %v9246_v48 = vor.u32 %v12000_v56, %v9245_v55 }
 0x511   :  { %v13585_v16 = vpack.c.bf16 %v2803_v7, %v2802_v10  ;;  %v9394_v20 = vor.u32 %v12038_v17, %v9393_v23  ;;  %v9390_v63 = vor.u32 %v12036_v58, %v9389_v57  ;;  %v11997_v7 = vld [vmem:[#allocation10 + $0x70] sm:$0xf0]  ;;  %v9377_v10 = vld [vmem:[#allocation10 + $0x188] sm:$0xf]  ;;  %v11991_v23 = vld [vmem:[#allocation10 + $0x40] sm:$0xf0] }
 0x512   :  { %v9234_v15 = vor.u32 %v11997_v7, %v9233_v6  ;;  %v9210_v17 = vor.u32 %v11991_v23, %v9209_v29  ;;  %v12728_v57 = vld [vmem:[#allocation2] sm:$0xff]  ;;  %v12731_v23 = vld [vmem:[#allocation2 + $0x18] sm:$0xff] }
 0x513   :  { %3307 = vmatmul.bf16.vlgmr.msrb.gmra.mxu2 %v13585_v16  ;;  %3349 = vmatmul.bf16.vlgmr.msrb.gmra.mxu1 %v13585_v16 }
 0x514   :  { %3411 = vmatpush.bf16.msrb.mxu2 %v9462_v12  ;;  %3332 = vmatpush.bf16.msrb.mxu0 %v9394_v20  ;;  %v12033_v12 = vld [vmem:[#allocation10 + $0x190] sm:$0xf0] }
 0x515   :  { %v12661_v22 = vpop.permute.xlu2 %12660  ;;  %v9378_v59 = vor.u32 %v12033_v12, %v9377_v10 }
 0x516   :  { %v12663_v27 = vunpack.i.h.bf16 %v12661_v22  ;;  %v12662_v43 = vunpack.i.l.bf16 %v12661_v22  ;;  %v11988_v22 = vld [vmem:[#allocation10 + $0x28] sm:$0xf0] }
 0x518   :  { %v2805_v33 = vsel %vm2059_vm7, %v13570_v0, %v12663_v27  ;;  %v2804_v51 = vsel %vm2059_vm7, %v13566_v14, %v12662_v43  ;;  %3412 = vmatpush.bf16.msrb.mxu2 %v9450_v18  ;;  %v9269_v0 = vld [vmem:[#allocation10 + $0xb0] sm:$0xf]  ;;  %v12042_v14 = vld [vmem:[#allocation10 + $0x1d8] sm:$0xf0]  ;;  %3333 = vmatpush.bf16.msrb.mxu0 %v9382_v53  ;;  %v9197_v18 = vld [vmem:[#allocation10 + $0x20] sm:$0xf]  ;;  %v9186_v27 = vor.u32 %v11985_v2, %v9185_v47 }
 0x519   :  { %v2809_v40 = vpack.c.bf16 %v2805_v33, %v2804_v51  ;;  %v9270_v5 = vor.u32 %v12006_v52, %v9269_v0  ;;  %v9414_v31 = vor.u32 %v12042_v14, %v9413_v41  ;;  %v9198_v26 = vor.u32 %v11988_v22, %v9197_v18  ;;  %v2907_v53 = vld [vmem:[#allocation11] sm:$0x7]  ;;  %v12732_v22 = vld [vmem:[#allocation2 + $0x28] sm:$0xff] }
 0x51a   :  { %v2910_v25 = vperm.slane %v2907_v53, 1  ;;  %v2909_v38 = vperm.slane %v2907_v53, 0  ;;  %v2911_v41 = vperm.slane %v2907_v53, 2  ;;  %v10137_v53 = vld [vmem:[#allocation16 + $0x540] sm:$0xf] }
 0x51b   :  { %3321 = vmatmul.bf16.vlgmr.msra.gmra.mxu3 %v2809_v40 }
 0x51c   :  { %3413 = vmatpush.bf16.msrb.mxu2 %v9438_v39  ;;  %3334 = vmatpush.bf16.msrb.mxu0 %v9370_v49 }
 0x520   :  { %3414 = vmatpush.bf16.msrb.mxu2 %v9426_v13  ;;  %3383 = vmatpush.bf16.msra.mxu0 %v9270_v5 }
 0x523   :  { %3363 = vmatmul.bf16.vlgmr.msra.gmra.mxu2 %v2809_v40  ;;  %3405 = vmatmul.bf16.vlgmr.msra.gmra.mxu1 %v2809_v40 }
 0x524   :  { %3415 = vmatpush.bf16.msrb.mxu2 %v9414_v31  ;;  %3384 = vmatpush.bf16.msra.mxu0 %v9258_v35 }
 0x528   :  { %3416 = vmatpush.bf16.msrb.mxu2 %v9402_v1  ;;  %3385 = vmatpush.bf16.msra.mxu0 %v9246_v48 }
 0x52c   :  { %3417 = vmatpush.bf16.msrb.mxu2 %v9390_v63  ;;  %3386 = vmatpush.bf16.msra.mxu0 %v9234_v15 }
 0x530   :  { %3418 = vmatpush.bf16.msrb.mxu2 %v9378_v59  ;;  %3387 = vmatpush.bf16.msra.mxu0 %v9222_v11 }
 0x534   :  { %3388 = vmatpush.bf16.msra.mxu0 %v9210_v17 }
 0x538   :  { %3389 = vmatpush.bf16.msra.mxu0 %v9198_v26 }
 0x53c   :  { %3390 = vmatpush.bf16.msra.mxu0 %v9186_v27  ;;  %v9801_v27 = vld [vmem:[#allocation16 + $0x2a0] sm:$0xf] }
 0x56d   :  { %v12666_v43 = vpop.permute.xlu0 %12665 }
 0x56e   :  { %v12668_v20 = vunpack.i.h.bf16 %v12666_v43  ;;  %v12667_v28 = vunpack.i.l.bf16 %v12666_v43  ;;  %v12145_v43 = vld [vmem:[#allocation16 + $0x2cc] sm:$0xf0] }
 0x570   :  { %v2807_v3 = vsel %vm2059_vm7, %v13573_v4, %v12668_v20  ;;  %v2806_v37 = vsel %vm2059_vm7, %v13577_v19, %v12667_v28  ;;  %v10185_v20 = vld [vmem:[#allocation16 + $0x5a0] sm:$0xf]  ;;  %v9802_v28 = vor.u32 %v12145_v43, %v9801_v27  ;;  %v9611_v27 = vld [vmem:[#allocation16 + $0x150] sm:$0xf0] }
 0x571   :  { %v2810_v8 = vpack.c.bf16 %v2807_v3, %v2806_v37  ;;  %v12241_v3 = vld [vmem:[#allocation16 + $0x5cc] sm:$0xf0]  ;;  %v10569_v37 = vld [vmem:[#allocation16 + $0x8a0] sm:$0xf] }
 0x572   :  { %5278 = vmatpush.bf16.msra.mxu3 %v9802_v28 }
 0x573   :  { %3335 = vmatmul.bf16.vlgmr.msrb.gmra.mxu0 %v2810_v8  ;;  %3377 = vmatmul.bf16.vlgmr.msrb.gmra.mxu3 %v2810_v8 }
 0x574   :  { %3419 = vmatmul.bf16.vlgmr.msrb.gmra.mxu2 %v2810_v8  ;;  %v12337_v8 = vld [vmem:[#allocation16 + $0x8cc] sm:$0xf0] }
 0x583   :  { %3391 = vmatmul.bf16.vlgmr.msra.gmra.mxu0 %v13585_v16 }
 0x590   :  { %v3350_v40 = vpop.f32.mrf.mxu1 }
 0x591   :  { %v3351_v13 = vadd.f32 %v3350_v40, %v2910_v25  ;;  %v9803_v40 = vld [vmem:[#allocation16 + $0x2d0] sm:$0xf0] }
 0x596   :  { %v3308_v33 = vpop.f32.mrf.mxu2 }
 0x597   :  { %v3309_v0 = vadd.f32 %v3308_v33, %v2909_v38  ;;  %v10186_v33 = vor.u32 %v12241_v3, %v10185_v20 }
 0x598   :  { %v3352_v46 = vpop.f32.mrf.mxu1 }
 0x599   :  { %v3353_v32 = vadd.f32 %v3352_v46, %v2910_v25  ;;  %v12229_v46 = vld [vmem:[#allocation16 + $0x56c] sm:$0xf0]  ;;  %5292 = vmatpush.bf16.msrb.mxu0 %v10186_v33 }
 0x59e   :  { %v3310_v51 = vpop.f32.mrf.mxu2  ;;  %v3322_v39 = vpop.f32.mrf.mxu3 }
 0x59f   :  { %v3323_v14 = vadd.f32 %v3322_v39, %v3309_v0  ;;  %v3311_v55 = vadd.f32 %v3310_v51, %v2909_v38  ;;  %v10570_v51 = vor.u32 %v12337_v8, %v10569_v37  ;;  %v12139_v39 = vld [vmem:[#allocation16 + $0x2a4] sm:$0xf]  ;;  %v10521_v38 = vld [vmem:[#allocation16 + $0x840] sm:$0xf]  ;;  %v9755_v0 = vld [vmem:[#allocation16 + $0x270] sm:$0xf0] }
 0x5a0   :  { %v3406_v21 = vpop.f32.mrf.mxu1 }
 0x5a1   :  { %5306 = vmatpush.bf16.msrb.mxu1 %v10570_v51 }
 0x5a6   :  { %v3364_v44 = vpop.f32.mrf.mxu2  ;;  %v3324_v45 = vpop.f32.mrf.mxu3 }
 0x5a7   :  { %v3365_v52 = vadd.f32 %v3364_v44, %v3351_v13  ;;  %v3325_v63 = vadd.f32 %v3324_v45, %v3311_v55  ;;  %v9753_v44 = vld [vmem:[#allocation16 + $0x240] sm:$0xf]  ;;  %v12133_v45 = vld [vmem:[#allocation16 + $0x26c] sm:$0xf0] }
 0x5a8   :  { %v3408_v59 = vpop.f32.mrf.mxu1  ;;  %v9754_v25 = vor.u32 %v12133_v45, %v9753_v44  ;;  %v12109_v55 = vld [vmem:[#allocation16 + $0x1ac] sm:$0xf0] }
 0x5aa   :  { %5279 = vmatpush.bf16.msra.mxu3 %v9754_v25 }
 0x5ae   :  { %v3366_v50 = vpop.f32.mrf.mxu2 }
 0x5af   :  { %v3367_v56 = vadd.f32 %v3366_v50, %v3353_v32  ;;  %v12325_v50 = vld [vmem:[#allocation16 + $0x86c] sm:$0xf0]  ;;  %v9707_v32 = vld [vmem:[#allocation16 + $0x210] sm:$0xf0] }
 0x5b0   :  { %v10522_v13 = vor.u32 %v12325_v50, %v10521_v38 }
 0x5b2   :  { %5307 = vmatpush.bf16.msrb.mxu1 %v10522_v13 }
 0x5f0   :  { %v3336_v30 = vpop.f32.mrf.mxu0 }
 0x5f1   :  { %v3337_v5 = vadd.f32 %v3336_v30, %v3323_v14  ;;  %v9806_v30 = vor.u32 %v12139_v39, %v9803_v40 }
 0x5f3   :  { %v13600_v58 = vadd.f32 %v12728_v57, %v3337_v5  ;;  %5320 = vmatpush.bf16.msra.mxu2 %v9806_v30 }
 0x5f6   :  { %v3378_v19 = vpop.f32.mrf.mxu3 }
 0x5f7   :  { %v3379_v16 = vadd.f32 %v3378_v19, %v3365_v52  ;;  %v3420_v34 = vpop.f32.mrf.mxu2  ;;  %v12127_v19 = vld [vmem:[#allocation16 + $0x244] sm:$0xf]  ;;  %v9705_v52 = vld [vmem:[#allocation16 + $0x1e0] sm:$0xf] }
 0x5f8   :  { %v3338_v4 = vpop.f32.mrf.mxu0  ;;  %v9758_v14 = vor.u32 %v12127_v19, %v9755_v0 }
 0x5f9   :  { %v13598_v54 = vadd.f32 %v12727_v61, %v3379_v16  ;;  %v3339_v10 = vadd.f32 %v3338_v4, %v3325_v63  ;;  %v10138_v4 = vor.u32 %v12229_v46, %v10137_v53  ;;  %v10089_v16 = vld [vmem:[#allocation16 + $0x4e0] sm:$0xf] }
 0x5fa   :  { %5321 = vmatpush.bf16.msra.mxu2 %v9758_v14  ;;  %v10425_v63 = vld [vmem:[#allocation16 + $0x780] sm:$0xf] }
 0x5fb   :  { %v3433_v42 = vadd.f32 %v13598_v54, %v13600_v58  ;;  %v13609_v17 = vadd.f32 %v12731_v23, %v3339_v10  ;;  %5293 = vmatpush.bf16.msrb.mxu0 %v10138_v4  ;;  %v9609_v10 = vld [vmem:[#allocation16 + $0x120] sm:$0xf]  ;;  %v12289_v23 = vld [vmem:[#allocation16 + $0x74c] sm:$0xf0] }
 0x5fc   :  { %v9945_v14 = vld [vmem:[#allocation16 + $0x3c0] sm:$0xf] }
 0x5fe   :  { %v3380_v1 = vpop.f32.mrf.mxu3 }
 0x5ff   :  { %v3381_v36 = vadd.f32 %v3380_v1, %v3367_v56  ;;  %v3422_v29 = vpop.f32.mrf.mxu2  ;;  %v9657_v1 = vld [vmem:[#allocation16 + $0x180] sm:$0xf] }
 0x600   :  { %v3392_v49 = vpop.f32.mrf.mxu0  ;;  %v10041_v56 = vld [vmem:[#allocation16 + $0x480] sm:$0xf] }
 0x601   :  { %v3393_v31 = vadd.f32 %v3392_v49, %v2911_v41  ;;  %v13607_v9 = vadd.f32 %v12730_v24, %v3381_v36  ;;  %v10473_v49 = vld [vmem:[#allocation16 + $0x7e0] sm:$0xf]  ;;  %v12301_v36 = vld [vmem:[#allocation16 + $0x7ac] sm:$0xf0] }
 0x602   :  { %v10426_v24 = vor.u32 %v12301_v36, %v10425_v63  ;;  %v10281_v63 = vld [vmem:[#allocation16 + $0x660] sm:$0xf]  ;;  %v12265_v36 = vld [vmem:[#allocation16 + $0x68c] sm:$0xf0] }
 0x603   :  { %v3407_v35 = vadd.f32 %v3406_v21, %v3393_v31  ;;  %v3437_v47 = vadd.f32 %v13607_v9, %v13609_v17  ;;  %v12217_v21 = vld [vmem:[#allocation16 + $0x50c] sm:$0xf0] }
 0x604   :  { %v12313_v31 = vld [vmem:[#allocation16 + $0x80c] sm:$0xf0]  ;;  %v10090_v61 = vor.u32 %v12217_v21, %v10089_v16 }
 0x605   :  { %v3421_v48 = vadd.f32 %v3420_v34, %v3407_v35  ;;  %v12115_v34 = vld [vmem:[#allocation16 + $0x1e4] sm:$0xf]  ;;  %v10474_v35 = vor.u32 %v12313_v31, %v10473_v49  ;;  %v12181_v21 = vld [vmem:[#allocation16 + $0x3ec] sm:$0xf0]  ;;  %v10329_v49 = vld [vmem:[#allocation16 + $0x6c0] sm:$0xf] }
 0x606   :  { %v9710_v57 = vor.u32 %v12115_v34, %v9707_v32  ;;  %5294 = vmatpush.bf16.msrb.mxu0 %v10090_v61  ;;  %v9946_v31 = vor.u32 %v12181_v21, %v9945_v14  ;;  %v12079_v32 = vld [vmem:[#allocation16 + $0xc4] sm:$0xf]  ;;  %v9563_v61 = vld [vmem:[#allocation16 + $0xf0] sm:$0xf0]  ;;  %v9761_v14 = vld [vmem:[#allocation16 + $0x248] sm:$0xf] }
 0x607   :  { %v13602_v6 = vadd.f32 %v12729_v62, %v3421_v48  ;;  %v12205_v48 = vld [vmem:[#allocation16 + $0x4ac] sm:$0xf0]  ;;  %v12103_v62 = vld [vmem:[#allocation16 + $0x184] sm:$0xf]  ;;  %5308 = vmatpush.bf16.msrb.mxu1 %v10474_v35  ;;  %v9566_v35 = vor.u32 %v12079_v32, %v9563_v61  ;;  %v12134_v21 = vld [vmem:[#allocation16 + $0x274] sm:$0xf0] }
 0x608   :  { %v3394_v7 = vpop.f32.mrf.mxu0  ;;  %5322 = vmatpush.bf16.msra.mxu2 %v9710_v57  ;;  %v12211_v32 = vld [vmem:[#allocation16 + $0x4e4] sm:$0xf]  ;;  %v10091_v61 = vld [vmem:[#allocation16 + $0x510] sm:$0xf0] }
 0x609   :  { %v3395_v12 = vadd.f32 %v3394_v7, %v2911_v41  ;;  %v3434_v15 = vadd.f32 %v3433_v42, %v13602_v6  ;;  %v12121_v41 = vld [vmem:[#allocation16 + $0x20c] sm:$0xf0]  ;;  %v9659_v42 = vld [vmem:[#allocation16 + $0x1b0] sm:$0xf0]  ;;  %v9658_v7 = vor.u32 %v12109_v55, %v9657_v1  ;;  %v9513_v1 = vld [vmem:[#allocation16 + $0x60] sm:$0xf] }
 0x60a   :  { %v9706_v5 = vor.u32 %v12121_v41, %v9705_v52  ;;  %v9561_v52 = vld [vmem:[#allocation16 + $0xc0] sm:$0xf]  ;;  %v12085_v41 = vld [vmem:[#allocation16 + $0xec] sm:$0xf0] }
 0x60b   :  { %v3409_v11 = vadd.f32 %v3408_v59, %v3395_v12  ;;  %3435 = vadd.xlane.f32.xlu1 %v3434_v15  ;;  %v12097_v12 = vld [vmem:[#allocation16 + $0x14c] sm:$0xf0]  ;;  %v9993_v15 = vld [vmem:[#allocation16 + $0x420] sm:$0xf]  ;;  %v10042_v59 = vor.u32 %v12205_v48, %v10041_v56  ;;  %5309 = vmatpush.bf16.msrb.mxu1 %v10426_v24  ;;  %v9562_v16 = vor.u32 %v12085_v41, %v9561_v52  ;;  %v12319_v52 = vld [vmem:[#allocation16 + $0x844] sm:$0xf] }
 0x60c   :  { %5280 = vmatpush.bf16.msra.mxu3 %v9706_v5  ;;  %v9610_v43 = vor.u32 %v12097_v12, %v9609_v10  ;;  %v12277_v5 = vld [vmem:[#allocation16 + $0x6ec] sm:$0xf0]  ;;  %v9897_v56 = vld [vmem:[#allocation16 + $0x360] sm:$0xf]  ;;  %v9515_v10 = vld [vmem:[#allocation16 + $0x90] sm:$0xf0] }
 0x60d   :  { %v3423_v18 = vadd.f32 %v3422_v29, %v3409_v11  ;;  %v12193_v11 = vld [vmem:[#allocation16 + $0x44c] sm:$0xf0]  ;;  %v10377_v29 = vld [vmem:[#allocation16 + $0x720] sm:$0xf]  ;;  %5295 = vmatpush.bf16.msrb.mxu0 %v10042_v59  ;;  %v10330_v34 = vor.u32 %v12277_v5, %v10329_v49  ;;  %v10523_v41 = vld [vmem:[#allocation16 + $0x870] sm:$0xf0] }
 0x60e   :  { %v9994_v20 = vor.u32 %v12193_v11, %v9993_v15  ;;  %v10378_v28 = vor.u32 %v12289_v23, %v10377_v29  ;;  %v12073_v55 = vld [vmem:[#allocation16 + $0x8c] sm:$0xf0]  ;;  %v9465_v15 = vld [vmem:[#allocation16] sm:$0xf]  ;;  %v10145_v49 = vld [vmem:[#allocation16 + $0x548] sm:$0xf] }
 0x60f   :  { %v13611_v26 = vadd.f32 %v12732_v22, %v3423_v18  ;;  %v9662_v22 = vor.u32 %v12103_v62, %v9659_v42  ;;  %v9514_v57 = vor.u32 %v12073_v55, %v9513_v1  ;;  %v12169_v48 = vld [vmem:[#allocation16 + $0x38c] sm:$0xf0]  ;;  %v10282_v42 = vor.u32 %v12265_v36, %v10281_v63  ;;  %v9849_v24 = vld [vmem:[#allocation16 + $0x300] sm:$0xf]  ;;  %v12230_v5 = vld [vmem:[#allocation16 + $0x574] sm:$0xf0] }
 0x610   :  { %5281 = vmatpush.bf16.msra.mxu3 %v9658_v7  ;;  %5310 = vmatpush.bf16.msrb.mxu1 %v10378_v28  ;;  %v9898_v62 = vor.u32 %v12169_v48, %v9897_v56  ;;  %v12067_v7 = vld [vmem:[#allocation16 + $0x64] sm:$0xf]  ;;  %v12061_v59 = vld [vmem:[#allocation16 + $0x2c] sm:$0xf0]  ;;  %v10233_v23 = vld [vmem:[#allocation16 + $0x600] sm:$0xf]  ;;  %v10094_v1 = vor.u32 %v12211_v32, %v10091_v61 }
 0x611   :  { %v3438_v2 = vadd.f32 %v3437_v47, %v13611_v26  ;;  %5323 = vmatpush.bf16.msra.mxu2 %v9662_v22  ;;  %5296 = vmatpush.bf16.msrb.mxu0 %v9994_v20  ;;  %v9518_v12 = vor.u32 %v12067_v7, %v9515_v10  ;;  %v9466_v11 = vor.u32 %v12061_v59, %v9465_v15  ;;  %v12157_v29 = vld [vmem:[#allocation16 + $0x32c] sm:$0xf0]  ;;  %v10187_v28 = vld [vmem:[#allocation16 + $0x5d0] sm:$0xf0]  ;;  %v9713_v56 = vld [vmem:[#allocation16 + $0x1e8] sm:$0xf] }
 0x612   :  { %v9850_v22 = vor.u32 %v12157_v29, %v9849_v24  ;;  %v10475_v55 = vld [vmem:[#allocation16 + $0x810] sm:$0xf0]  ;;  %v10097_v36 = vld [vmem:[#allocation16 + $0x4e8] sm:$0xf]  ;;  %v12199_v7 = vld [vmem:[#allocation16 + $0x484] sm:$0xf] }
 0x613   :  { %3439 = vadd.xlane.f32.xlu2 %v3438_v2  ;;  %v12091_v2 = vld [vmem:[#allocation16 + $0x124] sm:$0xf]  ;;  %v10043_v10 = vld [vmem:[#allocation16 + $0x4b0] sm:$0xf0]  ;;  %v9665_v24 = vld [vmem:[#allocation16 + $0x188] sm:$0xf] }
 0x614   :  { %v9614_v33 = vor.u32 %v12091_v2, %v9611_v27  ;;  %5282 = vmatpush.bf16.msra.mxu3 %v9610_v43  ;;  %5311 = vmatpush.bf16.msrb.mxu1 %v10330_v34  ;;  %v12055_v2 = vld [vmem:[#allocation16 + $0x4] sm:$0xf]  ;;  %v9467_v27 = vld [vmem:[#allocation16 + $0x30] sm:$0xf0]  ;;  %v10146_v34 = vor.u32 %v12230_v5, %v10145_v49  ;;  %v10046_v15 = vor.u32 %v12199_v7, %v10043_v10  ;;  %v9953_v49 = vld [vmem:[#allocation16 + $0x3c8] sm:$0xf] }
 0x615   :  { %5297 = vmatpush.bf16.msrb.mxu0 %v9946_v31  ;;  %v12235_v43 = vld [vmem:[#allocation16 + $0x5a4] sm:$0xf]  ;;  %v9470_v20 = vor.u32 %v12055_v2, %v9467_v27  ;;  %v9762_v31 = vor.u32 %v12134_v21, %v9761_v14  ;;  %v10427_v59 = vld [vmem:[#allocation16 + $0x7b0] sm:$0xf0]  ;;  %v12182_v5 = vld [vmem:[#allocation16 + $0x3f4] sm:$0xf0] }
 0x616   :  { %5324 = vmatpush.bf16.msra.mxu2 %v9614_v33  ;;  %v12331_v33 = vld [vmem:[#allocation16 + $0x8a4] sm:$0xf]  ;;  %v9995_v27 = vld [vmem:[#allocation16 + $0x450] sm:$0xf0] }
 0x617   :  { %v12187_v2 = vld [vmem:[#allocation16 + $0x424] sm:$0xf]  ;;  %v9899_v61 = vld [vmem:[#allocation16 + $0x390] sm:$0xf0] }
 0x618   :  { %5283 = vmatpush.bf16.msra.mxu3 %v9562_v16  ;;  %5312 = vmatpush.bf16.msrb.mxu1 %v10282_v42  ;;  %v10526_v16 = vor.u32 %v12319_v52, %v10523_v41  ;;  %v9569_v52 = vld [vmem:[#allocation16 + $0xc8] sm:$0xf]  ;;  %v12086_v41 = vld [vmem:[#allocation16 + $0xf4] sm:$0xf0]  ;;  %v12163_v32 = vld [vmem:[#allocation16 + $0x364] sm:$0xf] }
 0x619   :  { %5298 = vmatpush.bf16.msrb.mxu0 %v9898_v62  ;;  %v12218_v62 = vld [vmem:[#allocation16 + $0x514] sm:$0xf0]  ;;  %v9570_v21 = vor.u32 %v12086_v41, %v9569_v52  ;;  %v12151_v7 = vld [vmem:[#allocation16 + $0x304] sm:$0xf]  ;;  %v9851_v10 = vld [vmem:[#allocation16 + $0x330] sm:$0xf0] }
 0x61a   :  { %5325 = vmatpush.bf16.msra.mxu2 %v9566_v35  ;;  %v12307_v35 = vld [vmem:[#allocation16 + $0x7e4] sm:$0xf]  ;;  %v10098_v42 = vor.u32 %v12218_v62, %v10097_v36  ;;  %v12170_v36 = vld [vmem:[#allocation16 + $0x394] sm:$0xf0] }
 0x61b   :  { %v10478_v48 = vor.u32 %v12307_v35, %v10475_v55  ;;  %v9902_v35 = vor.u32 %v12163_v32, %v9899_v61  ;;  %v10283_v55 = vld [vmem:[#allocation16 + $0x690] sm:$0xf0] }
 0x61c   :  { %5284 = vmatpush.bf16.msra.mxu3 %v9514_v57  ;;  %v12122_v57 = vld [vmem:[#allocation16 + $0x214] sm:$0xf0] }
 0x61d   :  { %5299 = vmatpush.bf16.msrb.mxu0 %v9850_v22  ;;  %v9714_v63 = vor.u32 %v12122_v57, %v9713_v56  ;;  %v12206_v22 = vld [vmem:[#allocation16 + $0x4b4] sm:$0xf0]  ;;  %v9521_v56 = vld [vmem:[#allocation16 + $0x68] sm:$0xf] }
 0x61e   :  { %5326 = vmatpush.bf16.msra.mxu2 %v9518_v12  ;;  %v12295_v12 = vld [vmem:[#allocation16 + $0x784] sm:$0xf] }
 0x61f   :  { %v10430_v29 = vor.u32 %v12295_v12, %v10427_v59  ;;  %v12247_v12 = vld [vmem:[#allocation16 + $0x604] sm:$0xf]  ;;  %v9473_v59 = vld [vmem:[#allocation16 + $0x8] sm:$0xf] }
 0x620   :  { %5285 = vmatpush.bf16.msra.mxu3 %v9466_v11  ;;  %v12110_v11 = vld [vmem:[#allocation16 + $0x1b4] sm:$0xf0] }
 0x622   :  { %5327 = vmatpush.bf16.msra.mxu2 %v9470_v20  ;;  %v9998_v20 = vor.u32 %v12187_v2, %v9995_v27 }
 0x67e   :  { %v3436_v18 = vpop.xlane.xlu1 %3435 }
 0x67f   :  { %v3441_v47 = vmul.f32 %v3436_v18, %v13206_v60  ;;  %v12253_v18 = vld [vmem:[#allocation16 + $0x62c] sm:$0xf0] }
 0x681   :  { %v13618_v3 = vsub.f32 %v13600_v58, %v3441_v47  ;;  %v13621_v37 = vsub.f32 %v13598_v54, %v3441_v47  ;;  %v13624_v8 = vsub.f32 %v13602_v6, %v3441_v47  ;;  %v10234_v47 = vor.u32 %v12253_v18, %v10233_v23  ;;  %v10049_v18 = vld [vmem:[#allocation16 + $0x488] sm:$0xf] }
 0x682   :  { %v9666_v23 = vor.u32 %v12110_v11, %v9665_v24  ;;  %v12062_v24 = vld [vmem:[#allocation16 + $0x34] sm:$0xf0] }
 0x683   :  { %v3449_v51 = vmul.f32 %v13618_v3, %v13618_v3  ;;  %v3450_v39 = vmul.f32 %v13621_v37, %v13621_v37  ;;  %v3451_v40 = vmul.f32 %v13624_v8, %v13624_v8  ;;  %5313 = vmatpush.bf16.msrb.mxu1 %v10234_v47  ;;  %v10050_v47 = vor.u32 %v12206_v22, %v10049_v18  ;;  %v9857_v18 = vld [vmem:[#allocation16 + $0x308] sm:$0xf]  ;;  %v12158_v22 = vld [vmem:[#allocation16 + $0x334] sm:$0xf0] }
 0x684   :  { %v9474_v2 = vor.u32 %v12062_v24, %v9473_v59  ;;  %v9858_v27 = vor.u32 %v12158_v22, %v9857_v18  ;;  %v10195_v24 = vld [vmem:[#allocation16 + $0x5d8] sm:$0xf0]  ;;  %v10529_v22 = vld [vmem:[#allocation16 + $0x848] sm:$0xf] }
 0x685   :  { %v3455_v44 = vadd.f32 %v3450_v39, %v3449_v51  ;;  %v10571_v51 = vld [vmem:[#allocation16 + $0x8d0] sm:$0xf0]  ;;  %v10190_v39 = vor.u32 %v12235_v43, %v10187_v28  ;;  %v12283_v43 = vld [vmem:[#allocation16 + $0x724] sm:$0xf] }
 0x686   :  { %v3440_v30 = vpop.xlane.xlu2 %3439  ;;  %v10379_v28 = vld [vmem:[#allocation16 + $0x750] sm:$0xf0] }
 0x687   :  { %v3442_v45 = vmul.f32 %v3440_v30, %v13206_v60  ;;  %v3456_v53 = vadd.f32 %v3455_v44, %v3451_v40  ;;  %v10574_v40 = vor.u32 %v12331_v33, %v10571_v51  ;;  %v9809_v44 = vld [vmem:[#allocation16 + $0x2a8] sm:$0xf]  ;;  %v12146_v30 = vld [vmem:[#allocation16 + $0x2d4] sm:$0xf0]  ;;  %5334 = vmatpush.bf16.msrb.mxu3 %v10190_v39  ;;  %v10382_v39 = vor.u32 %v12283_v43, %v10379_v28 }
 0x688   :  { %v9617_v33 = vld [vmem:[#allocation16 + $0x128] sm:$0xf]  ;;  %v12098_v51 = vld [vmem:[#allocation16 + $0x154] sm:$0xf0] }
 0x689   :  { %v13634_v46 = vsub.f32 %v13609_v17, %v3442_v45  ;;  %v13637_v25 = vsub.f32 %v13607_v9, %v3442_v45  ;;  %v13640_v4 = vsub.f32 %v13611_v26, %v3442_v45  ;;  %3457 = vadd.xlane.f32.xlu0 %v3456_v53  ;;  %v10193_v45 = vld [vmem:[#allocation16 + $0x5a8] sm:$0xf]  ;;  %v9810_v53 = vor.u32 %v12146_v30, %v9809_v44  ;;  %v12194_v30 = vld [vmem:[#allocation16 + $0x454] sm:$0xf0] }
 0x68a   :  { %5348 = vmatpush.bf16.msra.mxu0 %v10574_v40  ;;  %v9618_v40 = vor.u32 %v12098_v51, %v9617_v33  ;;  %v10001_v44 = vld [vmem:[#allocation16 + $0x428] sm:$0xf] }
 0x68b   :  { %v3452_v38 = vmul.f32 %v13634_v46, %v13634_v46  ;;  %v3453_v50 = vmul.f32 %v13637_v25, %v13637_v25  ;;  %v3454_v19 = vmul.f32 %v13640_v4, %v13640_v4  ;;  %5362 = vmatpush.bf16.msra.mxu1 %v9810_v53  ;;  %v12175_v53 = vld [vmem:[#allocation16 + $0x3c4] sm:$0xf] }
 0x68d   :  { %v3459_v13 = vadd.f32 %v3453_v50, %v3452_v38  ;;  %v12242_v38 = vld [vmem:[#allocation16 + $0x5d4] sm:$0xf0]  ;;  %v12223_v50 = vld [vmem:[#allocation16 + $0x544] sm:$0xf] }
 0x68e   :  { %5349 = vmatpush.bf16.msra.mxu0 %v10526_v16 }
 0x68f   :  { %v3460_v0 = vadd.f32 %v3459_v13, %v3454_v19  ;;  %v10139_v19 = vld [vmem:[#allocation16 + $0x570] sm:$0xf0]  ;;  %v10194_v13 = vor.u32 %v12242_v38, %v10193_v45  ;;  %5363 = vmatpush.bf16.msra.mxu1 %v9762_v31  ;;  %v10002_v45 = vor.u32 %v12194_v30, %v10001_v44  ;;  %v9954_v31 = vor.u32 %v12182_v5, %v9953_v49 }
 0x690   :  { %v9947_v38 = vld [vmem:[#allocation16 + $0x3f0] sm:$0xf0] }
 0x691   :  { %3461 = vadd.xlane.f32.xlu1 %v3460_v0  ;;  %v10142_v0 = vor.u32 %v12223_v50, %v10139_v19  ;;  %5376 = vmatpush.bf16.msrb.mxu2 %v10194_v13  ;;  %v12271_v50 = vld [vmem:[#allocation16 + $0x6c4] sm:$0xf]  ;;  %v9950_v13 = vor.u32 %v12175_v53, %v9947_v38 }
 0x692   :  { %5350 = vmatpush.bf16.msra.mxu0 %v10478_v48  ;;  %v12074_v48 = vld [vmem:[#allocation16 + $0x94] sm:$0xf0] }
 0x693   :  { %5335 = vmatpush.bf16.msrb.mxu3 %v10142_v0  ;;  %5364 = vmatpush.bf16.msra.mxu1 %v9714_v63  ;;  %v10331_v0 = vld [vmem:[#allocation16 + $0x6f0] sm:$0xf0]  ;;  %v9905_v63 = vld [vmem:[#allocation16 + $0x368] sm:$0xf]  ;;  %v9522_v62 = vor.u32 %v12074_v48, %v9521_v56  ;;  %v12338_v48 = vld [vmem:[#allocation16 + $0x8d4] sm:$0xf0] }
 0x694   :  { %v10334_v16 = vor.u32 %v12271_v50, %v10331_v0 }
 0x695   :  { %5377 = vmatpush.bf16.msrb.mxu2 %v10146_v34 }
 0x696   :  { %5351 = vmatpush.bf16.msra.mxu0 %v10430_v29  ;;  %v9854_v29 = vor.u32 %v12151_v7, %v9851_v10  ;;  %v12236_v7 = vld [vmem:[#allocation16 + $0x5ac] sm:$0xf] }
 0x697   :  { %5336 = vmatpush.bf16.msrb.mxu3 %v10094_v1  ;;  %5365 = vmatpush.bf16.msra.mxu1 %v9666_v23  ;;  %v12259_v1 = vld [vmem:[#allocation16 + $0x664] sm:$0xf] }
 0x698   :  { %v10286_v57 = vor.u32 %v12259_v1, %v10283_v55 }
 0x699   :  { %5378 = vmatpush.bf16.msrb.mxu2 %v10098_v42  ;;  %v9906_v42 = vor.u32 %v12170_v36, %v9905_v63 }
 0x69a   :  { %5352 = vmatpush.bf16.msra.mxu0 %v10382_v39 }
 0x69b   :  { %5337 = vmatpush.bf16.msrb.mxu3 %v10046_v15  ;;  %5366 = vmatpush.bf16.msra.mxu1 %v9618_v40  ;;  %v10235_v15 = vld [vmem:[#allocation16 + $0x630] sm:$0xf0] }
 0x69c   :  { %v10238_v23 = vor.u32 %v12247_v12, %v10235_v15 }
 0x69d   :  { %5379 = vmatpush.bf16.msrb.mxu2 %v10050_v47 }
 0x69e   :  { %5353 = vmatpush.bf16.msra.mxu0 %v10334_v16 }
 0x69f   :  { %5338 = vmatpush.bf16.msrb.mxu3 %v9998_v20  ;;  %5367 = vmatpush.bf16.msra.mxu1 %v9570_v21 }
 0x6a1   :  { %5380 = vmatpush.bf16.msrb.mxu2 %v10002_v45 }
 0x6a2   :  { %5354 = vmatpush.bf16.msra.mxu0 %v10286_v57 }
 0x6a3   :  { %5339 = vmatpush.bf16.msrb.mxu3 %v9950_v13  ;;  %5368 = vmatpush.bf16.msra.mxu1 %v9522_v62  ;;  %v3432_v13 = vld [vmem:[#allocation14] sm:$0x7]  ;;  %v12140_v62 = vld [vmem:[#allocation16 + $0x2ac] sm:$0xf] }
 0x6a4   :  { %v3507_v49 = vperm.slane %v3432_v13, 0  ;;  %v3508_v5 = vperm.slane %v3432_v13, 1 }
 0x6a5   :  { %5381 = vmatpush.bf16.msrb.mxu2 %v9954_v31  ;;  %v3509_v31 = vperm.slane %v3432_v13, 2  ;;  %v10099_v13 = vld [vmem:[#allocation16 + $0x518] sm:$0xf0] }
 0x6a6   :  { %5355 = vmatpush.bf16.msra.mxu0 %v10238_v23 }
 0x6a7   :  { %5340 = vmatpush.bf16.msrb.mxu3 %v9902_v35  ;;  %5369 = vmatpush.bf16.msra.mxu1 %v9474_v2  ;;  %v10198_v2 = vor.u32 %v12236_v7, %v10195_v24  ;;  %v10387_v7 = vld [vmem:[#allocation16 + $0x758] sm:$0xf0] }
 0x6a9   :  { %5382 = vmatpush.bf16.msrb.mxu2 %v9906_v42  ;;  %v9811_v42 = vld [vmem:[#allocation16 + $0x2d8] sm:$0xf0] }
 0x6aa   :  { %v9814_v18 = vor.u32 %v12140_v62, %v9811_v42  ;;  %v10003_v62 = vld [vmem:[#allocation16 + $0x458] sm:$0xf0]  ;;  %v12284_v42 = vld [vmem:[#allocation16 + $0x72c] sm:$0xf] }
 0x6ab   :  { %5341 = vmatpush.bf16.msrb.mxu3 %v9854_v29 }
 0x6ad   :  { %5383 = vmatpush.bf16.msrb.mxu2 %v9858_v27 }
 0x6fc   :  { %v3458_v19 = vpop.xlane.xlu0 %3457 }
 0x6fd   :  { %v3463_v14 = vmul.f32 %v3458_v19, %v13206_v60 }
 0x6ff   :  { %v3465_v34 = vadd.f32 1e-05, %v3463_v14 }
 0x701   :  { %12723 = vrsqrt.f32 %v3465_v34  ;;  %vm3473_vm12 = vweird.f32 %v3465_v34 }
 0x704   :  { %v3462_v11 = vpop.xlane.xlu1 %3461 }
 0x705   :  { %v3464_v47 = vmul.f32 %v3462_v11, %v13206_v60  ;;  %v3431_v60 = vld [vmem:[#allocation13] sm:$0x7]  ;;  %v10579_v11 = vld [vmem:[#allocation16 + $0x8d8] sm:$0xf0] }
 0x706   :  { %v3494_v50 = vperm.slane %v3431_v60, 0  ;;  %v3495_v19 = vperm.slane %v3431_v60, 1  ;;  %v3496_v14 = vperm.slane %v3431_v60, 2  ;;  %v12314_v60 = vld [vmem:[#allocation16 + $0x814] sm:$0xf0] }
 0x707   :  { %v12724_v43 = vpop.eup %12723  ;;  %v3466_v20 = vadd.f32 1e-05, %v3464_v47  ;;  %v12326_v47 = vld [vmem:[#allocation16 + $0x874] sm:$0xf0] }
 0x708   :  { %v3468_v28 = vmul.f32 %v12724_v43, %v3465_v34  ;;  %vm3474_vm11 = vweird.f32 %v12724_v43 }
 0x709   :  { %12725 = vrsqrt.f32 %v3466_v20  ;;  %vm3475_vm13 = vmor %vm3473_vm12, %vm3474_vm11  ;;  %vm3483_vm15 = vweird.f32 %v3466_v20 }
 0x70a   :  { %v3469_v33 = vmul.f32 %v12724_v43, %v3468_v28  ;;  %v12224_v28 = vld [vmem:[#allocation16 + $0x54c] sm:$0xf] }
 0x70c   :  { %v3470_v51 = vmul.f32 0.5, %v3469_v33  ;;  %v10147_v33 = vld [vmem:[#allocation16 + $0x578] sm:$0xf0] }
 0x70e   :  { %v3471_v39 = vsub.f32 1.5, %v3470_v51  ;;  %v12320_v51 = vld [vmem:[#allocation16 + $0x84c] sm:$0xf] }
 0x70f   :  { %v12726_v40 = vpop.eup %12725 }
 0x710   :  { %v3472_v44 = vmul.f32 %v12724_v43, %v3471_v39  ;;  %v3478_v30 = vmul.f32 %v12726_v40, %v3466_v20  ;;  %vm3484_vm14 = vweird.f32 %v12726_v40  ;;  %v9763_v20 = vld [vmem:[#allocation16 + $0x278] sm:$0xf0] }
 0x711   :  { %vm3485_vm0 = vmor %vm3483_vm15, %vm3484_vm14  ;;  %v10531_v39 = vld [vmem:[#allocation16 + $0x878] sm:$0xf0] }
 0x712   :  { %v3479_v45 = vmul.f32 %v12726_v40, %v3478_v30  ;;  %v3476_v53 = vsel %vm3475_vm13, %v12724_v43, %v3472_v44  ;;  %v12128_v43 = vld [vmem:[#allocation16 + $0x24c] sm:$0xf]  ;;  %v10481_v30 = vld [vmem:[#allocation16 + $0x7e8] sm:$0xf] }
 0x713   :  { %v3487_v0 = vmul.f32 %v3476_v53, %v13618_v3  ;;  %v3488_v52 = vmul.f32 %v3476_v53, %v13621_v37  ;;  %v3489_v16 = vmul.f32 %v3476_v53, %v13624_v8  ;;  %v10577_v8 = vld [vmem:[#allocation16 + $0x8a8] sm:$0xf]  ;;  %v9766_v44 = vor.u32 %v12128_v43, %v9763_v20 }
 0x714   :  { %v3480_v38 = vmul.f32 0.5, %v3479_v45  ;;  %v10150_v45 = vor.u32 %v12224_v28, %v10147_v33  ;;  %v10534_v53 = vor.u32 %v12320_v51, %v10531_v39  ;;  %v10289_v20 = vld [vmem:[#allocation16 + $0x668] sm:$0xf]  ;;  %v12266_v28 = vld [vmem:[#allocation16 + $0x694] sm:$0xf0] }
 0x715   :  { %v3500_v34 = vmul.f32 %v3494_v50, %v3487_v0  ;;  %v3501_v32 = vmul.f32 %v3495_v19, %v3488_v52  ;;  %v3502_v35 = vmul.f32 %v3496_v14, %v3489_v16  ;;  %v12308_v0 = vld [vmem:[#allocation16 + $0x7ec] sm:$0xf]  ;;  %v10483_v52 = vld [vmem:[#allocation16 + $0x818] sm:$0xf0]  ;;  %v10433_v16 = vld [vmem:[#allocation16 + $0x788] sm:$0xf] }
 0x716   :  { %v3481_v41 = vsub.f32 1.5, %v3480_v38  ;;  %v12116_v38 = vld [vmem:[#allocation16 + $0x1ec] sm:$0xf] }
 0x717   :  { %v3513_v63 = vadd.f32 %v3507_v49, %v3500_v34  ;;  %v3514_v36 = vadd.f32 %v3508_v5, %v3501_v32  ;;  %v3515_v10 = vadd.f32 %v3509_v31, %v3502_v35  ;;  %v9667_v34 = vld [vmem:[#allocation16 + $0x1b8] sm:$0xf0]  ;;  %v12200_v32 = vld [vmem:[#allocation16 + $0x48c] sm:$0xf] }
 0x718   :  { %v3482_v21 = vmul.f32 %v12726_v40, %v3481_v41  ;;  %v10482_v41 = vor.u32 %v12314_v60, %v10481_v30  ;;  %v12296_v35 = vld [vmem:[#allocation16 + $0x78c] sm:$0xf]  ;;  %v9907_v30 = vld [vmem:[#allocation16 + $0x398] sm:$0xf0] }
 0x719   :  { %v12068_v39 = vld [vmem:[#allocation16 + $0x6c] sm:$0xf] }
 0x71a   :  { %v3486_v61 = vsel %vm3485_vm0, %v12726_v40, %v3482_v21  ;;  %v10530_v40 = vor.u32 %v12326_v47, %v10529_v22  ;;  %v12302_v21 = vld [vmem:[#allocation16 + $0x7b4] sm:$0xf0]  ;;  %v9955_v22 = vld [vmem:[#allocation16 + $0x3f8] sm:$0xf0]  ;;  %v12272_v47 = vld [vmem:[#allocation16 + $0x6cc] sm:$0xf] }
 0x71b   :  { %v3490_v1 = vmul.f32 %v3486_v61, %v13634_v46  ;;  %v3491_v3 = vmul.f32 %v3486_v61, %v13637_v25  ;;  %v3492_v37 = vmul.f32 %v3486_v61, %v13640_v4  ;;  %v12332_v46 = vld [vmem:[#allocation16 + $0x8ac] sm:$0xf]  ;;  %v10578_v25 = vor.u32 %v12338_v48, %v10577_v8  ;;  %v10051_v61 = vld [vmem:[#allocation16 + $0x4b8] sm:$0xf0] }
 0x71c   :  { %v10582_v27 = vor.u32 %v12332_v46, %v10579_v11  ;;  %v12092_v48 = vld [vmem:[#allocation16 + $0x12c] sm:$0xf]  ;;  %v10390_v46 = vor.u32 %v12284_v42, %v10387_v7  ;;  %v10153_v7 = vld [vmem:[#allocation16 + $0x550] sm:$0xf] }
 0x71d   :  { %v3503_v55 = vmul.f32 %v3494_v50, %v3490_v1  ;;  %v3504_v56 = vmul.f32 %v3495_v19, %v3491_v3  ;;  %v3505_v57 = vmul.f32 %v3496_v14, %v3492_v37  ;;  %v9715_v50 = vld [vmem:[#allocation16 + $0x218] sm:$0xf0]  ;;  %v12212_v19 = vld [vmem:[#allocation16 + $0x4ec] sm:$0xf]  ;;  %v10434_v3 = vor.u32 %v12302_v21, %v10433_v16 }
 0x71e   :  { %v9718_v14 = vor.u32 %v12116_v38, %v9715_v50  ;;  %v10435_v1 = vld [vmem:[#allocation16 + $0x7b8] sm:$0xf0]  ;;  %v12080_v11 = vld [vmem:[#allocation16 + $0xcc] sm:$0xf]  ;;  %v10290_v38 = vor.u32 %v12266_v28, %v10289_v20  ;;  %v12315_v20 = vld [vmem:[#allocation16 + $0x81c] sm:$0xf0] }
 0x71f   :  { %v3516_v12 = vadd.f32 %v3507_v49, %v3503_v55  ;;  %v3517_v15 = vadd.f32 %v3508_v5, %v3504_v56  ;;  %v3518_v59 = vadd.f32 %v3509_v31, %v3505_v57  ;;  %v10102_v49 = vor.u32 %v12212_v19, %v10099_v13  ;;  %v12104_v31 = vld [vmem:[#allocation16 + $0x18c] sm:$0xf]  ;;  %v10385_v55 = vld [vmem:[#allocation16 + $0x728] sm:$0xf]  ;;  %v12290_v56 = vld [vmem:[#allocation16 + $0x754] sm:$0xf0] }
 0x720   :  { %v10486_v5 = vor.u32 %v12308_v0, %v10483_v52  ;;  %v9670_v37 = vor.u32 %v12104_v31, %v9667_v34  ;;  %v10054_v57 = vor.u32 %v12200_v32, %v10051_v61  ;;  %v10438_v8 = vor.u32 %v12296_v35, %v10435_v1  ;;  %v12260_v60 = vld [vmem:[#allocation16 + $0x66c] sm:$0xf]  ;;  %v12254_v19 = vld [vmem:[#allocation16 + $0x634] sm:$0xf0]  ;;  %v9475_v0 = vld [vmem:[#allocation16 + $0x38] sm:$0xf0] }
 0x721   :  { %v13656_v29 = vpack.c.bf16 %v3516_v12, %v3513_v63  ;;  %v13658_v4 = vpack.c.bf16 %v3517_v15, %v3514_v36  ;;  %v13660_v23 = vpack.c.bf16 %v3518_v59, %v3515_v10  ;;  %v9619_v63 = vld [vmem:[#allocation16 + $0x158] sm:$0xf0]  ;;  %v12188_v36 = vld [vmem:[#allocation16 + $0x42c] sm:$0xf]  ;;  %v10386_v10 = vor.u32 %v12290_v56, %v10385_v55  ;;  %v10337_v15 = vld [vmem:[#allocation16 + $0x6c8] sm:$0xf] }
 0x722   :  { %v9622_v12 = vor.u32 %v12092_v48, %v9619_v63  ;;  %v12278_v59 = vld [vmem:[#allocation16 + $0x6f4] sm:$0xf0]  ;;  %v10006_v24 = vor.u32 %v12188_v36, %v10003_v62  ;;  %v12056_v13 = vld [vmem:[#allocation16 + $0xc] sm:$0xf]  ;;  %v9859_v16 = vld [vmem:[#allocation16 + $0x338] sm:$0xf0] }
 0x723   :  { %5286 = vmatmul.bf16.vlgmr.msra.gmra.mxu3 %v13656_v29  ;;  %5300 = vmatmul.bf16.vlgmr.msrb.gmra.mxu0 %v13658_v4  ;;  %v12248_v21 = vld [vmem:[#allocation16 + $0x60c] sm:$0xf]  ;;  %v12147_v31 = vld [vmem:[#allocation16 + $0x2dc] sm:$0xf0]  ;;  %v10201_v34 = vld [vmem:[#allocation16 + $0x5b0] sm:$0xf]  ;;  %v9478_v1 = vor.u32 %v12056_v13, %v9475_v0 }
 0x724   :  { %5314 = vmatmul.bf16.vlgmr.msrb.gmra.mxu1 %v13660_v23  ;;  %5328 = vmatmul.bf16.vlgmr.msra.gmra.mxu2 %v13656_v29  ;;  %v12243_v32 = vld [vmem:[#allocation16 + $0x5dc] sm:$0xf0]  ;;  %v10585_v61 = vld [vmem:[#allocation16 + $0x8b0] sm:$0xf]  ;;  %v9819_v55 = vld [vmem:[#allocation16 + $0x2e0] sm:$0xf0] }
 0x725   :  { %5390 = vmatpush.bf16.msra.mxu3 %v10578_v25  ;;  %5404 = vmatpush.bf16.msrb.mxu0 %v9814_v18  ;;  %v9571_v25 = vld [vmem:[#allocation16 + $0xf8] sm:$0xf0]  ;;  %v12176_v18 = vld [vmem:[#allocation16 + $0x3cc] sm:$0xf]  ;;  %v10202_v48 = vor.u32 %v12243_v32, %v10201_v34  ;;  %v9769_v63 = vld [vmem:[#allocation16 + $0x250] sm:$0xf] }
 0x726   :  { %5418 = vmatpush.bf16.msrb.mxu1 %v10198_v2  ;;  %5432 = vmatpush.bf16.msra.mxu2 %v10582_v27  ;;  %v10339_v2 = vld [vmem:[#allocation16 + $0x6f8] sm:$0xf0]  ;;  %v10338_v27 = vor.u32 %v12278_v59, %v10337_v15  ;;  %v9574_v43 = vor.u32 %v12080_v11, %v9571_v25  ;;  %v9958_v33 = vor.u32 %v12176_v18, %v9955_v22  ;;  %v12135_v36 = vld [vmem:[#allocation16 + $0x27c] sm:$0xf0]  ;;  %v12129_v59 = vld [vmem:[#allocation16 + $0x254] sm:$0xf] }
 0x727   :  { %v10342_v51 = vor.u32 %v12272_v47, %v10339_v2  ;;  %v12327_v15 = vld [vmem:[#allocation16 + $0x87c] sm:$0xf0]  ;;  %v9721_v25 = vld [vmem:[#allocation16 + $0x1f0] sm:$0xf]  ;;  %v12117_v28 = vld [vmem:[#allocation16 + $0x1f4] sm:$0xf] }
 0x728   :  { %v12123_v18 = vld [vmem:[#allocation16 + $0x21c] sm:$0xf0]  ;;  %v10105_v2 = vld [vmem:[#allocation16 + $0x4f0] sm:$0xf]  ;;  %v9675_v13 = vld [vmem:[#allocation16 + $0x1c0] sm:$0xf0] }
 0x729   :  { %5391 = vmatpush.bf16.msra.mxu3 %v10530_v40  ;;  %5405 = vmatpush.bf16.msrb.mxu0 %v9766_v44  ;;  %v9523_v40 = vld [vmem:[#allocation16 + $0x98] sm:$0xf0]  ;;  %v12164_v44 = vld [vmem:[#allocation16 + $0x36c] sm:$0xf]  ;;  %v12291_v34 = vld [vmem:[#allocation16 + $0x75c] sm:$0xf0] }
 0x72a   :  { %5419 = vmatpush.bf16.msrb.mxu1 %v10150_v45  ;;  %5433 = vmatpush.bf16.msra.mxu2 %v10534_v53  ;;  %v10291_v45 = vld [vmem:[#allocation16 + $0x698] sm:$0xf0]  ;;  %v10241_v53 = vld [vmem:[#allocation16 + $0x608] sm:$0xf]  ;;  %v9526_v50 = vor.u32 %v12068_v39, %v9523_v40  ;;  %v9910_v52 = vor.u32 %v12164_v44, %v9907_v30  ;;  %v9673_v40 = vld [vmem:[#allocation16 + $0x190] sm:$0xf] }
 0x72b   :  { %v10242_v35 = vor.u32 %v12254_v19, %v10241_v53  ;;  %v12111_v44 = vld [vmem:[#allocation16 + $0x1bc] sm:$0xf0]  ;;  %v12105_v19 = vld [vmem:[#allocation16 + $0x194] sm:$0xf] }
 0x72c   :  { %v12207_v53 = vld [vmem:[#allocation16 + $0x4bc] sm:$0xf0]  ;;  %v9674_v0 = vor.u32 %v12111_v44, %v9673_v40  ;;  %v12093_v32 = vld [vmem:[#allocation16 + $0x134] sm:$0xf] }
 0x72d   :  { %5392 = vmatpush.bf16.msra.mxu3 %v10482_v41  ;;  %5406 = vmatpush.bf16.msrb.mxu0 %v9718_v14  ;;  %v10294_v41 = vor.u32 %v12260_v60, %v10291_v45  ;;  %v12152_v14 = vld [vmem:[#allocation16 + $0x30c] sm:$0xf]  ;;  %v10057_v45 = vld [vmem:[#allocation16 + $0x490] sm:$0xf]  ;;  %v12255_v40 = vld [vmem:[#allocation16 + $0x63c] sm:$0xf0] }
 0x72e   :  { %5420 = vmatpush.bf16.msrb.mxu1 %v10102_v49  ;;  %5434 = vmatpush.bf16.msra.mxu2 %v10486_v5  ;;  %v10243_v49 = vld [vmem:[#allocation16 + $0x638] sm:$0xf0]  ;;  %v9817_v5 = vld [vmem:[#allocation16 + $0x2b0] sm:$0xf]  ;;  %v9862_v56 = vor.u32 %v12152_v14, %v9859_v16  ;;  %v12099_v14 = vld [vmem:[#allocation16 + $0x15c] sm:$0xf0] }
 0x72f   :  { %v12057_v44 = vld [vmem:[#allocation16 + $0x14] sm:$0xf] }
 0x731   :  { %5393 = vmatpush.bf16.msra.mxu3 %v10434_v3  ;;  %5407 = vmatpush.bf16.msrb.mxu0 %v9670_v37  ;;  %v12339_v3 = vld [vmem:[#allocation16 + $0x8dc] sm:$0xf0]  ;;  %v12141_v37 = vld [vmem:[#allocation16 + $0x2b4] sm:$0xf] }
 0x732   :  { %5421 = vmatpush.bf16.msrb.mxu1 %v10054_v57  ;;  %5435 = vmatpush.bf16.msra.mxu2 %v10438_v8  ;;  %v10246_v57 = vor.u32 %v12248_v21, %v10243_v49  ;;  %v9818_v8 = vor.u32 %v12147_v31, %v9817_v5  ;;  %v10586_v62 = vor.u32 %v12339_v3, %v10585_v61  ;;  %v10009_v49 = vld [vmem:[#allocation16 + $0x430] sm:$0xf]  ;;  %v12195_v5 = vld [vmem:[#allocation16 + $0x45c] sm:$0xf0]  ;;  %v9627_v61 = vld [vmem:[#allocation16 + $0x160] sm:$0xf0] }
 0x733   :  { %5342 = vmatmul.bf16.vlgmr.msrb.gmra.mxu3 %v13658_v4  ;;  %5356 = vmatmul.bf16.vlgmr.msra.gmra.mxu0 %v13660_v23  ;;  %v9822_v42 = vor.u32 %v12141_v37, %v9819_v55  ;;  %v9678_v21 = vor.u32 %v12105_v19, %v9675_v13  ;;  %v10393_v31 = vld [vmem:[#allocation16 + $0x730] sm:$0xf]  ;;  %v12087_v37 = vld [vmem:[#allocation16 + $0xfc] sm:$0xf0] }
 0x734   :  { %5370 = vmatmul.bf16.vlgmr.msra.gmra.mxu1 %v13656_v29  ;;  %5384 = vmatmul.bf16.vlgmr.msrb.gmra.mxu2 %v13658_v4  ;;  %v9577_v3 = vld [vmem:[#allocation16 + $0xd0] sm:$0xf]  ;;  %v10394_v55 = vor.u32 %v12291_v34, %v10393_v31  ;;  %v10155_v31 = vld [vmem:[#allocation16 + $0x580] sm:$0xf0] }
 0x735   :  { %5394 = vmatpush.bf16.msra.mxu3 %v10386_v10  ;;  %5408 = vmatpush.bf16.msrb.mxu0 %v9622_v12  ;;  %v12231_v10 = vld [vmem:[#allocation16 + $0x57c] sm:$0xf0]  ;;  %v10537_v12 = vld [vmem:[#allocation16 + $0x850] sm:$0xf] }
 0x736   :  { %5422 = vmatpush.bf16.msrb.mxu1 %v10006_v24  ;;  %5436 = vmatpush.bf16.msra.mxu2 %v10390_v46  ;;  %v9771_v24 = vld [vmem:[#allocation16 + $0x280] sm:$0xf0]  ;;  %v9770_v46 = vor.u32 %v12135_v36, %v9769_v63  ;;  %v10154_v11 = vor.u32 %v12231_v10, %v10153_v7  ;;  %v10538_v22 = vor.u32 %v12327_v15, %v10537_v12  ;;  %v12279_v63 = vld [vmem:[#allocation16 + $0x6fc] sm:$0xf0]  ;;  %v12081_v36 = vld [vmem:[#allocation16 + $0xd4] sm:$0xf] }
 0x737   :  { %v9774_v47 = vor.u32 %v12129_v59, %v9771_v24  ;;  %v9529_v10 = vld [vmem:[#allocation16 + $0x70] sm:$0xf]  ;;  %v12075_v12 = vld [vmem:[#allocation16 + $0x9c] sm:$0xf0] }
 0x738   :  { %v9913_v24 = vld [vmem:[#allocation16 + $0x370] sm:$0xf] }
 0x739   :  { %5395 = vmatpush.bf16.msra.mxu3 %v10338_v27  ;;  %5409 = vmatpush.bf16.msrb.mxu0 %v9574_v43  ;;  %v12219_v27 = vld [vmem:[#allocation16 + $0x51c] sm:$0xf0]  ;;  %v10489_v43 = vld [vmem:[#allocation16 + $0x7f0] sm:$0xf] }
 0x73a   :  { %5423 = vmatpush.bf16.msrb.mxu1 %v9958_v33  ;;  %5437 = vmatpush.bf16.msra.mxu2 %v10342_v51  ;;  %v9723_v33 = vld [vmem:[#allocation16 + $0x220] sm:$0xf0]  ;;  %v9722_v51 = vor.u32 %v12123_v18, %v9721_v25  ;;  %v10106_v39 = vor.u32 %v12219_v27, %v10105_v2  ;;  %v10490_v30 = vor.u32 %v12315_v20, %v10489_v43  ;;  %v12267_v25 = vld [vmem:[#allocation16 + $0x69c] sm:$0xf0]  ;;  %v12069_v18 = vld [vmem:[#allocation16 + $0x74] sm:$0xf] }
 0x73b   :  { %v9726_v60 = vor.u32 %v12117_v28, %v9723_v33  ;;  %v9530_v2 = vor.u32 %v12075_v12, %v9529_v10  ;;  %v12063_v43 = vld [vmem:[#allocation16 + $0x3c] sm:$0xf0]  ;;  %v9865_v20 = vld [vmem:[#allocation16 + $0x310] sm:$0xf]  ;;  %v12124_v10 = vld [vmem:[#allocation16 + $0x224] sm:$0xf0] }
 0x73c   :  { %v12159_v28 = vld [vmem:[#allocation16 + $0x33c] sm:$0xf0]  ;;  %v10113_v12 = vld [vmem:[#allocation16 + $0x4f8] sm:$0xf] }
 0x73d   :  { %5396 = vmatpush.bf16.msra.mxu3 %v10290_v38  ;;  %5410 = vmatpush.bf16.msrb.mxu0 %v9526_v50  ;;  %v10441_v38 = vld [vmem:[#allocation16 + $0x790] sm:$0xf]  ;;  %v12303_v50 = vld [vmem:[#allocation16 + $0x7bc] sm:$0xf0]  ;;  %v9866_v13 = vor.u32 %v12159_v28, %v9865_v20  ;;  %v12208_v20 = vld [vmem:[#allocation16 + $0x4c4] sm:$0xf0] }
 0x73e   :  { %5424 = vmatpush.bf16.msrb.mxu1 %v9910_v52  ;;  %5438 = vmatpush.bf16.msra.mxu2 %v10294_v41  ;;  %v10058_v52 = vor.u32 %v12207_v53, %v10057_v45  ;;  %v9625_v41 = vld [vmem:[#allocation16 + $0x130] sm:$0xf]  ;;  %v10442_v16 = vor.u32 %v12303_v50, %v10441_v38  ;;  %v10203_v45 = vld [vmem:[#allocation16 + $0x5e0] sm:$0xf0]  ;;  %v12333_v53 = vld [vmem:[#allocation16 + $0x8b4] sm:$0xf] }
 0x73f   :  { %v10587_v38 = vld [vmem:[#allocation16 + $0x8e0] sm:$0xf0]  ;;  %v9825_v50 = vld [vmem:[#allocation16 + $0x2b8] sm:$0xf] }
 0x741   :  { %5397 = vmatpush.bf16.msra.mxu3 %v10242_v35  ;;  %5411 = vmatpush.bf16.msrb.mxu0 %v9478_v1  ;;  %v9626_v35 = vor.u32 %v12099_v14, %v9625_v41  ;;  %v10010_v1 = vor.u32 %v12195_v5, %v10009_v49  ;;  %v12244_v41 = vld [vmem:[#allocation16 + $0x5e4] sm:$0xf0]  ;;  %v10590_v49 = vor.u32 %v12333_v53, %v10587_v38  ;;  %v12225_v5 = vld [vmem:[#allocation16 + $0x554] sm:$0xf]  ;;  %v10017_v38 = vld [vmem:[#allocation16 + $0x438] sm:$0xf] }
 0x742   :  { %5425 = vmatpush.bf16.msrb.mxu1 %v9862_v56  ;;  %5439 = vmatpush.bf16.msra.mxu2 %v10246_v57  ;;  %v9630_v56 = vor.u32 %v12093_v32, %v9627_v61  ;;  %v9961_v57 = vld [vmem:[#allocation16 + $0x3d0] sm:$0xf]  ;;  %v12321_v61 = vld [vmem:[#allocation16 + $0x854] sm:$0xf]  ;;  %v12100_v53 = vld [vmem:[#allocation16 + $0x164] sm:$0xf0] }
 0x744   :  { %5398 = vmatmul.bf16.vlgmr.msra.gmra.mxu3 %v13660_v23  ;;  %5412 = vmatmul.bf16.vlgmr.msrb.gmra.mxu0 %v13656_v29 }
 0x745   :  { %5446 = vmatpush.bf16.msrb.mxu3 %v9818_v8  ;;  %5460 = vmatpush.bf16.msra.mxu0 %v10202_v48  ;;  %v12183_v8 = vld [vmem:[#allocation16 + $0x3fc] sm:$0xf0]  ;;  %v10345_v48 = vld [vmem:[#allocation16 + $0x6d0] sm:$0xf] }
 0x746   :  { %5474 = vmatpush.bf16.msra.mxu1 %v10586_v62  ;;  %5488 = vmatpush.bf16.msrb.mxu2 %v9822_v42  ;;  %v9579_v62 = vld [vmem:[#allocation16 + $0x100] sm:$0xf0]  ;;  %v9578_v42 = vor.u32 %v12087_v37, %v9577_v3  ;;  %v9962_v7 = vor.u32 %v12183_v8, %v9961_v57  ;;  %v10346_v15 = vor.u32 %v12279_v63, %v10345_v48  ;;  %v12136_v3 = vld [vmem:[#allocation16 + $0x284] sm:$0xf0]  ;;  %v10161_v37 = vld [vmem:[#allocation16 + $0x558] sm:$0xf] }
 0x747   :  { %5426 = vmatmul.bf16.vlgmr.msrb.gmra.mxu1 %v13658_v4  ;;  %5440 = vmatmul.bf16.vlgmr.msra.gmra.mxu2 %v13660_v23  ;;  %v9582_v59 = vor.u32 %v12081_v36, %v9579_v62  ;;  %v12213_v8 = vld [vmem:[#allocation16 + $0x4f4] sm:$0xf]  ;;  %v10107_v48 = vld [vmem:[#allocation16 + $0x520] sm:$0xf0] }
 0x748   :  { %v12309_v62 = vld [vmem:[#allocation16 + $0x7f4] sm:$0xf] }
 0x749   :  { %5447 = vmatpush.bf16.msrb.mxu3 %v9770_v46  ;;  %5461 = vmatpush.bf16.msra.mxu0 %v10154_v11  ;;  %v12171_v46 = vld [vmem:[#allocation16 + $0x39c] sm:$0xf0]  ;;  %v10297_v11 = vld [vmem:[#allocation16 + $0x670] sm:$0xf] }
 0x74a   :  { %5475 = vmatpush.bf16.msra.mxu1 %v10538_v22  ;;  %5489 = vmatpush.bf16.msrb.mxu2 %v9774_v47  ;;  %v9531_v22 = vld [vmem:[#allocation16 + $0xa0] sm:$0xf0]  ;;  %v9481_v47 = vld [vmem:[#allocation16 + $0x10] sm:$0xf]  ;;  %v9914_v27 = vor.u32 %v12171_v46, %v9913_v24  ;;  %v10298_v33 = vor.u32 %v12267_v25, %v10297_v11  ;;  %v12201_v46 = vld [vmem:[#allocation16 + $0x494] sm:$0xf] }
 0x74b   :  { %v9482_v19 = vor.u32 %v12063_v43, %v9481_v47  ;;  %v10059_v11 = vld [vmem:[#allocation16 + $0x4c0] sm:$0xf0]  ;;  %v10065_v43 = vld [vmem:[#allocation16 + $0x498] sm:$0xf] }
 0x74c   :  { %v10443_v47 = vld [vmem:[#allocation16 + $0x7c0] sm:$0xf0]  ;;  %v10062_v28 = vor.u32 %v12201_v46, %v10059_v11  ;;  %v12064_v46 = vld [vmem:[#allocation16 + $0x44] sm:$0xf0]  ;;  %v9873_v11 = vld [vmem:[#allocation16 + $0x318] sm:$0xf] }
 0x74d   :  { %5448 = vmatpush.bf16.msrb.mxu3 %v9722_v51  ;;  %5462 = vmatpush.bf16.msra.mxu0 %v10106_v39  ;;  %v9534_v51 = vor.u32 %v12069_v18, %v9531_v22  ;;  %v10249_v39 = vld [vmem:[#allocation16 + $0x610] sm:$0xf]  ;;  %v12297_v22 = vld [vmem:[#allocation16 + $0x794] sm:$0xf] }
 0x74e   :  { %5476 = vmatpush.bf16.msra.mxu1 %v10490_v30  ;;  %5490 = vmatpush.bf16.msrb.mxu2 %v9726_v60  ;;  %v9483_v30 = vld [vmem:[#allocation16 + $0x40] sm:$0xf0]  ;;  %v12237_v60 = vld [vmem:[#allocation16 + $0x5b4] sm:$0xf]  ;;  %v10250_v14 = vor.u32 %v12255_v40, %v10249_v39 }
 0x74f   :  { %v10011_v39 = vld [vmem:[#allocation16 + $0x460] sm:$0xf0] }
 0x751   :  { %5449 = vmatpush.bf16.msrb.mxu3 %v9674_v0  ;;  %5463 = vmatpush.bf16.msra.mxu0 %v10058_v52  ;;  %v12148_v0 = vld [vmem:[#allocation16 + $0x2e4] sm:$0xf0]  ;;  %v10209_v52 = vld [vmem:[#allocation16 + $0x5b8] sm:$0xf] }
 0x752   :  { %5477 = vmatpush.bf16.msra.mxu1 %v10442_v16  ;;  %5491 = vmatpush.bf16.msrb.mxu2 %v9678_v21  ;;  %v9486_v16 = vor.u32 %v12057_v44, %v9483_v30  ;;  %v10206_v21 = vor.u32 %v12237_v60, %v10203_v45  ;;  %v9826_v34 = vor.u32 %v12148_v0, %v9825_v50  ;;  %v12285_v30 = vld [vmem:[#allocation16 + $0x734] sm:$0xf]  ;;  %v10395_v60 = vld [vmem:[#allocation16 + $0x760] sm:$0xf0]  ;;  %v9633_v45 = vld [vmem:[#allocation16 + $0x138] sm:$0xf] }
 0x753   :  { %v10210_v32 = vor.u32 %v12244_v41, %v10209_v52  ;;  %v10066_v44 = vor.u32 %v12208_v20, %v10065_v43  ;;  %v12196_v50 = vld [vmem:[#allocation16 + $0x464] sm:$0xf0]  ;;  %v12177_v0 = vld [vmem:[#allocation16 + $0x3d4] sm:$0xf]  ;;  %v9963_v52 = vld [vmem:[#allocation16 + $0x400] sm:$0xf0]  ;;  %v9634_v41 = vor.u32 %v12100_v53, %v9633_v45 }
 0x754   :  { %v12328_v45 = vld [vmem:[#allocation16 + $0x884] sm:$0xf0] }
 0x755   :  { %5450 = vmatpush.bf16.msrb.mxu3 %v9626_v35  ;;  %5464 = vmatpush.bf16.msra.mxu0 %v10010_v1  ;;  %v10539_v35 = vld [vmem:[#allocation16 + $0x880] sm:$0xf0]  ;;  %v9777_v1 = vld [vmem:[#allocation16 + $0x258] sm:$0xf] }
 0x756   :  { %5478 = vmatpush.bf16.msra.mxu1 %v10394_v55  ;;  %5492 = vmatpush.bf16.msrb.mxu2 %v9630_v56  ;;  %v12232_v55 = vld [vmem:[#allocation16 + $0x584] sm:$0xf0]  ;;  %v10158_v56 = vor.u32 %v12225_v5, %v10155_v31  ;;  %v10542_v57 = vor.u32 %v12321_v61, %v10539_v35  ;;  %v9778_v63 = vor.u32 %v12136_v3, %v9777_v1  ;;  %v9969_v31 = vld [vmem:[#allocation16 + $0x3d8] sm:$0xf]  ;;  %v12165_v35 = vld [vmem:[#allocation16 + $0x374] sm:$0xf] }
 0x757   :  { %v10162_v36 = vor.u32 %v12232_v55, %v10161_v37  ;;  %v12088_v5 = vld [vmem:[#allocation16 + $0x104] sm:$0xf0]  ;;  %v9915_v1 = vld [vmem:[#allocation16 + $0x3a0] sm:$0xf0]  ;;  %v12261_v55 = vld [vmem:[#allocation16 + $0x674] sm:$0xf] }
 0x759   :  { %5451 = vmatpush.bf16.msrb.mxu3 %v9578_v42  ;;  %5465 = vmatpush.bf16.msra.mxu0 %v9962_v7  ;;  %v10491_v42 = vld [vmem:[#allocation16 + $0x820] sm:$0xf0]  ;;  %v9729_v7 = vld [vmem:[#allocation16 + $0x1f8] sm:$0xf] }
 0x75a   :  { %5479 = vmatpush.bf16.msra.mxu1 %v10346_v15  ;;  %5493 = vmatpush.bf16.msrb.mxu2 %v9582_v59  ;;  %v12220_v15 = vld [vmem:[#allocation16 + $0x524] sm:$0xf0]  ;;  %v10110_v59 = vor.u32 %v12213_v8, %v10107_v48  ;;  %v10494_v24 = vor.u32 %v12309_v62, %v10491_v42  ;;  %v9730_v25 = vor.u32 %v12124_v10, %v9729_v7  ;;  %v9921_v48 = vld [vmem:[#allocation16 + $0x378] sm:$0xf]  ;;  %v9867_v7 = vld [vmem:[#allocation16 + $0x340] sm:$0xf0] }
 0x75b   :  { %v10114_v18 = vor.u32 %v12220_v15, %v10113_v12  ;;  %v12076_v8 = vld [vmem:[#allocation16 + $0xa4] sm:$0xf0]  ;;  %v9918_v62 = vor.u32 %v12165_v35, %v9915_v1  ;;  %v12249_v10 = vld [vmem:[#allocation16 + $0x614] sm:$0xf]  ;;  %v10251_v12 = vld [vmem:[#allocation16 + $0x640] sm:$0xf0] }
 0x75c   :  { %v10254_v20 = vor.u32 %v12249_v10, %v10251_v12  ;;  %v10115_v35 = vld [vmem:[#allocation16 + $0x528] sm:$0xf0]  ;;  %v12310_v1 = vld [vmem:[#allocation16 + $0x7fc] sm:$0xf] }
 0x75d   :  { %5452 = vmatpush.bf16.msrb.mxu3 %v9530_v2  ;;  %5466 = vmatpush.bf16.msra.mxu0 %v9914_v27  ;;  %v9681_v2 = vld [vmem:[#allocation16 + $0x198] sm:$0xf]  ;;  %v12112_v27 = vld [vmem:[#allocation16 + $0x1c4] sm:$0xf0]  ;;  %v10451_v10 = vld [vmem:[#allocation16 + $0x7c8] sm:$0xf0] }
 0x75e   :  { %5480 = vmatpush.bf16.msra.mxu1 %v10298_v33  ;;  %5494 = vmatpush.bf16.msrb.mxu2 %v9534_v51  ;;  %v10446_v33 = vor.u32 %v12297_v22, %v10443_v47  ;;  %v12189_v51 = vld [vmem:[#allocation16 + $0x434] sm:$0xf]  ;;  %v9682_v40 = vor.u32 %v12112_v27, %v9681_v2  ;;  %v12340_v22 = vld [vmem:[#allocation16 + $0x8e4] sm:$0xf0]  ;;  %v12142_v47 = vld [vmem:[#allocation16 + $0x2bc] sm:$0xf] }
 0x75f   :  { %v9827_v2 = vld [vmem:[#allocation16 + $0x2e8] sm:$0xf0]  ;;  %v12238_v27 = vld [vmem:[#allocation16 + $0x5bc] sm:$0xf] }
 0x761   :  { %5453 = vmatpush.bf16.msrb.mxu3 %v9482_v19  ;;  %5467 = vmatpush.bf16.msra.mxu0 %v9866_v13  ;;  %v10014_v19 = vor.u32 %v12189_v51, %v10011_v39  ;;  %v10398_v13 = vor.u32 %v12285_v30, %v10395_v60  ;;  %v10595_v51 = vld [vmem:[#allocation16 + $0x8e8] sm:$0xf0]  ;;  %v9830_v30 = vor.u32 %v12142_v47, %v9827_v2  ;;  %v10545_v60 = vld [vmem:[#allocation16 + $0x858] sm:$0xf]  ;;  %v12286_v2 = vld [vmem:[#allocation16 + $0x73c] sm:$0xf] }
 0x762   :  { %5481 = vmatpush.bf16.msra.mxu1 %v10250_v14  ;;  %5495 = vmatpush.bf16.msrb.mxu2 %v9486_v16  ;;  %v10018_v14 = vor.u32 %v12196_v50, %v10017_v38  ;;  %v12273_v16 = vld [vmem:[#allocation16 + $0x6d4] sm:$0xf]  ;;  %v12130_v50 = vld [vmem:[#allocation16 + $0x25c] sm:$0xf]  ;;  %v10019_v47 = vld [vmem:[#allocation16 + $0x468] sm:$0xf0] }
 0x764   :  { %5454 = vmatmul.bf16.vlgmr.msrb.gmra.mxu3 %v13656_v29  ;;  %5468 = vmatmul.bf16.vlgmr.msra.gmra.mxu0 %v13658_v4 }
 0x765   :  { %5502 = vmatpush.bf16.msra.mxu3 %v10206_v21  ;;  %5516 = vmatpush.bf16.msrb.mxu0 %v10590_v49  ;;  %v10347_v21 = vld [vmem:[#allocation16 + $0x700] sm:$0xf0]  ;;  %v9585_v49 = vld [vmem:[#allocation16 + $0xd8] sm:$0xf] }
 0x766   :  { %5530 = vmatpush.bf16.msrb.mxu1 %v9826_v34  ;;  %5544 = vmatpush.bf16.msra.mxu2 %v10210_v32  ;;  %v12184_v34 = vld [vmem:[#allocation16 + $0x404] sm:$0xf0]  ;;  %v9966_v32 = vor.u32 %v12177_v0, %v9963_v52  ;;  %v10350_v61 = vor.u32 %v12273_v16, %v10347_v21  ;;  %v9586_v3 = vor.u32 %v12088_v5, %v9585_v49  ;;  %v10163_v0 = vld [vmem:[#allocation16 + $0x588] sm:$0xf0]  ;;  %v12322_v52 = vld [vmem:[#allocation16 + $0x85c] sm:$0xf] }
 0x767   :  { %5482 = vmatmul.bf16.vlgmr.msra.gmra.mxu1 %v13660_v23  ;;  %5496 = vmatmul.bf16.vlgmr.msrb.gmra.mxu2 %v13656_v29  ;;  %v9970_v37 = vor.u32 %v12184_v34, %v9969_v31  ;;  %v10497_v21 = vld [vmem:[#allocation16 + $0x7f8] sm:$0xf]  ;;  %v12316_v49 = vld [vmem:[#allocation16 + $0x824] sm:$0xf0]  ;;  %v12118_v34 = vld [vmem:[#allocation16 + $0x1fc] sm:$0xf] }
 0x769   :  { %5503 = vmatpush.bf16.msra.mxu3 %v10158_v56  ;;  %5517 = vmatpush.bf16.msrb.mxu0 %v10542_v57  ;;  %v10299_v56 = vld [vmem:[#allocation16 + $0x6a0] sm:$0xf0]  ;;  %v9537_v57 = vld [vmem:[#allocation16 + $0x78] sm:$0xf] }
 0x76a   :  { %5531 = vmatpush.bf16.msrb.mxu1 %v9778_v63  ;;  %5545 = vmatpush.bf16.msra.mxu2 %v10162_v36  ;;  %v12172_v63 = vld [vmem:[#allocation16 + $0x3a4] sm:$0xf0]  ;;  %v12153_v36 = vld [vmem:[#allocation16 + $0x314] sm:$0xf]  ;;  %v10302_v42 = vor.u32 %v12261_v55, %v10299_v56  ;;  %v9538_v15 = vor.u32 %v12076_v8, %v9537_v57  ;;  %v10449_v56 = vld [vmem:[#allocation16 + $0x798] sm:$0xf] }
 0x76b   :  { %v9870_v43 = vor.u32 %v12153_v36, %v9867_v7  ;;  %v12304_v57 = vld [vmem:[#allocation16 + $0x7c4] sm:$0xf0]  ;;  %v9683_v36 = vld [vmem:[#allocation16 + $0x1c8] sm:$0xf0]  ;;  %v12298_v7 = vld [vmem:[#allocation16 + $0x79c] sm:$0xf] }
 0x76c   :  { %v10450_v12 = vor.u32 %v12304_v57, %v10449_v56  ;;  %v9875_v56 = vld [vmem:[#allocation16 + $0x348] sm:$0xf0]  ;;  %v12250_v57 = vld [vmem:[#allocation16 + $0x61c] sm:$0xf] }
 0x76d   :  { %5504 = vmatpush.bf16.msra.mxu3 %v10110_v59  ;;  %5518 = vmatpush.bf16.msrb.mxu0 %v10494_v24  ;;  %v9922_v59 = vor.u32 %v12172_v63, %v9921_v48  ;;  %v9489_v24 = vld [vmem:[#allocation16 + $0x18] sm:$0xf]  ;;  %v12106_v63 = vld [vmem:[#allocation16 + $0x19c] sm:$0xf] }
 0x76e   :  { %5532 = vmatpush.bf16.msrb.mxu1 %v9730_v25  ;;  %5546 = vmatpush.bf16.msra.mxu2 %v10114_v18  ;;  %v12160_v25 = vld [vmem:[#allocation16 + $0x344] sm:$0xf0]  ;;  %v10593_v18 = vld [vmem:[#allocation16 + $0x8b8] sm:$0xf]  ;;  %v9490_v39 = vor.u32 %v12064_v46, %v9489_v24 }
 0x76f   :  { %v12292_v24 = vld [vmem:[#allocation16 + $0x764] sm:$0xf0] }
 0x771   :  { %5505 = vmatpush.bf16.msra.mxu3 %v10062_v28  ;;  %5519 = vmatpush.bf16.msrb.mxu0 %v10446_v33  ;;  %v10211_v28 = vld [vmem:[#allocation16 + $0x5e8] sm:$0xf0]  ;;  %v12334_v33 = vld [vmem:[#allocation16 + $0x8bc] sm:$0xf] }
 0x772   :  { %5533 = vmatpush.bf16.msrb.mxu1 %v9682_v40  ;;  %5547 = vmatpush.bf16.msra.mxu2 %v10066_v44  ;;  %v9874_v40 = vor.u32 %v12160_v25, %v9873_v11  ;;  %v10594_v44 = vor.u32 %v12340_v22, %v10593_v18  ;;  %v10214_v53 = vor.u32 %v12238_v27, %v10211_v28  ;;  %v12094_v25 = vld [vmem:[#allocation16 + $0x13c] sm:$0xf]  ;;  %v9635_v18 = vld [vmem:[#allocation16 + $0x168] sm:$0xf0]  ;;  %v10353_v28 = vld [vmem:[#allocation16 + $0x6d8] sm:$0xf] }
 0x773   :  { %v10598_v38 = vor.u32 %v12334_v33, %v10595_v51  ;;  %v10454_v11 = vor.u32 %v12298_v7, %v10451_v10  ;;  %v12190_v22 = vld [vmem:[#allocation16 + $0x43c] sm:$0xf]  ;;  %v10403_v27 = vld [vmem:[#allocation16 + $0x768] sm:$0xf0]  ;;  %v12280_v33 = vld [vmem:[#allocation16 + $0x704] sm:$0xf0] }
 0x774   :  { %v10022_v51 = vor.u32 %v12190_v22, %v10019_v47  ;;  %v12137_v22 = vld [vmem:[#allocation16 + $0x28c] sm:$0xf0] }
 0x775   :  { %5506 = vmatpush.bf16.msra.mxu3 %v10014_v19  ;;  %5520 = vmatpush.bf16.msrb.mxu0 %v10398_v13  ;;  %v9779_v19 = vld [vmem:[#allocation16 + $0x288] sm:$0xf0]  ;;  %v12226_v13 = vld [vmem:[#allocation16 + $0x55c] sm:$0xf] }
 0x776   :  { %5534 = vmatpush.bf16.msrb.mxu1 %v9634_v41  ;;  %5548 = vmatpush.bf16.msra.mxu2 %v10018_v14  ;;  %v10547_v41 = vld [vmem:[#allocation16 + $0x888] sm:$0xf0]  ;;  %v10546_v14 = vor.u32 %v12328_v45, %v10545_v60  ;;  %v9782_v16 = vor.u32 %v12130_v50, %v9779_v19  ;;  %v10166_v5 = vor.u32 %v12226_v13, %v10163_v0  ;;  %v12274_v45 = vld [vmem:[#allocation16 + $0x6dc] sm:$0xf]  ;;  %v10305_v19 = vld [vmem:[#allocation16 + $0x678] sm:$0xf] }
 0x777   :  { %v10550_v31 = vor.u32 %v12322_v52, %v10547_v41  ;;  %v9971_v60 = vld [vmem:[#allocation16 + $0x408] sm:$0xf0]  ;;  %v12268_v13 = vld [vmem:[#allocation16 + $0x6a4] sm:$0xf0]  ;;  %v12070_v41 = vld [vmem:[#allocation16 + $0x7c] sm:$0xf] }
 0x779   :  { %5507 = vmatpush.bf16.msra.mxu3 %v9966_v32  ;;  %5521 = vmatpush.bf16.msrb.mxu0 %v10350_v61  ;;  %v9731_v32 = vld [vmem:[#allocation16 + $0x228] sm:$0xf0]  ;;  %v12214_v61 = vld [vmem:[#allocation16 + $0x4fc] sm:$0xf] }
 0x77a   :  { %5535 = vmatpush.bf16.msrb.mxu1 %v9586_v3  ;;  %5549 = vmatpush.bf16.msra.mxu2 %v9970_v37  ;;  %v10499_v3 = vld [vmem:[#allocation16 + $0x828] sm:$0xf0]  ;;  %v10498_v37 = vor.u32 %v12316_v49, %v10497_v21  ;;  %v9734_v55 = vor.u32 %v12118_v34, %v9731_v32  ;;  %v10118_v8 = vor.u32 %v12214_v61, %v10115_v35  ;;  %v12262_v49 = vld [vmem:[#allocation16 + $0x67c] sm:$0xf]  ;;  %v12256_v61 = vld [vmem:[#allocation16 + $0x644] sm:$0xf0] }
 0x77b   :  { %v10502_v48 = vor.u32 %v12310_v1, %v10499_v3  ;;  %v9923_v21 = vld [vmem:[#allocation16 + $0x3a8] sm:$0xf0]  ;;  %v10306_v34 = vor.u32 %v12268_v13, %v10305_v19  ;;  %v12058_v35 = vld [vmem:[#allocation16 + $0x1c] sm:$0xf]  ;;  %v12317_v19 = vld [vmem:[#allocation16 + $0x82c] sm:$0xf0] }
 0x77c   :  { %v9491_v1 = vld [vmem:[#allocation16 + $0x48] sm:$0xf0]  ;;  %v12119_v13 = vld [vmem:[#allocation16 + $0x204] sm:$0xf] }
 0x77d   :  { %5508 = vmatpush.bf16.msra.mxu3 %v9918_v62  ;;  %5522 = vmatpush.bf16.msrb.mxu0 %v10302_v42  ;;  %v12202_v62 = vld [vmem:[#allocation16 + $0x49c] sm:$0xf]  ;;  %v10067_v42 = vld [vmem:[#allocation16 + $0x4c8] sm:$0xf0]  ;;  %v9494_v10 = vor.u32 %v12058_v35, %v9491_v1  ;;  %v9691_v35 = vld [vmem:[#allocation16 + $0x1d0] sm:$0xf0] }
 0x77e   :  { %5536 = vmatpush.bf16.msrb.mxu1 %v9538_v15  ;;  %5550 = vmatpush.bf16.msra.mxu2 %v9922_v59  ;;  %v9686_v15 = vor.u32 %v12106_v63, %v9683_v36  ;;  %v10401_v59 = vld [vmem:[#allocation16 + $0x738] sm:$0xf]  ;;  %v10070_v46 = vor.u32 %v12202_v62, %v10067_v42  ;;  %v12149_v63 = vld [vmem:[#allocation16 + $0x2ec] sm:$0xf0]  ;;  %v10217_v36 = vld [vmem:[#allocation16 + $0x5c0] sm:$0xf] }
 0x77f   :  { %v12245_v62 = vld [vmem:[#allocation16 + $0x5ec] sm:$0xf0]  ;;  %v10601_v42 = vld [vmem:[#allocation16 + $0x8c0] sm:$0xf] }
 0x781   :  { %5509 = vmatpush.bf16.msra.mxu3 %v9870_v43  ;;  %5523 = vmatpush.bf16.msrb.mxu0 %v10254_v20  ;;  %v10402_v43 = vor.u32 %v12292_v24, %v10401_v59  ;;  %v9638_v20 = vor.u32 %v12094_v25, %v9635_v18  ;;  %v9835_v59 = vld [vmem:[#allocation16 + $0x2f0] sm:$0xf0]  ;;  %v10218_v25 = vor.u32 %v12245_v62, %v10217_v36  ;;  %v9785_v18 = vld [vmem:[#allocation16 + $0x260] sm:$0xf]  ;;  %v12293_v36 = vld [vmem:[#allocation16 + $0x76c] sm:$0xf0] }
 0x782   :  { %5537 = vmatpush.bf16.msrb.mxu1 %v9490_v39  ;;  %5551 = vmatpush.bf16.msra.mxu2 %v9874_v40  ;;  %v10406_v39 = vor.u32 %v12286_v2, %v10403_v27  ;;  %v12082_v40 = vld [vmem:[#allocation16 + $0xdc] sm:$0xf]  ;;  %v10169_v27 = vld [vmem:[#allocation16 + $0x560] sm:$0xf]  ;;  %v12095_v62 = vld [vmem:[#allocation16 + $0x144] sm:$0xf] }
 0x784   :  { %5510 = vmatmul.bf16.vlgmr.msra.gmra.mxu3 %v13658_v4  ;;  %5524 = vmatmul.bf16.vlgmr.msrb.gmra.mxu0 %v13660_v23 }
 0x785   :  { %5558 = vmatpush.bf16.msrb.mxu3 %v10594_v44  ;;  %5572 = vmatpush.bf16.msra.mxu0 %v9830_v30  ;;  %v9587_v44 = vld [vmem:[#allocation16 + $0x108] sm:$0xf0]  ;;  %v12178_v30 = vld [vmem:[#allocation16 + $0x3dc] sm:$0xf] }
 0x786   :  { %5586 = vmatpush.bf16.msra.mxu1 %v10214_v53  ;;  %5600 = vmatpush.bf16.msrb.mxu2 %v10598_v38  ;;  %v10355_v53 = vld [vmem:[#allocation16 + $0x708] sm:$0xf0]  ;;  %v10354_v38 = vor.u32 %v12280_v33, %v10353_v28  ;;  %v9590_v50 = vor.u32 %v12082_v40, %v9587_v44  ;;  %v9974_v0 = vor.u32 %v12178_v30, %v9971_v60  ;;  %v12329_v28 = vld [vmem:[#allocation16 + $0x88c] sm:$0xf0]  ;;  %v12131_v33 = vld [vmem:[#allocation16 + $0x264] sm:$0xf] }
 0x787   :  { %5538 = vmatmul.bf16.vlgmr.msrb.gmra.mxu1 %v13656_v29  ;;  %5552 = vmatmul.bf16.vlgmr.msra.gmra.mxu2 %v13658_v4  ;;  %v10358_v52 = vor.u32 %v12274_v45, %v10355_v53  ;;  %v9737_v44 = vld [vmem:[#allocation16 + $0x200] sm:$0xf]  ;;  %v12125_v30 = vld [vmem:[#allocation16 + $0x22c] sm:$0xf0] }
 0x788   :  { %v10121_v53 = vld [vmem:[#allocation16 + $0x500] sm:$0xf] }
 0x789   :  { %5559 = vmatpush.bf16.msrb.mxu3 %v10546_v14  ;;  %5573 = vmatpush.bf16.msra.mxu0 %v9782_v16  ;;  %v9539_v14 = vld [vmem:[#allocation16 + $0xa8] sm:$0xf0]  ;;  %v12166_v16 = vld [vmem:[#allocation16 + $0x37c] sm:$0xf] }
 0x78a   :  { %5587 = vmatpush.bf16.msra.mxu1 %v10166_v5  ;;  %5601 = vmatpush.bf16.msrb.mxu2 %v10550_v31  ;;  %v10307_v5 = vld [vmem:[#allocation16 + $0x6a8] sm:$0xf0]  ;;  %v10257_v31 = vld [vmem:[#allocation16 + $0x618] sm:$0xf]  ;;  %v9542_v32 = vor.u32 %v12070_v41, %v9539_v14  ;;  %v9926_v3 = vor.u32 %v12166_v16, %v9923_v21  ;;  %v9689_v14 = vld [vmem:[#allocation16 + $0x1a0] sm:$0xf] }
 0x78b   :  { %v10258_v7 = vor.u32 %v12256_v61, %v10257_v31  ;;  %v12113_v16 = vld [vmem:[#allocation16 + $0x1cc] sm:$0xf0]  ;;  %v12107_v61 = vld [vmem:[#allocation16 + $0x1a4] sm:$0xf] }
 0x78c   :  { %v12209_v31 = vld [vmem:[#allocation16 + $0x4cc] sm:$0xf0]  ;;  %v9690_v1 = vor.u32 %v12113_v16, %v9689_v14  ;;  %v12059_v16 = vld [vmem:[#allocation16 + $0x24] sm:$0xf] }
 0x78d   :  { %5560 = vmatpush.bf16.msrb.mxu3 %v10498_v37  ;;  %5574 = vmatpush.bf16.msra.mxu0 %v9734_v55  ;;  %v10310_v37 = vor.u32 %v12262_v49, %v10307_v5  ;;  %v12154_v55 = vld [vmem:[#allocation16 + $0x31c] sm:$0xf]  ;;  %v10073_v5 = vld [vmem:[#allocation16 + $0x4a0] sm:$0xf]  ;;  %v12257_v14 = vld [vmem:[#allocation16 + $0x64c] sm:$0xf0] }
 0x78e   :  { %5588 = vmatpush.bf16.msra.mxu1 %v10118_v8  ;;  %5602 = vmatpush.bf16.msrb.mxu2 %v10502_v48  ;;  %v10259_v8 = vld [vmem:[#allocation16 + $0x648] sm:$0xf0]  ;;  %v9833_v48 = vld [vmem:[#allocation16 + $0x2c0] sm:$0xf]  ;;  %v9878_v24 = vor.u32 %v12154_v55, %v9875_v56  ;;  %v12101_v55 = vld [vmem:[#allocation16 + $0x16c] sm:$0xf0] }
 0x791   :  { %5561 = vmatpush.bf16.msrb.mxu3 %v10450_v12  ;;  %5575 = vmatpush.bf16.msra.mxu0 %v9686_v15  ;;  %v12341_v12 = vld [vmem:[#allocation16 + $0x8ec] sm:$0xf0]  ;;  %v12143_v15 = vld [vmem:[#allocation16 + $0x2c4] sm:$0xf] }
 0x792   :  { %5589 = vmatpush.bf16.msra.mxu1 %v10070_v46  ;;  %5603 = vmatpush.bf16.msrb.mxu2 %v10454_v11  ;;  %v10262_v46 = vor.u32 %v12250_v57, %v10259_v8  ;;  %v9834_v11 = vor.u32 %v12149_v63, %v9833_v48  ;;  %v10602_v47 = vor.u32 %v12341_v12, %v10601_v42  ;;  %v10025_v8 = vld [vmem:[#allocation16 + $0x440] sm:$0xf]  ;;  %v12197_v48 = vld [vmem:[#allocation16 + $0x46c] sm:$0xf0]  ;;  %v9643_v42 = vld [vmem:[#allocation16 + $0x170] sm:$0xf0] }
 0x793   :  { %v9838_v2 = vor.u32 %v12143_v15, %v9835_v59  ;;  %v9694_v57 = vor.u32 %v12107_v61, %v9691_v35  ;;  %v10409_v63 = vld [vmem:[#allocation16 + $0x740] sm:$0xf]  ;;  %v12089_v15 = vld [vmem:[#allocation16 + $0x10c] sm:$0xf0] }
 0x794   :  { %v9593_v12 = vld [vmem:[#allocation16 + $0xe0] sm:$0xf]  ;;  %v10410_v59 = vor.u32 %v12293_v36, %v10409_v63  ;;  %v10171_v63 = vld [vmem:[#allocation16 + $0x590] sm:$0xf0] }
 0x795   :  { %5562 = vmatpush.bf16.msrb.mxu3 %v10402_v43  ;;  %5576 = vmatpush.bf16.msra.mxu0 %v9638_v20  ;;  %v12233_v43 = vld [vmem:[#allocation16 + $0x58c] sm:$0xf0]  ;;  %v10553_v20 = vld [vmem:[#allocation16 + $0x860] sm:$0xf] }
 0x796   :  { %5590 = vmatpush.bf16.msra.mxu1 %v10022_v51  ;;  %5604 = vmatpush.bf16.msrb.mxu2 %v10406_v39  ;;  %v9787_v51 = vld [vmem:[#allocation16 + $0x290] sm:$0xf0]  ;;  %v9786_v39 = vor.u32 %v12137_v22, %v9785_v18  ;;  %v10170_v40 = vor.u32 %v12233_v43, %v10169_v27  ;;  %v10554_v60 = vor.u32 %v12329_v28, %v10553_v20  ;;  %v12281_v18 = vld [vmem:[#allocation16 + $0x70c] sm:$0xf0]  ;;  %v12083_v22 = vld [vmem:[#allocation16 + $0xe4] sm:$0xf] }
 0x797   :  { %v9790_v45 = vor.u32 %v12131_v33, %v9787_v51  ;;  %v9545_v43 = vld [vmem:[#allocation16 + $0x80] sm:$0xf]  ;;  %v12077_v20 = vld [vmem:[#allocation16 + $0xac] sm:$0xf0] }
 0x798   :  { %v9929_v51 = vld [vmem:[#allocation16 + $0x380] sm:$0xf] }
 0x799   :  { %5563 = vmatpush.bf16.msrb.mxu3 %v10354_v38  ;;  %5577 = vmatpush.bf16.msra.mxu0 %v9590_v50  ;;  %v12221_v38 = vld [vmem:[#allocation16 + $0x52c] sm:$0xf0]  ;;  %v10505_v50 = vld [vmem:[#allocation16 + $0x800] sm:$0xf] }
 0x79a   :  { %5591 = vmatpush.bf16.msra.mxu1 %v9974_v0  ;;  %5605 = vmatpush.bf16.msrb.mxu2 %v10358_v52  ;;  %v9739_v0 = vld [vmem:[#allocation16 + $0x230] sm:$0xf0]  ;;  %v9738_v52 = vor.u32 %v12125_v30, %v9737_v44  ;;  %v10122_v41 = vor.u32 %v12221_v38, %v10121_v53  ;;  %v10506_v21 = vor.u32 %v12317_v19, %v10505_v50  ;;  %v12269_v44 = vld [vmem:[#allocation16 + $0x6ac] sm:$0xf0]  ;;  %v12071_v30 = vld [vmem:[#allocation16 + $0x84] sm:$0xf] }
 0x79b   :  { %v9742_v49 = vor.u32 %v12119_v13, %v9739_v0  ;;  %v9546_v53 = vor.u32 %v12077_v20, %v9545_v43  ;;  %v12065_v50 = vld [vmem:[#allocation16 + $0x4c] sm:$0xf0]  ;;  %v9881_v19 = vld [vmem:[#allocation16 + $0x320] sm:$0xf]  ;;  %v12126_v43 = vld [vmem:[#allocation16 + $0x234] sm:$0xf0] }
 0x79c   :  { %v12161_v13 = vld [vmem:[#allocation16 + $0x34c] sm:$0xf0]  ;;  %v10129_v20 = vld [vmem:[#allocation16 + $0x508] sm:$0xf] }
 0x79d   :  { %5564 = vmatpush.bf16.msrb.mxu3 %v10306_v34  ;;  %5578 = vmatpush.bf16.msra.mxu0 %v9542_v32  ;;  %v10457_v34 = vld [vmem:[#allocation16 + $0x7a0] sm:$0xf]  ;;  %v12305_v32 = vld [vmem:[#allocation16 + $0x7cc] sm:$0xf0]  ;;  %v9882_v35 = vor.u32 %v12161_v13, %v9881_v19  ;;  %v12114_v19 = vld [vmem:[#allocation16 + $0x1d4] sm:$0xf0] }
 0x79e   :  { %5592 = vmatpush.bf16.msra.mxu1 %v9926_v3  ;;  %5606 = vmatpush.bf16.msrb.mxu2 %v10310_v37  ;;  %v10074_v3 = vor.u32 %v12209_v31, %v10073_v5  ;;  %v9641_v37 = vld [vmem:[#allocation16 + $0x140] sm:$0xf]  ;;  %v10458_v56 = vor.u32 %v12305_v32, %v10457_v34  ;;  %v10219_v5 = vld [vmem:[#allocation16 + $0x5f0] sm:$0xf0]  ;;  %v12335_v31 = vld [vmem:[#allocation16 + $0x8c4] sm:$0xf] }
 0x79f   :  { %v10603_v34 = vld [vmem:[#allocation16 + $0x8f0] sm:$0xf0]  ;;  %v9841_v32 = vld [vmem:[#allocation16 + $0x2c8] sm:$0xf] }
 0x7a0   :  { %v10081_v13 = vld [vmem:[#allocation16 + $0x4a8] sm:$0xf] }
 0x7a1   :  { %5565 = vmatpush.bf16.msrb.mxu3 %v10258_v7  ;;  %5579 = vmatpush.bf16.msra.mxu0 %v9494_v10  ;;  %v9642_v7 = vor.u32 %v12101_v55, %v9641_v37  ;;  %v10026_v10 = vor.u32 %v12197_v48, %v10025_v8  ;;  %v12246_v37 = vld [vmem:[#allocation16 + $0x5f4] sm:$0xf0]  ;;  %v10606_v8 = vor.u32 %v12335_v31, %v10603_v34  ;;  %v12227_v48 = vld [vmem:[#allocation16 + $0x564] sm:$0xf]  ;;  %v10411_v34 = vld [vmem:[#allocation16 + $0x770] sm:$0xf0] }
 0x7a2   :  { %5593 = vmatpush.bf16.msra.mxu1 %v9878_v24  ;;  %5607 = vmatpush.bf16.msrb.mxu2 %v10262_v46  ;;  %v9646_v24 = vor.u32 %v12095_v62, %v9643_v42  ;;  %v9977_v46 = vld [vmem:[#allocation16 + $0x3e0] sm:$0xf]  ;;  %v12323_v42 = vld [vmem:[#allocation16 + $0x864] sm:$0xf] }
 0x7a3   :  { %v12287_v31 = vld [vmem:[#allocation16 + $0x744] sm:$0xf] }
 0x7a4   :  { %5566 = vmatmul.bf16.vlgmr.msrb.gmra.mxu3 %v13660_v23  ;;  %5580 = vmatmul.bf16.vlgmr.msra.gmra.mxu0 %v13656_v29 }
 0x7a5   :  { %5614 = vmatpush.bf16.msra.mxu3 %v9834_v11  ;;  %5628 = vmatpush.bf16.msrb.mxu0 %v10218_v25  ;;  %v12185_v11 = vld [vmem:[#allocation16 + $0x40c] sm:$0xf0]  ;;  %v10361_v25 = vld [vmem:[#allocation16 + $0x6e0] sm:$0xf] }
 0x7a6   :  { %5642 = vmatpush.bf16.msrb.mxu1 %v10602_v47  ;;  %5656 = vmatpush.bf16.msra.mxu2 %v9838_v2  ;;  %v9595_v47 = vld [vmem:[#allocation16 + $0x110] sm:$0xf0]  ;;  %v9594_v2 = vor.u32 %v12089_v15, %v9593_v12  ;;  %v9978_v27 = vor.u32 %v12185_v11, %v9977_v46  ;;  %v10362_v28 = vor.u32 %v12281_v18, %v10361_v25  ;;  %v12138_v12 = vld [vmem:[#allocation16 + $0x294] sm:$0xf0]  ;;  %v10177_v15 = vld [vmem:[#allocation16 + $0x568] sm:$0xf] }
 0x7a7   :  { %5594 = vmatmul.bf16.vlgmr.msra.gmra.mxu1 %v13658_v4  ;;  %5608 = vmatmul.bf16.vlgmr.msrb.gmra.mxu2 %v13660_v23  ;;  %v9598_v33 = vor.u32 %v12083_v22, %v9595_v47  ;;  %v12215_v11 = vld [vmem:[#allocation16 + $0x504] sm:$0xf]  ;;  %v10123_v25 = vld [vmem:[#allocation16 + $0x530] sm:$0xf0] }
 0x7a8   :  { %v12311_v47 = vld [vmem:[#allocation16 + $0x804] sm:$0xf] }
 0x7a9   :  { %5615 = vmatpush.bf16.msra.mxu3 %v9786_v39  ;;  %5629 = vmatpush.bf16.msrb.mxu0 %v10170_v40  ;;  %v12173_v39 = vld [vmem:[#allocation16 + $0x3ac] sm:$0xf0]  ;;  %v10313_v40 = vld [vmem:[#allocation16 + $0x680] sm:$0xf] }
 0x7aa   :  { %5643 = vmatpush.bf16.msrb.mxu1 %v10554_v60  ;;  %5657 = vmatpush.bf16.msra.mxu2 %v9790_v45  ;;  %v9547_v60 = vld [vmem:[#allocation16 + $0xb0] sm:$0xf0]  ;;  %v9497_v45 = vld [vmem:[#allocation16 + $0x20] sm:$0xf]  ;;  %v9930_v38 = vor.u32 %v12173_v39, %v9929_v51  ;;  %v10314_v0 = vor.u32 %v12269_v44, %v10313_v40  ;;  %v10126_v51 = vor.u32 %v12215_v11, %v10123_v25  ;;  %v12203_v40 = vld [vmem:[#allocation16 + $0x4a4] sm:$0xf] }
 0x7ab   :  { %v9498_v61 = vor.u32 %v12065_v50, %v9497_v45  ;;  %v10075_v44 = vld [vmem:[#allocation16 + $0x4d0] sm:$0xf0]  ;;  %v12299_v45 = vld [vmem:[#allocation16 + $0x7a4] sm:$0xf]  ;;  %v13692_v50 = vpop.f32.mrf.mxu1 }
 0x7ac   :  { %v9931_v11 = vld [vmem:[#allocation16 + $0x3b0] sm:$0xf0] }
 0x7ad   :  { %5616 = vmatpush.bf16.msra.mxu3 %v9738_v52  ;;  %5630 = vmatpush.bf16.msrb.mxu0 %v10122_v41  ;;  %v9550_v52 = vor.u32 %v12071_v30, %v9547_v60  ;;  %v10265_v41 = vld [vmem:[#allocation16 + $0x620] sm:$0xf] }
 0x7ae   :  { %5644 = vmatpush.bf16.msrb.mxu1 %v10506_v21  ;;  %5658 = vmatpush.bf16.msra.mxu2 %v9742_v49  ;;  %v9499_v21 = vld [vmem:[#allocation16 + $0x50] sm:$0xf0]  ;;  %v12239_v49 = vld [vmem:[#allocation16 + $0x5c4] sm:$0xf]  ;;  %v10266_v55 = vor.u32 %v12257_v14, %v10265_v41 }
 0x7af   :  { %v12191_v14 = vld [vmem:[#allocation16 + $0x444] sm:$0xf] }
 0x7b1   :  { %5617 = vmatpush.bf16.msra.mxu3 %v9690_v1  ;;  %5631 = vmatpush.bf16.msrb.mxu0 %v10074_v3  ;;  %v12150_v1 = vld [vmem:[#allocation16 + $0x2f4] sm:$0xf0]  ;;  %v10225_v3 = vld [vmem:[#allocation16 + $0x5c8] sm:$0xf] }
 0x7b2   :  { %5645 = vmatpush.bf16.msrb.mxu1 %v10458_v56  ;;  %5659 = vmatpush.bf16.msra.mxu2 %v9694_v57  ;;  %v9502_v56 = vor.u32 %v12059_v16, %v9499_v21  ;;  %v10222_v57 = vor.u32 %v12239_v49, %v10219_v5  ;;  %v9842_v36 = vor.u32 %v12150_v1, %v9841_v32  ;;  %v10027_v16 = vld [vmem:[#allocation16 + $0x470] sm:$0xf0]  ;;  %v13694_v21 = vpop.f32.mrf.mxu3  ;;  %v9649_v32 = vld [vmem:[#allocation16 + $0x148] sm:$0xf] }
 0x7b3   :  { %v10226_v62 = vor.u32 %v12246_v37, %v10225_v3  ;;  %v10033_v1 = vld [vmem:[#allocation16 + $0x448] sm:$0xf]  ;;  %v12198_v3 = vld [vmem:[#allocation16 + $0x474] sm:$0xf0]  ;;  %v10030_v37 = vor.u32 %v12191_v14, %v10027_v16 }
 0x7b4   :  { %v12342_v14 = vld [vmem:[#allocation16 + $0x8f4] sm:$0xf0] }
 0x7b5   :  { %5618 = vmatpush.bf16.msra.mxu3 %v9642_v7  ;;  %5632 = vmatpush.bf16.msrb.mxu0 %v10026_v10  ;;  %v10555_v7 = vld [vmem:[#allocation16 + $0x890] sm:$0xf0]  ;;  %v9793_v10 = vld [vmem:[#allocation16 + $0x268] sm:$0xf] }
 0x7b6   :  { %5646 = vmatpush.bf16.msrb.mxu1 %v10410_v59  ;;  %5660 = vmatpush.bf16.msra.mxu2 %v9646_v24  ;;  %v12234_v59 = vld [vmem:[#allocation16 + $0x594] sm:$0xf0]  ;;  %v10174_v24 = vor.u32 %v12227_v48, %v10171_v63  ;;  %v10558_v46 = vor.u32 %v12323_v42, %v10555_v7  ;;  %v9794_v18 = vor.u32 %v12138_v12, %v9793_v10  ;;  %v9601_v42 = vld [vmem:[#allocation16 + $0xe8] sm:$0xf] }
 0x7b7   :  { %v10178_v22 = vor.u32 %v12234_v59, %v10177_v15  ;;  %v10034_v63 = vor.u32 %v12198_v3, %v10033_v1  ;;  %v12090_v7 = vld [vmem:[#allocation16 + $0x114] sm:$0xf0]  ;;  %v9985_v10 = vld [vmem:[#allocation16 + $0x3e8] sm:$0xf]  ;;  %v13700_v15 = vpop.f32.mrf.mxu1  ;;  %v12336_v1 = vld [vmem:[#allocation16 + $0x8cc] sm:$0xf] }
 0x7b8   :  { %v12186_v12 = vld [vmem:[#allocation16 + $0x414] sm:$0xf0]  ;;  %v9602_v25 = vor.u32 %v12090_v7, %v9601_v42  ;;  %v10611_v3 = vld [vmem:[#allocation16 + $0x8f8] sm:$0xf0]  ;;  %v12132_v7 = vld [vmem:[#allocation16 + $0x26c] sm:$0xf] }
 0x7b9   :  { %5619 = vmatpush.bf16.msra.mxu3 %v9594_v2  ;;  %5633 = vmatpush.bf16.msrb.mxu0 %v9978_v27  ;;  %v10507_v2 = vld [vmem:[#allocation16 + $0x830] sm:$0xf0]  ;;  %v9745_v27 = vld [vmem:[#allocation16 + $0x208] sm:$0xf]  ;;  %v10614_v42 = vor.u32 %v12336_v1, %v10611_v3 }
 0x7ba   :  { %5647 = vmatpush.bf16.msrb.mxu1 %v10362_v28  ;;  %5661 = vmatpush.bf16.msra.mxu2 %v9598_v33  ;;  %v12222_v28 = vld [vmem:[#allocation16 + $0x534] sm:$0xf0]  ;;  %v13688_v33 = vpop.f32.mrf.mxu0  ;;  %v10510_v39 = vor.u32 %v12311_v47, %v10507_v2  ;;  %v9746_v30 = vor.u32 %v12126_v43, %v9745_v27  ;;  %v10315_v47 = vld [vmem:[#allocation16 + $0x6b0] sm:$0xf0]  ;;  %v9553_v2 = vld [vmem:[#allocation16 + $0x88] sm:$0xf] }
 0x7bb   :  { %v10130_v60 = vor.u32 %v12222_v28, %v10129_v20  ;;  %v12078_v27 = vld [vmem:[#allocation16 + $0xb4] sm:$0xf0]  ;;  %v9937_v43 = vld [vmem:[#allocation16 + $0x388] sm:$0xf]  ;;  %v13702_v28 = vpop.f32.mrf.mxu3 }
 0x7bc   :  { %v12174_v20 = vld [vmem:[#allocation16 + $0x3b4] sm:$0xf0]  ;;  %v10417_v3 = vld [vmem:[#allocation16 + $0x748] sm:$0xf] }
 0x7bd   :  { %5620 = vmatpush.bf16.msra.mxu3 %v9546_v53  ;;  %5634 = vmatpush.bf16.msrb.mxu0 %v9930_v38  ;;  %v10459_v53 = vld [vmem:[#allocation16 + $0x7d0] sm:$0xf0]  ;;  %v9697_v38 = vld [vmem:[#allocation16 + $0x1a8] sm:$0xf] }
 0x7be   :  { %5648 = vmatpush.bf16.msrb.mxu1 %v10314_v0  ;;  %5662 = vmatpush.bf16.msra.mxu2 %v9550_v52  ;;  %v12210_v0 = vld [vmem:[#allocation16 + $0x4d4] sm:$0xf0]  ;;  %v10078_v52 = vor.u32 %v12203_v40, %v10075_v44  ;;  %v10462_v41 = vor.u32 %v12299_v45, %v10459_v53  ;;  %v9698_v49 = vor.u32 %v12114_v19, %v9697_v38  ;;  %v10267_v45 = vld [vmem:[#allocation16 + $0x650] sm:$0xf0]  ;;  %v9505_v19 = vld [vmem:[#allocation16 + $0x28] sm:$0xf] }
 0x7bf   :  { %v10082_v5 = vor.u32 %v12210_v0, %v10081_v13  ;;  %v9554_v53 = vor.u32 %v12078_v27, %v9553_v2  ;;  %v9938_v38 = vor.u32 %v12174_v20, %v9937_v43  ;;  %v12066_v13 = vld [vmem:[#allocation16 + $0x54] sm:$0xf0]  ;;  %v9889_v0 = vld [vmem:[#allocation16 + $0x328] sm:$0xf]  ;;  %v12120_v20 = vld [vmem:[#allocation16 + $0x20c] sm:$0xf] }
 0x7c0   :  { %v12318_v2 = vld [vmem:[#allocation16 + $0x834] sm:$0xf0] }
 0x7c1   :  { %5621 = vmatpush.bf16.msra.mxu3 %v9498_v61  ;;  %5635 = vmatpush.bf16.msrb.mxu0 %v9882_v35  ;;  %v13696_v61 = vpop.f32.mrf.mxu2  ;;  %v12102_v35 = vld [vmem:[#allocation16 + $0x174] sm:$0xf0] }
 0x7c2   :  { %5649 = vmatpush.bf16.msrb.mxu1 %v10266_v55  ;;  %5663 = vmatpush.bf16.msra.mxu2 %v9502_v56  ;;  %v10414_v55 = vor.u32 %v12287_v31, %v10411_v34  ;;  %v12179_v56 = vld [vmem:[#allocation16 + $0x3e4] sm:$0xf]  ;;  %v9650_v48 = vor.u32 %v12102_v35, %v9649_v32  ;;  %v12240_v31 = vld [vmem:[#allocation16 + $0x5cc] sm:$0xf]  ;;  %v10227_v35 = vld [vmem:[#allocation16 + $0x5f8] sm:$0xf0] }
 0x7c4   :  { %5622 = vmatmul.bf16.vlgmr.msra.gmra.mxu3 %v13656_v29  ;;  %5636 = vmatmul.bf16.vlgmr.msrb.gmra.mxu0 %v13658_v4 }
 0x7c5   :  { %5670 = vmatpush.bf16.msrb.mxu3 %v10222_v57  ;;  %5684 = vmatpush.bf16.msra.mxu0 %v10606_v8  ;;  %v9979_v57 = vld [vmem:[#allocation16 + $0x410] sm:$0xf0]  ;;  %v13698_v8 = vpop.f32.mrf.mxu0 }
 0x7c6   :  { %5698 = vmatpush.bf16.msra.mxu1 %v9842_v36  ;;  %5712 = vmatpush.bf16.msrb.mxu2 %v10226_v62  ;;  %v12275_v36 = vld [vmem:[#allocation16 + $0x6e4] sm:$0xf]  ;;  %v10363_v62 = vld [vmem:[#allocation16 + $0x710] sm:$0xf0]  ;;  %v9982_v59 = vor.u32 %v12179_v56, %v9979_v57  ;;  %v13708_v56 = vpop.f32.mrf.mxu1 }
 0x7c7   :  { %5650 = vmatmul.bf16.vlgmr.msrb.gmra.mxu1 %v13660_v23  ;;  %5664 = vmatmul.bf16.vlgmr.msra.gmra.mxu2 %v13656_v29 }
 0x7c9   :  { %5671 = vmatpush.bf16.msrb.mxu3 %v10174_v24  ;;  %5685 = vmatpush.bf16.msra.mxu0 %v10558_v46  ;;  %v10366_v24 = vor.u32 %v12275_v36, %v10363_v62  ;;  %v12167_v46 = vld [vmem:[#allocation16 + $0x384] sm:$0xf]  ;;  %v12330_v36 = vld [vmem:[#allocation16 + $0x894] sm:$0xf0]  ;;  %v10230_v62 = vor.u32 %v12240_v31, %v10227_v35  ;;  %v10083_v31 = vld [vmem:[#allocation16 + $0x4d8] sm:$0xf0] }
 0x7ca   :  { %5699 = vmatpush.bf16.msra.mxu1 %v9794_v18  ;;  %5713 = vmatpush.bf16.msrb.mxu2 %v10178_v22  ;;  %v9986_v18 = vor.u32 %v12186_v12, %v9985_v10  ;;  %v12263_v22 = vld [vmem:[#allocation16 + $0x684] sm:$0xf]  ;;  %v9934_v40 = vor.u32 %v12167_v46, %v9931_v11  ;;  %v9795_v10 = vld [vmem:[#allocation16 + $0x298] sm:$0xf0]  ;;  %v12228_v12 = vld [vmem:[#allocation16 + $0x56c] sm:$0xf]  ;;  %v13710_v11 = vpop.f32.mrf.mxu3 }
 0x7cb   :  { %v10318_v44 = vor.u32 %v12263_v22, %v10315_v47  ;;  %v10563_v46 = vld [vmem:[#allocation16 + $0x898] sm:$0xf0]  ;;  %v9798_v22 = vor.u32 %v12132_v7, %v9795_v10  ;;  %v10513_v47 = vld [vmem:[#allocation16 + $0x808] sm:$0xf]  ;;  %v12288_v10 = vld [vmem:[#allocation16 + $0x74c] sm:$0xf] }
 0x7cc   :  { %v10035_v7 = vld [vmem:[#allocation16 + $0x478] sm:$0xf0] }
 0x7cd   :  { %5672 = vmatpush.bf16.msrb.mxu3 %v10126_v51  ;;  %5686 = vmatpush.bf16.msra.mxu0 %v10510_v39  ;;  %v12155_v51 = vld [vmem:[#allocation16 + $0x324] sm:$0xf]  ;;  %v13704_v39 = vpop.f32.mrf.mxu2  ;;  %v13706_v16 = vpop.f32.mrf.mxu0 }
 0x7ce   :  { %5700 = vmatpush.bf16.msra.mxu1 %v9746_v30  ;;  %5714 = vmatpush.bf16.msrb.mxu2 %v10130_v60  ;;  %v9883_v30 = vld [vmem:[#allocation16 + $0x350] sm:$0xf0]  ;;  %v12251_v60 = vld [vmem:[#allocation16 + $0x624] sm:$0xf] }
 0x7cf   :  { %v9886_v34 = vor.u32 %v12155_v51, %v9883_v30  ;;  %v10270_v32 = vor.u32 %v12251_v60, %v10267_v45  ;;  %v9747_v51 = vld [vmem:[#allocation16 + $0x238] sm:$0xf0]  ;;  %v12312_v30 = vld [vmem:[#allocation16 + $0x80c] sm:$0xf] }
 0x7d0   :  { %v10515_v60 = vld [vmem:[#allocation16 + $0x838] sm:$0xf0] }
 0x7d1   :  { %5673 = vmatpush.bf16.msrb.mxu3 %v10078_v52  ;;  %5687 = vmatpush.bf16.msra.mxu0 %v10462_v41  ;;  %v12162_v52 = vld [vmem:[#allocation16 + $0x354] sm:$0xf0]  ;;  %v10609_v41 = vld [vmem:[#allocation16 + $0x8c8] sm:$0xf] }
 0x7d2   :  { %5701 = vmatpush.bf16.msra.mxu1 %v9698_v49  ;;  %5715 = vmatpush.bf16.msrb.mxu2 %v10082_v5  ;;  %v12144_v49 = vld [vmem:[#allocation16 + $0x2cc] sm:$0xf]  ;;  %v9843_v5 = vld [vmem:[#allocation16 + $0x2f8] sm:$0xf0]  ;;  %v10610_v57 = vor.u32 %v12342_v14, %v10609_v41 }
 0x7d3   :  { %v12108_v41 = vld [vmem:[#allocation16 + $0x1ac] sm:$0xf]  ;;  %v9699_v14 = vld [vmem:[#allocation16 + $0x1d8] sm:$0xf0] }
 0x7d4   :  { %v9702_v1 = vor.u32 %v12108_v41, %v9699_v14  ;;  %v9555_v41 = vld [vmem:[#allocation16 + $0xb8] sm:$0xf0]  ;;  %v12168_v14 = vld [vmem:[#allocation16 + $0x38c] sm:$0xf] }
 0x7d5   :  { %5674 = vmatpush.bf16.msrb.mxu3 %v10030_v37  ;;  %5688 = vmatpush.bf16.msra.mxu0 %v10414_v55  ;;  %v9506_v37 = vor.u32 %v12066_v13, %v9505_v19  ;;  %v9890_v55 = vor.u32 %v12162_v52, %v9889_v0  ;;  %v13716_v45 = vpop.f32.mrf.mxu0  ;;  %v10465_v19 = vld [vmem:[#allocation16 + $0x7a8] sm:$0xf]  ;;  %v12306_v13 = vld [vmem:[#allocation16 + $0x7d4] sm:$0xf0]  ;;  %v10518_v52 = vor.u32 %v12312_v30, %v10515_v60 }
 0x7d6   :  { %5702 = vmatpush.bf16.msra.mxu1 %v9650_v48  ;;  %5716 = vmatpush.bf16.msrb.mxu2 %v10034_v63  ;;  %v9846_v48 = vor.u32 %v12144_v49, %v9843_v5  ;;  %v10561_v63 = vld [vmem:[#allocation16 + $0x868] sm:$0xf]  ;;  %v12204_v49 = vld [vmem:[#allocation16 + $0x4ac] sm:$0xf]  ;;  %v13720_v5 = vpop.f32.mrf.mxu1  ;;  %v10466_v35 = vor.u32 %v12306_v13, %v10465_v19  ;;  %v12270_v19 = vld [vmem:[#allocation16 + $0x6b4] sm:$0xf0] }
 0x7d9   :  { %5675 = vmatpush.bf16.msrb.mxu3 %v9982_v59  ;;  %5689 = vmatpush.bf16.msra.mxu0 %v10366_v24  ;;  %v10179_v59 = vld [vmem:[#allocation16 + $0x598] sm:$0xf0]  ;;  %v12324_v24 = vld [vmem:[#allocation16 + $0x86c] sm:$0xf] }
 0x7da   :  { %5703 = vmatpush.bf16.msra.mxu1 %v9602_v25  ;;  %5717 = vmatpush.bf16.msrb.mxu2 %v9986_v18  ;;  %v13712_v25 = vpop.f32.mrf.mxu2  ;;  %v10562_v18 = vor.u32 %v12330_v36, %v10561_v63  ;;  %v10182_v27 = vor.u32 %v12228_v12, %v10179_v59  ;;  %v10566_v43 = vor.u32 %v12324_v24, %v10563_v46  ;;  %v12096_v63 = vld [vmem:[#allocation16 + $0x14c] sm:$0xf]  ;;  %v9651_v36 = vld [vmem:[#allocation16 + $0x178] sm:$0xf0]  ;;  %v10369_v46 = vld [vmem:[#allocation16 + $0x6e8] sm:$0xf] }
 0x7db   :  { %v10419_v12 = vld [vmem:[#allocation16 + $0x778] sm:$0xf0]  ;;  %v9654_v24 = vor.u32 %v12096_v63, %v9651_v36 }
 0x7dc   :  { %v9507_v63 = vld [vmem:[#allocation16 + $0x58] sm:$0xf0] }
 0x7dd   :  { %5676 = vmatpush.bf16.msrb.mxu3 %v9934_v40  ;;  %5690 = vmatpush.bf16.msra.mxu0 %v10318_v44  ;;  %v12216_v40 = vld [vmem:[#allocation16 + $0x50c] sm:$0xf]  ;;  %v10131_v44 = vld [vmem:[#allocation16 + $0x538] sm:$0xf0] }
 0x7de   :  { %5704 = vmatpush.bf16.msra.mxu1 %v9554_v53  ;;  %5718 = vmatpush.bf16.msrb.mxu2 %v9938_v38  ;;  %v10514_v53 = vor.u32 %v12318_v2, %v10513_v47  ;;  %v9750_v38 = vor.u32 %v12120_v20, %v9747_v51  ;;  %v10134_v0 = vor.u32 %v12216_v40, %v10131_v44  ;;  %v12180_v20 = vld [vmem:[#allocation16 + $0x3ec] sm:$0xf]  ;;  %v9987_v51 = vld [vmem:[#allocation16 + $0x418] sm:$0xf0]  ;;  %v13728_v30 = vpop.f32.mrf.mxu1 }
 0x7df   :  { %v10422_v2 = vor.u32 %v12288_v10, %v10419_v12  ;;  %v12276_v40 = vld [vmem:[#allocation16 + $0x6ec] sm:$0xf]  ;;  %v10371_v44 = vld [vmem:[#allocation16 + $0x718] sm:$0xf0]  ;;  %v9990_v13 = vor.u32 %v12180_v20, %v9987_v51  ;;  %v12413_v51 = vld [vmem:[#allocation19 + $0x230] sm:$0xf0] }
 0x7e0   :  { %v9891_v10 = vld [vmem:[#allocation16 + $0x358] sm:$0xf0]  ;;  %v12252_v12 = vld [vmem:[#allocation16 + $0x62c] sm:$0xf] }
 0x7e1   :  { %5677 = vmatpush.bf16.msrb.mxu3 %v9886_v34  ;;  %5691 = vmatpush.bf16.msra.mxu0 %v10270_v32  ;;  %v12300_v34 = vld [vmem:[#allocation16 + $0x7ac] sm:$0xf]  ;;  %v10467_v32 = vld [vmem:[#allocation16 + $0x7d8] sm:$0xf0] }
 0x7e2   :  { %5705 = vmatpush.bf16.msra.mxu1 %v9506_v37  ;;  %5719 = vmatpush.bf16.msrb.mxu2 %v9890_v55  ;;  %v12294_v37 = vld [vmem:[#allocation16 + $0x774] sm:$0xf0]  ;;  %v13722_v55 = vpop.f32.mrf.mxu3 }
 0x7e3   :  { %v10418_v59 = vor.u32 %v12294_v37, %v10417_v3 }
 0x7e4   :  { %5678 = vmatmul.bf16.vlgmr.msrb.gmra.mxu3 %v13658_v4  ;;  %5692 = vmatmul.bf16.vlgmr.msra.gmra.mxu0 %v13660_v23 }
 0x7e5   :  { %5726 = vmatpush.bf16.msra.mxu3 %v10610_v57  ;;  %5740 = vmatpush.bf16.msrb.mxu0 %v9846_v48  ;;  %v10086_v57 = vor.u32 %v12204_v49, %v10083_v31  ;;  %v10470_v48 = vor.u32 %v12300_v34, %v10467_v32  ;;  %v9939_v49 = vld [vmem:[#allocation16 + $0x3b8] sm:$0xf0]  ;;  %v12264_v31 = vld [vmem:[#allocation16 + $0x68c] sm:$0xf] }
 0x7e6   :  { %5754 = vmatpush.bf16.msrb.mxu1 %v10230_v62  ;;  %5768 = vmatpush.bf16.msra.mxu2 %v10614_v42  ;;  %v12192_v62 = vld [vmem:[#allocation16 + $0x44c] sm:$0xf]  ;;  %v13724_v42 = vpop.f32.mrf.mxu2  ;;  %v10323_v34 = vld [vmem:[#allocation16 + $0x6b8] sm:$0xf0]  ;;  %v9942_v36 = vor.u32 %v12168_v14, %v9939_v49 }
 0x7e7   :  { %5706 = vmatmul.bf16.vlgmr.msra.gmra.mxu1 %v13656_v29  ;;  %5720 = vmatmul.bf16.vlgmr.msrb.gmra.mxu2 %v13658_v4  ;;  %v10038_v47 = vor.u32 %v12192_v62, %v10035_v7  ;;  %v10326_v62 = vor.u32 %v12264_v31, %v10323_v34  ;;  %v12156_v7 = vld [vmem:[#allocation16 + $0x32c] sm:$0xf]  ;;  %v10785_v31 = vld [vmem:[#allocation19 + $0x150] sm:$0xf]  ;;  %v12386_v34 = vld [vmem:[#allocation19 + $0x158] sm:$0xf0] }
 0x7e9   :  { %5727 = vmatpush.bf16.msra.mxu3 %v10562_v18  ;;  %5741 = vmatpush.bf16.msrb.mxu0 %v9798_v22  ;;  %v12282_v18 = vld [vmem:[#allocation16 + $0x714] sm:$0xf0]  ;;  %v13726_v22 = vpop.f32.mrf.mxu0 }
 0x7ea   :  { %5755 = vmatpush.bf16.msrb.mxu1 %v10182_v27  ;;  %5769 = vmatpush.bf16.msra.mxu2 %v10566_v43  ;;  %v12084_v27 = vld [vmem:[#allocation16 + $0xec] sm:$0xf]  ;;  %v9603_v43 = vld [vmem:[#allocation16 + $0x118] sm:$0xf0]  ;;  %v10370_v60 = vor.u32 %v12282_v18, %v10369_v46  ;;  %v13730_v32 = vpop.f32.mrf.mxu3  ;;  %v12365_v46 = vld [vmem:[#allocation19 + $0xb0] sm:$0xf0] }
 0x7ed   :  { %5728 = vmatpush.bf16.msra.mxu3 %v10514_v53  ;;  %5742 = vmatpush.bf16.msrb.mxu0 %v9750_v38  ;;  %v9606_v53 = vor.u32 %v12084_v27, %v9603_v43  ;;  %v10321_v38 = vld [vmem:[#allocation16 + $0x688] sm:$0xf]  ;;  %v10893_v27 = vld [vmem:[#allocation19 + $0x228] sm:$0xf] }
 0x7ee   :  { %5756 = vmatpush.bf16.msrb.mxu1 %v10134_v0  ;;  %5770 = vmatpush.bf16.msra.mxu2 %v10518_v52  ;;  %v10374_v0 = vor.u32 %v12276_v40, %v10371_v44  ;;  %v12072_v52 = vld [vmem:[#allocation16 + $0x8c] sm:$0xf]  ;;  %v10322_v3 = vor.u32 %v12270_v19, %v10321_v38  ;;  %v10989_v40 = vld [vmem:[#allocation19 + $0x2e8] sm:$0xf]  ;;  %v12437_v44 = vld [vmem:[#allocation19 + $0x2f0] sm:$0xf0]  ;;  %v13738_v19 = vpop.f32.mrf.mxu1  ;;  %v10894_v14 = vor.u32 %v12413_v51, %v10893_v27 }
 0x7ef   :  { %v9558_v37 = vor.u32 %v12072_v52, %v9555_v41  ;;  %v13736_v38 = vld [vmem:[#allocation17] sm:$0xff]  ;;  %v10689_v52 = vld [vmem:[#allocation19 + $0x90] sm:$0xf]  ;;  %v12362_v41 = vld [vmem:[#allocation19 + $0x98] sm:$0xf0]  ;;  %v10990_v49 = vor.u32 %v12437_v44, %v10989_v40 }
 0x7f0   :  { %v10869_v27 = vld [vmem:[#allocation19 + $0x1f8] sm:$0xf]  ;;  %v12431_v51 = vld [vmem:[#allocation19 + $0x2c0] sm:$0xf0]  ;;  %v3815_v44 = vperm.slane %v13736_v38, 1 }
 0x7f1   :  { %5729 = vmatpush.bf16.msra.mxu3 %v10466_v35  ;;  %5743 = vmatpush.bf16.msrb.mxu0 %v9702_v1  ;;  %v10273_v35 = vld [vmem:[#allocation16 + $0x628] sm:$0xf]  ;;  %v13732_v1 = vpop.f32.mrf.mxu2  ;;  %v13734_v18 = vpop.f32.mrf.mxu0 }
 0x7f2   :  { %5757 = vmatpush.bf16.msrb.mxu1 %v10086_v57  ;;  %5771 = vmatpush.bf16.msra.mxu2 %v10470_v48  ;;  %v12258_v57 = vld [vmem:[#allocation16 + $0x654] sm:$0xf0]  ;;  %v12060_v48 = vld [vmem:[#allocation16 + $0x2c] sm:$0xf] }
 0x7f3   :  { %v10274_v43 = vor.u32 %v12258_v57, %v10273_v35  ;;  %v9510_v20 = vor.u32 %v12060_v48, %v9507_v63  ;;  %v10881_v35 = vld [vmem:[#allocation19 + $0x210] sm:$0xf]  ;;  %v12434_v57 = vld [vmem:[#allocation19 + $0x2d8] sm:$0xf0]  ;;  %v3814_v48 = vperm.slane %v13736_v38, 0  ;;  %v13741_v63 = vpop.f32.mrf.mxu3 }
 0x7f5   :  { %5730 = vmatpush.bf16.msra.mxu3 %v10418_v59  ;;  %5744 = vmatpush.bf16.msrb.mxu0 %v9654_v24  ;;  %v10275_v59 = vld [vmem:[#allocation16 + $0x658] sm:$0xf0]  ;;  %v10701_v24 = vld [vmem:[#allocation19 + $0xa8] sm:$0xf]  ;;  %v5288_v40 = vadd.f32 %v13694_v21, %v3814_v48 }
 0x7f6   :  { %5758 = vmatpush.bf16.msrb.mxu1 %v10038_v47  ;;  %5772 = vmatpush.bf16.msra.mxu2 %v10422_v2  ;;  %v10797_v47 = vld [vmem:[#allocation19 + $0x168] sm:$0xf]  ;;  %v12389_v2 = vld [vmem:[#allocation19 + $0x170] sm:$0xf0] }
 0x7f9   :  { %5731 = vmatpush.bf16.msra.mxu3 %v10370_v60  ;;  %5745 = vmatpush.bf16.msrb.mxu0 %v9606_v53  ;;  %v9894_v60 = vor.u32 %v12156_v7, %v9891_v10  ;;  %v10278_v53 = vor.u32 %v12252_v12, %v10275_v59  ;;  %v10786_v7 = vor.u32 %v12386_v34, %v10785_v31  ;;  %v10677_v10 = vld [vmem:[#allocation19 + $0x78] sm:$0xf]  ;;  %v12359_v12 = vld [vmem:[#allocation19 + $0x80] sm:$0xf0]  ;;  %v13745_v59 = vpop.f32.mrf.mxu0  ;;  %v10857_v31 = vld [vmem:[#allocation19 + $0x1e0] sm:$0xf] }
 0x7fa   :  { %5759 = vmatpush.bf16.msrb.mxu1 %v9990_v13  ;;  %5773 = vmatpush.bf16.msra.mxu2 %v10374_v0  ;;  %v10702_v13 = vor.u32 %v12365_v46, %v10701_v24  ;;  %v10798_v0 = vor.u32 %v12389_v2, %v10797_v47  ;;  %v10773_v47 = vld [vmem:[#allocation19 + $0x138] sm:$0xf]  ;;  %v12383_v2 = vld [vmem:[#allocation19 + $0x140] sm:$0xf0]  ;;  %v10953_v34 = vld [vmem:[#allocation19 + $0x2a0] sm:$0xf] }
 0x7fd   :  { %5732 = vmatpush.bf16.msra.mxu3 %v10322_v3  ;;  %5746 = vmatpush.bf16.msrb.mxu0 %v9558_v37  ;;  %v12410_v3 = vld [vmem:[#allocation19 + $0x218] sm:$0xf0]  ;;  %v10977_v37 = vld [vmem:[#allocation19 + $0x2d0] sm:$0xf] }
 0x7fe   :  { %5760 = vmatpush.bf16.msrb.mxu1 %v9942_v36  ;;  %5774 = vmatpush.bf16.msra.mxu2 %v10326_v62  ;;  %v13743_v36 = vpop.f32.mrf.mxu2  ;;  %v10690_v62 = vor.u32 %v12362_v41, %v10689_v52  ;;  %v10882_v24 = vor.u32 %v12410_v3, %v10881_v35  ;;  %v10978_v46 = vor.u32 %v12434_v57, %v10977_v37  ;;  %v12356_v52 = vld [vmem:[#allocation19 + $0x68] sm:$0xf0]  ;;  %v13758_v3 = vpop.f32.mrf.mxu3 }
 0x7ff   :  { %v5330_v35 = vadd.f32 %v13696_v61, %v3815_v44  ;;  %v12377_v61 = vld [vmem:[#allocation19 + $0x110] sm:$0xf0] }
 0x801   :  { %5733 = vmatpush.bf16.msra.mxu3 %v10274_v43  ;;  %5747 = vmatpush.bf16.msrb.mxu0 %v9510_v20  ;;  %v12407_v43 = vld [vmem:[#allocation19 + $0x200] sm:$0xf0]  ;;  %v10965_v20 = vld [vmem:[#allocation19 + $0x2b8] sm:$0xf] }
 0x802   :  { %5761 = vmatpush.bf16.msrb.mxu1 %v9894_v60  ;;  %5775 = vmatpush.bf16.msra.mxu2 %v10278_v53  ;;  %v5290_v60 = vadd.f32 %v13702_v28, %v3814_v48  ;;  %v13754_v53 = vpop.f32.mrf.mxu1  ;;  %v10870_v41 = vor.u32 %v12407_v43, %v10869_v27  ;;  %v10966_v21 = vor.u32 %v12431_v51, %v10965_v20  ;;  %v10941_v27 = vld [vmem:[#allocation19 + $0x288] sm:$0xf]  ;;  %v3816_v20 = vperm.slane %v13736_v38, 2 }
 0x803   :  { %v5302_v28 = vadd.f32 %v13688_v33, %v5288_v40  ;;  %v5344_v51 = vadd.f32 %v13710_v11, %v5330_v35  ;;  %v10737_v11 = vld [vmem:[#allocation19 + $0xf0] sm:$0xf] }
 0x804   :  { %5734 = vmatmul.bf16.vlgmr.msra.gmra.mxu3 %v13660_v23  ;;  %5748 = vmatmul.bf16.vlgmr.msrb.gmra.mxu0 %v13656_v29  ;;  %v10665_v29 = vld [vmem:[#allocation19 + $0x60] sm:$0xf]  ;;  %v5304_v37 = vadd.f32 %v13698_v8, %v5290_v60  ;;  %v12425_v8 = vld [vmem:[#allocation19 + $0x290] sm:$0xf0]  ;;  %v3817_v60 = vperm.slane %v13736_v38, 3 }
 0x805   :  { %7746 = vmatpush.bf16.msrb.mxu3 %v10702_v13  ;;  %7760 = vmatpush.bf16.msra.mxu0 %v10798_v0  ;;  %v10678_v13 = vor.u32 %v12359_v12, %v10677_v10  ;;  %v10774_v0 = vor.u32 %v12383_v2, %v10773_v47  ;;  %v10666_v48 = vor.u32 %v12356_v52, %v10665_v29  ;;  %v12353_v10 = vld [vmem:[#allocation19 + $0x50] sm:$0xf0]  ;;  %v10845_v47 = vld [vmem:[#allocation19 + $0x1c8] sm:$0xf]  ;;  %v10641_v29 = vld [vmem:[#allocation19 + $0x30] sm:$0xf] }
 0x806   :  { %7774 = vmatpush.bf16.msra.mxu1 %v10894_v14  ;;  %7788 = vmatpush.bf16.msrb.mxu2 %v10990_v49  ;;  %v10761_v14 = vld [vmem:[#allocation19 + $0x120] sm:$0xf]  ;;  %v12380_v49 = vld [vmem:[#allocation19 + $0x128] sm:$0xf0]  ;;  %v13761_v57 = vpop.f32.mrf.mxu2  ;;  %v5332_v12 = vadd.f32 %v13704_v39, %v3815_v44  ;;  %v12401_v2 = vld [vmem:[#allocation19 + $0x1d0] sm:$0xf0]  ;;  %v13765_v43 = vadd.f32 %v13692_v50, %v5302_v28  ;;  %v13770_v39 = vpop.f32.mrf.mxu0  ;;  %v13773_v44 = vadd.f32 %v13700_v15, %v5304_v37 }
 0x807   :  { %5762 = vmatmul.bf16.vlgmr.msrb.gmra.mxu1 %v13658_v4  ;;  %5776 = vmatmul.bf16.vlgmr.msra.gmra.mxu2 %v13660_v23  ;;  %v12404_v4 = vld [vmem:[#allocation19 + $0x1e8] sm:$0xf0]  ;;  %v12350_v50 = vld [vmem:[#allocation19 + $0x38] sm:$0xf0]  ;;  %v10846_v52 = vor.u32 %v12401_v2, %v10845_v47  ;;  %v10929_v15 = vld [vmem:[#allocation19 + $0x270] sm:$0xf]  ;;  %v5416_v37 = vadd.f32 %v13734_v18, %v3817_v60 }
 0x808   :  { %v12428_v23 = vld [vmem:[#allocation19 + $0x2a8] sm:$0xf0]  ;;  %v5346_v40 = vadd.f32 %v13722_v55, %v5332_v12  ;;  %v10833_v55 = vld [vmem:[#allocation19 + $0x1b0] sm:$0xf]  ;;  %v5794_v35 = vmax.f32 %v13773_v44, 0.0  ;;  %v5374_v12 = vadd.f32 %v13720_v5, %v3816_v20 }
 0x809   :  { %7747 = vmatpush.bf16.msrb.mxu3 %v10690_v62  ;;  %7761 = vmatpush.bf16.msra.mxu0 %v10786_v7  ;;  %v10762_v62 = vor.u32 %v12380_v49, %v10761_v14  ;;  %v10653_v7 = vld [vmem:[#allocation19 + $0x48] sm:$0xf]  ;;  %v10954_v33 = vor.u32 %v12428_v23, %v10953_v34  ;;  %v12398_v49 = vld [vmem:[#allocation19 + $0x1b8] sm:$0xf0]  ;;  %v5372_v34 = vadd.f32 %v13708_v56, %v3816_v20  ;;  %v12395_v47 = vld [vmem:[#allocation19 + $0x1a0] sm:$0xf0] }
 0x80a   :  { %7775 = vmatpush.bf16.msra.mxu1 %v10882_v24  ;;  %7789 = vmatpush.bf16.msrb.mxu2 %v10978_v46  ;;  %v10858_v24 = vor.u32 %v12404_v4, %v10857_v31  ;;  %v10749_v46 = vld [vmem:[#allocation19 + $0x108] sm:$0xf]  ;;  %v13776_v14 = vpop.f32.mrf.mxu1  ;;  %v12422_v31 = vld [vmem:[#allocation19 + $0x278] sm:$0xf0]  ;;  %v5782_v4 = vmax.f32 %v13765_v43, 0.0  ;;  %v13781_v23 = vadd.f32 %v13706_v16, %v5344_v51  ;;  %v13784_v28 = vadd.f32 %v13716_v45, %v5346_v40 }
 0x80b   :  { %v10834_v16 = vor.u32 %v12398_v49, %v10833_v55  ;;  %v10930_v56 = vor.u32 %v12422_v31, %v10929_v15  ;;  %v10725_v45 = vld [vmem:[#allocation19 + $0xd8] sm:$0xf]  ;;  %v5388_v20 = vadd.f32 %v13724_v42, %v5374_v12  ;;  %v5414_v51 = vadd.f32 %v13726_v22, %v3817_v60  ;;  %v10809_v55 = vld [vmem:[#allocation19 + $0x180] sm:$0xf]  ;;  %v12392_v22 = vld [vmem:[#allocation19 + $0x188] sm:$0xf0] }
 0x80c   :  { %v10917_v2 = vld [vmem:[#allocation19 + $0x258] sm:$0xf]  ;;  %v5795_v5 = vmax.f32 %v13784_v28, 0.0  ;;  %v10905_v60 = vld [vmem:[#allocation19 + $0x240] sm:$0xf] }
 0x80d   :  { %7748 = vmatpush.bf16.msrb.mxu3 %v10678_v13  ;;  %7762 = vmatpush.bf16.msra.mxu0 %v10774_v0  ;;  %v10654_v13 = vor.u32 %v12353_v10, %v10653_v7  ;;  %v10750_v0 = vor.u32 %v12377_v61, %v10749_v46  ;;  %v10629_v7 = vld [vmem:[#allocation19 + $0x18] sm:$0xf]  ;;  %v12347_v10 = vld [vmem:[#allocation19 + $0x20] sm:$0xf0]  ;;  %v5386_v61 = vadd.f32 %v13712_v25, %v5372_v34  ;;  %v12416_v31 = vld [vmem:[#allocation19 + $0x248] sm:$0xf0] }
 0x80e   :  { %7776 = vmatpush.bf16.msra.mxu1 %v10870_v41  ;;  %7790 = vmatpush.bf16.msrb.mxu2 %v10966_v21  ;;  %v10942_v41 = vor.u32 %v12425_v8, %v10941_v27  ;;  %v12374_v21 = vld [vmem:[#allocation19 + $0xf8] sm:$0xf0]  ;;  %v10821_v46 = vld [vmem:[#allocation19 + $0x198] sm:$0xf]  ;;  %v13792_v18 = vpop.f32.mrf.mxu2  ;;  %v12419_v27 = vld [vmem:[#allocation19 + $0x260] sm:$0xf0]  ;;  %v13798_v40 = vpop.f32.mrf.mxu0  ;;  %v10630_v25 = vor.u32 %v12347_v10, %v10629_v7  ;;  %v5402_v49 = vadd.f32 %v13741_v63, %v5388_v20 }
 0x80f   :  { %v5783_v8 = vmax.f32 %v13781_v23, 0.0  ;;  %v10918_v42 = vor.u32 %v12419_v27, %v10917_v2  ;;  %v11085_v34 = vld [vmem:[#allocation19 + $0x3a8] sm:$0xf] }
 0x810   :  { %v11277_v7 = vld [vmem:[#allocation19 + $0x528] sm:$0xf] }
 0x811   :  { %7749 = vmatpush.bf16.msrb.mxu3 %v10666_v48  ;;  %7763 = vmatpush.bf16.msra.mxu0 %v10762_v62  ;;  %v10642_v48 = vor.u32 %v12350_v50, %v10641_v29  ;;  %v10738_v62 = vor.u32 %v12374_v21, %v10737_v11  ;;  %v12344_v50 = vld [vmem:[#allocation19 + $0x8] sm:$0xf0]  ;;  %v5400_v11 = vadd.f32 %v13730_v32, %v5386_v61  ;;  %v12485_v32 = vld [vmem:[#allocation19 + $0x470] sm:$0xf0] }
 0x812   :  { %7777 = vmatpush.bf16.msra.mxu1 %v10858_v24  ;;  %7791 = vmatpush.bf16.msrb.mxu2 %v10954_v33  ;;  %v13789_v24 = vpop.f32.mrf.mxu3  ;;  %v12371_v33 = vld [vmem:[#allocation19 + $0xe0] sm:$0xf0]  ;;  %v10822_v21 = vor.u32 %v12395_v47, %v10821_v46  ;;  %v13804_v15 = vpop.f32.mrf.mxu1  ;;  %v10810_v46 = vor.u32 %v12392_v22, %v10809_v55  ;;  %v10906_v61 = vor.u32 %v12416_v31, %v10905_v60  ;;  %v11253_v31 = vld [vmem:[#allocation19 + $0x4f8] sm:$0xf] }
 0x813   :  { %v10726_v29 = vor.u32 %v12371_v33, %v10725_v45  ;;  %v12533_v45 = vld [vmem:[#allocation19 + $0x5f0] sm:$0xf0]  ;;  %v5784_v63 = vmax.f32 %v5400_v11, 0.0  ;;  %v12530_v11 = vld [vmem:[#allocation19 + $0x5d8] sm:$0xf0] }
 0x815   :  { %7750 = vmatpush.bf16.msrb.mxu3 %v10654_v13  ;;  %7764 = vmatpush.bf16.msra.mxu0 %v10750_v0  ;;  %v10617_v13 = vld [vmem:[#allocation19] sm:$0xf]  ;;  %v5430_v0 = vadd.f32 %v13738_v19, %v5416_v37  ;;  %v12461_v37 = vld [vmem:[#allocation19 + $0x3b0] sm:$0xf0] }
 0x816   :  { %7778 = vmatpush.bf16.msra.mxu1 %v10846_v52  ;;  %7792 = vmatpush.bf16.msrb.mxu2 %v10942_v41  ;;  %v10713_v52 = vld [vmem:[#allocation19 + $0xc0] sm:$0xf]  ;;  %v12368_v41 = vld [vmem:[#allocation19 + $0xc8] sm:$0xf0]  ;;  %v10618_v10 = vor.u32 %v12344_v50, %v10617_v13  ;;  %v13810_v2 = vpop.f32.mrf.mxu2  ;;  %v11086_v27 = vor.u32 %v12461_v37, %v11085_v34  ;;  %v12458_v13 = vld [vmem:[#allocation19 + $0x398] sm:$0xf0]  ;;  %v13824_v22 = vpop.f32.mrf.mxu0 }
 0x817   :  { %v5444_v19 = vadd.f32 %v13743_v36, %v5430_v0  ;;  %v10714_v12 = vor.u32 %v12368_v41, %v10713_v52  ;;  %v12482_v50 = vld [vmem:[#allocation19 + $0x458] sm:$0xf0]  ;;  %v11265_v52 = vld [vmem:[#allocation19 + $0x510] sm:$0xf]  ;;  %v12503_v37 = vld [vmem:[#allocation19 + $0x500] sm:$0xf0] }
 0x818   :  { %v11361_v41 = vld [vmem:[#allocation19 + $0x5d0] sm:$0xf] }
 0x819   :  { %7751 = vmatpush.bf16.msrb.mxu3 %v10642_v48  ;;  %7765 = vmatpush.bf16.msra.mxu0 %v10738_v62  ;;  %v5428_v48 = vadd.f32 %v13728_v30, %v5414_v51  ;;  %v11181_v62 = vld [vmem:[#allocation19 + $0x468] sm:$0xf]  ;;  %v5796_v30 = vmax.f32 %v5402_v49, 0.0  ;;  %v5797_v47 = vmax.f32 %v5444_v19, 0.0  ;;  %v11073_v51 = vld [vmem:[#allocation19 + $0x390] sm:$0xf] }
 0x81a   :  { %7779 = vmatpush.bf16.msra.mxu1 %v10834_v16  ;;  %7793 = vmatpush.bf16.msrb.mxu2 %v10930_v56  ;;  %v12509_v16 = vld [vmem:[#allocation19 + $0x530] sm:$0xf0]  ;;  %v11373_v56 = vld [vmem:[#allocation19 + $0x5e8] sm:$0xf]  ;;  %v13808_v33 = vpop.f32.mrf.mxu3  ;;  %v11182_v20 = vor.u32 %v12485_v32, %v11181_v62  ;;  %v3818_v49 = vperm.slane %v13736_v38, 4  ;;  %v11074_v43 = vor.u32 %v12458_v13, %v11073_v51  ;;  %v13831_v34 = vpop.f32.mrf.mxu1 }
 0x81b   :  { %v5442_v36 = vadd.f32 %v13732_v1, %v5428_v48  ;;  %v11278_v0 = vor.u32 %v12509_v16, %v11277_v7  ;;  %v12506_v1 = vld [vmem:[#allocation19 + $0x518] sm:$0xf0]  ;;  %v13826_v60 = vpack.c.bf16 %v5796_v30, %v5784_v63  ;;  %v12479_v19 = vld [vmem:[#allocation19 + $0x440] sm:$0xf0]  ;;  %v11349_v48 = vld [vmem:[#allocation19 + $0x5b8] sm:$0xf] }
 0x81c   :  { %v11266_v28 = vor.u32 %v12506_v1, %v11265_v52  ;;  %v12527_v62 = vld [vmem:[#allocation19 + $0x5c0] sm:$0xf0]  ;;  %v11145_v63 = vld [vmem:[#allocation19 + $0x420] sm:$0xf]  ;;  %v5458_v30 = vadd.f32 %v13789_v24, %v3818_v49  ;;  %v12524_v51 = vld [vmem:[#allocation19 + $0x5a8] sm:$0xf0] }
 0x81d   :  { %7752 = vmatpush.bf16.msrb.mxu3 %v10630_v25  ;;  %7766 = vmatpush.bf16.msra.mxu0 %v10726_v29  ;;  %v11374_v25 = vor.u32 %v12533_v45, %v11373_v56  ;;  %v11169_v29 = vld [vmem:[#allocation19 + $0x450] sm:$0xf]  ;;  %v5785_v55 = vmax.f32 %v5442_v36, 0.0  ;;  %v11254_v56 = vor.u32 %v12503_v37, %v11253_v31  ;;  %v11350_v45 = vor.u32 %v12527_v62, %v11349_v48  ;;  %v12476_v36 = vld [vmem:[#allocation19 + $0x428] sm:$0xf0] }
 0x81e   :  { %7780 = vmatpush.bf16.msra.mxu1 %v10822_v21  ;;  %7794 = vmatpush.bf16.msrb.mxu2 %v10918_v42  ;;  %v13816_v21 = vpack.c.bf16 %v5794_v35, %v5782_v4  ;;  %v13822_v42 = vpack.c.bf16 %v5795_v5, %v5783_v8  ;;  %v11170_v44 = vor.u32 %v12482_v50, %v11169_v29  ;;  %v11061_v4 = vld [vmem:[#allocation19 + $0x378] sm:$0xf]  ;;  %v12455_v35 = vld [vmem:[#allocation19 + $0x380] sm:$0xf0]  ;;  %v11037_v50 = vld [vmem:[#allocation19 + $0x348] sm:$0xf] }
 0x81f   :  { %v13829_v23 = vpack.c.bf16 %v5797_v47, %v5785_v55  ;;  %v11362_v8 = vor.u32 %v12530_v11, %v11361_v41  ;;  %v11157_v5 = vld [vmem:[#allocation19 + $0x438] sm:$0xf]  ;;  %v11062_v32 = vor.u32 %v12455_v35, %v11061_v4  ;;  %v13841_v47 = vpop.f32.mrf.mxu2  ;;  %v11146_v29 = vor.u32 %v12476_v36, %v11145_v63  ;;  %v12449_v52 = vld [vmem:[#allocation19 + $0x350] sm:$0xf0]  ;;  %v11133_v41 = vld [vmem:[#allocation19 + $0x408] sm:$0xf] }
 0x820   :  { %v11158_v7 = vor.u32 %v12479_v19, %v11157_v5  ;;  %v12473_v24 = vld [vmem:[#allocation19 + $0x410] sm:$0xf0]  ;;  %v11229_v11 = vld [vmem:[#allocation19 + $0x4c8] sm:$0xf]  ;;  %v11038_v5 = vor.u32 %v12449_v52, %v11037_v50  ;;  %v11025_v31 = vld [vmem:[#allocation19 + $0x330] sm:$0xf] }
 0x821   :  { %7753 = vmatpush.bf16.msrb.mxu3 %v10618_v10  ;;  %7767 = vmatpush.bf16.msra.mxu0 %v10714_v12  ;;  %v11049_v10 = vld [vmem:[#allocation19 + $0x360] sm:$0xf]  ;;  %v12452_v12 = vld [vmem:[#allocation19 + $0x368] sm:$0xf0]  ;;  %v5581_v13 = vpop.f32.mrf.mxu0  ;;  %v11325_v4 = vld [vmem:[#allocation19 + $0x588] sm:$0xf]  ;;  %v11134_v19 = vor.u32 %v12473_v24, %v11133_v41 }
 0x822   :  { %7781 = vmatpush.bf16.msra.mxu1 %v10810_v46  ;;  %7795 = vmatpush.bf16.msrb.mxu2 %v10906_v61  ;;  %v13837_v16 = vpop.f32.mrf.mxu3  ;;  %v11241_v46 = vld [vmem:[#allocation19 + $0x4e0] sm:$0xf]  ;;  %v5456_v61 = vadd.f32 %v13758_v3, %v3818_v49  ;;  %v5472_v49 = vadd.f32 %v13770_v39, %v5458_v30  ;;  %v12521_v35 = vld [vmem:[#allocation19 + $0x590] sm:$0xf0]  ;;  %v12446_v37 = vld [vmem:[#allocation19 + $0x338] sm:$0xf0] }
 0x823   :  { %v11121_v48 = vld [vmem:[#allocation19 + $0x3f0] sm:$0xf]  ;;  %v12518_v36 = vld [vmem:[#allocation19 + $0x578] sm:$0xf0]  ;;  %v12467_v50 = vld [vmem:[#allocation19 + $0x3e0] sm:$0xf0] }
 0x824   :  { %7754 = vmatmul.bf16.vlgmr.msrb.gmra.mxu3 %v13816_v21  ;;  %7768 = vmatmul.bf16.vlgmr.msra.gmra.mxu0 %v13822_v42  ;;  %v5470_v55 = vadd.f32 %v13745_v59, %v5456_v61  ;;  %v11313_v63 = vld [vmem:[#allocation19 + $0x570] sm:$0xf]  ;;  %v11301_v41 = vld [vmem:[#allocation19 + $0x558] sm:$0xf]  ;;  %v12515_v24 = vld [vmem:[#allocation19 + $0x560] sm:$0xf0] }
 0x825   :  { %7802 = vmatpush.bf16.msra.mxu3 %v11086_v27  ;;  %7816 = vmatpush.bf16.msrb.mxu0 %v11182_v20  ;;  %v12500_v27 = vld [vmem:[#allocation19 + $0x4e8] sm:$0xf0]  ;;  %v11337_v20 = vld [vmem:[#allocation19 + $0x5a0] sm:$0xf] }
 0x826   :  { %7830 = vmatpush.bf16.msrb.mxu1 %v11278_v0  ;;  %7844 = vmatpush.bf16.msra.mxu2 %v11374_v25  ;;  %v3819_v0 = vperm.slane %v13736_v38, 5  ;;  %v11050_v25 = vor.u32 %v12452_v12, %v11049_v10  ;;  %v11242_v1 = vor.u32 %v12500_v27, %v11241_v46  ;;  %v11338_v3 = vor.u32 %v12524_v51, %v11337_v20  ;;  %v11217_v10 = vld [vmem:[#allocation19 + $0x4b0] sm:$0xf]  ;;  %v12494_v12 = vld [vmem:[#allocation19 + $0x4b8] sm:$0xf0] }
 0x827   :  { %7782 = vmatmul.bf16.vlgmr.msra.gmra.mxu1 %v13826_v60  ;;  %7796 = vmatmul.bf16.vlgmr.msrb.gmra.mxu2 %v13829_v23  ;;  %v11026_v27 = vor.u32 %v12446_v37, %v11025_v31  ;;  %v11013_v20 = vld [vmem:[#allocation19 + $0x318] sm:$0xf]  ;;  %v11097_v31 = vld [vmem:[#allocation19 + $0x3c0] sm:$0xf]  ;;  %v11302_v37 = vor.u32 %v12515_v24, %v11301_v41  ;;  %v12629_v24 = vld [vmem:[#allocation19 + $0x8f0] sm:$0xf0] }
 0x828   :  { %v5498_v62 = vadd.f32 %v13761_v57, %v3819_v0  ;;  %v5500_v46 = vadd.f32 %v13792_v18, %v3819_v0  ;;  %v11314_v0 = vor.u32 %v12518_v36, %v11313_v63  ;;  %v11565_v63 = vld [vmem:[#allocation19 + $0x768] sm:$0xf]  ;;  %v12581_v36 = vld [vmem:[#allocation19 + $0x770] sm:$0xf0] }
 0x829   :  { %7803 = vmatpush.bf16.msra.mxu3 %v11074_v43  ;;  %7817 = vmatpush.bf16.msrb.mxu0 %v11170_v44  ;;  %v5595_v43 = vpop.f32.mrf.mxu1  ;;  %v12497_v44 = vld [vmem:[#allocation19 + $0x4d0] sm:$0xf0]  ;;  %v5583_v30 = vpop.f32.mrf.mxu0 }
 0x82a   :  { %7831 = vmatpush.bf16.msrb.mxu1 %v11266_v28  ;;  %7845 = vmatpush.bf16.msra.mxu2 %v11362_v8  ;;  %v3820_v28 = vperm.slane %v13736_v38, 6  ;;  %v3821_v8 = vperm.slane %v13736_v38, 7  ;;  %v5567_v59 = vpop.f32.mrf.mxu3  ;;  %v11230_v39 = vor.u32 %v12497_v44, %v11229_v11  ;;  %v13853_v38 = vadd.f32 %v13776_v14, %v5472_v49  ;;  %v11109_v14 = vld [vmem:[#allocation19 + $0x3d8] sm:$0xf] }
 0x82b   :  { %v5512_v61 = vadd.f32 %v13808_v33, %v5498_v62  ;;  %v5514_v52 = vadd.f32 %v13837_v16, %v5500_v46  ;;  %v11110_v49 = vor.u32 %v12467_v50, %v11109_v14  ;;  %v12488_v62 = vld [vmem:[#allocation19 + $0x488] sm:$0xf0]  ;;  %v11566_v14 = vor.u32 %v12581_v36, %v11565_v63  ;;  %v11553_v50 = vld [vmem:[#allocation19 + $0x750] sm:$0xf]  ;;  %v13881_v36 = vld [vmem:[#allocation17 + $0x8] sm:$0xf] }
 0x82c   :  { %v5540_v57 = vadd.f32 %v13804_v15, %v3820_v28  ;;  %v5582_v51 = vadd.f32 %v5581_v13, %v3821_v8  ;;  %v5584_v18 = vadd.f32 %v5583_v30, %v3821_v8  ;;  %v11205_v15 = vld [vmem:[#allocation19 + $0x498] sm:$0xf]  ;;  %v5542_v13 = vadd.f32 %v13831_v34, %v3820_v28 }
 0x82d   :  { %7804 = vmatpush.bf16.msra.mxu3 %v11062_v32  ;;  %7818 = vmatpush.bf16.msrb.mxu0 %v11158_v7  ;;  %v11326_v32 = vor.u32 %v12521_v35, %v11325_v4  ;;  %v12470_v7 = vld [vmem:[#allocation19 + $0x3f8] sm:$0xf0]  ;;  %v13863_v11 = vadd.f32 %v13798_v40, %v5512_v61  ;;  %v5528_v34 = vadd.f32 %v13824_v22, %v5514_v52 }
 0x82e   :  { %7832 = vmatpush.bf16.msrb.mxu1 %v11254_v56  ;;  %7846 = vmatpush.bf16.msra.mxu2 %v11350_v45  ;;  %v13850_v56 = vadd.f32 %v13754_v53, %v5470_v55  ;;  %v5609_v45 = vpop.f32.mrf.mxu2  ;;  %v11122_v53 = vor.u32 %v12470_v7, %v11121_v48  ;;  %v5554_v55 = vadd.f32 %v13810_v2, %v5540_v57  ;;  %v12464_v2 = vld [vmem:[#allocation19 + $0x3c8] sm:$0xf0]  ;;  %v11193_v48 = vld [vmem:[#allocation19 + $0x480] sm:$0xf]  ;;  %v12578_v52 = vld [vmem:[#allocation19 + $0x758] sm:$0xf0] }
 0x82f   :  { %v5556_v44 = vadd.f32 %v13841_v47, %v5542_v13  ;;  %v5596_v4 = vadd.f32 %v5595_v43, %v5582_v51  ;;  %v11289_v7 = vld [vmem:[#allocation19 + $0x540] sm:$0xf]  ;;  %v5787_v22 = vmax.f32 %v13863_v11, 0.0  ;;  %v11098_v61 = vor.u32 %v12464_v2, %v11097_v31  ;;  %v12554_v51 = vld [vmem:[#allocation19 + $0x698] sm:$0xf0] }
 0x830   :  { %v5786_v33 = vmax.f32 %v13850_v56, 0.0  ;;  %v5799_v30 = vmax.f32 %v5528_v34, 0.0  ;;  %v12626_v31 = vld [vmem:[#allocation19 + $0x8d8] sm:$0xf0]  ;;  %v12548_v2 = vld [vmem:[#allocation19 + $0x668] sm:$0xf0] }
 0x831   :  { %7805 = vmatpush.bf16.msra.mxu3 %v11050_v25  ;;  %7819 = vmatpush.bf16.msrb.mxu0 %v11146_v29  ;;  %v11218_v25 = vor.u32 %v12494_v12, %v11217_v10  ;;  %v12443_v29 = vld [vmem:[#allocation19 + $0x320] sm:$0xf0]  ;;  %v5597_v35 = vpop.f32.mrf.mxu1  ;;  %v5610_v47 = vadd.f32 %v5609_v45, %v5596_v4  ;;  %v12512_v10 = vld [vmem:[#allocation19 + $0x548] sm:$0xf0]  ;;  %v11469_v12 = vld [vmem:[#allocation19 + $0x6a8] sm:$0xf] }
 0x832   :  { %7833 = vmatpush.bf16.msrb.mxu1 %v11242_v1  ;;  %7847 = vmatpush.bf16.msra.mxu2 %v11338_v3  ;;  %v12491_v1 = vld [vmem:[#allocation19 + $0x4a0] sm:$0xf0]  ;;  %v5798_v3 = vmax.f32 %v13853_v38, 0.0  ;;  %v11014_v16 = vor.u32 %v12443_v29, %v11013_v20  ;;  %v5598_v28 = vadd.f32 %v5597_v35, %v5584_v18  ;;  %v5569_v40 = vpop.f32.mrf.mxu3  ;;  %v12557_v38 = vld [vmem:[#allocation19 + $0x6b0] sm:$0xf0]  ;;  %v11290_v45 = vor.u32 %v12512_v10, %v11289_v7 }
 0x833   :  { %v11206_v8 = vor.u32 %v12491_v1, %v11205_v15  ;;  %v5570_v43 = vadd.f32 %v5569_v40, %v5556_v44  ;;  %v11457_v20 = vld [vmem:[#allocation19 + $0x690] sm:$0xf]  ;;  %v11470_v29 = vor.u32 %v12557_v38, %v11469_v12  ;;  %v11661_v18 = vld [vmem:[#allocation19 + $0x828] sm:$0xf]  ;;  %v13875_v11 = vpack.c.bf16 %v5799_v30, %v5787_v22  ;;  %v12551_v4 = vld [vmem:[#allocation19 + $0x680] sm:$0xf0] }
 0x834   :  { %v11757_v15 = vld [vmem:[#allocation19 + $0x8e8] sm:$0xf]  ;;  %v13869_v1 = vpack.c.bf16 %v5798_v3, %v5786_v33  ;;  %v11458_v44 = vor.u32 %v12554_v51, %v11457_v20  ;;  %v11554_v33 = vor.u32 %v12578_v52, %v11553_v50  ;;  %v11541_v3 = vld [vmem:[#allocation19 + $0x738] sm:$0xf]  ;;  %v12575_v35 = vld [vmem:[#allocation19 + $0x740] sm:$0xf0] }
 0x835   :  { %7806 = vmatpush.bf16.msra.mxu3 %v11038_v5  ;;  %7820 = vmatpush.bf16.msrb.mxu0 %v11134_v19  ;;  %v11001_v5 = vld [vmem:[#allocation19 + $0x300] sm:$0xf]  ;;  %v12440_v19 = vld [vmem:[#allocation19 + $0x308] sm:$0xf0]  ;;  %v5800_v46 = vmax.f32 %v5570_v43, 0.0 }
 0x836   :  { %7834 = vmatpush.bf16.msrb.mxu1 %v11230_v39  ;;  %7848 = vmatpush.bf16.msra.mxu2 %v11326_v32  ;;  %v5568_v39 = vadd.f32 %v5567_v59, %v5554_v55  ;;  %v5611_v32 = vpop.f32.mrf.mxu2  ;;  %v11002_v57 = vor.u32 %v12440_v19, %v11001_v5  ;;  %v11194_v59 = vor.u32 %v12488_v62, %v11193_v48  ;;  %v11445_v55 = vld [vmem:[#allocation19 + $0x678] sm:$0xf]  ;;  %v12602_v5 = vld [vmem:[#allocation19 + $0x818] sm:$0xf0]  ;;  %v11745_v19 = vld [vmem:[#allocation19 + $0x8d0] sm:$0xf] }
 0x837   :  { %v5612_v56 = vadd.f32 %v5611_v32, %v5598_v28  ;;  %v11746_v28 = vor.u32 %v12626_v31, %v11745_v19  ;;  %v11446_v40 = vor.u32 %v12551_v4, %v11445_v55  ;;  %v11542_v48 = vor.u32 %v12575_v35, %v11541_v3  ;;  %v11529_v62 = vld [vmem:[#allocation19 + $0x720] sm:$0xf]  ;;  %v12599_v43 = vld [vmem:[#allocation19 + $0x800] sm:$0xf0]  ;;  %v11733_v32 = vld [vmem:[#allocation19 + $0x8b8] sm:$0xf] }
 0x838   :  { %v12623_v7 = vld [vmem:[#allocation19 + $0x8c0] sm:$0xf0]  ;;  %v11421_v10 = vld [vmem:[#allocation19 + $0x648] sm:$0xf]  ;;  %v12545_v12 = vld [vmem:[#allocation19 + $0x650] sm:$0xf0] }
 0x839   :  { %7807 = vmatpush.bf16.msra.mxu3 %v11026_v27  ;;  %7821 = vmatpush.bf16.msrb.mxu0 %v11122_v53  ;;  %v5801_v27 = vmax.f32 %v5612_v56, 0.0  ;;  %v5788_v53 = vmax.f32 %v5568_v39, 0.0  ;;  %v12572_v39 = vld [vmem:[#allocation19 + $0x728] sm:$0xf0]  ;;  %v11734_v38 = vor.u32 %v12623_v7, %v11733_v32  ;;  %v11409_v20 = vld [vmem:[#allocation19 + $0x630] sm:$0xf] }
 0x83a   :  { %7835 = vmatpush.bf16.msrb.mxu1 %v11218_v25  ;;  %7849 = vmatpush.bf16.msra.mxu2 %v11314_v0  ;;  %v5789_v25 = vmax.f32 %v5610_v47, 0.0  ;;  %v12605_v0 = vld [vmem:[#allocation19 + $0x830] sm:$0xf0]  ;;  %v11637_v47 = vld [vmem:[#allocation19 + $0x7f8] sm:$0xf]  ;;  %v11530_v22 = vor.u32 %v12572_v39, %v11529_v62 }
 0x83b   :  { %v13871_v13 = vpack.c.bf16 %v5800_v46, %v5788_v53  ;;  %v11638_v56 = vor.u32 %v12599_v43, %v11637_v47  ;;  %v11517_v46 = vld [vmem:[#allocation19 + $0x708] sm:$0xf]  ;;  %v12596_v30 = vld [vmem:[#allocation19 + $0x7e8] sm:$0xf0]  ;;  %v11505_v50 = vld [vmem:[#allocation19 + $0x6f0] sm:$0xf] }
 0x83c   :  { %v13873_v41 = vpack.c.bf16 %v5801_v27, %v5789_v25  ;;  %v11721_v27 = vld [vmem:[#allocation19 + $0x8a0] sm:$0xf]  ;;  %v11422_v25 = vor.u32 %v12545_v12, %v11421_v10  ;;  %v12566_v52 = vld [vmem:[#allocation19 + $0x6f8] sm:$0xf0]  ;;  %v11709_v55 = vld [vmem:[#allocation19 + $0x888] sm:$0xf] }
 0x83d   :  { %7808 = vmatpush.bf16.msra.mxu3 %v11014_v16  ;;  %7822 = vmatpush.bf16.msrb.mxu0 %v11110_v49  ;;  %v11662_v16 = vor.u32 %v12605_v0, %v11661_v18  ;;  %v11758_v49 = vor.u32 %v12629_v24, %v11757_v15  ;;  %v11613_v15 = vld [vmem:[#allocation19 + $0x7c8] sm:$0xf]  ;;  %v12593_v24 = vld [vmem:[#allocation19 + $0x7d0] sm:$0xf0]  ;;  %v11493_v19 = vld [vmem:[#allocation19 + $0x6d8] sm:$0xf] }
 0x83e   :  { %7836 = vmatpush.bf16.msrb.mxu1 %v11206_v8  ;;  %7850 = vmatpush.bf16.msra.mxu2 %v11302_v37  ;;  %v11649_v8 = vld [vmem:[#allocation19 + $0x810] sm:$0xf]  ;;  %v11433_v37 = vld [vmem:[#allocation19 + $0x660] sm:$0xf]  ;;  %v11614_v4 = vor.u32 %v12593_v24, %v11613_v15  ;;  %v12563_v31 = vld [vmem:[#allocation19 + $0x6e0] sm:$0xf0] }
 0x83f   :  { %v11650_v34 = vor.u32 %v12602_v5, %v11649_v8  ;;  %v11434_v63 = vor.u32 %v12548_v2, %v11433_v37  ;;  %v12539_v8 = vld [vmem:[#allocation19 + $0x620] sm:$0xf0]  ;;  %v11506_v5 = vor.u32 %v12566_v52, %v11505_v50  ;;  %v12614_v37 = vld [vmem:[#allocation19 + $0x878] sm:$0xf0]  ;;  %v11385_v2 = vld [vmem:[#allocation19 + $0x600] sm:$0xf]  ;;  %v11494_v32 = vor.u32 %v12563_v31, %v11493_v19 }
 0x840   :  { %v12364_v7 = vld [vmem:[#allocation19 + $0xac] sm:$0xf]  ;;  %v10703_v10 = vld [vmem:[#allocation19 + $0xb4] sm:$0xf0]  ;;  %v11481_v12 = vld [vmem:[#allocation19 + $0x6c0] sm:$0xf] }
 0x841   :  { %7809 = vmatpush.bf16.msra.mxu3 %v11002_v57  ;;  %7823 = vmatpush.bf16.msrb.mxu0 %v11098_v61  ;;  %v12569_v57 = vld [vmem:[#allocation19 + $0x710] sm:$0xf0]  ;;  %v11625_v61 = vld [vmem:[#allocation19 + $0x7e0] sm:$0xf]  ;;  %v5637_v18 = vpop.f32.mrf.mxu0  ;;  %v10991_v19 = vld [vmem:[#allocation19 + $0x2f4] sm:$0xf0] }
 0x842   :  { %7837 = vmatpush.bf16.msrb.mxu1 %v11194_v59  ;;  %7851 = vmatpush.bf16.msra.mxu2 %v11290_v45  ;;  %v12620_v59 = vld [vmem:[#allocation19 + $0x8a8] sm:$0xf0]  ;;  %v3822_v45 = vperm.slane %v13881_v36, 0  ;;  %v11626_v51 = vor.u32 %v12596_v30, %v11625_v61  ;;  %v10799_v30 = vld [vmem:[#allocation19 + $0x174] sm:$0xf0] }
 0x843   :  { %v11722_v53 = vor.u32 %v12620_v59, %v11721_v27  ;;  %v12388_v61 = vld [vmem:[#allocation19 + $0x16c] sm:$0xf]  ;;  %v12611_v27 = vld [vmem:[#allocation19 + $0x860] sm:$0xf0]  ;;  %v12361_v50 = vld [vmem:[#allocation19 + $0x94] sm:$0xf] }
 0x844   :  { %7810 = vmatmul.bf16.vlgmr.msra.gmra.mxu3 %v13869_v1  ;;  %7824 = vmatmul.bf16.vlgmr.msrb.gmra.mxu0 %v13875_v11  ;;  %v10691_v52 = vld [vmem:[#allocation19 + $0x9c] sm:$0xf0]  ;;  %v10802_v24 = vor.u32 %v12388_v61, %v10799_v30  ;;  %v10763_v61 = vld [vmem:[#allocation19 + $0x12c] sm:$0xf0] }
 0x845   :  { %7858 = vmatpush.bf16.msrb.mxu3 %v11470_v29  ;;  %7872 = vmatpush.bf16.msra.mxu0 %v11566_v14  ;;  %v12542_v29 = vld [vmem:[#allocation19 + $0x638] sm:$0xf0]  ;;  %v11518_v14 = vor.u32 %v12569_v57, %v11517_v46  ;;  %v11685_v46 = vld [vmem:[#allocation19 + $0x858] sm:$0xf] }
 0x846   :  { %7838 = vmatmul.bf16.vlgmr.msrb.gmra.mxu1 %v13871_v13  ;;  %7852 = vmatmul.bf16.vlgmr.msra.gmra.mxu2 %v13873_v41  ;;  %v11410_v35 = vor.u32 %v12542_v29, %v11409_v20 }
 0x847   :  { %7886 = vmatpush.bf16.msra.mxu1 %v11662_v16  ;;  %7900 = vmatpush.bf16.msrb.mxu2 %v11758_v49  ;;  %v5623_v0 = vpop.f32.mrf.mxu3  ;;  %v12617_v16 = vld [vmem:[#allocation19 + $0x890] sm:$0xf0]  ;;  %v5651_v49 = vpop.f32.mrf.mxu1 }
 0x848   :  { %v5624_v3 = vadd.f32 %v5623_v0, %v3822_v45  ;;  %v10787_v0 = vld [vmem:[#allocation19 + $0x15c] sm:$0xf0] }
 0x849   :  { %7859 = vmatpush.bf16.msrb.mxu3 %v11458_v44  ;;  %7873 = vmatpush.bf16.msra.mxu0 %v11554_v33  ;;  %v11397_v44 = vld [vmem:[#allocation19 + $0x618] sm:$0xf]  ;;  %v11710_v33 = vor.u32 %v12617_v16, %v11709_v55  ;;  %v5639_v59 = vpop.f32.mrf.mxu0  ;;  %v11577_v55 = vld [vmem:[#allocation19 + $0x780] sm:$0xf]  ;;  %v12584_v16 = vld [vmem:[#allocation19 + $0x788] sm:$0xf0] }
 0x84a   :  { %v5638_v47 = vadd.f32 %v5637_v18, %v5624_v3  ;;  %v11398_v43 = vor.u32 %v12539_v8, %v11397_v44  ;;  %v12385_v18 = vld [vmem:[#allocation19 + $0x154] sm:$0xf]  ;;  %v11673_v44 = vld [vmem:[#allocation19 + $0x840] sm:$0xf]  ;;  %v12412_v3 = vld [vmem:[#allocation19 + $0x22c] sm:$0xf] }
 0x84b   :  { %7887 = vmatpush.bf16.msra.mxu1 %v11650_v34  ;;  %7901 = vmatpush.bf16.msrb.mxu2 %v11746_v28  ;;  %v11601_v34 = vld [vmem:[#allocation19 + $0x7b0] sm:$0xf]  ;;  %v12590_v28 = vld [vmem:[#allocation19 + $0x7b8] sm:$0xf0] }
 0x84c   :  { %v11602_v62 = vor.u32 %v12590_v28, %v11601_v34 }
 0x84d   :  { %7860 = vmatpush.bf16.msrb.mxu3 %v11446_v40  ;;  %7874 = vmatpush.bf16.msra.mxu0 %v11542_v48  ;;  %v11697_v40 = vld [vmem:[#allocation19 + $0x870] sm:$0xf]  ;;  %v12536_v48 = vld [vmem:[#allocation19 + $0x608] sm:$0xf0] }
 0x84e   :  { %v11698_v39 = vor.u32 %v12614_v37, %v11697_v40  ;;  %v11386_v20 = vor.u32 %v12536_v48, %v11385_v2  ;;  %v10694_v40 = vor.u32 %v12361_v50, %v10691_v52  ;;  %v12358_v37 = vld [vmem:[#allocation19 + $0x7c] sm:$0xf]  ;;  %v10679_v2 = vld [vmem:[#allocation19 + $0x84] sm:$0xf0]  ;;  %v10790_v48 = vor.u32 %v12385_v18, %v10787_v0  ;;  %v10655_v50 = vld [vmem:[#allocation19 + $0x54] sm:$0xf0] }
 0x84f   :  { %7888 = vmatpush.bf16.msra.mxu1 %v11638_v56  ;;  %7902 = vmatpush.bf16.msrb.mxu2 %v11734_v38  ;;  %v12560_v56 = vld [vmem:[#allocation19 + $0x6c8] sm:$0xf0]  ;;  %v5625_v38 = vpop.f32.mrf.mxu3  ;;  %v5653_v15 = vpop.f32.mrf.mxu1  ;;  %v10751_v0 = vld [vmem:[#allocation19 + $0x114] sm:$0xf0] }
 0x850   :  { %v5626_v57 = vadd.f32 %v5625_v38, %v3822_v45  ;;  %v10706_v45 = vor.u32 %v12364_v7, %v10703_v10  ;;  %v10883_v7 = vld [vmem:[#allocation19 + $0x21c] sm:$0xf0]  ;;  %v12433_v10 = vld [vmem:[#allocation19 + $0x2d4] sm:$0xf]  ;;  %v10682_v38 = vor.u32 %v12358_v37, %v10679_v2  ;;  %v12376_v18 = vld [vmem:[#allocation19 + $0x10c] sm:$0xf] }
 0x851   :  { %7861 = vmatpush.bf16.msrb.mxu3 %v11434_v63  ;;  %7875 = vmatpush.bf16.msra.mxu0 %v11530_v22  ;;  %v11589_v63 = vld [vmem:[#allocation19 + $0x798] sm:$0xf]  ;;  %v12587_v22 = vld [vmem:[#allocation19 + $0x7a0] sm:$0xf0]  ;;  %v12424_v37 = vld [vmem:[#allocation19 + $0x28c] sm:$0xf] }
 0x852   :  { %v5640_v29 = vadd.f32 %v5639_v59, %v5626_v57  ;;  %v12379_v57 = vld [vmem:[#allocation19 + $0x124] sm:$0xf]  ;;  %v10871_v59 = vld [vmem:[#allocation19 + $0x204] sm:$0xf0]  ;;  %v10943_v2 = vld [vmem:[#allocation19 + $0x294] sm:$0xf0] }
 0x853   :  { %7889 = vmatpush.bf16.msra.mxu1 %v11626_v51  ;;  %7903 = vmatpush.bf16.msrb.mxu2 %v11722_v53  ;;  %v11590_v51 = vor.u32 %v12587_v22, %v11589_v63  ;;  %v11686_v53 = vor.u32 %v12611_v27, %v11685_v46  ;;  %v12355_v63 = vld [vmem:[#allocation19 + $0x64] sm:$0xf]  ;;  %v10667_v22 = vld [vmem:[#allocation19 + $0x6c] sm:$0xf0]  ;;  %v12406_v27 = vld [vmem:[#allocation19 + $0x1fc] sm:$0xf]  ;;  %v10766_v52 = vor.u32 %v12379_v57, %v10763_v61 }
 0x854   :  { %v10931_v57 = vld [vmem:[#allocation19 + $0x27c] sm:$0xf0] }
 0x855   :  { %7862 = vmatpush.bf16.msrb.mxu3 %v11422_v25  ;;  %7876 = vmatpush.bf16.msra.mxu0 %v11518_v14  ;;  %v5652_v25 = vadd.f32 %v5651_v49, %v5638_v47  ;;  %v11482_v14 = vor.u32 %v12560_v56, %v11481_v12  ;;  %v11578_v49 = vor.u32 %v12584_v16, %v11577_v55  ;;  %v10775_v47 = vld [vmem:[#allocation19 + $0x144] sm:$0xf0]  ;;  %v10979_v12 = vld [vmem:[#allocation19 + $0x2dc] sm:$0xf0]  ;;  %v12427_v55 = vld [vmem:[#allocation19 + $0x2a4] sm:$0xf] }
 0x856   :  { %v10982_v30 = vor.u32 %v12433_v10, %v10979_v12  ;;  %v10955_v16 = vld [vmem:[#allocation19 + $0x2ac] sm:$0xf0]  ;;  %v10727_v12 = vld [vmem:[#allocation19 + $0xe4] sm:$0xf0] }
 0x857   :  { %7890 = vmatpush.bf16.msra.mxu1 %v11614_v4  ;;  %7904 = vmatpush.bf16.msrb.mxu2 %v11710_v33  ;;  %v5654_v4 = vadd.f32 %v5653_v15, %v5640_v29  ;;  %v12608_v33 = vld [vmem:[#allocation19 + $0x848] sm:$0xf0]  ;;  %v5790_v31 = vmax.f32 %v5652_v25, 0.0  ;;  %v5665_v25 = vpop.f32.mrf.mxu2  ;;  %v10670_v29 = vor.u32 %v12355_v63, %v10667_v22  ;;  %v10835_v63 = vld [vmem:[#allocation19 + $0x1bc] sm:$0xf0] }
 0x858   :  { %v11674_v8 = vor.u32 %v12608_v33, %v11673_v44  ;;  %v3823_v44 = vperm.slane %v13881_v36, 1 }
 0x859   :  { %7863 = vmatpush.bf16.msrb.mxu3 %v11410_v35  ;;  %7877 = vmatpush.bf16.msra.mxu0 %v11506_v5  ;;  %v10895_v35 = vld [vmem:[#allocation19 + $0x234] sm:$0xf0]  ;;  %v12436_v5 = vld [vmem:[#allocation19 + $0x2ec] sm:$0xf]  ;;  %v5802_v34 = vmax.f32 %v5654_v4, 0.0 }
 0x85a   :  { %v10898_v28 = vor.u32 %v12412_v3, %v10895_v35  ;;  %v12349_v3 = vld [vmem:[#allocation19 + $0x34] sm:$0xf]  ;;  %v10643_v35 = vld [vmem:[#allocation19 + $0x3c] sm:$0xf0]  ;;  %v5666_v10 = vadd.f32 %v5665_v25, %v3823_v44 }
 0x85b   :  { %7891 = vmatpush.bf16.msra.mxu1 %v11602_v62  ;;  %7905 = vmatpush.bf16.msrb.mxu2 %v11698_v39  ;;  %v12382_v62 = vld [vmem:[#allocation19 + $0x13c] sm:$0xf]  ;;  %v13884_v39 = vpack.c.bf16 %v5802_v34, %v5790_v31  ;;  %v12400_v31 = vld [vmem:[#allocation19 + $0x1cc] sm:$0xf]  ;;  %v10847_v34 = vld [vmem:[#allocation19 + $0x1d4] sm:$0xf0] }
 0x85c   :  { %v10778_v46 = vor.u32 %v12382_v62, %v10775_v47  ;;  %v10646_v62 = vor.u32 %v12349_v3, %v10643_v35  ;;  %v12346_v47 = vld [vmem:[#allocation19 + $0x1c] sm:$0xf] }
 0x85d   :  { %7864 = vmatpush.bf16.msrb.mxu3 %v11398_v43  ;;  %7878 = vmatpush.bf16.msra.mxu0 %v11494_v32  ;;  %v10994_v43 = vor.u32 %v12436_v5, %v10991_v19  ;;  %v12409_v32 = vld [vmem:[#allocation19 + $0x214] sm:$0xf]  ;;  %v10739_v5 = vld [vmem:[#allocation19 + $0xfc] sm:$0xf0]  ;;  %v10958_v19 = vor.u32 %v12427_v55, %v10955_v16 }
 0x85e   :  { %v10886_v56 = vor.u32 %v12409_v32, %v10883_v7  ;;  %v12370_v7 = vld [vmem:[#allocation19 + $0xdc] sm:$0xf] }
 0x85f   :  { %7892 = vmatpush.bf16.msra.mxu1 %v11590_v51  ;;  %7906 = vmatpush.bf16.msrb.mxu2 %v11686_v53  ;;  %v10967_v51 = vld [vmem:[#allocation19 + $0x2c4] sm:$0xf0]  ;;  %v10874_v53 = vor.u32 %v12406_v27, %v10871_v59  ;;  %v5667_v22 = vpop.f32.mrf.mxu2 }
 0x860   :  { %v5668_v25 = vadd.f32 %v5667_v22, %v3823_v44  ;;  %v12454_v22 = vld [vmem:[#allocation19 + $0x37c] sm:$0xf] }
 0x861   :  { %7865 = vmatpush.bf16.msrb.mxu3 %v11386_v20  ;;  %7879 = vmatpush.bf16.msra.mxu0 %v11482_v14  ;;  %v12430_v20 = vld [vmem:[#allocation19 + $0x2bc] sm:$0xf]  ;;  %v12352_v14 = vld [vmem:[#allocation19 + $0x4c] sm:$0xf] }
 0x862   :  { %v10970_v15 = vor.u32 %v12430_v20, %v10967_v51  ;;  %v10658_v33 = vor.u32 %v12352_v14, %v10655_v50  ;;  %v10619_v20 = vld [vmem:[#allocation19 + $0xc] sm:$0xf0]  ;;  %v10730_v51 = vor.u32 %v12370_v7, %v10727_v12 }
 0x863   :  { %7893 = vmatpush.bf16.msra.mxu1 %v11578_v49  ;;  %7907 = vmatpush.bf16.msrb.mxu2 %v11674_v8  ;;  %v10754_v49 = vor.u32 %v12376_v18, %v10751_v0  ;;  %v12373_v8 = vld [vmem:[#allocation19 + $0xf4] sm:$0xf]  ;;  %v10715_v14 = vld [vmem:[#allocation19 + $0xcc] sm:$0xf0]  ;;  %v10823_v18 = vld [vmem:[#allocation19 + $0x1a4] sm:$0xf0] }
 0x864   :  { %7866 = vmatmul.bf16.vlgmr.msrb.gmra.mxu3 %v13884_v39  ;;  %v10742_v32 = vor.u32 %v12373_v8, %v10739_v5  ;;  %v13888_v55 = vpop.f32.mrf.mxu1  ;;  %v12484_v8 = vld [vmem:[#allocation19 + $0x46c] sm:$0xf] }
 0x865   :  { %7914 = vmatpush.bf16.msra.mxu3 %v10706_v45  ;;  %7928 = vmatpush.bf16.msrb.mxu0 %v10802_v24  ;;  %v12403_v45 = vld [vmem:[#allocation19 + $0x1e4] sm:$0xf]  ;;  %v10859_v24 = vld [vmem:[#allocation19 + $0x1ec] sm:$0xf0] }
 0x866   :  { %v10862_v4 = vor.u32 %v12403_v45, %v10859_v24  ;;  %v12418_v45 = vld [vmem:[#allocation19 + $0x25c] sm:$0xf]  ;;  %v10919_v24 = vld [vmem:[#allocation19 + $0x264] sm:$0xf0] }
 0x867   :  { %7942 = vmatpush.bf16.msrb.mxu1 %v10898_v28  ;;  %7956 = vmatpush.bf16.msra.mxu2 %v10994_v43  ;;  %v5693_v28 = vpop.f32.mrf.mxu0  ;;  %v10631_v43 = vld [vmem:[#allocation19 + $0x24] sm:$0xf0] }
 0x868   :  { %v10634_v59 = vor.u32 %v12346_v47, %v10631_v43 }
 0x869   :  { %7915 = vmatpush.bf16.msra.mxu3 %v10694_v40  ;;  %7929 = vmatpush.bf16.msrb.mxu0 %v10790_v48  ;;  %v5679_v40 = vpop.f32.mrf.mxu3  ;;  %v10850_v48 = vor.u32 %v12400_v31, %v10847_v34  ;;  %v11183_v31 = vld [vmem:[#allocation19 + $0x474] sm:$0xf0]  ;;  %v10922_v34 = vor.u32 %v12418_v45, %v10919_v24 }
 0x86a   :  { %v5680_v61 = vadd.f32 %v5679_v40, %v5666_v10  ;;  %v12391_v40 = vld [vmem:[#allocation19 + $0x184] sm:$0xf]  ;;  %v13890_v47 = vpop.f32.mrf.mxu2 }
 0x86b   :  { %7943 = vmatpush.bf16.msrb.mxu1 %v10886_v56  ;;  %7957 = vmatpush.bf16.msra.mxu2 %v10982_v30  ;;  %v10946_v56 = vor.u32 %v12424_v37, %v10943_v2  ;;  %v12343_v30 = vld [vmem:[#allocation19 + $0x4] sm:$0xf]  ;;  %v10811_v37 = vld [vmem:[#allocation19 + $0x18c] sm:$0xf0]  ;;  %v11075_v2 = vld [vmem:[#allocation19 + $0x39c] sm:$0xf0] }
 0x86c   :  { %v5694_v16 = vadd.f32 %v5693_v28, %v5680_v61  ;;  %v10622_v35 = vor.u32 %v12343_v30, %v10619_v20  ;;  %v10907_v28 = vld [vmem:[#allocation19 + $0x24c] sm:$0xf0]  ;;  %v10814_v7 = vor.u32 %v12391_v40, %v10811_v37  ;;  %v5709_v61 = vpop.f32.mrf.mxu1  ;;  %v12451_v20 = vld [vmem:[#allocation19 + $0x364] sm:$0xf] }
 0x86d   :  { %7916 = vmatpush.bf16.msra.mxu3 %v10682_v38  ;;  %7930 = vmatpush.bf16.msrb.mxu0 %v10778_v46  ;;  %v12397_v38 = vld [vmem:[#allocation19 + $0x1b4] sm:$0xf] }
 0x86e   :  { %v12421_v46 = vld [vmem:[#allocation19 + $0x274] sm:$0xf]  ;;  %v10838_v27 = vor.u32 %v12397_v38, %v10835_v63  ;;  %v11171_v38 = vld [vmem:[#allocation19 + $0x45c] sm:$0xf0] }
 0x86f   :  { %7944 = vmatpush.bf16.msrb.mxu1 %v10874_v53  ;;  %7958 = vmatpush.bf16.msra.mxu2 %v10970_v15  ;;  %v12460_v53 = vld [vmem:[#allocation19 + $0x3ac] sm:$0xf]  ;;  %v10934_v50 = vor.u32 %v12421_v46, %v10931_v57  ;;  %v11087_v15 = vld [vmem:[#allocation19 + $0x3b4] sm:$0xf0]  ;;  %v5695_v3 = vpop.f32.mrf.mxu0  ;;  %v11063_v46 = vld [vmem:[#allocation19 + $0x384] sm:$0xf0] }
 0x870   :  { %v11066_v30 = vor.u32 %v12454_v22, %v11063_v46  ;;  %v11003_v22 = vld [vmem:[#allocation19 + $0x30c] sm:$0xf0] }
 0x871   :  { %7917 = vmatpush.bf16.msra.mxu3 %v10670_v29  ;;  %7931 = vmatpush.bf16.msrb.mxu0 %v10766_v52  ;;  %v12367_v29 = vld [vmem:[#allocation19 + $0xc4] sm:$0xf]  ;;  %v12394_v52 = vld [vmem:[#allocation19 + $0x19c] sm:$0xf]  ;;  %v5681_v0 = vpop.f32.mrf.mxu3 }
 0x872   :  { %v10718_v44 = vor.u32 %v12367_v29, %v10715_v14  ;;  %v5723_v29 = vpop.f32.mrf.mxu2  ;;  %v12475_v14 = vld [vmem:[#allocation19 + $0x424] sm:$0xf] }
 0x873   :  { %7945 = vmatpush.bf16.msrb.mxu1 %v10862_v4  ;;  %7959 = vmatpush.bf16.msra.mxu2 %v10958_v19  ;;  %v5682_v4 = vadd.f32 %v5681_v0, %v5668_v25  ;;  %v11090_v19 = vor.u32 %v12460_v53, %v11087_v15  ;;  %v11039_v0 = vld [vmem:[#allocation19 + $0x354] sm:$0xf0] }
 0x875   :  { %7918 = vmatpush.bf16.msra.mxu3 %v10658_v33  ;;  %7932 = vmatpush.bf16.msrb.mxu0 %v10754_v49  ;;  %v10826_v33 = vor.u32 %v12394_v52, %v10823_v18  ;;  %v12457_v49 = vld [vmem:[#allocation19 + $0x394] sm:$0xf]  ;;  %v5696_v5 = vadd.f32 %v5695_v3, %v5682_v4  ;;  %v12448_v18 = vld [vmem:[#allocation19 + $0x34c] sm:$0xf]  ;;  %v11135_v4 = vld [vmem:[#allocation19 + $0x414] sm:$0xf0] }
 0x876   :  { %v11078_v12 = vor.u32 %v12457_v49, %v11075_v2  ;;  %v11042_v24 = vor.u32 %v12448_v18, %v11039_v0  ;;  %v12445_v3 = vld [vmem:[#allocation19 + $0x334] sm:$0xf]  ;;  %v12442_v2 = vld [vmem:[#allocation19 + $0x31c] sm:$0xf] }
 0x877   :  { %7946 = vmatpush.bf16.msrb.mxu1 %v10850_v48  ;;  %7960 = vmatpush.bf16.msra.mxu2 %v10946_v56  ;;  %v12415_v48 = vld [vmem:[#allocation19 + $0x244] sm:$0xf]  ;;  %v5803_v43 = vmax.f32 %v5696_v5, 0.0  ;;  %v12481_v56 = vld [vmem:[#allocation19 + $0x454] sm:$0xf] }
 0x878   :  { %v10910_v63 = vor.u32 %v12415_v48, %v10907_v28  ;;  %v11174_v57 = vor.u32 %v12481_v56, %v11171_v38  ;;  %v11015_v48 = vld [vmem:[#allocation19 + $0x324] sm:$0xf0] }
 0x879   :  { %7919 = vmatpush.bf16.msra.mxu3 %v10646_v62  ;;  %7933 = vmatpush.bf16.msrb.mxu0 %v10742_v32  ;;  %v5791_v62 = vmax.f32 %v5694_v16, 0.0  ;;  %v11186_v32 = vor.u32 %v12484_v8, %v11183_v31  ;;  %v12472_v16 = vld [vmem:[#allocation19 + $0x40c] sm:$0xf]  ;;  %v12469_v31 = vld [vmem:[#allocation19 + $0x3f4] sm:$0xf] }
 0x87a   :  { %v11138_v8 = vor.u32 %v12472_v16, %v11135_v4  ;;  %v11111_v56 = vld [vmem:[#allocation19 + $0x3e4] sm:$0xf0]  ;;  %v12553_v4 = vld [vmem:[#allocation19 + $0x694] sm:$0xf] }
 0x87b   :  { %7947 = vmatpush.bf16.msrb.mxu1 %v10838_v27  ;;  %7961 = vmatpush.bf16.msra.mxu2 %v10934_v50  ;;  %v13892_v10 = vpack.c.bf16 %v5803_v43, %v5791_v62  ;;  %v12478_v27 = vld [vmem:[#allocation19 + $0x43c] sm:$0xf]  ;;  %v11147_v50 = vld [vmem:[#allocation19 + $0x42c] sm:$0xf0] }
 0x87c   :  { %v11150_v15 = vor.u32 %v12475_v14, %v11147_v50  ;;  %v12508_v14 = vld [vmem:[#allocation19 + $0x52c] sm:$0xf]  ;;  %v11279_v50 = vld [vmem:[#allocation19 + $0x534] sm:$0xf0] }
 0x87d   :  { %7920 = vmatpush.bf16.msra.mxu3 %v10634_v59  ;;  %7934 = vmatpush.bf16.msrb.mxu0 %v10730_v51  ;;  %v11159_v59 = vld [vmem:[#allocation19 + $0x444] sm:$0xf0]  ;;  %v11051_v51 = vld [vmem:[#allocation19 + $0x36c] sm:$0xf0] }
 0x87e   :  { %7880 = vmatmul.bf16.vlgmr.msra.gmra.mxu0 %v13892_v10  ;;  %v11162_v53 = vor.u32 %v12478_v27, %v11159_v59  ;;  %v11054_v25 = vor.u32 %v12451_v20, %v11051_v51  ;;  %v12556_v27 = vld [vmem:[#allocation19 + $0x6ac] sm:$0xf] }
 0x87f   :  { %7948 = vmatpush.bf16.msrb.mxu1 %v10826_v33  ;;  %7962 = vmatpush.bf16.msra.mxu2 %v10922_v34  ;;  %v3825_v33 = vperm.slane %v13881_v36, 3  ;;  %v11123_v34 = vld [vmem:[#allocation19 + $0x3fc] sm:$0xf0] }
 0x880   :  { %v11126_v43 = vor.u32 %v12469_v31, %v11123_v34  ;;  %v12505_v31 = vld [vmem:[#allocation19 + $0x514] sm:$0xf] }
 0x881   :  { %7921 = vmatpush.bf16.msra.mxu3 %v10622_v35  ;;  %7935 = vmatpush.bf16.msrb.mxu0 %v10718_v44  ;;  %v5749_v52 = vpop.f32.mrf.mxu0  ;;  %v11027_v35 = vld [vmem:[#allocation19 + $0x33c] sm:$0xf0]  ;;  %v3824_v44 = vperm.slane %v13881_v36, 2 }
 0x882   :  { %v5750_v40 = vadd.f32 %v5749_v52, %v3825_v33  ;;  %v12532_v52 = vld [vmem:[#allocation19 + $0x5ec] sm:$0xf] }
 0x883   :  { %7949 = vmatpush.bf16.msrb.mxu1 %v10814_v7  ;;  %7963 = vmatpush.bf16.msra.mxu2 %v10910_v63  ;;  %v5708_v28 = vadd.f32 %v13888_v55, %v3824_v44  ;;  %v11018_v7 = vor.u32 %v12442_v2, %v11015_v48  ;;  %v12439_v63 = vld [vmem:[#allocation19 + $0x304] sm:$0xf]  ;;  %v11471_v55 = vld [vmem:[#allocation19 + $0x6b4] sm:$0xf0]  ;;  %v11267_v2 = vld [vmem:[#allocation19 + $0x51c] sm:$0xf0] }
 0x884   :  { %7922 = vmatmul.bf16.vlgmr.msra.gmra.mxu3 %v13816_v21  ;;  %v5763_v45 = vpop.f32.mrf.mxu1  ;;  %v11474_v0 = vor.u32 %v12556_v27, %v11471_v55  ;;  %v12529_v48 = vld [vmem:[#allocation19 + $0x5d4] sm:$0xf]  ;;  %v12547_v27 = vld [vmem:[#allocation19 + $0x664] sm:$0xf]  ;;  %v11435_v55 = vld [vmem:[#allocation19 + $0x66c] sm:$0xf0] }
 0x885   :  { %7970 = vmatpush.bf16.msrb.mxu3 %v11090_v19  ;;  %7984 = vmatpush.bf16.msra.mxu0 %v11186_v32  ;;  %v11030_v19 = vor.u32 %v12445_v3, %v11027_v35  ;;  %v5722_v36 = vadd.f32 %v13890_v47, %v5708_v28  ;;  %v5710_v32 = vadd.f32 %v5709_v61, %v3824_v44  ;;  %v12580_v44 = vld [vmem:[#allocation19 + $0x76c] sm:$0xf]  ;;  %v11363_v28 = vld [vmem:[#allocation19 + $0x5dc] sm:$0xf0] }
 0x886   :  { %v5764_v38 = vadd.f32 %v5763_v45, %v5750_v40  ;;  %v11099_v45 = vld [vmem:[#allocation19 + $0x3cc] sm:$0xf0] }
 0x887   :  { %v5735_v49 = vpop.f32.mrf.mxu3  ;;  %v5724_v46 = vadd.f32 %v5723_v29, %v5710_v32  ;;  %v12463_v29 = vld [vmem:[#allocation19 + $0x3c4] sm:$0xf]  ;;  %v12577_v32 = vld [vmem:[#allocation19 + $0x754] sm:$0xf] }
 0x888   :  { %v11102_v40 = vor.u32 %v12463_v29, %v11099_v45  ;;  %v11531_v29 = vld [vmem:[#allocation19 + $0x72c] sm:$0xf0] }
 0x889   :  { %7971 = vmatpush.bf16.msrb.mxu3 %v11078_v12  ;;  %7985 = vmatpush.bf16.msra.mxu0 %v11174_v57  ;;  %v5751_v37 = vpop.f32.mrf.mxu0  ;;  %v12466_v12 = vld [vmem:[#allocation19 + $0x3dc] sm:$0xf]  ;;  %v5736_v57 = vadd.f32 %v5735_v49, %v5722_v36  ;;  %v11567_v49 = vld [vmem:[#allocation19 + $0x774] sm:$0xf0]  ;;  %v11447_v36 = vld [vmem:[#allocation19 + $0x684] sm:$0xf0] }
 0x88a   :  { %v5777_v5 = vpop.f32.mrf.mxu2  ;;  %v5752_v62 = vadd.f32 %v5751_v37, %v3825_v33  ;;  %v11459_v33 = vld [vmem:[#allocation19 + $0x69c] sm:$0xf0] }
 0x88b   :  { %v5778_v59 = vadd.f32 %v5777_v5, %v5764_v38  ;;  %v11282_v5 = vor.u32 %v12508_v14, %v11279_v50  ;;  %v11462_v37 = vor.u32 %v12553_v4, %v11459_v33  ;;  %v12502_v38 = vld [vmem:[#allocation19 + $0x4fc] sm:$0xf]  ;;  %v12523_v14 = vld [vmem:[#allocation19 + $0x5a4] sm:$0xf]  ;;  %v11339_v50 = vld [vmem:[#allocation19 + $0x5ac] sm:$0xf0] }
 0x88c   :  { %v11231_v33 = vld [vmem:[#allocation19 + $0x4d4] sm:$0xf0] }
 0x88d   :  { %7972 = vmatpush.bf16.msrb.mxu3 %v11066_v30  ;;  %7986 = vmatpush.bf16.msra.mxu0 %v11162_v53  ;;  %v5765_v30 = vpop.f32.mrf.mxu1  ;;  %v11114_v53 = vor.u32 %v12466_v12, %v11111_v56  ;;  %v5793_v3 = vmax.f32 %v5778_v59, 0.0  ;;  %v11270_v12 = vor.u32 %v12505_v31, %v11267_v2  ;;  %v11366_v56 = vor.u32 %v12529_v48, %v11363_v28  ;;  %v12574_v59 = vld [vmem:[#allocation19 + $0x73c] sm:$0xf]  ;;  %v11519_v31 = vld [vmem:[#allocation19 + $0x714] sm:$0xf0] }
 0x88e   :  { %7936 = vmatmul.bf16.vlgmr.msrb.gmra.mxu0 %v13822_v42  ;;  %v5766_v20 = vadd.f32 %v5765_v30, %v5752_v62  ;;  %v11570_v62 = vor.u32 %v12580_v44, %v11567_v49  ;;  %v12541_v49 = vld [vmem:[#allocation19 + $0x634] sm:$0xf]  ;;  %v11219_v28 = vld [vmem:[#allocation19 + $0x4bc] sm:$0xf0] }
 0x88f   :  { %v5737_v51 = vpop.f32.mrf.mxu3  ;;  %v12493_v2 = vld [vmem:[#allocation19 + $0x4b4] sm:$0xf] }
 0x890   :  { %v5738_v47 = vadd.f32 %v5737_v51, %v5724_v46  ;;  %v12526_v46 = vld [vmem:[#allocation19 + $0x5bc] sm:$0xf] }
 0x891   :  { %7973 = vmatpush.bf16.msrb.mxu3 %v11054_v25  ;;  %7987 = vmatpush.bf16.msra.mxu0 %v11150_v15  ;;  %v11006_v25 = vor.u32 %v12439_v63, %v11003_v22  ;;  %v11375_v15 = vld [vmem:[#allocation19 + $0x5f4] sm:$0xf0]  ;;  %v11255_v22 = vld [vmem:[#allocation19 + $0x504] sm:$0xf0] }
 0x892   :  { %v5779_v61 = vpop.f32.mrf.mxu2  ;;  %v5804_v16 = vmax.f32 %v5738_v47, 0.0  ;;  %v11258_v51 = vor.u32 %v12502_v38, %v11255_v22  ;;  %v12499_v47 = vld [vmem:[#allocation19 + $0x4e4] sm:$0xf]  ;;  %v11222_v38 = vor.u32 %v12493_v2, %v11219_v28  ;;  %v12490_v22 = vld [vmem:[#allocation19 + $0x49c] sm:$0xf] }
 0x893   :  { %v5780_v18 = vadd.f32 %v5779_v61, %v5766_v20  ;;  %v11543_v20 = vld [vmem:[#allocation19 + $0x744] sm:$0xf0]  ;;  %v11438_v61 = vor.u32 %v12547_v27, %v11435_v55  ;;  %v12601_v28 = vld [vmem:[#allocation19 + $0x814] sm:$0xf] }
 0x894   :  { %v11303_v27 = vld [vmem:[#allocation19 + $0x564] sm:$0xf0] }
 0x895   :  { %7974 = vmatpush.bf16.msrb.mxu3 %v11042_v24  ;;  %7988 = vmatpush.bf16.msra.mxu0 %v11138_v8  ;;  %v5792_v24 = vmax.f32 %v5736_v57, 0.0  ;;  %v5805_v35 = vmax.f32 %v5780_v18, 0.0  ;;  %v11351_v57 = vld [vmem:[#allocation19 + $0x5c4] sm:$0xf0]  ;;  %v12544_v18 = vld [vmem:[#allocation19 + $0x64c] sm:$0xf] }
 0x897   :  { %v13901_v8 = vpack.c.bf16 %v5804_v16, %v5792_v24  ;;  %v13903_v34 = vpack.c.bf16 %v5805_v35, %v5793_v3  ;;  %v11342_v24 = vor.u32 %v12523_v14, %v11339_v50  ;;  %v12496_v16 = vld [vmem:[#allocation19 + $0x4cc] sm:$0xf]  ;;  %v11327_v35 = vld [vmem:[#allocation19 + $0x594] sm:$0xf0]  ;;  %v12487_v50 = vld [vmem:[#allocation19 + $0x484] sm:$0xf] }
 0x898   :  { %v12520_v3 = vld [vmem:[#allocation19 + $0x58c] sm:$0xf] }
 0x899   :  { %7975 = vmatpush.bf16.msrb.mxu3 %v11030_v19  ;;  %7989 = vmatpush.bf16.msra.mxu0 %v11126_v43  ;;  %v11378_v19 = vor.u32 %v12532_v52, %v11375_v15  ;;  %v12550_v43 = vld [vmem:[#allocation19 + $0x67c] sm:$0xf]  ;;  %v11546_v52 = vor.u32 %v12574_v59, %v11543_v20  ;;  %v12571_v15 = vld [vmem:[#allocation19 + $0x724] sm:$0xf]  ;;  %v11387_v20 = vld [vmem:[#allocation19 + $0x60c] sm:$0xf0] }
 0x89a   :  { %7894 = vmatmul.bf16.vlgmr.msra.gmra.mxu1 %v13901_v8  ;;  %7908 = vmatmul.bf16.vlgmr.msrb.gmra.mxu2 %v13903_v34  ;;  %v11450_v63 = vor.u32 %v12550_v43, %v11447_v36  ;;  %v11534_v44 = vor.u32 %v12571_v15, %v11531_v29  ;;  %v11315_v43 = vld [vmem:[#allocation19 + $0x57c] sm:$0xf0]  ;;  %v12535_v59 = vld [vmem:[#allocation19 + $0x604] sm:$0xf]  ;;  %v11291_v15 = vld [vmem:[#allocation19 + $0x54c] sm:$0xf0] }
 0x89b   :  { %7998 = vmatpush.bf16.msra.mxu1 %v11282_v5  ;;  %8012 = vmatpush.bf16.msrb.mxu2 %v11378_v19  ;;  %v11411_v5 = vld [vmem:[#allocation19 + $0x63c] sm:$0xf0]  ;;  %v12568_v19 = vld [vmem:[#allocation19 + $0x70c] sm:$0xf] }
 0x89c   :  { %v11414_v48 = vor.u32 %v12541_v49, %v11411_v5  ;;  %v11522_v36 = vor.u32 %v12568_v19, %v11519_v31  ;;  %v12604_v29 = vld [vmem:[#allocation19 + $0x82c] sm:$0xf]  ;;  %v12363_v19 = vld [vmem:[#allocation19 + $0xa0] sm:$0xf0]  ;;  %v10805_v31 = vld [vmem:[#allocation19 + $0x170] sm:$0xf] }
 0x89d   :  { %7976 = vmatpush.bf16.msrb.mxu3 %v11018_v7  ;;  %7990 = vmatpush.bf16.msra.mxu0 %v11114_v53  ;;  %v11555_v7 = vld [vmem:[#allocation19 + $0x75c] sm:$0xf0]  ;;  %v11354_v53 = vor.u32 %v12526_v46, %v11351_v57  ;;  %v11207_v57 = vld [vmem:[#allocation19 + $0x4a4] sm:$0xf0] }
 0x89e   :  { %v11558_v30 = vor.u32 %v12577_v32, %v11555_v7  ;;  %v12538_v32 = vld [vmem:[#allocation19 + $0x61c] sm:$0xf]  ;;  %v11399_v7 = vld [vmem:[#allocation19 + $0x624] sm:$0xf0] }
 0x89f   :  { %7999 = vmatpush.bf16.msra.mxu1 %v11270_v12  ;;  %8013 = vmatpush.bf16.msrb.mxu2 %v11366_v56  ;;  %v12565_v12 = vld [vmem:[#allocation19 + $0x6f4] sm:$0xf]  ;;  %v11507_v56 = vld [vmem:[#allocation19 + $0x6fc] sm:$0xf0]  ;;  %v11402_v46 = vor.u32 %v12538_v32, %v11399_v7 }
 0x8a0   :  { %v11510_v55 = vor.u32 %v12565_v12, %v11507_v56  ;;  %v12625_v32 = vld [vmem:[#allocation19 + $0x8d4] sm:$0xf]  ;;  %v11747_v7 = vld [vmem:[#allocation19 + $0x8dc] sm:$0xf0]  ;;  %v12360_v56 = vld [vmem:[#allocation19 + $0x88] sm:$0xf0] }
 0x8a1   :  { %7977 = vmatpush.bf16.msrb.mxu3 %v11006_v25  ;;  %7991 = vmatpush.bf16.msra.mxu0 %v11102_v40  ;;  %v11243_v25 = vld [vmem:[#allocation19 + $0x4ec] sm:$0xf0]  ;;  %v11234_v40 = vor.u32 %v12496_v16, %v11231_v33  ;;  %v11663_v16 = vld [vmem:[#allocation19 + $0x834] sm:$0xf0]  ;;  %v10685_v12 = vld [vmem:[#allocation19 + $0x80] sm:$0xf] }
 0x8a2   :  { %v11246_v45 = vor.u32 %v12499_v47, %v11243_v25  ;;  %v10709_v47 = vld [vmem:[#allocation19 + $0xb0] sm:$0xf]  ;;  %v11210_v25 = vor.u32 %v12490_v22, %v11207_v57  ;;  %v11759_v33 = vld [vmem:[#allocation19 + $0x8f4] sm:$0xf0]  ;;  %v12598_v57 = vld [vmem:[#allocation19 + $0x7fc] sm:$0xf] }
 0x8a3   :  { %8000 = vmatpush.bf16.msra.mxu1 %v11258_v51  ;;  %8014 = vmatpush.bf16.msrb.mxu2 %v11354_v53  ;;  %v12562_v51 = vld [vmem:[#allocation19 + $0x6dc] sm:$0xf]  ;;  %v11495_v53 = vld [vmem:[#allocation19 + $0x6e4] sm:$0xf0] }
 0x8a4   :  { %7978 = vmatmul.bf16.vlgmr.msrb.gmra.mxu3 %v13869_v1  ;;  %7992 = vmatmul.bf16.vlgmr.msra.gmra.mxu0 %v13875_v11 }
 0x8a5   :  { %8026 = vmatpush.bf16.msra.mxu3 %v11474_v0  ;;  %8040 = vmatpush.bf16.msrb.mxu0 %v11570_v62  ;;  %v11423_v0 = vld [vmem:[#allocation19 + $0x654] sm:$0xf0]  ;;  %v12517_v62 = vld [vmem:[#allocation19 + $0x574] sm:$0xf] }
 0x8a6   :  { %v11426_v4 = vor.u32 %v12544_v18, %v11423_v0  ;;  %v11390_v18 = vor.u32 %v12535_v59, %v11387_v20  ;;  %v12511_v0 = vld [vmem:[#allocation19 + $0x544] sm:$0xf]  ;;  %v12622_v59 = vld [vmem:[#allocation19 + $0x8bc] sm:$0xf]  ;;  %v11735_v20 = vld [vmem:[#allocation19 + $0x8c4] sm:$0xf0] }
 0x8a7   :  { %8001 = vmatpush.bf16.msra.mxu1 %v11246_v45  ;;  %8015 = vmatpush.bf16.msrb.mxu2 %v11342_v24  ;;  %v11498_v45 = vor.u32 %v12562_v51, %v11495_v53  ;;  %v11294_v5 = vor.u32 %v12511_v0, %v11291_v15  ;;  %v10673_v51 = vld [vmem:[#allocation19 + $0x68] sm:$0xf]  ;;  %v12357_v53 = vld [vmem:[#allocation19 + $0x70] sm:$0xf0]  ;;  %v12619_v15 = vld [vmem:[#allocation19 + $0x8a4] sm:$0xf] }
 0x8a9   :  { %8027 = vmatpush.bf16.msra.mxu3 %v11462_v37  ;;  %8041 = vmatpush.bf16.msrb.mxu0 %v11558_v30  ;;  %v11330_v37 = vor.u32 %v12520_v3, %v11327_v35  ;;  %v12514_v30 = vld [vmem:[#allocation19 + $0x55c] sm:$0xf]  ;;  %v12559_v3 = vld [vmem:[#allocation19 + $0x6c4] sm:$0xf]  ;;  %v11483_v35 = vld [vmem:[#allocation19 + $0x6cc] sm:$0xf0] }
 0x8aa   :  { %7950 = vmatmul.bf16.vlgmr.msrb.gmra.mxu1 %v13826_v60  ;;  %7964 = vmatmul.bf16.vlgmr.msra.gmra.mxu2 %v13829_v23  ;;  %v11306_v14 = vor.u32 %v12514_v30, %v11303_v27  ;;  %v11639_v30 = vld [vmem:[#allocation19 + $0x804] sm:$0xf0]  ;;  %v10686_v27 = vor.u32 %v12360_v56, %v10685_v12  ;;  %v12613_v12 = vld [vmem:[#allocation19 + $0x874] sm:$0xf]  ;;  %v11699_v56 = vld [vmem:[#allocation19 + $0x87c] sm:$0xf0] }
 0x8ab   :  { %8002 = vmatpush.bf16.msra.mxu1 %v11234_v40  ;;  %8016 = vmatpush.bf16.msrb.mxu2 %v11330_v37  ;;  %v12390_v40 = vld [vmem:[#allocation19 + $0x178] sm:$0xf0]  ;;  %v11666_v37 = vor.u32 %v12604_v29, %v11663_v16  ;;  %v11723_v29 = vld [vmem:[#allocation19 + $0x8ac] sm:$0xf0]  ;;  %v10769_v16 = vld [vmem:[#allocation19 + $0x128] sm:$0xf] }
 0x8ad   :  { %8028 = vmatpush.bf16.msra.mxu3 %v11450_v63  ;;  %8042 = vmatpush.bf16.msrb.mxu0 %v11546_v52  ;;  %v11318_v63 = vor.u32 %v12517_v62, %v11315_v43  ;;  %v11195_v52 = vld [vmem:[#allocation19 + $0x48c] sm:$0xf0]  ;;  %v11651_v62 = vld [vmem:[#allocation19 + $0x81c] sm:$0xf0] }
 0x8ae   :  { %v11198_v49 = vor.u32 %v12487_v50, %v11195_v52  ;;  %v11654_v22 = vor.u32 %v12601_v28, %v11651_v62  ;;  %v12595_v50 = vld [vmem:[#allocation19 + $0x7e4] sm:$0xf]  ;;  %v11627_v52 = vld [vmem:[#allocation19 + $0x7ec] sm:$0xf0] }
 0x8af   :  { %8003 = vmatpush.bf16.msra.mxu1 %v11222_v38  ;;  %8017 = vmatpush.bf16.msrb.mxu2 %v11318_v63  ;;  %v10793_v38 = vld [vmem:[#allocation19 + $0x158] sm:$0xf]  ;;  %v12387_v63 = vld [vmem:[#allocation19 + $0x160] sm:$0xf0] }
 0x8b1   :  { %8029 = vmatpush.bf16.msra.mxu3 %v11438_v61  ;;  %8043 = vmatpush.bf16.msrb.mxu0 %v11534_v44  ;;  %v12366_v61 = vld [vmem:[#allocation19 + $0xb8] sm:$0xf0]  ;;  %v10697_v44 = vld [vmem:[#allocation19 + $0x98] sm:$0xf] }
 0x8b2   :  { %v10710_v24 = vor.u32 %v12366_v61, %v10709_v47  ;;  %v10698_v43 = vor.u32 %v12363_v19, %v10697_v44  ;;  %v10781_v47 = vld [vmem:[#allocation19 + $0x140] sm:$0xf]  ;;  %v12384_v61 = vld [vmem:[#allocation19 + $0x148] sm:$0xf0]  ;;  %v11615_v44 = vld [vmem:[#allocation19 + $0x7d4] sm:$0xf0] }
 0x8b3   :  { %8004 = vmatpush.bf16.msra.mxu1 %v11210_v25  ;;  %8018 = vmatpush.bf16.msrb.mxu2 %v11306_v14  ;;  %v11642_v25 = vor.u32 %v12598_v57, %v11639_v30  ;;  %v11738_v14 = vor.u32 %v12622_v59, %v11735_v20  ;;  %v10782_v0 = vor.u32 %v12384_v61, %v10781_v47  ;;  %v12616_v19 = vld [vmem:[#allocation19 + $0x88c] sm:$0xf]  ;;  %v10625_v47 = vld [vmem:[#allocation19 + $0x8] sm:$0xf]  ;;  %v12345_v61 = vld [vmem:[#allocation19 + $0x10] sm:$0xf0] }
 0x8b4   :  { %v11702_v30 = vor.u32 %v12613_v12, %v11699_v56  ;;  %v12411_v12 = vld [vmem:[#allocation19 + $0x220] sm:$0xf0]  ;;  %v10985_v56 = vld [vmem:[#allocation19 + $0x2d8] sm:$0xf] }
 0x8b5   :  { %8030 = vmatpush.bf16.msra.mxu3 %v11426_v4  ;;  %8044 = vmatpush.bf16.msrb.mxu0 %v11522_v36  ;;  %v12628_v4 = vld [vmem:[#allocation19 + $0x8ec] sm:$0xf]  ;;  %v10806_v36 = vor.u32 %v12390_v40, %v10805_v31  ;;  %v11711_v31 = vld [vmem:[#allocation19 + $0x894] sm:$0xf0] }
 0x8b6   :  { %v11762_v2 = vor.u32 %v12628_v4, %v11759_v33  ;;  %v12381_v4 = vld [vmem:[#allocation19 + $0x130] sm:$0xf0]  ;;  %v11630_v33 = vor.u32 %v12595_v50, %v11627_v52  ;;  %v10649_v40 = vld [vmem:[#allocation19 + $0x38] sm:$0xf]  ;;  %v11714_v62 = vor.u32 %v12616_v19, %v11711_v31  ;;  %v11093_v52 = vld [vmem:[#allocation19 + $0x3b0] sm:$0xf] }
 0x8b7   :  { %8005 = vmatpush.bf16.msra.mxu1 %v11198_v49  ;;  %8019 = vmatpush.bf16.msrb.mxu2 %v11294_v5  ;;  %v10770_v5 = vor.u32 %v12381_v4, %v10769_v16  ;;  %v11675_v4 = vld [vmem:[#allocation19 + $0x84c] sm:$0xf0]  ;;  %v12369_v31 = vld [vmem:[#allocation19 + $0xd0] sm:$0xf0] }
 0x8b9   :  { %8031 = vmatpush.bf16.msra.mxu3 %v11414_v48  ;;  %8045 = vmatpush.bf16.msrb.mxu0 %v11510_v55  ;;  %v11486_v48 = vor.u32 %v12559_v3, %v11483_v35  ;;  %v10794_v55 = vor.u32 %v12387_v63, %v10793_v38  ;;  %v11726_v3 = vor.u32 %v12619_v15, %v11723_v29  ;;  %v12592_v35 = vld [vmem:[#allocation19 + $0x7cc] sm:$0xf]  ;;  %v10637_v38 = vld [vmem:[#allocation19 + $0x20] sm:$0xf]  ;;  %v12583_v15 = vld [vmem:[#allocation19 + $0x784] sm:$0xf] }
 0x8ba   :  { %8006 = vmatmul.bf16.vlgmr.msra.gmra.mxu1 %v13871_v13  ;;  %8020 = vmatmul.bf16.vlgmr.msrb.gmra.mxu2 %v13873_v41  ;;  %v11618_v28 = vor.u32 %v12592_v35, %v11615_v44  ;;  %v12348_v63 = vld [vmem:[#allocation19 + $0x28] sm:$0xf0]  ;;  %v11579_v29 = vld [vmem:[#allocation19 + $0x78c] sm:$0xf0] }
 0x8bb   :  { %8054 = vmatpush.bf16.msrb.mxu1 %v11666_v37  ;;  %8068 = vmatpush.bf16.msra.mxu2 %v11762_v2  ;;  %v12351_v37 = vld [vmem:[#allocation19 + $0x40] sm:$0xf0]  ;;  %v10757_v2 = vld [vmem:[#allocation19 + $0x110] sm:$0xf]  ;;  %v10638_v59 = vor.u32 %v12348_v63, %v10637_v38  ;;  %v11582_v19 = vor.u32 %v12583_v15, %v11579_v29  ;;  %v11069_v63 = vld [vmem:[#allocation19 + $0x380] sm:$0xf] }
 0x8bc   :  { %v10997_v44 = vld [vmem:[#allocation19 + $0x2f0] sm:$0xf]  ;;  %v12435_v38 = vld [vmem:[#allocation19 + $0x2e0] sm:$0xf0]  ;;  %v10865_v15 = vld [vmem:[#allocation19 + $0x1e8] sm:$0xf] }
 0x8bd   :  { %8032 = vmatpush.bf16.msra.mxu3 %v11402_v46  ;;  %8046 = vmatpush.bf16.msrb.mxu0 %v11498_v45  ;;  %v11750_v46 = vor.u32 %v12625_v32, %v11747_v7  ;;  %v10661_v45 = vld [vmem:[#allocation19 + $0x50] sm:$0xf]  ;;  %v10650_v32 = vor.u32 %v12351_v37, %v10649_v40  ;;  %v11081_v40 = vld [vmem:[#allocation19 + $0x398] sm:$0xf]  ;;  %v12459_v37 = vld [vmem:[#allocation19 + $0x3a0] sm:$0xf0] }
 0x8be   :  { %v12405_v29 = vld [vmem:[#allocation19 + $0x1f0] sm:$0xf0] }
 0x8bf   :  { %8055 = vmatpush.bf16.msrb.mxu1 %v11654_v22  ;;  %8069 = vmatpush.bf16.msra.mxu2 %v11750_v46  ;;  %v10745_v22 = vld [vmem:[#allocation19 + $0xf8] sm:$0xf]  ;;  %v12375_v46 = vld [vmem:[#allocation19 + $0x100] sm:$0xf0] }
 0x8c0   :  { %v10746_v20 = vor.u32 %v12375_v46, %v10745_v22  ;;  %v12456_v22 = vld [vmem:[#allocation19 + $0x388] sm:$0xf0] }
 0x8c1   :  { %8033 = vmatpush.bf16.msra.mxu3 %v11390_v18  ;;  %8047 = vmatpush.bf16.msrb.mxu0 %v11486_v48  ;;  %v10674_v18 = vor.u32 %v12357_v53, %v10673_v51  ;;  %v12378_v48 = vld [vmem:[#allocation19 + $0x118] sm:$0xf0]  ;;  %v11687_v53 = vld [vmem:[#allocation19 + $0x864] sm:$0xf0] }
 0x8c2   :  { %v10758_v7 = vor.u32 %v12378_v48, %v10757_v2  ;;  %v12610_v51 = vld [vmem:[#allocation19 + $0x85c] sm:$0xf] }
 0x8c3   :  { %8056 = vmatpush.bf16.msrb.mxu1 %v11642_v25  ;;  %8070 = vmatpush.bf16.msra.mxu2 %v11738_v14  ;;  %v10733_v25 = vld [vmem:[#allocation19 + $0xe0] sm:$0xf]  ;;  %v12372_v14 = vld [vmem:[#allocation19 + $0xe8] sm:$0xf0] }
 0x8c4   :  { %8034 = vmatmul.bf16.vlgmr.msra.gmra.mxu3 %v13884_v39  ;;  %8048 = vmatmul.bf16.vlgmr.msrb.gmra.mxu0 %v13892_v10  ;;  %v10734_v16 = vor.u32 %v12372_v14, %v10733_v25 }
 0x8c5   :  { %8082 = vmatpush.bf16.msrb.mxu3 %v10710_v24  ;;  %8096 = vmatpush.bf16.msra.mxu0 %v10806_v36  ;;  %v12354_v24 = vld [vmem:[#allocation19 + $0x58] sm:$0xf0]  ;;  %v11603_v36 = vld [vmem:[#allocation19 + $0x7bc] sm:$0xf0] }
 0x8c6   :  { %v10662_v49 = vor.u32 %v12354_v24, %v10661_v45  ;;  %v12607_v45 = vld [vmem:[#allocation19 + $0x844] sm:$0xf]  ;;  %v10626_v24 = vor.u32 %v12345_v61, %v10625_v47  ;;  %v12432_v47 = vld [vmem:[#allocation19 + $0x2c8] sm:$0xf0]  ;;  %v11057_v61 = vld [vmem:[#allocation19 + $0x368] sm:$0xf] }
 0x8c7   :  { %8057 = vmatpush.bf16.msrb.mxu1 %v11630_v33  ;;  %8071 = vmatpush.bf16.msra.mxu2 %v11726_v3  ;;  %v10901_v33 = vld [vmem:[#allocation19 + $0x230] sm:$0xf]  ;;  %v12414_v3 = vld [vmem:[#allocation19 + $0x238] sm:$0xf0]  ;;  %v11678_v2 = vor.u32 %v12607_v45, %v11675_v4  ;;  %v10961_v45 = vld [vmem:[#allocation19 + $0x2a8] sm:$0xf] }
 0x8c8   :  { %v10902_v48 = vor.u32 %v12414_v3, %v10901_v33  ;;  %v12450_v4 = vld [vmem:[#allocation19 + $0x358] sm:$0xf0]  ;;  %v10866_v3 = vor.u32 %v12405_v29, %v10865_v15  ;;  %v10817_v15 = vld [vmem:[#allocation19 + $0x188] sm:$0xf] }
 0x8c9   :  { %8083 = vmatpush.bf16.msrb.mxu3 %v10698_v43  ;;  %8097 = vmatpush.bf16.msra.mxu0 %v10794_v55  ;;  %v12589_v43 = vld [vmem:[#allocation19 + $0x7b4] sm:$0xf]  ;;  %v11591_v55 = vld [vmem:[#allocation19 + $0x7a4] sm:$0xf0] }
 0x8ca   :  { %v11606_v57 = vor.u32 %v12589_v43, %v11603_v36  ;;  %v12486_v43 = vld [vmem:[#allocation19 + $0x478] sm:$0xf0] }
 0x8cb   :  { %8058 = vmatpush.bf16.msrb.mxu1 %v11618_v28  ;;  %8072 = vmatpush.bf16.msra.mxu2 %v11714_v62  ;;  %v11189_v62 = vld [vmem:[#allocation19 + $0x470] sm:$0xf] }
 0x8cc   :  { %v11190_v46 = vor.u32 %v12486_v43, %v11189_v62  ;;  %v11141_v62 = vld [vmem:[#allocation19 + $0x410] sm:$0xf]  ;;  %v12474_v43 = vld [vmem:[#allocation19 + $0x418] sm:$0xf0] }
 0x8cd   :  { %8084 = vmatpush.bf16.msrb.mxu3 %v10686_v27  ;;  %8098 = vmatpush.bf16.msra.mxu0 %v10782_v0  ;;  %v12586_v27 = vld [vmem:[#allocation19 + $0x79c] sm:$0xf]  ;;  %v11690_v0 = vor.u32 %v12610_v51, %v11687_v53  ;;  %v12408_v51 = vld [vmem:[#allocation19 + $0x208] sm:$0xf0]  ;;  %v10973_v53 = vld [vmem:[#allocation19 + $0x2c0] sm:$0xf] }
 0x8ce   :  { %v11594_v50 = vor.u32 %v12586_v27, %v11591_v55  ;;  %v12483_v27 = vld [vmem:[#allocation19 + $0x460] sm:$0xf0]  ;;  %v10986_v55 = vor.u32 %v12435_v38, %v10985_v56  ;;  %v10937_v56 = vld [vmem:[#allocation19 + $0x278] sm:$0xf] }
 0x8cf   :  { %8059 = vmatpush.bf16.msrb.mxu1 %v11606_v57  ;;  %8073 = vmatpush.bf16.msra.mxu2 %v11702_v30  ;;  %v11177_v30 = vld [vmem:[#allocation19 + $0x458] sm:$0xf]  ;;  %v12423_v38 = vld [vmem:[#allocation19 + $0x280] sm:$0xf0] }
 0x8d0   :  { %v11178_v25 = vor.u32 %v12483_v27, %v11177_v30  ;;  %v11129_v30 = vld [vmem:[#allocation19 + $0x3f8] sm:$0xf]  ;;  %v12471_v27 = vld [vmem:[#allocation19 + $0x400] sm:$0xf0] }
 0x8d1   :  { %8085 = vmatpush.bf16.msrb.mxu3 %v10674_v18  ;;  %8099 = vmatpush.bf16.msra.mxu0 %v10770_v5  ;;  %v12462_v18 = vld [vmem:[#allocation19 + $0x3b8] sm:$0xf0]  ;;  %v10721_v5 = vld [vmem:[#allocation19 + $0xc8] sm:$0xf] }
 0x8d2   :  { %v11094_v35 = vor.u32 %v12462_v18, %v11093_v52  ;;  %v10722_v36 = vor.u32 %v12369_v31, %v10721_v5  ;;  %v12480_v52 = vld [vmem:[#allocation19 + $0x448] sm:$0xf0]  ;;  %v10974_v18 = vor.u32 %v12432_v47, %v10973_v53  ;;  %v10853_v5 = vld [vmem:[#allocation19 + $0x1d0] sm:$0xf]  ;;  %v10925_v53 = vld [vmem:[#allocation19 + $0x260] sm:$0xf] }
 0x8d3   :  { %8060 = vmatpush.bf16.msrb.mxu1 %v11594_v50  ;;  %8074 = vmatpush.bf16.msra.mxu2 %v11690_v0  ;;  %v11165_v50 = vld [vmem:[#allocation19 + $0x440] sm:$0xf]  ;;  %v10949_v31 = vld [vmem:[#allocation19 + $0x290] sm:$0xf]  ;;  %v12420_v47 = vld [vmem:[#allocation19 + $0x268] sm:$0xf0] }
 0x8d4   :  { %v11166_v33 = vor.u32 %v12480_v52, %v11165_v50  ;;  %v12558_v50 = vld [vmem:[#allocation19 + $0x6b8] sm:$0xf0]  ;;  %v10926_v29 = vor.u32 %v12420_v47, %v10925_v53  ;;  %v11261_v53 = vld [vmem:[#allocation19 + $0x500] sm:$0xf]  ;;  %v12504_v47 = vld [vmem:[#allocation19 + $0x508] sm:$0xf0] }
 0x8d5   :  { %8086 = vmatpush.bf16.msrb.mxu3 %v10662_v49  ;;  %8100 = vmatpush.bf16.msra.mxu0 %v10758_v7  ;;  %v12438_v49 = vld [vmem:[#allocation19 + $0x2f8] sm:$0xf0]  ;;  %v10889_v7 = vld [vmem:[#allocation19 + $0x218] sm:$0xf] }
 0x8d6   :  { %v10998_v28 = vor.u32 %v12438_v49, %v10997_v44  ;;  %v10890_v57 = vor.u32 %v12411_v12, %v10889_v7  ;;  %v10841_v7 = vld [vmem:[#allocation19 + $0x1b8] sm:$0xf]  ;;  %v12399_v12 = vld [vmem:[#allocation19 + $0x1c0] sm:$0xf0] }
 0x8d7   :  { %8061 = vmatpush.bf16.msrb.mxu1 %v11582_v19  ;;  %8075 = vmatpush.bf16.msra.mxu2 %v11678_v2  ;;  %v12402_v19 = vld [vmem:[#allocation19 + $0x1d8] sm:$0xf0]  ;;  %v12447_v2 = vld [vmem:[#allocation19 + $0x340] sm:$0xf0] }
 0x8d9   :  { %8087 = vmatpush.bf16.msrb.mxu3 %v10650_v32  ;;  %8101 = vmatpush.bf16.msra.mxu0 %v10746_v20  ;;  %v11082_v32 = vor.u32 %v12459_v37, %v11081_v40  ;;  %v10877_v20 = vld [vmem:[#allocation19 + $0x200] sm:$0xf]  ;;  %v12426_v40 = vld [vmem:[#allocation19 + $0x298] sm:$0xf0]  ;;  %v11033_v37 = vld [vmem:[#allocation19 + $0x338] sm:$0xf] }
 0x8da   :  { %8062 = vmatmul.bf16.vlgmr.msrb.gmra.mxu1 %v13901_v8  ;;  %8076 = vmatmul.bf16.vlgmr.msra.gmra.mxu2 %v13903_v34  ;;  %v10878_v14 = vor.u32 %v12408_v51, %v10877_v20  ;;  %v10829_v20 = vld [vmem:[#allocation19 + $0x1a0] sm:$0xf]  ;;  %v12396_v51 = vld [vmem:[#allocation19 + $0x1a8] sm:$0xf0] }
 0x8db   :  { %8110 = vmatpush.bf16.msra.mxu1 %v10902_v48  ;;  %8124 = vmatpush.bf16.msrb.mxu2 %v10998_v28  ;;  %v10854_v28 = vor.u32 %v12402_v19, %v10853_v5  ;;  %v10830_v52 = vor.u32 %v12396_v51, %v10829_v20  ;;  %v11465_v5 = vld [vmem:[#allocation19 + $0x698] sm:$0xf]  ;;  %v12555_v19 = vld [vmem:[#allocation19 + $0x6a0] sm:$0xf0]  ;;  %v13924_v20 = vpop.f32.mrf.mxu1 }
 0x8dd   :  { %8088 = vmatpush.bf16.msrb.mxu3 %v10638_v59  ;;  %8102 = vmatpush.bf16.msra.mxu0 %v10734_v16  ;;  %v11070_v59 = vor.u32 %v12456_v22, %v11069_v63  ;;  %v11045_v16 = vld [vmem:[#allocation19 + $0x350] sm:$0xf]  ;;  %v11021_v63 = vld [vmem:[#allocation19 + $0x320] sm:$0xf]  ;;  %v12444_v22 = vld [vmem:[#allocation19 + $0x328] sm:$0xf0] }
 0x8de   :  { %v11046_v49 = vor.u32 %v12450_v4, %v11045_v16  ;;  %v10913_v16 = vld [vmem:[#allocation19 + $0x248] sm:$0xf]  ;;  %v12417_v4 = vld [vmem:[#allocation19 + $0x250] sm:$0xf0] }
 0x8df   :  { %8111 = vmatpush.bf16.msra.mxu1 %v10890_v57  ;;  %8125 = vmatpush.bf16.msrb.mxu2 %v10986_v55  ;;  %v10842_v57 = vor.u32 %v12399_v12, %v10841_v7  ;;  %v10938_v55 = vor.u32 %v12423_v38, %v10937_v56  ;;  %v11273_v7 = vld [vmem:[#allocation19 + $0x518] sm:$0xf]  ;;  %v12507_v12 = vld [vmem:[#allocation19 + $0x520] sm:$0xf0] }
 0x8e0   :  { %v11369_v38 = vld [vmem:[#allocation19 + $0x5d8] sm:$0xf] }
 0x8e1   :  { %8089 = vmatpush.bf16.msrb.mxu3 %v10626_v24  ;;  %8103 = vmatpush.bf16.msra.mxu0 %v10722_v36  ;;  %v12429_v24 = vld [vmem:[#allocation19 + $0x2b0] sm:$0xf0]  ;;  %v10950_v36 = vor.u32 %v12426_v40, %v10949_v31  ;;  %v11105_v40 = vld [vmem:[#allocation19 + $0x3c8] sm:$0xf] }
 0x8e2   :  { %v10962_v44 = vor.u32 %v12429_v24, %v10961_v45  ;;  %v12393_v24 = vld [vmem:[#allocation19 + $0x190] sm:$0xf0] }
 0x8e3   :  { %8112 = vmatpush.bf16.msra.mxu1 %v10878_v14  ;;  %8126 = vmatpush.bf16.msrb.mxu2 %v10974_v18  ;;  %v11477_v14 = vld [vmem:[#allocation19 + $0x6b0] sm:$0xf]  ;;  %v11117_v18 = vld [vmem:[#allocation19 + $0x3e0] sm:$0xf]  ;;  %v10818_v31 = vor.u32 %v12393_v24, %v10817_v15  ;;  %v12576_v15 = vld [vmem:[#allocation19 + $0x748] sm:$0xf0] }
 0x8e4   :  { %8090 = vmatmul.bf16.vlgmr.msrb.gmra.mxu3 %v13816_v21  ;;  %v12453_v21 = vld [vmem:[#allocation19 + $0x370] sm:$0xf0]  ;;  %8104 = vmatmul.bf16.vlgmr.msra.gmra.mxu0 %v13822_v42 }
 0x8e5   :  { %8138 = vmatpush.bf16.msra.mxu3 %v11094_v35  ;;  %8152 = vmatpush.bf16.msrb.mxu0 %v11190_v46  ;;  %v11058_v0 = vor.u32 %v12453_v21, %v11057_v61  ;;  %v11153_v35 = vld [vmem:[#allocation19 + $0x428] sm:$0xf]  ;;  %v12477_v42 = vld [vmem:[#allocation19 + $0x430] sm:$0xf0]  ;;  %v11142_v46 = vor.u32 %v12474_v43, %v11141_v62  ;;  %v12582_v62 = vld [vmem:[#allocation19 + $0x778] sm:$0xf0]  ;;  %v13919_v43 = vpop.f32.mrf.mxu3 }
 0x8e6   :  { %v11154_v48 = vor.u32 %v12477_v42, %v11153_v35  ;;  %v11009_v61 = vld [vmem:[#allocation19 + $0x308] sm:$0xf]  ;;  %v12441_v21 = vld [vmem:[#allocation19 + $0x310] sm:$0xf0]  ;;  %v12510_v35 = vld [vmem:[#allocation19 + $0x538] sm:$0xf0] }
 0x8e7   :  { %8113 = vmatpush.bf16.msra.mxu1 %v10866_v3  ;;  %8127 = vmatpush.bf16.msrb.mxu2 %v10962_v44  ;;  %v11010_v45 = vor.u32 %v12441_v21, %v11009_v61  ;;  %v11285_v3 = vld [vmem:[#allocation19 + $0x530] sm:$0xf]  ;;  %v12528_v21 = vld [vmem:[#allocation19 + $0x5c8] sm:$0xf0] }
 0x8e8   :  { %v11381_v42 = vld [vmem:[#allocation19 + $0x5f0] sm:$0xf] }
 0x8e9   :  { %8139 = vmatpush.bf16.msra.mxu3 %v11082_v32  ;;  %8153 = vmatpush.bf16.msrb.mxu0 %v11178_v25  ;;  %v11034_v32 = vor.u32 %v12447_v2, %v11033_v37  ;;  %v11130_v25 = vor.u32 %v12471_v27, %v11129_v30  ;;  %v12465_v37 = vld [vmem:[#allocation19 + $0x3d0] sm:$0xf0]  ;;  %v10914_v2 = vor.u32 %v12417_v4, %v10913_v16  ;;  %v12552_v30 = vld [vmem:[#allocation19 + $0x688] sm:$0xf0]  ;;  %v11345_v4 = vld [vmem:[#allocation19 + $0x5a8] sm:$0xf] }
 0x8ea   :  { %v11106_v56 = vor.u32 %v12465_v37, %v11105_v40  ;;  %v11274_v27 = vor.u32 %v12507_v12, %v11273_v7  ;;  %v11237_v40 = vld [vmem:[#allocation19 + $0x4d0] sm:$0xf]  ;;  %v12498_v37 = vld [vmem:[#allocation19 + $0x4d8] sm:$0xf0]  ;;  %v11417_v7 = vld [vmem:[#allocation19 + $0x638] sm:$0xf] }
 0x8eb   :  { %8114 = vmatpush.bf16.msra.mxu1 %v10854_v28  ;;  %8128 = vmatpush.bf16.msrb.mxu2 %v10950_v36  ;;  %v11573_v28 = vld [vmem:[#allocation19 + $0x770] sm:$0xf]  ;;  %v12543_v12 = vld [vmem:[#allocation19 + $0x640] sm:$0xf0] }
 0x8ed   :  { %8140 = vmatpush.bf16.msra.mxu3 %v11070_v59  ;;  %8154 = vmatpush.bf16.msrb.mxu0 %v11166_v33  ;;  %v11022_v59 = vor.u32 %v12444_v22, %v11021_v63  ;;  %v11478_v33 = vor.u32 %v12558_v50, %v11477_v14  ;;  %v12531_v63 = vld [vmem:[#allocation19 + $0x5e0] sm:$0xf0]  ;;  %v13921_v22 = vpop.f32.mrf.mxu0  ;;  %v11441_v50 = vld [vmem:[#allocation19 + $0x668] sm:$0xf] }
 0x8ee   :  { %v11370_v51 = vor.u32 %v12531_v63, %v11369_v38  ;;  %v11525_v38 = vld [vmem:[#allocation19 + $0x710] sm:$0xf]  ;;  %v12570_v63 = vld [vmem:[#allocation19 + $0x718] sm:$0xf0] }
 0x8ef   :  { %8115 = vmatpush.bf16.msra.mxu1 %v10842_v57  ;;  %8129 = vmatpush.bf16.msrb.mxu2 %v10938_v55  ;;  %v11453_v57 = vld [vmem:[#allocation19 + $0x680] sm:$0xf]  ;;  %v11561_v55 = vld [vmem:[#allocation19 + $0x758] sm:$0xf] }
 0x8f0   :  { %v11454_v61 = vor.u32 %v12552_v30, %v11453_v57  ;;  %v11225_v57 = vld [vmem:[#allocation19 + $0x4b8] sm:$0xf]  ;;  %v12495_v30 = vld [vmem:[#allocation19 + $0x4c0] sm:$0xf0] }
 0x8f1   :  { %8141 = vmatpush.bf16.msra.mxu3 %v11058_v0  ;;  %8155 = vmatpush.bf16.msrb.mxu0 %v11154_v48  ;;  %v12468_v0 = vld [vmem:[#allocation19 + $0x3e8] sm:$0xf0]  ;;  %v11286_v48 = vor.u32 %v12510_v35, %v11285_v3  ;;  %v7757_v3 = vpop.f32.mrf.mxu3 }
 0x8f2   :  { %v11118_v44 = vor.u32 %v12468_v0, %v11117_v18  ;;  %v11262_v18 = vor.u32 %v12504_v47, %v11261_v53  ;;  %v11549_v0 = vld [vmem:[#allocation19 + $0x740] sm:$0xf]  ;;  %v11526_v53 = vor.u32 %v12570_v63, %v11525_v38  ;;  %v11489_v38 = vld [vmem:[#allocation19 + $0x6c8] sm:$0xf]  ;;  %v12561_v63 = vld [vmem:[#allocation19 + $0x6d0] sm:$0xf0] }
 0x8f3   :  { %8116 = vmatpush.bf16.msra.mxu1 %v10830_v52  ;;  %8130 = vmatpush.bf16.msrb.mxu2 %v10926_v29  ;;  %v12549_v52 = vld [vmem:[#allocation19 + $0x670] sm:$0xf0]  ;;  %v11550_v35 = vor.u32 %v12576_v15, %v11549_v0  ;;  %v11405_v47 = vld [vmem:[#allocation19 + $0x620] sm:$0xf]  ;;  %v12492_v15 = vld [vmem:[#allocation19 + $0x4a8] sm:$0xf0] }
 0x8f4   :  { %v11442_v16 = vor.u32 %v12549_v52, %v11441_v50  ;;  %v11213_v0 = vld [vmem:[#allocation19 + $0x4a0] sm:$0xf] }
 0x8f5   :  { %8142 = vmatpush.bf16.msra.mxu3 %v11046_v49  ;;  %8156 = vmatpush.bf16.msrb.mxu0 %v11142_v46  ;;  %v12534_v49 = vld [vmem:[#allocation19 + $0x5f8] sm:$0xf0]  ;;  %v11574_v46 = vor.u32 %v12582_v62, %v11573_v28  ;;  %v11333_v28 = vld [vmem:[#allocation19 + $0x590] sm:$0xf] }
 0x8f6   :  { %v11382_v36 = vor.u32 %v12534_v49, %v11381_v42  ;;  %v11429_v42 = vld [vmem:[#allocation19 + $0x650] sm:$0xf]  ;;  %v12522_v62 = vld [vmem:[#allocation19 + $0x598] sm:$0xf0] }
 0x8f7   :  { %8117 = vmatpush.bf16.msra.mxu1 %v10818_v31  ;;  %8131 = vmatpush.bf16.msrb.mxu2 %v10914_v2 }
 0x8f9   :  { %8143 = vmatpush.bf16.msra.mxu3 %v11034_v32  ;;  %8157 = vmatpush.bf16.msrb.mxu0 %v11130_v25  ;;  %v11466_v32 = vor.u32 %v12555_v19, %v11465_v5  ;;  %v13927_v25 = vld [vmem:[#allocation20] sm:$0x7]  ;;  %v12573_v5 = vld [vmem:[#allocation19 + $0x730] sm:$0xf0]  ;;  %v13934_v19 = vpop.f32.mrf.mxu0 }
 0x8fa   :  { %8118 = vmatmul.bf16.vlgmr.msra.gmra.mxu1 %v13826_v60  ;;  %8132 = vmatmul.bf16.vlgmr.msrb.gmra.mxu2 %v13829_v23  ;;  %v11249_v60 = vld [vmem:[#allocation19 + $0x4e8] sm:$0xf]  ;;  %v6204_v24 = vperm.slane %v13927_v25, 0  ;;  %v12525_v23 = vld [vmem:[#allocation19 + $0x5b0] sm:$0xf0] }
 0x8fb   :  { %8166 = vmatpush.bf16.msrb.mxu1 %v11286_v48  ;;  %8180 = vmatpush.bf16.msra.mxu2 %v11382_v36  ;;  %v11346_v31 = vor.u32 %v12525_v23, %v11345_v4  ;;  %v13937_v36 = vpop.f32.mrf.mxu1 }
 0x8fc   :  { %v7756_v2 = vadd.f32 %v13919_v43, %v6204_v24 }
 0x8fd   :  { %8144 = vmatpush.bf16.msra.mxu3 %v11022_v59  ;;  %8158 = vmatpush.bf16.msrb.mxu0 %v11118_v44  ;;  %v12579_v59 = vld [vmem:[#allocation19 + $0x760] sm:$0xf0]  ;;  %v12546_v44 = vld [vmem:[#allocation19 + $0x658] sm:$0xf0] }
 0x8fe   :  { %v11562_v14 = vor.u32 %v12579_v59, %v11561_v55  ;;  %v11430_v48 = vor.u32 %v12546_v44, %v11429_v42  ;;  %v7770_v43 = vadd.f32 %v13921_v22, %v7756_v2  ;;  %v11321_v55 = vld [vmem:[#allocation19 + $0x578] sm:$0xf]  ;;  %v12519_v59 = vld [vmem:[#allocation19 + $0x580] sm:$0xf0]  ;;  %v12537_v42 = vld [vmem:[#allocation19 + $0x610] sm:$0xf0]  ;;  %v11214_v44 = vor.u32 %v12492_v15, %v11213_v0 }
 0x8ff   :  { %8167 = vmatpush.bf16.msrb.mxu1 %v11274_v27  ;;  %8181 = vmatpush.bf16.msra.mxu2 %v11370_v51  ;;  %v11418_v27 = vor.u32 %v12543_v12, %v11417_v7  ;;  %v7811_v51 = vpop.f32.mrf.mxu3  ;;  %v12513_v2 = vld [vmem:[#allocation19 + $0x550] sm:$0xf0]  ;;  %v12630_v7 = vld [vmem:[#allocation19 + $0x8f8] sm:$0xf0]  ;;  %v12600_v0 = vld [vmem:[#allocation19 + $0x808] sm:$0xf0] }
 0x900   :  { %v7784_v22 = vadd.f32 %v13924_v20, %v7770_v43 }
 0x901   :  { %8145 = vmatpush.bf16.msra.mxu3 %v11010_v45  ;;  %8159 = vmatpush.bf16.msrb.mxu0 %v11106_v56  ;;  %v12501_v45 = vld [vmem:[#allocation19 + $0x4f0] sm:$0xf0]  ;;  %v11238_v56 = vor.u32 %v12498_v37, %v11237_v40  ;;  %v7825_v52 = vpop.f32.mrf.mxu0  ;;  %v11297_v37 = vld [vmem:[#allocation19 + $0x548] sm:$0xf] }
 0x902   :  { %v11250_v49 = vor.u32 %v12501_v45, %v11249_v60  ;;  %v11309_v45 = vld [vmem:[#allocation19 + $0x560] sm:$0xf]  ;;  %v12489_v40 = vld [vmem:[#allocation19 + $0x490] sm:$0xf0] }
 0x903   :  { %8168 = vmatpush.bf16.msrb.mxu1 %v11262_v18  ;;  %v11322_v18 = vor.u32 %v12519_v59, %v11321_v55  ;;  %v7839_v4 = vpop.f32.mrf.mxu1  ;;  %v11490_v55 = vor.u32 %v12561_v63, %v11489_v38  ;;  %v11657_v59 = vld [vmem:[#allocation19 + $0x818] sm:$0xf]  ;;  %v12615_v63 = vld [vmem:[#allocation19 + $0x880] sm:$0xf0] }
 0x904   :  { %8146 = vmatmul.bf16.vlgmr.msra.gmra.mxu3 %v13869_v1  ;;  %v11357_v1 = vld [vmem:[#allocation19 + $0x5c0] sm:$0xf]  ;;  %8160 = vmatmul.bf16.vlgmr.msrb.gmra.mxu0 %v13875_v11  ;;  %v11537_v11 = vld [vmem:[#allocation19 + $0x728] sm:$0xf]  ;;  %v11705_v38 = vld [vmem:[#allocation19 + $0x878] sm:$0xf] }
 0x905   :  { %8194 = vmatpush.bf16.msrb.mxu3 %v11478_v33  ;;  %8208 = vmatpush.bf16.msra.mxu0 %v11574_v46  ;;  %v11358_v29 = vor.u32 %v12528_v21, %v11357_v1  ;;  %v13932_v33 = vpop.f32.mrf.mxu2  ;;  %v11334_v46 = vor.u32 %v12522_v62, %v11333_v28  ;;  %v11226_v1 = vor.u32 %v12495_v30, %v11225_v57  ;;  %v11513_v21 = vld [vmem:[#allocation19 + $0x6f8] sm:$0xf]  ;;  %v12606_v62 = vld [vmem:[#allocation19 + $0x838] sm:$0xf0] }
 0x906   :  { %v7798_v20 = vadd.f32 %v13932_v33, %v7784_v22  ;;  %v11298_v33 = vor.u32 %v12513_v2, %v11297_v37 }
 0x907   :  { %8182 = vmatpush.bf16.msra.mxu2 %v11358_v29  ;;  %8169 = vmatpush.bf16.msrb.mxu1 %v11250_v49  ;;  %v7758_v29 = vadd.f32 %v7757_v3, %v6204_v24  ;;  %v11501_v49 = vld [vmem:[#allocation19 + $0x6e0] sm:$0xf]  ;;  %v7813_v57 = vpop.f32.mrf.mxu3 }
 0x908   :  { %v7812_v12 = vadd.f32 %v7811_v51, %v7798_v20  ;;  %v11753_v51 = vld [vmem:[#allocation19 + $0x8d8] sm:$0xf] }
 0x909   :  { %8195 = vmatpush.bf16.msrb.mxu3 %v11466_v32  ;;  %8209 = vmatpush.bf16.msra.mxu0 %v11562_v14  ;;  %v11538_v32 = vor.u32 %v12573_v5, %v11537_v11  ;;  %v12567_v14 = vld [vmem:[#allocation19 + $0x700] sm:$0xf0]  ;;  %v12564_v11 = vld [vmem:[#allocation19 + $0x6e8] sm:$0xf0]  ;;  %v7772_v24 = vadd.f32 %v13934_v19, %v7758_v29 }
 0x90a   :  { %v11514_v23 = vor.u32 %v12567_v14, %v11513_v21  ;;  %v11502_v28 = vor.u32 %v12564_v11, %v11501_v49  ;;  %v12624_v29 = vld [vmem:[#allocation19 + $0x8c8] sm:$0xf0] }
 0x90b   :  { %8183 = vmatpush.bf16.msra.mxu2 %v11346_v31  ;;  %8170 = vmatpush.bf16.msrb.mxu1 %v11238_v56  ;;  %v11201_v31 = vld [vmem:[#allocation19 + $0x488] sm:$0xf]  ;;  %v7786_v19 = vadd.f32 %v13937_v36, %v7772_v24  ;;  %v11717_v24 = vld [vmem:[#allocation19 + $0x890] sm:$0xf] }
 0x90c   :  { %v11202_v56 = vor.u32 %v12489_v40, %v11201_v31  ;;  %v11621_v31 = vld [vmem:[#allocation19 + $0x7d0] sm:$0xf] }
 0x90d   :  { %8196 = vmatpush.bf16.msrb.mxu3 %v11454_v61  ;;  %8210 = vmatpush.bf16.msra.mxu0 %v11550_v35  ;;  %v12540_v61 = vld [vmem:[#allocation19 + $0x628] sm:$0xf0]  ;;  %v7799_v50 = vpop.f32.mrf.mxu2  ;;  %v11393_v35 = vld [vmem:[#allocation19 + $0x608] sm:$0xf] }
 0x90e   :  { %v11406_v60 = vor.u32 %v12540_v61, %v11405_v47  ;;  %v11394_v3 = vor.u32 %v12537_v42, %v11393_v35  ;;  %v7826_v47 = vadd.f32 %v7825_v52, %v7812_v12  ;;  %v12627_v61 = vld [vmem:[#allocation19 + $0x8e0] sm:$0xf0]  ;;  %v7800_v21 = vadd.f32 %v7799_v50, %v7786_v19  ;;  %v11741_v52 = vld [vmem:[#allocation19 + $0x8c0] sm:$0xf] }
 0x90f   :  { %8184 = vmatpush.bf16.msra.mxu2 %v11334_v46  ;;  %8171 = vmatpush.bf16.msrb.mxu1 %v11226_v1  ;;  %v7841_v1 = vpop.f32.mrf.mxu1  ;;  %v11754_v14 = vor.u32 %v12627_v61, %v11753_v51 }
 0x910   :  { %v7840_v15 = vadd.f32 %v7839_v4, %v7826_v47  ;;  %v7814_v22 = vadd.f32 %v7813_v57, %v7800_v21  ;;  %v12621_v4 = vld [vmem:[#allocation19 + $0x8b0] sm:$0xf0]  ;;  %v12612_v47 = vld [vmem:[#allocation19 + $0x868] sm:$0xf0] }
 0x911   :  { %8197 = vmatpush.bf16.msrb.mxu3 %v11442_v16  ;;  %8211 = vmatpush.bf16.msra.mxu0 %v11538_v32  ;;  %v12516_v16 = vld [vmem:[#allocation19 + $0x568] sm:$0xf0]  ;;  %v11765_v32 = vld [vmem:[#allocation19 + $0x8f0] sm:$0xf] }
 0x912   :  { %v11310_v5 = vor.u32 %v12516_v16, %v11309_v45  ;;  %v11766_v43 = vor.u32 %v12630_v7, %v11765_v32  ;;  %v11742_v16 = vor.u32 %v12624_v29, %v11741_v52  ;;  %v11609_v32 = vld [vmem:[#allocation19 + $0x7b8] sm:$0xf]  ;;  %v12591_v7 = vld [vmem:[#allocation19 + $0x7c0] sm:$0xf0] }
 0x913   :  { %8185 = vmatpush.bf16.msra.mxu2 %v11322_v18  ;;  %8172 = vmatpush.bf16.msrb.mxu1 %v11214_v44  ;;  %v11645_v18 = vld [vmem:[#allocation19 + $0x800] sm:$0xf]  ;;  %v11729_v44 = vld [vmem:[#allocation19 + $0x8a8] sm:$0xf]  ;;  %v11610_v19 = vor.u32 %v12591_v7, %v11609_v32 }
 0x915   :  { %8198 = vmatpush.bf16.msrb.mxu3 %v11430_v48  ;;  %8212 = vmatpush.bf16.msra.mxu0 %v11526_v53  ;;  %v11669_v48 = vld [vmem:[#allocation19 + $0x830] sm:$0xf]  ;;  %v7853_v46 = vpop.f32.mrf.mxu2  ;;  %v12603_v53 = vld [vmem:[#allocation19 + $0x820] sm:$0xf0] }
 0x916   :  { %v11670_v30 = vor.u32 %v12606_v62, %v11669_v48  ;;  %v11658_v36 = vor.u32 %v12603_v53, %v11657_v59  ;;  %v7854_v35 = vadd.f32 %v7853_v46, %v7840_v15  ;;  %v11693_v53 = vld [vmem:[#allocation19 + $0x860] sm:$0xf] }
 0x917   :  { %8186 = vmatpush.bf16.msra.mxu2 %v11310_v5  ;;  %8173 = vmatpush.bf16.msrb.mxu1 %v11202_v56  ;;  %v7895_v49 = vpop.f32.mrf.mxu1  ;;  %v11730_v5 = vor.u32 %v12621_v4, %v11729_v44  ;;  %v11694_v21 = vor.u32 %v12612_v47, %v11693_v53 }
 0x919   :  { %8199 = vmatpush.bf16.msrb.mxu3 %v11418_v27  ;;  %8213 = vmatpush.bf16.msra.mxu0 %v11514_v23  ;;  %v7827_v27 = vpop.f32.mrf.mxu0  ;;  %v11633_v23 = vld [vmem:[#allocation19 + $0x7e8] sm:$0xf] }
 0x91a   :  { %8174 = vmatmul.bf16.vlgmr.msrb.gmra.mxu1 %v13871_v13  ;;  %v12597_v13 = vld [vmem:[#allocation19 + $0x7f0] sm:$0xf0]  ;;  %v7828_v42 = vadd.f32 %v7827_v27, %v7814_v22  ;;  %v11597_v27 = vld [vmem:[#allocation19 + $0x7a0] sm:$0xf] }
 0x91b   :  { %8187 = vmatpush.bf16.msra.mxu2 %v11298_v33  ;;  %8222 = vmatpush.bf16.msra.mxu1 %v11670_v30 }
 0x91c   :  { %v7842_v40 = vadd.f32 %v7841_v1, %v7828_v42 }
 0x91d   :  { %8200 = vmatpush.bf16.msrb.mxu3 %v11406_v60  ;;  %8214 = vmatpush.bf16.msra.mxu0 %v11502_v28  ;;  %v7867_v60 = vpop.f32.mrf.mxu3  ;;  %v7855_v50 = vpop.f32.mrf.mxu2 }
 0x91e   :  { %8188 = vmatmul.bf16.vlgmr.msra.gmra.mxu2 %v13873_v41  ;;  %v7868_v11 = vadd.f32 %v7867_v60, %v7854_v35  ;;  %v11634_v41 = vor.u32 %v12597_v13, %v11633_v23  ;;  %v7856_v12 = vadd.f32 %v7855_v50, %v7842_v40 }
 0x91f   :  { %8236 = vmatpush.bf16.msrb.mxu2 %v11766_v43  ;;  %8223 = vmatpush.bf16.msra.mxu1 %v11658_v36  ;;  %v7897_v30 = vpop.f32.mrf.mxu1  ;;  %v11706_v43 = vor.u32 %v12615_v63, %v11705_v38  ;;  %v11585_v36 = vld [vmem:[#allocation19 + $0x788] sm:$0xf] }
 0x921   :  { %8201 = vmatpush.bf16.msrb.mxu3 %v11394_v3  ;;  %8215 = vmatpush.bf16.msra.mxu0 %v11490_v55  ;;  %v7881_v45 = vpop.f32.mrf.mxu0  ;;  %v12618_v3 = vld [vmem:[#allocation19 + $0x898] sm:$0xf0]  ;;  %v12588_v55 = vld [vmem:[#allocation19 + $0x7a8] sm:$0xf0] }
 0x922   :  { %v7882_v20 = vadd.f32 %v7881_v45, %v7868_v11  ;;  %v11718_v62 = vor.u32 %v12618_v3, %v11717_v24  ;;  %v11598_v61 = vor.u32 %v12588_v55, %v11597_v27 }
 0x923   :  { %8237 = vmatpush.bf16.msrb.mxu2 %v11754_v14  ;;  %v12585_v14 = vld [vmem:[#allocation19 + $0x790] sm:$0xf0] }
 0x924   :  { %8202 = vmatmul.bf16.vlgmr.msrb.gmra.mxu3 %v13884_v39  ;;  %8216 = vmatmul.bf16.vlgmr.msra.gmra.mxu0 %v13892_v10  ;;  %v11646_v39 = vor.u32 %v12600_v0, %v11645_v18  ;;  %v12594_v10 = vld [vmem:[#allocation19 + $0x7d8] sm:$0xf0]  ;;  %v7896_v37 = vadd.f32 %v7895_v49, %v7882_v20  ;;  %v11681_v18 = vld [vmem:[#allocation19 + $0x848] sm:$0xf]  ;;  %v12609_v0 = vld [vmem:[#allocation19 + $0x850] sm:$0xf0]  ;;  %v11586_v22 = vor.u32 %v12585_v14, %v11585_v36 }
 0x925   :  { %v11622_v2 = vor.u32 %v12594_v10, %v11621_v31  ;;  %v7869_v48 = vpop.f32.mrf.mxu3  ;;  %v7909_v28 = vpop.f32.mrf.mxu2  ;;  %v11682_v52 = vor.u32 %v12609_v0, %v11681_v18 }
 0x926   :  { %8224 = vmatpush.bf16.msra.mxu1 %v11646_v39  ;;  %v7910_v56 = vadd.f32 %v7909_v28, %v7896_v37  ;;  %v7870_v57 = vadd.f32 %v7869_v48, %v7856_v12 }
 0x927   :  { %8238 = vmatpush.bf16.msrb.mxu2 %v11742_v16  ;;  %v7951_v39 = vpop.f32.mrf.mxu1 }
 0x928   :  { %v8250_v33 = vadd.f32 %v7910_v56, %v13600_v58 }
 0x929   :  { %v7883_v46 = vpop.f32.mrf.mxu0 }
 0x92a   :  { %8225 = vmatpush.bf16.msra.mxu1 %v11634_v41  ;;  %v7884_v59 = vadd.f32 %v7883_v46, %v7870_v57  ;;  %8256 = vst [vmem:[#allocation22] sm:$0xff] %v8250_v33 }
 0x92b   :  { %8239 = vmatpush.bf16.msrb.mxu2 %v11730_v5 }
 0x92c   :  { %v7898_v51 = vadd.f32 %v7897_v30, %v7884_v59 }
 0x92d   :  { %v7911_v1 = vpop.f32.mrf.mxu2  ;;  %v7923_v29 = vpop.f32.mrf.mxu3 }
 0x92e   :  { %8226 = vmatpush.bf16.msra.mxu1 %v11622_v2  ;;  %v7912_v58 = vadd.f32 %v7911_v1, %v7898_v51 }
 0x92f   :  { %8240 = vmatpush.bf16.msrb.mxu2 %v11718_v62  ;;  %v7953_v23 = vpop.f32.mrf.mxu1 }
 0x930   :  { %v8253_v15 = vadd.f32 %v7912_v58, %v13609_v17  ;;  %v6205_v17 = vperm.slane %v13927_v25, 1 }
 0x931   :  { %v7937_v60 = vpop.f32.mrf.mxu0 }
 0x932   :  { %8227 = vmatpush.bf16.msra.mxu1 %v11610_v19  ;;  %8259 = vst [vmem:[#allocation22 + $0x18] sm:$0xff] %v8253_v15  ;;  %v7924_v13 = vadd.f32 %v7923_v29, %v6205_v17  ;;  %v6206_v15 = vperm.slane %v13927_v25, 2 }
 0x933   :  { %8241 = vmatpush.bf16.msrb.mxu2 %v11706_v43 }
 0x934   :  { %v7938_v44 = vadd.f32 %v7937_v60, %v7924_v13 }
 0x935   :  { %v7965_v50 = vpop.f32.mrf.mxu2  ;;  %v7925_v45 = vpop.f32.mrf.mxu3 }
 0x936   :  { %8228 = vmatpush.bf16.msra.mxu1 %v11598_v61  ;;  %v7952_v4 = vadd.f32 %v7951_v39, %v7938_v44  ;;  %v7926_v5 = vadd.f32 %v7925_v45, %v6205_v17 }
 0x937   :  { %8242 = vmatpush.bf16.msrb.mxu2 %v11694_v21  ;;  %v8007_v11 = vpop.f32.mrf.mxu1 }
 0x938   :  { %v7966_v41 = vadd.f32 %v7965_v50, %v7952_v4 }
 0x939   :  { %v7939_v16 = vpop.f32.mrf.mxu0 }
 0x93a   :  { %8229 = vmatpush.bf16.msra.mxu1 %v11586_v22  ;;  %v7940_v31 = vadd.f32 %v7939_v16, %v7926_v5 }
 0x93b   :  { %8243 = vmatpush.bf16.msrb.mxu2 %v11682_v52 }
 0x93d   :  { %8230 = vmatmul.bf16.vlgmr.msra.gmra.mxu1 %v13901_v8  ;;  %v7979_v35 = vpop.f32.mrf.mxu3  ;;  %v7967_v42 = vpop.f32.mrf.mxu2 }
 0x93e   :  { %8244 = vmatmul.bf16.vlgmr.msrb.gmra.mxu2 %v13903_v34  ;;  %v7980_v10 = vadd.f32 %v7979_v35, %v7966_v41  ;;  %v7954_v34 = vadd.f32 %v7953_v23, %v7940_v31 }
 0x93f   :  { %v8009_v37 = vpop.f32.mrf.mxu1 }
 0x940   :  { %v7968_v20 = vadd.f32 %v7967_v42, %v7954_v34 }
 0x941   :  { %v7993_v49 = vpop.f32.mrf.mxu0 }
 0x942   :  { %v7994_v24 = vadd.f32 %v7993_v49, %v7980_v10 }
 0x944   :  { %v8008_v2 = vadd.f32 %v8007_v11, %v7994_v24 }
 0x945   :  { %v7981_v8 = vpop.f32.mrf.mxu3  ;;  %v8021_v40 = vpop.f32.mrf.mxu2 }
 0x946   :  { %v7982_v48 = vadd.f32 %v7981_v8, %v7968_v20  ;;  %v8022_v28 = vadd.f32 %v8021_v40, %v8008_v2 }
 0x949   :  { %v7995_v3 = vpop.f32.mrf.mxu0 }
 0x94a   :  { %v7996_v12 = vadd.f32 %v7995_v3, %v7982_v48 }
 0x94c   :  { %v8010_v63 = vadd.f32 %v8009_v37, %v7996_v12 }
 0x94d   :  { %v8035_v62 = vpop.f32.mrf.mxu3  ;;  %v8023_v32 = vpop.f32.mrf.mxu2 }
 0x94e   :  { %v8036_v7 = vadd.f32 %v8035_v62, %v8022_v28  ;;  %v8024_v46 = vadd.f32 %v8023_v32, %v8010_v63 }
 0x951   :  { %v8049_v56 = vpop.f32.mrf.mxu0 }
 0x952   :  { %v8050_v57 = vadd.f32 %v8049_v56, %v8036_v7 }
 0x955   :  { %v8037_v19 = vpop.f32.mrf.mxu3 }
 0x956   :  { %v8038_v43 = vadd.f32 %v8037_v19, %v8024_v46 }
 0x957   :  { %v8063_v38 = vpop.f32.mrf.mxu1 }
 0x958   :  { %v8064_v33 = vadd.f32 %v8063_v38, %v8050_v57 }
 0x959   :  { %v8051_v59 = vpop.f32.mrf.mxu0 }
 0x95a   :  { %v8052_v47 = vadd.f32 %v8051_v59, %v8038_v43 }
 0x95d   :  { %v8077_v30 = vpop.f32.mrf.mxu2 }
 0x95e   :  { %v8078_v27 = vadd.f32 %v8077_v30, %v8064_v33 }
 0x95f   :  { %v8065_v53 = vpop.f32.mrf.mxu1 }
 0x960   :  { %v8251_v55 = vadd.f32 %v8078_v27, %v13598_v54  ;;  %v8066_v51 = vadd.f32 %v8065_v53, %v8052_v47 }
 0x961   :  { %v8105_v14 = vpop.f32.mrf.mxu0 }
 0x962   :  { %8257 = vst [vmem:[#allocation22 + $0x8] sm:$0xff] %v8251_v55 }
 0x965   :  { %v8079_v61 = vpop.f32.mrf.mxu2 }
 0x966   :  { %v8080_v1 = vadd.f32 %v8079_v61, %v8066_v51 }
 0x967   :  { %v8091_v36 = vpop.f32.mrf.mxu3 }
 0x968   :  { %v8254_v21 = vadd.f32 %v8080_v1, %v13607_v9  ;;  %v8092_v54 = vadd.f32 %v8091_v36, %v6206_v15 }
 0x969   :  { %v8107_v22 = vpop.f32.mrf.mxu0 }
 0x96a   :  { %8260 = vst [vmem:[#allocation22 + $0x20] sm:$0xff] %v8254_v21  ;;  %v8106_v60 = vadd.f32 %v8105_v14, %v8092_v54 }
 0x96f   :  { %v8093_v18 = vpop.f32.mrf.mxu3 }
 0x970   :  { %v8094_v23 = vadd.f32 %v8093_v18, %v6206_v15 }
 0x972   :  { %v8108_v13 = vadd.f32 %v8107_v22, %v8094_v23 }
 0x977   :  { %v8119_v58 = vpop.f32.mrf.mxu1 }
 0x978   :  { %v8120_v50 = vadd.f32 %v8119_v58, %v8106_v60 }
 0x97d   :  { %v8133_v0 = vpop.f32.mrf.mxu2 }
 0x97e   :  { %v8134_v17 = vadd.f32 %v8133_v0, %v8120_v50 }
 0x97f   :  { %v8121_v52 = vpop.f32.mrf.mxu1 }
 0x980   :  { %v8122_v44 = vadd.f32 %v8121_v52, %v8108_v13 }
 0x981   :  { %v8161_v45 = vpop.f32.mrf.mxu0 }
 0x985   :  { %v8135_v39 = vpop.f32.mrf.mxu2 }
 0x986   :  { %v8136_v4 = vadd.f32 %v8135_v39, %v8122_v44 }
 0x987   :  { %v8147_v29 = vpop.f32.mrf.mxu3 }
 0x988   :  { %v8148_v9 = vadd.f32 %v8147_v29, %v8134_v17 }
 0x989   :  { %v8163_v11 = vpop.f32.mrf.mxu0 }
 0x98a   :  { %v8162_v49 = vadd.f32 %v8161_v45, %v8148_v9 }
 0x98f   :  { %v8149_v35 = vpop.f32.mrf.mxu3 }
 0x990   :  { %v8150_v5 = vadd.f32 %v8149_v35, %v8136_v4 }
 0x992   :  { %v8164_v34 = vadd.f32 %v8163_v11, %v8150_v5 }
 0x997   :  { %v8175_v16 = vpop.f32.mrf.mxu1 }
 0x998   :  { %v8176_v41 = vadd.f32 %v8175_v16, %v8162_v49 }
 0x99f   :  { %v8177_v25 = vpop.f32.mrf.mxu1 }
 0x9a0   :  { %v8178_v3 = vadd.f32 %v8177_v25, %v8164_v34 }
 0x9a1   :  { %v8189_v42 = vpop.f32.mrf.mxu2  ;;  %v8217_v20 = vpop.f32.mrf.mxu0 }
 0x9a2   :  { %v8190_v31 = vadd.f32 %v8189_v42, %v8176_v41 }
 0x9a7   :  { %v8203_v10 = vpop.f32.mrf.mxu3 }
 0x9a8   :  { %v8204_v40 = vadd.f32 %v8203_v10, %v8190_v31 }
 0x9a9   :  { %v8191_v8 = vpop.f32.mrf.mxu2  ;;  %v8219_v56 = vpop.f32.mrf.mxu0 }
 0x9aa   :  { %v8192_v37 = vadd.f32 %v8191_v8, %v8178_v3  ;;  %v8218_v2 = vadd.f32 %v8217_v20, %v8204_v40 }
 0x9af   :  { %v8205_v28 = vpop.f32.mrf.mxu3 }
 0x9b0   :  { %v8206_v32 = vadd.f32 %v8205_v28, %v8192_v37 }
 0x9b2   :  { %v8220_v63 = vadd.f32 %v8219_v56, %v8206_v32 }
 0x9ba   :  { %v8231_v24 = vpop.f32.mrf.mxu1 }
 0x9bb   :  { %v8232_v48 = vadd.f32 %v8231_v24, %v8218_v2 }
 0x9c1   :  { %v8245_v62 = vpop.f32.mrf.mxu2 }
 0x9c2   :  { %v8246_v7 = vadd.f32 %v8245_v62, %v8232_v48  ;;  %v8233_v38 = vpop.f32.mrf.mxu1 }
 0x9c3   :  { %v8234_v46 = vadd.f32 %v8233_v38, %v8220_v63 }
 0x9c4   :  { %v8252_v12 = vadd.f32 %v8246_v7, %v13602_v6 }
 0x9c6   :  { %8258 = vst [vmem:[#allocation22 + $0x10] sm:$0xff] %v8252_v12 }
 0x9c9   :  { %v8247_v57 = vpop.f32.mrf.mxu2 }
 0x9ca   :  { %v8248_v33 = vadd.f32 %v8247_v57, %v8234_v46 }
 0x9cc   :  { %v8255_v19 = vadd.f32 %v8248_v33, %v13611_v26 }
 0x9ce   :  { %8261 = vst [vmem:[#allocation22 + $0x28] sm:$0xff] %v8255_v19 }
 0x9cf   :  { %8274 = dma.vmem_to_hbm [thread:$0]  %s8267_s20, 768, %s8269_s22, [#allocation4], %s13069_s13, %s13069_s13, %s13070_s14  }
 0x9d0   :  { %13059 = dma.done.wait [#allocation4], 768  }
 0x9d1   :  { %13060 = vsyncadd [#allocation4], 4294966528 }
 0x9d2   :  { %8279 = vsyncpa [#allocation3], 1 }
 0x9d3   :  { %8280 = vsyncpa [#allocation6], 1 }
 0x9d4   :  { %8281 = vsyncpa [#allocation9], 1 }
 0x9d5   :  { %8282 = vsyncpa [#allocation12], 1 }
 0x9d6   :  { %8283 = vsyncpa [#allocation15], 1 }
 0x9d7   :  { %8284 = vsyncpa [#allocation18], 1 }
 0x9d8   :  { %8285 = vsyncpa [#allocation21], 1 }
 0x9d9   :  { %8286 = vsyncpa [#allocation4], 1 }

</bundles_post_ra>
